<compile_context>
chip_gen: v7x
topology: tpu7x:2x2x1
jax: 0.10.0
libtpu: 0.0.40
codegen_flags: <defaults>
</compile_context>

<pallas_src>
import functools

import jax
import jax.numpy as jnp
import numpy as np
from jax import lax
from jax.experimental import pallas as pl
from jax.experimental.pallas import tpu as pltpu

_EPS = 1e-5  # nn.InstanceNorm2d default eps


# ----------------------------- in-kernel helpers -----------------------------

def _reflect_pad1(x):
    """ReflectionPad2d(1) on an (H, W, C) activation via unit slices + concats."""
    H, W, _ = x.shape
    x = jnp.concatenate([x[1:2], x, x[H - 2:H - 1]], axis=0)        # pad rows
    x = jnp.concatenate([x[:, 1:2], x, x[:, W - 2:W - 1]], axis=1)  # pad cols
    return x


def _phase_split2(x):
    """Split (A, B, C) into its 4 even/odd (row, col) phases without strided slicing."""
    A, B, _ = x.shape
    rows = {
        0: jnp.concatenate([x[i:i + 1] for i in range(0, A, 2)], axis=0),
        1: jnp.concatenate([x[i:i + 1] for i in range(1, A, 2)], axis=0),
    }
    phases = {}
    for rp, xr in rows.items():
        for cp in (0, 1):
            phases[(rp, cp)] = jnp.concatenate(
                [xr[:, j:j + 1] for j in range(cp, B, 2)], axis=1)
    return phases


def _conv3x3_in_act(x, w_ref, b_ref, g_ref, beta_ref, *, stride, relu):
    """ReflectionPad(1) -> Conv2d(3x3, stride) -> InstanceNorm2d(affine) [-> ReLU].

    x: (H, W, Cin) activation (channels on the lane axis).
    w_ref: (9*Cin, Cout) weight with rows ordered (kh, kw, cin).
    b_ref / g_ref / beta_ref: (1, Cout).
    Returns (HO, WO, Cout) in f32.
    """
    H, W, cin = x.shape
    cout = w_ref.shape[-1]

    xp = _reflect_pad1(x)                      # (H+2, W+2, Cin)
    Hp, Wp = H + 2, W + 2
    HO = (Hp - 3) // stride + 1
    WO = (Wp - 3) // stride + 1

    if stride == 1:
        taps = [xp[kh:kh + HO, kw:kw + WO] for kh in range(3) for kw in range(3)]
    else:  # stride == 2 (even Hp/Wp): tap (kh, kw) lives in phase (kh%2, kw%2)
        phases = _phase_split2(xp)
        taps = []
        for kh in range(3):
            for kw in range(3):
                p = phases[(kh % 2, kw % 2)]
                r0, c0 = kh // 2, kw // 2
                taps.append(p[r0:r0 + HO, c0:c0 + WO])

    # One im2col slab + ONE MXU matmul (instead of 9 per-tap dots with per-tap reshapes).
    slab = jnp.concatenate(taps, axis=-1).reshape(HO * WO, 9 * cin)
    y = jnp.dot(slab, w_ref[...], preferred_element_type=jnp.float32) + b_ref[...]

    # InstanceNorm over spatial positions, per channel (biased variance, eps=1e-5).
    # Reductions over the sublane axis are expressed as matmuls to keep them on the MXU.
    inv_m = jnp.full((1, HO * WO), 1.0 / (HO * WO), dtype=jnp.float32)
    mean = jnp.dot(inv_m, y, preferred_element_type=jnp.float32)        # (1, Cout)
    yc = y - mean
    var = jnp.dot(inv_m, yc * yc, preferred_element_type=jnp.float32)   # (1, Cout)
    y = yc * lax.rsqrt(var + _EPS) * g_ref[...] + beta_ref[...]
    if relu:
        y = jnp.maximum(y, 0.0)
    return y.reshape(HO, WO, cout)


# ----------------------------- fused encoder kernel -----------------------------

def _encoder_kernel(x_ref, *refs, H, W, cin0, stem_strides, n_res):
    o_ref = refs[-1]
    p = refs[:-1]

    # NCHW -> HWC with one in-kernel 2-D transpose (input block is (Cin, H*W)).
    h = x_ref[...].T.reshape(H, W, cin0)

    i = 0
    # Stem: 3 ConvNormLayers (strides 1, 2, 2), each IN + ReLU.
    for s in stem_strides:
        h = _conv3x3_in_act(h, p[i], p[i + 1], p[i + 2], p[i + 3], stride=s, relu=True)
        i += 4
    # Residual blocks: h = ReLU(h + ConvNorm_noact(ConvNorm_relu(h))).
    for _ in range(n_res):
        r = _conv3x3_in_act(h, p[i], p[i + 1], p[i + 2], p[i + 3], stride=1, relu=True)
        r = _conv3x3_in_act(r, p[i + 4], p[i + 5], p[i + 6], p[i + 7], stride=1, relu=False)
        h = jnp.maximum(h + r, 0.0)
        i += 8

    Hf, Wf, Cf = h.shape
    # Store NCHW-shaped (Cout, Hf*Wf): spatial on the lane axis, so the wrapper only needs a
    # metadata reshape back to (N, C, H, W) -- no output transpose pass over HBM.
    o_ref[...] = h.reshape(Hf * Wf, Cf).T.astype(o_ref.dtype)


def encoder_forward(x_nchw, stem_params, res_params):
    """Encoder forward (frn=False, use_skip=False).

    x_nchw:      (N, 3, H, W) float32.
    stem_params: list of (w, b, gamma, beta, stride), w of shape (Cout, Cin, 3, 3).
    res_params:  list of ((w, b, gamma, beta), (w, b, gamma, beta)) residual blocks.
    """
    N, cin0, H, W = x_nchw.shape

    flat_inputs = [x_nchw.reshape(N, cin0, H * W)]                     # metadata-only reshape
    in_specs = [pl.BlockSpec((pl.Squeezed(), cin0, H * W), lambda n: (n, 0, 0))]

    def add_conv_params(w, b, g, be):
        cout, cin, kh, kw = w.shape
        # (Cout, Cin, KH, KW) -> (KH*KW*Cin, Cout), rows ordered (kh, kw, cin) to match the
        # in-kernel tap concatenation order.
        wr = jnp.transpose(w, (2, 3, 1, 0)).reshape(kh * kw * cin, cout)
        for arr in (wr, b.reshape(1, cout), g.reshape(1, cout), be.reshape(1, cout)):
            flat_inputs.append(arr)
            in_specs.append(pl.BlockSpec(arr.shape, lambda n: (0, 0)))

    stem_strides = []
    for (w, b, g, be, stride) in stem_params:
        add_conv_params(w, b, g, be)
        stem_strides.append(stride)
    for block in res_params:
        for (w, b, g, be) in block:
            add_conv_params(w, b, g, be)

    # Output spatial size after the stem (ReflectionPad(1) + 3x3 conv, given stride).
    ho, wo = H, W
    for s in stem_strides:
        ho = (ho + 2 - 3) // s + 1
        wo = (wo + 2 - 3) // s + 1
    cf = stem_params[-1][0].shape[0]

    kernel = functools.partial(
        _encoder_kernel, H=H, W=W, cin0=cin0,
        stem_strides=tuple(stem_strides), n_res=len(res_params))

    out = pl.pallas_call(
        kernel,
        out_shape=jax.ShapeDtypeStruct((N, cf, ho * wo), x_nchw.dtype),
        grid_spec=pltpu.PrefetchScalarGridSpec(
            num_scalar_prefetch=0,
            grid=(N,),                       # one image per step; >=2 parallel steps for v7x
            in_specs=in_specs,
            out_specs=pl.BlockSpec((pl.Squeezed(), cf, ho * wo), lambda n: (n, 0, 0)),
        ),
        compiler_params=pltpu.CompilerParams(
            dimension_semantics=("parallel",),
        ),
    )(*flat_inputs)

    return out.reshape(N, cf, ho, wo)        # metadata-only reshape back to NCHW


# ----------------------------- pure-JAX reference -----------------------------

def _encoder_reference(x, stem_params, res_params):
    def conv_in(h, w, b, g, be, stride, relu):
        hp = jnp.pad(h, ((0, 0), (0, 0), (1, 1), (1, 1)), mode="reflect")
        y = lax.conv_general_dilated(
            hp, w, (stride, stride), "VALID",
            dimension_numbers=("NCHW", "OIHW", "NCHW"),
            precision=lax.Precision.HIGHEST)
        y = y + b.reshape(1, -1, 1, 1)
        mean = jnp.mean(y, axis=(2, 3), keepdims=True)
        var = jnp.mean((y - mean) ** 2, axis=(2, 3), keepdims=True)
        y = (y - mean) * lax.rsqrt(var + _EPS)
        y = y * g.reshape(1, -1, 1, 1) + be.reshape(1, -1, 1, 1)
        return jnp.maximum(y, 0.0) if relu else y

    h = x
    for (w, b, g, be, stride) in stem_params:
        h = conv_in(h, w, b, g, be, stride, True)
    for (c1, c2) in res_params:
        r = conv_in(h, *c1, 1, True)
        r = conv_in(r, *c2, 1, False)
        h = jnp.maximum(h + r, 0.0)
    return h


# ----------------------------- demo / self-check -----------------------------

if __name__ == "__main__":
    # Encoder(a=0.25, b=0.5): filter_counts = [8, 12, 16], res_layer_count = 2.
    A_PARAM, B_PARAM = 0.25, 0.5
    filters = [int(A_PARAM * c) for c in (32, 48, 64)]   # [8, 12, 16]
    n_res = int(B_PARAM * 4)                             # 2
    N, H, W = 2, 16, 16

    key = jax.random.PRNGKey(0)

    def make_conv(k, cin, cout):
        kw_, kb_, kg_, kbeta = jax.random.split(k, 4)
        w = 0.1 * jax.random.normal(kw_, (cout, cin, 3, 3), dtype=jnp.float32)
        b = 0.1 * jax.random.normal(kb_, (cout,), dtype=jnp.float32)
        g = 1.0 + 0.1 * jax.random.normal(kg_, (cout,), dtype=jnp.float32)
        be = 0.1 * jax.random.normal(kbeta, (cout,), dtype=jnp.float32)
        return w, b, g, be

    key, kx = jax.random.split(key)
    x = jax.random.normal(kx, (N, 3, H, W), dtype=jnp.float32)

    stem_cfg = [(3, filters[0], 1), (filters[0], filters[1], 2), (filters[1], filters[2], 2)]
    stem_params = []
    for (cin, cout, stride) in stem_cfg:
        key, k = jax.random.split(key)
        stem_params.append(make_conv(k, cin, cout) + (stride,))

    res_params = []
    for _ in range(n_res):
        key, k1 = jax.random.split(key)
        key, k2 = jax.random.split(key)
        res_params.append((make_conv(k1, filters[2], filters[2]),
                           make_conv(k2, filters[2], filters[2])))

    out = jax.block_until_ready(encoder_forward(x, stem_params, res_params))
    ref = jax.block_until_ready(_encoder_reference(x, stem_params, res_params))

    assert out.shape == (N, filters[2], 4, 4), out.shape
    np.testing.assert_allclose(np.asarray(out), np.asarray(ref), atol=2e-3, rtol=2e-3)

    print("KERNEL_OK")
</pallas_src>

<mosaic_0001>
module attributes {stable_mosaic.version = 11 : i64} {
  func.func @_encoder_kernel(%arg0: i32, %arg1: memref<1x3x256xf32, #tpu.memory_space<vmem>>, %arg2: memref<27x8xf32, #tpu.memory_space<vmem>>, %arg3: memref<1x8xf32, #tpu.memory_space<vmem>>, %arg4: memref<1x8xf32, #tpu.memory_space<vmem>>, %arg5: memref<1x8xf32, #tpu.memory_space<vmem>>, %arg6: memref<72x12xf32, #tpu.memory_space<vmem>>, %arg7: memref<1x12xf32, #tpu.memory_space<vmem>>, %arg8: memref<1x12xf32, #tpu.memory_space<vmem>>, %arg9: memref<1x12xf32, #tpu.memory_space<vmem>>, %arg10: memref<108x16xf32, #tpu.memory_space<vmem>>, %arg11: memref<1x16xf32, #tpu.memory_space<vmem>>, %arg12: memref<1x16xf32, #tpu.memory_space<vmem>>, %arg13: memref<1x16xf32, #tpu.memory_space<vmem>>, %arg14: memref<144x16xf32, #tpu.memory_space<vmem>>, %arg15: memref<1x16xf32, #tpu.memory_space<vmem>>, %arg16: memref<1x16xf32, #tpu.memory_space<vmem>>, %arg17: memref<1x16xf32, #tpu.memory_space<vmem>>, %arg18: memref<144x16xf32, #tpu.memory_space<vmem>>, %arg19: memref<1x16xf32, #tpu.memory_space<vmem>>, %arg20: memref<1x16xf32, #tpu.memory_space<vmem>>, %arg21: memref<1x16xf32, #tpu.memory_space<vmem>>, %arg22: memref<144x16xf32, #tpu.memory_space<vmem>>, %arg23: memref<1x16xf32, #tpu.memory_space<vmem>>, %arg24: memref<1x16xf32, #tpu.memory_space<vmem>>, %arg25: memref<1x16xf32, #tpu.memory_space<vmem>>, %arg26: memref<144x16xf32, #tpu.memory_space<vmem>>, %arg27: memref<1x16xf32, #tpu.memory_space<vmem>>, %arg28: memref<1x16xf32, #tpu.memory_space<vmem>>, %arg29: memref<1x16xf32, #tpu.memory_space<vmem>>, %arg30: memref<1x16x16xf32, #tpu.memory_space<vmem>>) attributes {dimension_semantics = [#tpu.dimension_semantics<parallel>], iteration_bounds = array<i64: 2>, scalar_prefetch = 0 : i64, scratch_operands = 0 : i64, tpu.core_type = #tpu.core_type<tc>, window_params = [{transform_indices = @transform_0, window_bounds = array<i64: 1, 3, 256>}, {pipeline_mode = #tpu.pipeline_mode<synchronous>, transform_indices = @transform_1, window_bounds = array<i64: 27, 8>}, {pipeline_mode = #tpu.pipeline_mode<synchronous>, transform_indices = @transform_2, window_bounds = array<i64: 1, 8>}, {pipeline_mode = #tpu.pipeline_mode<synchronous>, transform_indices = @transform_3, window_bounds = array<i64: 1, 8>}, {pipeline_mode = #tpu.pipeline_mode<synchronous>, transform_indices = @transform_4, window_bounds = array<i64: 1, 8>}, {pipeline_mode = #tpu.pipeline_mode<synchronous>, transform_indices = @transform_5, window_bounds = array<i64: 72, 12>}, {pipeline_mode = #tpu.pipeline_mode<synchronous>, transform_indices = @transform_6, window_bounds = array<i64: 1, 12>}, {pipeline_mode = #tpu.pipeline_mode<synchronous>, transform_indices = @transform_7, window_bounds = array<i64: 1, 12>}, {pipeline_mode = #tpu.pipeline_mode<synchronous>, transform_indices = @transform_8, window_bounds = array<i64: 1, 12>}, {pipeline_mode = #tpu.pipeline_mode<synchronous>, transform_indices = @transform_9, window_bounds = array<i64: 108, 16>}, {pipeline_mode = #tpu.pipeline_mode<synchronous>, transform_indices = @transform_10, window_bounds = array<i64: 1, 16>}, {pipeline_mode = #tpu.pipeline_mode<synchronous>, transform_indices = @transform_11, window_bounds = array<i64: 1, 16>}, {pipeline_mode = #tpu.pipeline_mode<synchronous>, transform_indices = @transform_12, window_bounds = array<i64: 1, 16>}, {pipeline_mode = #tpu.pipeline_mode<synchronous>, transform_indices = @transform_13, window_bounds = array<i64: 144, 16>}, {pipeline_mode = #tpu.pipeline_mode<synchronous>, transform_indices = @transform_14, window_bounds = array<i64: 1, 16>}, {pipeline_mode = #tpu.pipeline_mode<synchronous>, transform_indices = @transform_15, window_bounds = array<i64: 1, 16>}, {pipeline_mode = #tpu.pipeline_mode<synchronous>, transform_indices = @transform_16, window_bounds = array<i64: 1, 16>}, {pipeline_mode = #tpu.pipeline_mode<synchronous>, transform_indices = @transform_17, window_bounds = array<i64: 144, 16>}, {pipeline_mode = #tpu.pipeline_mode<synchronous>, transform_indices = @transform_18, window_bounds = array<i64: 1, 16>}, {pipeline_mode = #tpu.pipeline_mode<synchronous>, transform_indices = @transform_19, window_bounds = array<i64: 1, 16>}, {pipeline_mode = #tpu.pipeline_mode<synchronous>, transform_indices = @transform_20, window_bounds = array<i64: 1, 16>}, {pipeline_mode = #tpu.pipeline_mode<synchronous>, transform_indices = @transform_21, window_bounds = array<i64: 144, 16>}, {pipeline_mode = #tpu.pipeline_mode<synchronous>, transform_indices = @transform_22, window_bounds = array<i64: 1, 16>}, {pipeline_mode = #tpu.pipeline_mode<synchronous>, transform_indices = @transform_23, window_bounds = array<i64: 1, 16>}, {pipeline_mode = #tpu.pipeline_mode<synchronous>, transform_indices = @transform_24, window_bounds = array<i64: 1, 16>}, {pipeline_mode = #tpu.pipeline_mode<synchronous>, transform_indices = @transform_25, window_bounds = array<i64: 144, 16>}, {pipeline_mode = #tpu.pipeline_mode<synchronous>, transform_indices = @transform_26, window_bounds = array<i64: 1, 16>}, {pipeline_mode = #tpu.pipeline_mode<synchronous>, transform_indices = @transform_27, window_bounds = array<i64: 1, 16>}, {pipeline_mode = #tpu.pipeline_mode<synchronous>, transform_indices = @transform_28, window_bounds = array<i64: 1, 16>}, {transform_indices = @transform_29, window_bounds = array<i64: 1, 16, 16>}]} {
    %c0 = arith.constant 0 : index
    %c0_0 = arith.constant 0 : index
    %c0_1 = arith.constant 0 : index
    %0 = vector.load %arg1[%c0, %c0_0, %c0_1] : memref<1x3x256xf32, #tpu.memory_space<vmem>>, vector<1x3x256xf32>
    %1 = vector.shape_cast %0 : vector<1x3x256xf32> to vector<3x256xf32>
    %2 = tpu.transpose %1, [1, 0] : vector<3x256xf32> -> vector<256x3xf32>
    %3 = vector.shape_cast %2 : vector<256x3xf32> to vector<16x16x3xf32>
    %4 = vector.extract_strided_slice %3 {offsets = [1, 0, 0], sizes = [1, 16, 3], strides = [1, 1, 1]} : vector<16x16x3xf32> to vector<1x16x3xf32>
    %5 = vector.extract_strided_slice %3 {offsets = [14, 0, 0], sizes = [1, 16, 3], strides = [1, 1, 1]} : vector<16x16x3xf32> to vector<1x16x3xf32>
    %6 = tpu.concatenate %4, %3, %5 in 0 : vector<1x16x3xf32>, vector<16x16x3xf32>, vector<1x16x3xf32> -> vector<18x16x3xf32>
    %7 = vector.extract_strided_slice %6 {offsets = [0, 1, 0], sizes = [18, 1, 3], strides = [1, 1, 1]} : vector<18x16x3xf32> to vector<18x1x3xf32>
    %8 = vector.extract_strided_slice %6 {offsets = [0, 14, 0], sizes = [18, 1, 3], strides = [1, 1, 1]} : vector<18x16x3xf32> to vector<18x1x3xf32>
    %9 = tpu.concatenate %7, %6, %8 in 1 : vector<18x1x3xf32>, vector<18x16x3xf32>, vector<18x1x3xf32> -> vector<18x18x3xf32>
    %10 = vector.extract_strided_slice %9 {offsets = [0, 0, 0], sizes = [16, 16, 3], strides = [1, 1, 1]} : vector<18x18x3xf32> to vector<16x16x3xf32>
    %11 = vector.extract_strided_slice %9 {offsets = [0, 1, 0], sizes = [16, 16, 3], strides = [1, 1, 1]} : vector<18x18x3xf32> to vector<16x16x3xf32>
    %12 = vector.extract_strided_slice %9 {offsets = [0, 2, 0], sizes = [16, 16, 3], strides = [1, 1, 1]} : vector<18x18x3xf32> to vector<16x16x3xf32>
    %13 = vector.extract_strided_slice %9 {offsets = [1, 0, 0], sizes = [16, 16, 3], strides = [1, 1, 1]} : vector<18x18x3xf32> to vector<16x16x3xf32>
    %14 = vector.extract_strided_slice %9 {offsets = [1, 1, 0], sizes = [16, 16, 3], strides = [1, 1, 1]} : vector<18x18x3xf32> to vector<16x16x3xf32>
    %15 = vector.extract_strided_slice %9 {offsets = [1, 2, 0], sizes = [16, 16, 3], strides = [1, 1, 1]} : vector<18x18x3xf32> to vector<16x16x3xf32>
    %16 = vector.extract_strided_slice %9 {offsets = [2, 0, 0], sizes = [16, 16, 3], strides = [1, 1, 1]} : vector<18x18x3xf32> to vector<16x16x3xf32>
    %17 = vector.extract_strided_slice %9 {offsets = [2, 1, 0], sizes = [16, 16, 3], strides = [1, 1, 1]} : vector<18x18x3xf32> to vector<16x16x3xf32>
    %18 = vector.extract_strided_slice %9 {offsets = [2, 2, 0], sizes = [16, 16, 3], strides = [1, 1, 1]} : vector<18x18x3xf32> to vector<16x16x3xf32>
    %19 = tpu.concatenate %10, %11, %12, %13, %14, %15, %16, %17, %18 in 2 : vector<16x16x3xf32>, vector<16x16x3xf32>, vector<16x16x3xf32>, vector<16x16x3xf32>, vector<16x16x3xf32>, vector<16x16x3xf32>, vector<16x16x3xf32>, vector<16x16x3xf32>, vector<16x16x3xf32> -> vector<16x16x27xf32>
    %20 = vector.shape_cast %19 : vector<16x16x27xf32> to vector<256x27xf32>
    %c0_2 = arith.constant 0 : index
    %c0_3 = arith.constant 0 : index
    %21 = vector.load %arg2[%c0_2, %c0_3] : memref<27x8xf32, #tpu.memory_space<vmem>>, vector<27x8xf32>
    %cst = arith.constant dense<0.000000e+00> : vector<256x8xf32>
    %22 = tpu.matmul %20, %21, %cst {dimension_numbers = #tpu.dot_dimension_numbers<[1], [0], [0], [1], [0, 0, 1, 1], [], []>} : vector<256x27xf32>, vector<27x8xf32>, vector<256x8xf32> -> vector<256x8xf32>
    %c0_4 = arith.constant 0 : index
    %c0_5 = arith.constant 0 : index
    %23 = vector.load %arg3[%c0_4, %c0_5] : memref<1x8xf32, #tpu.memory_space<vmem>>, vector<1x8xf32>
    %24 = vector.broadcast %23 : vector<1x8xf32> to vector<256x8xf32>
    %25 = arith.addf %22, %24 : vector<256x8xf32>
    %cst_6 = arith.constant 3.906250e-03 : f32
    %26 = vector.broadcast %cst_6 : f32 to vector<1x256xf32>
    %cst_7 = arith.constant dense<0.000000e+00> : vector<1x8xf32>
    %27 = tpu.matmul %26, %25, %cst_7 {dimension_numbers = #tpu.dot_dimension_numbers<[1], [0], [0], [1], [0, 0, 1, 1], [], []>} : vector<1x256xf32>, vector<256x8xf32>, vector<1x8xf32> -> vector<1x8xf32>
    %28 = vector.broadcast %27 : vector<1x8xf32> to vector<256x8xf32>
    %29 = arith.subf %25, %28 : vector<256x8xf32>
    %30 = arith.mulf %29, %29 : vector<256x8xf32>
    %cst_8 = arith.constant dense<0.000000e+00> : vector<1x8xf32>
    %31 = tpu.matmul %26, %30, %cst_8 {dimension_numbers = #tpu.dot_dimension_numbers<[1], [0], [0], [1], [0, 0, 1, 1], [], []>} : vector<1x256xf32>, vector<256x8xf32>, vector<1x8xf32> -> vector<1x8xf32>
    %cst_9 = arith.constant 9.99999974E-6 : f32
    %32 = vector.broadcast %cst_9 : f32 to vector<1x8xf32>
    %33 = arith.addf %31, %32 : vector<1x8xf32>
    %34 = math.rsqrt %33 : vector<1x8xf32>
    %35 = vector.broadcast %34 : vector<1x8xf32> to vector<256x8xf32>
    %36 = arith.mulf %29, %35 : vector<256x8xf32>
    %c0_10 = arith.constant 0 : index
    %c0_11 = arith.constant 0 : index
    %37 = vector.load %arg4[%c0_10, %c0_11] : memref<1x8xf32, #tpu.memory_space<vmem>>, vector<1x8xf32>
    %38 = vector.broadcast %37 : vector<1x8xf32> to vector<256x8xf32>
    %39 = arith.mulf %36, %38 : vector<256x8xf32>
    %c0_12 = arith.constant 0 : index
    %c0_13 = arith.constant 0 : index
    %40 = vector.load %arg5[%c0_12, %c0_13] : memref<1x8xf32, #tpu.memory_space<vmem>>, vector<1x8xf32>
    %41 = vector.broadcast %40 : vector<1x8xf32> to vector<256x8xf32>
    %42 = arith.addf %39, %41 : vector<256x8xf32>
    %cst_14 = arith.constant 0.000000e+00 : f32
    %43 = vector.broadcast %cst_14 : f32 to vector<256x8xf32>
    %44 = arith.maximumf %42, %43 : vector<256x8xf32>
    %45 = vector.shape_cast %44 : vector<256x8xf32> to vector<16x16x8xf32>
    %46 = vector.extract_strided_slice %45 {offsets = [1, 0, 0], sizes = [1, 16, 8], strides = [1, 1, 1]} : vector<16x16x8xf32> to vector<1x16x8xf32>
    %47 = vector.extract_strided_slice %45 {offsets = [14, 0, 0], sizes = [1, 16, 8], strides = [1, 1, 1]} : vector<16x16x8xf32> to vector<1x16x8xf32>
    %48 = tpu.concatenate %46, %45, %47 in 0 : vector<1x16x8xf32>, vector<16x16x8xf32>, vector<1x16x8xf32> -> vector<18x16x8xf32>
    %49 = vector.extract_strided_slice %48 {offsets = [0, 1, 0], sizes = [18, 1, 8], strides = [1, 1, 1]} : vector<18x16x8xf32> to vector<18x1x8xf32>
    %50 = vector.extract_strided_slice %48 {offsets = [0, 14, 0], sizes = [18, 1, 8], strides = [1, 1, 1]} : vector<18x16x8xf32> to vector<18x1x8xf32>
    %51 = tpu.concatenate %49, %48, %50 in 1 : vector<18x1x8xf32>, vector<18x16x8xf32>, vector<18x1x8xf32> -> vector<18x18x8xf32>
    %52 = vector.extract_strided_slice %51 {offsets = [0, 0, 0], sizes = [1, 18, 8], strides = [1, 1, 1]} : vector<18x18x8xf32> to vector<1x18x8xf32>
    %53 = vector.extract_strided_slice %51 {offsets = [2, 0, 0], sizes = [1, 18, 8], strides = [1, 1, 1]} : vector<18x18x8xf32> to vector<1x18x8xf32>
    %54 = vector.extract_strided_slice %51 {offsets = [4, 0, 0], sizes = [1, 18, 8], strides = [1, 1, 1]} : vector<18x18x8xf32> to vector<1x18x8xf32>
    %55 = vector.extract_strided_slice %51 {offsets = [6, 0, 0], sizes = [1, 18, 8], strides = [1, 1, 1]} : vector<18x18x8xf32> to vector<1x18x8xf32>
    %56 = vector.extract_strided_slice %51 {offsets = [8, 0, 0], sizes = [1, 18, 8], strides = [1, 1, 1]} : vector<18x18x8xf32> to vector<1x18x8xf32>
    %57 = vector.extract_strided_slice %51 {offsets = [10, 0, 0], sizes = [1, 18, 8], strides = [1, 1, 1]} : vector<18x18x8xf32> to vector<1x18x8xf32>
    %58 = vector.extract_strided_slice %51 {offsets = [12, 0, 0], sizes = [1, 18, 8], strides = [1, 1, 1]} : vector<18x18x8xf32> to vector<1x18x8xf32>
    %59 = vector.extract_strided_slice %51 {offsets = [14, 0, 0], sizes = [1, 18, 8], strides = [1, 1, 1]} : vector<18x18x8xf32> to vector<1x18x8xf32>
    %60 = vector.extract_strided_slice %51 {offsets = [16, 0, 0], sizes = [1, 18, 8], strides = [1, 1, 1]} : vector<18x18x8xf32> to vector<1x18x8xf32>
    %61 = tpu.concatenate %52, %53, %54, %55, %56, %57, %58, %59, %60 in 0 : vector<1x18x8xf32>, vector<1x18x8xf32>, vector<1x18x8xf32>, vector<1x18x8xf32>, vector<1x18x8xf32>, vector<1x18x8xf32>, vector<1x18x8xf32>, vector<1x18x8xf32>, vector<1x18x8xf32> -> vector<9x18x8xf32>
    %62 = vector.extract_strided_slice %51 {offsets = [1, 0, 0], sizes = [1, 18, 8], strides = [1, 1, 1]} : vector<18x18x8xf32> to vector<1x18x8xf32>
    %63 = vector.extract_strided_slice %51 {offsets = [3, 0, 0], sizes = [1, 18, 8], strides = [1, 1, 1]} : vector<18x18x8xf32> to vector<1x18x8xf32>
    %64 = vector.extract_strided_slice %51 {offsets = [5, 0, 0], sizes = [1, 18, 8], strides = [1, 1, 1]} : vector<18x18x8xf32> to vector<1x18x8xf32>
    %65 = vector.extract_strided_slice %51 {offsets = [7, 0, 0], sizes = [1, 18, 8], strides = [1, 1, 1]} : vector<18x18x8xf32> to vector<1x18x8xf32>
    %66 = vector.extract_strided_slice %51 {offsets = [9, 0, 0], sizes = [1, 18, 8], strides = [1, 1, 1]} : vector<18x18x8xf32> to vector<1x18x8xf32>
    %67 = vector.extract_strided_slice %51 {offsets = [11, 0, 0], sizes = [1, 18, 8], strides = [1, 1, 1]} : vector<18x18x8xf32> to vector<1x18x8xf32>
    %68 = vector.extract_strided_slice %51 {offsets = [13, 0, 0], sizes = [1, 18, 8], strides = [1, 1, 1]} : vector<18x18x8xf32> to vector<1x18x8xf32>
    %69 = vector.extract_strided_slice %51 {offsets = [15, 0, 0], sizes = [1, 18, 8], strides = [1, 1, 1]} : vector<18x18x8xf32> to vector<1x18x8xf32>
    %70 = vector.extract_strided_slice %51 {offsets = [17, 0, 0], sizes = [1, 18, 8], strides = [1, 1, 1]} : vector<18x18x8xf32> to vector<1x18x8xf32>
    %71 = tpu.concatenate %62, %63, %64, %65, %66, %67, %68, %69, %70 in 0 : vector<1x18x8xf32>, vector<1x18x8xf32>, vector<1x18x8xf32>, vector<1x18x8xf32>, vector<1x18x8xf32>, vector<1x18x8xf32>, vector<1x18x8xf32>, vector<1x18x8xf32>, vector<1x18x8xf32> -> vector<9x18x8xf32>
    %72 = vector.extract_strided_slice %61 {offsets = [0, 0, 0], sizes = [9, 1, 8], strides = [1, 1, 1]} : vector<9x18x8xf32> to vector<9x1x8xf32>
    %73 = vector.extract_strided_slice %61 {offsets = [0, 2, 0], sizes = [9, 1, 8], strides = [1, 1, 1]} : vector<9x18x8xf32> to vector<9x1x8xf32>
    %74 = vector.extract_strided_slice %61 {offsets = [0, 4, 0], sizes = [9, 1, 8], strides = [1, 1, 1]} : vector<9x18x8xf32> to vector<9x1x8xf32>
    %75 = vector.extract_strided_slice %61 {offsets = [0, 6, 0], sizes = [9, 1, 8], strides = [1, 1, 1]} : vector<9x18x8xf32> to vector<9x1x8xf32>
    %76 = vector.extract_strided_slice %61 {offsets = [0, 8, 0], sizes = [9, 1, 8], strides = [1, 1, 1]} : vector<9x18x8xf32> to vector<9x1x8xf32>
    %77 = vector.extract_strided_slice %61 {offsets = [0, 10, 0], sizes = [9, 1, 8], strides = [1, 1, 1]} : vector<9x18x8xf32> to vector<9x1x8xf32>
    %78 = vector.extract_strided_slice %61 {offsets = [0, 12, 0], sizes = [9, 1, 8], strides = [1, 1, 1]} : vector<9x18x8xf32> to vector<9x1x8xf32>
    %79 = vector.extract_strided_slice %61 {offsets = [0, 14, 0], sizes = [9, 1, 8], strides = [1, 1, 1]} : vector<9x18x8xf32> to vector<9x1x8xf32>
    %80 = vector.extract_strided_slice %61 {offsets = [0, 16, 0], sizes = [9, 1, 8], strides = [1, 1, 1]} : vector<9x18x8xf32> to vector<9x1x8xf32>
    %81 = tpu.concatenate %72, %73, %74, %75, %76, %77, %78, %79, %80 in 1 : vector<9x1x8xf32>, vector<9x1x8xf32>, vector<9x1x8xf32>, vector<9x1x8xf32>, vector<9x1x8xf32>, vector<9x1x8xf32>, vector<9x1x8xf32>, vector<9x1x8xf32>, vector<9x1x8xf32> -> vector<9x9x8xf32>
    %82 = vector.extract_strided_slice %61 {offsets = [0, 1, 0], sizes = [9, 1, 8], strides = [1, 1, 1]} : vector<9x18x8xf32> to vector<9x1x8xf32>
    %83 = vector.extract_strided_slice %61 {offsets = [0, 3, 0], sizes = [9, 1, 8], strides = [1, 1, 1]} : vector<9x18x8xf32> to vector<9x1x8xf32>
    %84 = vector.extract_strided_slice %61 {offsets = [0, 5, 0], sizes = [9, 1, 8], strides = [1, 1, 1]} : vector<9x18x8xf32> to vector<9x1x8xf32>
    %85 = vector.extract_strided_slice %61 {offsets = [0, 7, 0], sizes = [9, 1, 8], strides = [1, 1, 1]} : vector<9x18x8xf32> to vector<9x1x8xf32>
    %86 = vector.extract_strided_slice %61 {offsets = [0, 9, 0], sizes = [9, 1, 8], strides = [1, 1, 1]} : vector<9x18x8xf32> to vector<9x1x8xf32>
    %87 = vector.extract_strided_slice %61 {offsets = [0, 11, 0], sizes = [9, 1, 8], strides = [1, 1, 1]} : vector<9x18x8xf32> to vector<9x1x8xf32>
    %88 = vector.extract_strided_slice %61 {offsets = [0, 13, 0], sizes = [9, 1, 8], strides = [1, 1, 1]} : vector<9x18x8xf32> to vector<9x1x8xf32>
    %89 = vector.extract_strided_slice %61 {offsets = [0, 15, 0], sizes = [9, 1, 8], strides = [1, 1, 1]} : vector<9x18x8xf32> to vector<9x1x8xf32>
    %90 = vector.extract_strided_slice %61 {offsets = [0, 17, 0], sizes = [9, 1, 8], strides = [1, 1, 1]} : vector<9x18x8xf32> to vector<9x1x8xf32>
    %91 = tpu.concatenate %82, %83, %84, %85, %86, %87, %88, %89, %90 in 1 : vector<9x1x8xf32>, vector<9x1x8xf32>, vector<9x1x8xf32>, vector<9x1x8xf32>, vector<9x1x8xf32>, vector<9x1x8xf32>, vector<9x1x8xf32>, vector<9x1x8xf32>, vector<9x1x8xf32> -> vector<9x9x8xf32>
    %92 = vector.extract_strided_slice %71 {offsets = [0, 0, 0], sizes = [9, 1, 8], strides = [1, 1, 1]} : vector<9x18x8xf32> to vector<9x1x8xf32>
    %93 = vector.extract_strided_slice %71 {offsets = [0, 2, 0], sizes = [9, 1, 8], strides = [1, 1, 1]} : vector<9x18x8xf32> to vector<9x1x8xf32>
    %94 = vector.extract_strided_slice %71 {offsets = [0, 4, 0], sizes = [9, 1, 8], strides = [1, 1, 1]} : vector<9x18x8xf32> to vector<9x1x8xf32>
    %95 = vector.extract_strided_slice %71 {offsets = [0, 6, 0], sizes = [9, 1, 8], strides = [1, 1, 1]} : vector<9x18x8xf32> to vector<9x1x8xf32>
    %96 = vector.extract_strided_slice %71 {offsets = [0, 8, 0], sizes = [9, 1, 8], strides = [1, 1, 1]} : vector<9x18x8xf32> to vector<9x1x8xf32>
    %97 = vector.extract_strided_slice %71 {offsets = [0, 10, 0], sizes = [9, 1, 8], strides = [1, 1, 1]} : vector<9x18x8xf32> to vector<9x1x8xf32>
    %98 = vector.extract_strided_slice %71 {offsets = [0, 12, 0], sizes = [9, 1, 8], strides = [1, 1, 1]} : vector<9x18x8xf32> to vector<9x1x8xf32>
    %99 = vector.extract_strided_slice %71 {offsets = [0, 14, 0], sizes = [9, 1, 8], strides = [1, 1, 1]} : vector<9x18x8xf32> to vector<9x1x8xf32>
    %100 = vector.extract_strided_slice %71 {offsets = [0, 16, 0], sizes = [9, 1, 8], strides = [1, 1, 1]} : vector<9x18x8xf32> to vector<9x1x8xf32>
    %101 = tpu.concatenate %92, %93, %94, %95, %96, %97, %98, %99, %100 in 1 : vector<9x1x8xf32>, vector<9x1x8xf32>, vector<9x1x8xf32>, vector<9x1x8xf32>, vector<9x1x8xf32>, vector<9x1x8xf32>, vector<9x1x8xf32>, vector<9x1x8xf32>, vector<9x1x8xf32> -> vector<9x9x8xf32>
    %102 = vector.extract_strided_slice %71 {offsets = [0, 1, 0], sizes = [9, 1, 8], strides = [1, 1, 1]} : vector<9x18x8xf32> to vector<9x1x8xf32>
    %103 = vector.extract_strided_slice %71 {offsets = [0, 3, 0], sizes = [9, 1, 8], strides = [1, 1, 1]} : vector<9x18x8xf32> to vector<9x1x8xf32>
    %104 = vector.extract_strided_slice %71 {offsets = [0, 5, 0], sizes = [9, 1, 8], strides = [1, 1, 1]} : vector<9x18x8xf32> to vector<9x1x8xf32>
    %105 = vector.extract_strided_slice %71 {offsets = [0, 7, 0], sizes = [9, 1, 8], strides = [1, 1, 1]} : vector<9x18x8xf32> to vector<9x1x8xf32>
    %106 = vector.extract_strided_slice %71 {offsets = [0, 9, 0], sizes = [9, 1, 8], strides = [1, 1, 1]} : vector<9x18x8xf32> to vector<9x1x8xf32>
    %107 = vector.extract_strided_slice %71 {offsets = [0, 11, 0], sizes = [9, 1, 8], strides = [1, 1, 1]} : vector<9x18x8xf32> to vector<9x1x8xf32>
    %108 = vector.extract_strided_slice %71 {offsets = [0, 13, 0], sizes = [9, 1, 8], strides = [1, 1, 1]} : vector<9x18x8xf32> to vector<9x1x8xf32>
    %109 = vector.extract_strided_slice %71 {offsets = [0, 15, 0], sizes = [9, 1, 8], strides = [1, 1, 1]} : vector<9x18x8xf32> to vector<9x1x8xf32>
    %110 = vector.extract_strided_slice %71 {offsets = [0, 17, 0], sizes = [9, 1, 8], strides = [1, 1, 1]} : vector<9x18x8xf32> to vector<9x1x8xf32>
    %111 = tpu.concatenate %102, %103, %104, %105, %106, %107, %108, %109, %110 in 1 : vector<9x1x8xf32>, vector<9x1x8xf32>, vector<9x1x8xf32>, vector<9x1x8xf32>, vector<9x1x8xf32>, vector<9x1x8xf32>, vector<9x1x8xf32>, vector<9x1x8xf32>, vector<9x1x8xf32> -> vector<9x9x8xf32>
    %112 = vector.extract_strided_slice %81 {offsets = [0, 0, 0], sizes = [8, 8, 8], strides = [1, 1, 1]} : vector<9x9x8xf32> to vector<8x8x8xf32>
    %113 = vector.extract_strided_slice %91 {offsets = [0, 0, 0], sizes = [8, 8, 8], strides = [1, 1, 1]} : vector<9x9x8xf32> to vector<8x8x8xf32>
    %114 = vector.extract_strided_slice %81 {offsets = [0, 1, 0], sizes = [8, 8, 8], strides = [1, 1, 1]} : vector<9x9x8xf32> to vector<8x8x8xf32>
    %115 = vector.extract_strided_slice %101 {offsets = [0, 0, 0], sizes = [8, 8, 8], strides = [1, 1, 1]} : vector<9x9x8xf32> to vector<8x8x8xf32>
    %116 = vector.extract_strided_slice %111 {offsets = [0, 0, 0], sizes = [8, 8, 8], strides = [1, 1, 1]} : vector<9x9x8xf32> to vector<8x8x8xf32>
    %117 = vector.extract_strided_slice %101 {offsets = [0, 1, 0], sizes = [8, 8, 8], strides = [1, 1, 1]} : vector<9x9x8xf32> to vector<8x8x8xf32>
    %118 = vector.extract_strided_slice %81 {offsets = [1, 0, 0], sizes = [8, 8, 8], strides = [1, 1, 1]} : vector<9x9x8xf32> to vector<8x8x8xf32>
    %119 = vector.extract_strided_slice %91 {offsets = [1, 0, 0], sizes = [8, 8, 8], strides = [1, 1, 1]} : vector<9x9x8xf32> to vector<8x8x8xf32>
    %120 = vector.extract_strided_slice %81 {offsets = [1, 1, 0], sizes = [8, 8, 8], strides = [1, 1, 1]} : vector<9x9x8xf32> to vector<8x8x8xf32>
    %121 = tpu.concatenate %112, %113, %114, %115, %116, %117, %118, %119, %120 in 2 : vector<8x8x8xf32>, vector<8x8x8xf32>, vector<8x8x8xf32>, vector<8x8x8xf32>, vector<8x8x8xf32>, vector<8x8x8xf32>, vector<8x8x8xf32>, vector<8x8x8xf32>, vector<8x8x8xf32> -> vector<8x8x72xf32>
    %122 = vector.shape_cast %121 : vector<8x8x72xf32> to vector<64x72xf32>
    %c0_15 = arith.constant 0 : index
    %c0_16 = arith.constant 0 : index
    %123 = vector.load %arg6[%c0_15, %c0_16] : memref<72x12xf32, #tpu.memory_space<vmem>>, vector<72x12xf32>
    %cst_17 = arith.constant dense<0.000000e+00> : vector<64x12xf32>
    %124 = tpu.matmul %122, %123, %cst_17 {dimension_numbers = #tpu.dot_dimension_numbers<[1], [0], [0], [1], [0, 0, 1, 1], [], []>} : vector<64x72xf32>, vector<72x12xf32>, vector<64x12xf32> -> vector<64x12xf32>
    %c0_18 = arith.constant 0 : index
    %c0_19 = arith.constant 0 : index
    %125 = vector.load %arg7[%c0_18, %c0_19] : memref<1x12xf32, #tpu.memory_space<vmem>>, vector<1x12xf32>
    %126 = vector.broadcast %125 : vector<1x12xf32> to vector<64x12xf32>
    %127 = arith.addf %124, %126 : vector<64x12xf32>
    %cst_20 = arith.constant 1.562500e-02 : f32
    %128 = vector.broadcast %cst_20 : f32 to vector<1x64xf32>
    %cst_21 = arith.constant dense<0.000000e+00> : vector<1x12xf32>
    %129 = tpu.matmul %128, %127, %cst_21 {dimension_numbers = #tpu.dot_dimension_numbers<[1], [0], [0], [1], [0, 0, 1, 1], [], []>} : vector<1x64xf32>, vector<64x12xf32>, vector<1x12xf32> -> vector<1x12xf32>
    %130 = vector.broadcast %129 : vector<1x12xf32> to vector<64x12xf32>
    %131 = arith.subf %127, %130 : vector<64x12xf32>
    %132 = arith.mulf %131, %131 : vector<64x12xf32>
    %cst_22 = arith.constant dense<0.000000e+00> : vector<1x12xf32>
    %133 = tpu.matmul %128, %132, %cst_22 {dimension_numbers = #tpu.dot_dimension_numbers<[1], [0], [0], [1], [0, 0, 1, 1], [], []>} : vector<1x64xf32>, vector<64x12xf32>, vector<1x12xf32> -> vector<1x12xf32>
    %cst_23 = arith.constant 9.99999974E-6 : f32
    %134 = vector.broadcast %cst_23 : f32 to vector<1x12xf32>
    %135 = arith.addf %133, %134 : vector<1x12xf32>
    %136 = math.rsqrt %135 : vector<1x12xf32>
    %137 = vector.broadcast %136 : vector<1x12xf32> to vector<64x12xf32>
    %138 = arith.mulf %131, %137 : vector<64x12xf32>
    %c0_24 = arith.constant 0 : index
    %c0_25 = arith.constant 0 : index
    %139 = vector.load %arg8[%c0_24, %c0_25] : memref<1x12xf32, #tpu.memory_space<vmem>>, vector<1x12xf32>
    %140 = vector.broadcast %139 : vector<1x12xf32> to vector<64x12xf32>
    %141 = arith.mulf %138, %140 : vector<64x12xf32>
    %c0_26 = arith.constant 0 : index
    %c0_27 = arith.constant 0 : index
    %142 = vector.load %arg9[%c0_26, %c0_27] : memref<1x12xf32, #tpu.memory_space<vmem>>, vector<1x12xf32>
    %143 = vector.broadcast %142 : vector<1x12xf32> to vector<64x12xf32>
    %144 = arith.addf %141, %143 : vector<64x12xf32>
    %cst_28 = arith.constant 0.000000e+00 : f32
    %145 = vector.broadcast %cst_28 : f32 to vector<64x12xf32>
    %146 = arith.maximumf %144, %145 : vector<64x12xf32>
    %147 = vector.shape_cast %146 : vector<64x12xf32> to vector<8x8x12xf32>
    %148 = vector.extract_strided_slice %147 {offsets = [1, 0, 0], sizes = [1, 8, 12], strides = [1, 1, 1]} : vector<8x8x12xf32> to vector<1x8x12xf32>
    %149 = vector.extract_strided_slice %147 {offsets = [6, 0, 0], sizes = [1, 8, 12], strides = [1, 1, 1]} : vector<8x8x12xf32> to vector<1x8x12xf32>
    %150 = tpu.concatenate %148, %147, %149 in 0 : vector<1x8x12xf32>, vector<8x8x12xf32>, vector<1x8x12xf32> -> vector<10x8x12xf32>
    %151 = vector.extract_strided_slice %150 {offsets = [0, 1, 0], sizes = [10, 1, 12], strides = [1, 1, 1]} : vector<10x8x12xf32> to vector<10x1x12xf32>
    %152 = vector.extract_strided_slice %150 {offsets = [0, 6, 0], sizes = [10, 1, 12], strides = [1, 1, 1]} : vector<10x8x12xf32> to vector<10x1x12xf32>
    %153 = tpu.concatenate %151, %150, %152 in 1 : vector<10x1x12xf32>, vector<10x8x12xf32>, vector<10x1x12xf32> -> vector<10x10x12xf32>
    %154 = vector.extract_strided_slice %153 {offsets = [0, 0, 0], sizes = [1, 10, 12], strides = [1, 1, 1]} : vector<10x10x12xf32> to vector<1x10x12xf32>
    %155 = vector.extract_strided_slice %153 {offsets = [2, 0, 0], sizes = [1, 10, 12], strides = [1, 1, 1]} : vector<10x10x12xf32> to vector<1x10x12xf32>
    %156 = vector.extract_strided_slice %153 {offsets = [4, 0, 0], sizes = [1, 10, 12], strides = [1, 1, 1]} : vector<10x10x12xf32> to vector<1x10x12xf32>
    %157 = vector.extract_strided_slice %153 {offsets = [6, 0, 0], sizes = [1, 10, 12], strides = [1, 1, 1]} : vector<10x10x12xf32> to vector<1x10x12xf32>
    %158 = vector.extract_strided_slice %153 {offsets = [8, 0, 0], sizes = [1, 10, 12], strides = [1, 1, 1]} : vector<10x10x12xf32> to vector<1x10x12xf32>
    %159 = tpu.concatenate %154, %155, %156, %157, %158 in 0 : vector<1x10x12xf32>, vector<1x10x12xf32>, vector<1x10x12xf32>, vector<1x10x12xf32>, vector<1x10x12xf32> -> vector<5x10x12xf32>
    %160 = vector.extract_strided_slice %153 {offsets = [1, 0, 0], sizes = [1, 10, 12], strides = [1, 1, 1]} : vector<10x10x12xf32> to vector<1x10x12xf32>
    %161 = vector.extract_strided_slice %153 {offsets = [3, 0, 0], sizes = [1, 10, 12], strides = [1, 1, 1]} : vector<10x10x12xf32> to vector<1x10x12xf32>
    %162 = vector.extract_strided_slice %153 {offsets = [5, 0, 0], sizes = [1, 10, 12], strides = [1, 1, 1]} : vector<10x10x12xf32> to vector<1x10x12xf32>
    %163 = vector.extract_strided_slice %153 {offsets = [7, 0, 0], sizes = [1, 10, 12], strides = [1, 1, 1]} : vector<10x10x12xf32> to vector<1x10x12xf32>
    %164 = vector.extract_strided_slice %153 {offsets = [9, 0, 0], sizes = [1, 10, 12], strides = [1, 1, 1]} : vector<10x10x12xf32> to vector<1x10x12xf32>
    %165 = tpu.concatenate %160, %161, %162, %163, %164 in 0 : vector<1x10x12xf32>, vector<1x10x12xf32>, vector<1x10x12xf32>, vector<1x10x12xf32>, vector<1x10x12xf32> -> vector<5x10x12xf32>
    %166 = vector.extract_strided_slice %159 {offsets = [0, 0, 0], sizes = [5, 1, 12], strides = [1, 1, 1]} : vector<5x10x12xf32> to vector<5x1x12xf32>
    %167 = vector.extract_strided_slice %159 {offsets = [0, 2, 0], sizes = [5, 1, 12], strides = [1, 1, 1]} : vector<5x10x12xf32> to vector<5x1x12xf32>
    %168 = vector.extract_strided_slice %159 {offsets = [0, 4, 0], sizes = [5, 1, 12], strides = [1, 1, 1]} : vector<5x10x12xf32> to vector<5x1x12xf32>
    %169 = vector.extract_strided_slice %159 {offsets = [0, 6, 0], sizes = [5, 1, 12], strides = [1, 1, 1]} : vector<5x10x12xf32> to vector<5x1x12xf32>
    %170 = vector.extract_strided_slice %159 {offsets = [0, 8, 0], sizes = [5, 1, 12], strides = [1, 1, 1]} : vector<5x10x12xf32> to vector<5x1x12xf32>
    %171 = tpu.concatenate %166, %167, %168, %169, %170 in 1 : vector<5x1x12xf32>, vector<5x1x12xf32>, vector<5x1x12xf32>, vector<5x1x12xf32>, vector<5x1x12xf32> -> vector<5x5x12xf32>
    %172 = vector.extract_strided_slice %159 {offsets = [0, 1, 0], sizes = [5, 1, 12], strides = [1, 1, 1]} : vector<5x10x12xf32> to vector<5x1x12xf32>
    %173 = vector.extract_strided_slice %159 {offsets = [0, 3, 0], sizes = [5, 1, 12], strides = [1, 1, 1]} : vector<5x10x12xf32> to vector<5x1x12xf32>
    %174 = vector.extract_strided_slice %159 {offsets = [0, 5, 0], sizes = [5, 1, 12], strides = [1, 1, 1]} : vector<5x10x12xf32> to vector<5x1x12xf32>
    %175 = vector.extract_strided_slice %159 {offsets = [0, 7, 0], sizes = [5, 1, 12], strides = [1, 1, 1]} : vector<5x10x12xf32> to vector<5x1x12xf32>
    %176 = vector.extract_strided_slice %159 {offsets = [0, 9, 0], sizes = [5, 1, 12], strides = [1, 1, 1]} : vector<5x10x12xf32> to vector<5x1x12xf32>
    %177 = tpu.concatenate %172, %173, %174, %175, %176 in 1 : vector<5x1x12xf32>, vector<5x1x12xf32>, vector<5x1x12xf32>, vector<5x1x12xf32>, vector<5x1x12xf32> -> vector<5x5x12xf32>
    %178 = vector.extract_strided_slice %165 {offsets = [0, 0, 0], sizes = [5, 1, 12], strides = [1, 1, 1]} : vector<5x10x12xf32> to vector<5x1x12xf32>
    %179 = vector.extract_strided_slice %165 {offsets = [0, 2, 0], sizes = [5, 1, 12], strides = [1, 1, 1]} : vector<5x10x12xf32> to vector<5x1x12xf32>
    %180 = vector.extract_strided_slice %165 {offsets = [0, 4, 0], sizes = [5, 1, 12], strides = [1, 1, 1]} : vector<5x10x12xf32> to vector<5x1x12xf32>
    %181 = vector.extract_strided_slice %165 {offsets = [0, 6, 0], sizes = [5, 1, 12], strides = [1, 1, 1]} : vector<5x10x12xf32> to vector<5x1x12xf32>
    %182 = vector.extract_strided_slice %165 {offsets = [0, 8, 0], sizes = [5, 1, 12], strides = [1, 1, 1]} : vector<5x10x12xf32> to vector<5x1x12xf32>
    %183 = tpu.concatenate %178, %179, %180, %181, %182 in 1 : vector<5x1x12xf32>, vector<5x1x12xf32>, vector<5x1x12xf32>, vector<5x1x12xf32>, vector<5x1x12xf32> -> vector<5x5x12xf32>
    %184 = vector.extract_strided_slice %165 {offsets = [0, 1, 0], sizes = [5, 1, 12], strides = [1, 1, 1]} : vector<5x10x12xf32> to vector<5x1x12xf32>
    %185 = vector.extract_strided_slice %165 {offsets = [0, 3, 0], sizes = [5, 1, 12], strides = [1, 1, 1]} : vector<5x10x12xf32> to vector<5x1x12xf32>
    %186 = vector.extract_strided_slice %165 {offsets = [0, 5, 0], sizes = [5, 1, 12], strides = [1, 1, 1]} : vector<5x10x12xf32> to vector<5x1x12xf32>
    %187 = vector.extract_strided_slice %165 {offsets = [0, 7, 0], sizes = [5, 1, 12], strides = [1, 1, 1]} : vector<5x10x12xf32> to vector<5x1x12xf32>
    %188 = vector.extract_strided_slice %165 {offsets = [0, 9, 0], sizes = [5, 1, 12], strides = [1, 1, 1]} : vector<5x10x12xf32> to vector<5x1x12xf32>
    %189 = tpu.concatenate %184, %185, %186, %187, %188 in 1 : vector<5x1x12xf32>, vector<5x1x12xf32>, vector<5x1x12xf32>, vector<5x1x12xf32>, vector<5x1x12xf32> -> vector<5x5x12xf32>
    %190 = vector.extract_strided_slice %171 {offsets = [0, 0, 0], sizes = [4, 4, 12], strides = [1, 1, 1]} : vector<5x5x12xf32> to vector<4x4x12xf32>
    %191 = vector.extract_strided_slice %177 {offsets = [0, 0, 0], sizes = [4, 4, 12], strides = [1, 1, 1]} : vector<5x5x12xf32> to vector<4x4x12xf32>
    %192 = vector.extract_strided_slice %171 {offsets = [0, 1, 0], sizes = [4, 4, 12], strides = [1, 1, 1]} : vector<5x5x12xf32> to vector<4x4x12xf32>
    %193 = vector.extract_strided_slice %183 {offsets = [0, 0, 0], sizes = [4, 4, 12], strides = [1, 1, 1]} : vector<5x5x12xf32> to vector<4x4x12xf32>
    %194 = vector.extract_strided_slice %189 {offsets = [0, 0, 0], sizes = [4, 4, 12], strides = [1, 1, 1]} : vector<5x5x12xf32> to vector<4x4x12xf32>
    %195 = vector.extract_strided_slice %183 {offsets = [0, 1, 0], sizes = [4, 4, 12], strides = [1, 1, 1]} : vector<5x5x12xf32> to vector<4x4x12xf32>
    %196 = vector.extract_strided_slice %171 {offsets = [1, 0, 0], sizes = [4, 4, 12], strides = [1, 1, 1]} : vector<5x5x12xf32> to vector<4x4x12xf32>
    %197 = vector.extract_strided_slice %177 {offsets = [1, 0, 0], sizes = [4, 4, 12], strides = [1, 1, 1]} : vector<5x5x12xf32> to vector<4x4x12xf32>
    %198 = vector.extract_strided_slice %171 {offsets = [1, 1, 0], sizes = [4, 4, 12], strides = [1, 1, 1]} : vector<5x5x12xf32> to vector<4x4x12xf32>
    %199 = tpu.concatenate %190, %191, %192, %193, %194, %195, %196, %197, %198 in 2 : vector<4x4x12xf32>, vector<4x4x12xf32>, vector<4x4x12xf32>, vector<4x4x12xf32>, vector<4x4x12xf32>, vector<4x4x12xf32>, vector<4x4x12xf32>, vector<4x4x12xf32>, vector<4x4x12xf32> -> vector<4x4x108xf32>
    %200 = vector.shape_cast %199 : vector<4x4x108xf32> to vector<16x108xf32>
    %c0_29 = arith.constant 0 : index
    %c0_30 = arith.constant 0 : index
    %201 = vector.load %arg10[%c0_29, %c0_30] : memref<108x16xf32, #tpu.memory_space<vmem>>, vector<108x16xf32>
    %cst_31 = arith.constant dense<0.000000e+00> : vector<16x16xf32>
    %202 = tpu.matmul %200, %201, %cst_31 {dimension_numbers = #tpu.dot_dimension_numbers<[1], [0], [0], [1], [0, 0, 1, 1], [], []>} : vector<16x108xf32>, vector<108x16xf32>, vector<16x16xf32> -> vector<16x16xf32>
    %c0_32 = arith.constant 0 : index
    %c0_33 = arith.constant 0 : index
    %203 = vector.load %arg11[%c0_32, %c0_33] : memref<1x16xf32, #tpu.memory_space<vmem>>, vector<1x16xf32>
    %204 = vector.broadcast %203 : vector<1x16xf32> to vector<16x16xf32>
    %205 = arith.addf %202, %204 : vector<16x16xf32>
    %cst_34 = arith.constant 6.250000e-02 : f32
    %206 = vector.broadcast %cst_34 : f32 to vector<1x16xf32>
    %cst_35 = arith.constant dense<0.000000e+00> : vector<1x16xf32>
    %207 = tpu.matmul %206, %205, %cst_35 {dimension_numbers = #tpu.dot_dimension_numbers<[1], [0], [0], [1], [0, 0, 1, 1], [], []>} : vector<1x16xf32>, vector<16x16xf32>, vector<1x16xf32> -> vector<1x16xf32>
    %208 = vector.broadcast %207 : vector<1x16xf32> to vector<16x16xf32>
    %209 = arith.subf %205, %208 : vector<16x16xf32>
    %210 = arith.mulf %209, %209 : vector<16x16xf32>
    %cst_36 = arith.constant dense<0.000000e+00> : vector<1x16xf32>
    %211 = tpu.matmul %206, %210, %cst_36 {dimension_numbers = #tpu.dot_dimension_numbers<[1], [0], [0], [1], [0, 0, 1, 1], [], []>} : vector<1x16xf32>, vector<16x16xf32>, vector<1x16xf32> -> vector<1x16xf32>
    %cst_37 = arith.constant 9.99999974E-6 : f32
    %212 = vector.broadcast %cst_37 : f32 to vector<1x16xf32>
    %213 = arith.addf %211, %212 : vector<1x16xf32>
    %214 = math.rsqrt %213 : vector<1x16xf32>
    %215 = vector.broadcast %214 : vector<1x16xf32> to vector<16x16xf32>
    %216 = arith.mulf %209, %215 : vector<16x16xf32>
    %c0_38 = arith.constant 0 : index
    %c0_39 = arith.constant 0 : index
    %217 = vector.load %arg12[%c0_38, %c0_39] : memref<1x16xf32, #tpu.memory_space<vmem>>, vector<1x16xf32>
    %218 = vector.broadcast %217 : vector<1x16xf32> to vector<16x16xf32>
    %219 = arith.mulf %216, %218 : vector<16x16xf32>
    %c0_40 = arith.constant 0 : index
    %c0_41 = arith.constant 0 : index
    %220 = vector.load %arg13[%c0_40, %c0_41] : memref<1x16xf32, #tpu.memory_space<vmem>>, vector<1x16xf32>
    %221 = vector.broadcast %220 : vector<1x16xf32> to vector<16x16xf32>
    %222 = arith.addf %219, %221 : vector<16x16xf32>
    %cst_42 = arith.constant 0.000000e+00 : f32
    %223 = vector.broadcast %cst_42 : f32 to vector<16x16xf32>
    %224 = arith.maximumf %222, %223 : vector<16x16xf32>
    %225 = vector.shape_cast %224 : vector<16x16xf32> to vector<4x4x16xf32>
    %226 = vector.extract_strided_slice %225 {offsets = [1, 0, 0], sizes = [1, 4, 16], strides = [1, 1, 1]} : vector<4x4x16xf32> to vector<1x4x16xf32>
    %227 = vector.extract_strided_slice %225 {offsets = [2, 0, 0], sizes = [1, 4, 16], strides = [1, 1, 1]} : vector<4x4x16xf32> to vector<1x4x16xf32>
    %228 = tpu.concatenate %226, %225, %227 in 0 : vector<1x4x16xf32>, vector<4x4x16xf32>, vector<1x4x16xf32> -> vector<6x4x16xf32>
    %229 = vector.extract_strided_slice %228 {offsets = [0, 1, 0], sizes = [6, 1, 16], strides = [1, 1, 1]} : vector<6x4x16xf32> to vector<6x1x16xf32>
    %230 = vector.extract_strided_slice %228 {offsets = [0, 2, 0], sizes = [6, 1, 16], strides = [1, 1, 1]} : vector<6x4x16xf32> to vector<6x1x16xf32>
    %231 = tpu.concatenate %229, %228, %230 in 1 : vector<6x1x16xf32>, vector<6x4x16xf32>, vector<6x1x16xf32> -> vector<6x6x16xf32>
    %232 = vector.extract_strided_slice %231 {offsets = [0, 0, 0], sizes = [4, 4, 16], strides = [1, 1, 1]} : vector<6x6x16xf32> to vector<4x4x16xf32>
    %233 = vector.extract_strided_slice %231 {offsets = [0, 1, 0], sizes = [4, 4, 16], strides = [1, 1, 1]} : vector<6x6x16xf32> to vector<4x4x16xf32>
    %234 = vector.extract_strided_slice %231 {offsets = [0, 2, 0], sizes = [4, 4, 16], strides = [1, 1, 1]} : vector<6x6x16xf32> to vector<4x4x16xf32>
    %235 = vector.extract_strided_slice %231 {offsets = [1, 0, 0], sizes = [4, 4, 16], strides = [1, 1, 1]} : vector<6x6x16xf32> to vector<4x4x16xf32>
    %236 = vector.extract_strided_slice %231 {offsets = [1, 1, 0], sizes = [4, 4, 16], strides = [1, 1, 1]} : vector<6x6x16xf32> to vector<4x4x16xf32>
    %237 = vector.extract_strided_slice %231 {offsets = [1, 2, 0], sizes = [4, 4, 16], strides = [1, 1, 1]} : vector<6x6x16xf32> to vector<4x4x16xf32>
    %238 = vector.extract_strided_slice %231 {offsets = [2, 0, 0], sizes = [4, 4, 16], strides = [1, 1, 1]} : vector<6x6x16xf32> to vector<4x4x16xf32>
    %239 = vector.extract_strided_slice %231 {offsets = [2, 1, 0], sizes = [4, 4, 16], strides = [1, 1, 1]} : vector<6x6x16xf32> to vector<4x4x16xf32>
    %240 = vector.extract_strided_slice %231 {offsets = [2, 2, 0], sizes = [4, 4, 16], strides = [1, 1, 1]} : vector<6x6x16xf32> to vector<4x4x16xf32>
    %241 = tpu.concatenate %232, %233, %234, %235, %236, %237, %238, %239, %240 in 2 : vector<4x4x16xf32>, vector<4x4x16xf32>, vector<4x4x16xf32>, vector<4x4x16xf32>, vector<4x4x16xf32>, vector<4x4x16xf32>, vector<4x4x16xf32>, vector<4x4x16xf32>, vector<4x4x16xf32> -> vector<4x4x144xf32>
    %242 = vector.shape_cast %241 : vector<4x4x144xf32> to vector<16x144xf32>
    %c0_43 = arith.constant 0 : index
    %c0_44 = arith.constant 0 : index
    %243 = vector.load %arg14[%c0_43, %c0_44] : memref<144x16xf32, #tpu.memory_space<vmem>>, vector<144x16xf32>
    %cst_45 = arith.constant dense<0.000000e+00> : vector<16x16xf32>
    %244 = tpu.matmul %242, %243, %cst_45 {dimension_numbers = #tpu.dot_dimension_numbers<[1], [0], [0], [1], [0, 0, 1, 1], [], []>} : vector<16x144xf32>, vector<144x16xf32>, vector<16x16xf32> -> vector<16x16xf32>
    %c0_46 = arith.constant 0 : index
    %c0_47 = arith.constant 0 : index
    %245 = vector.load %arg15[%c0_46, %c0_47] : memref<1x16xf32, #tpu.memory_space<vmem>>, vector<1x16xf32>
    %246 = vector.broadcast %245 : vector<1x16xf32> to vector<16x16xf32>
    %247 = arith.addf %244, %246 : vector<16x16xf32>
    %cst_48 = arith.constant 6.250000e-02 : f32
    %248 = vector.broadcast %cst_48 : f32 to vector<1x16xf32>
    %cst_49 = arith.constant dense<0.000000e+00> : vector<1x16xf32>
    %249 = tpu.matmul %248, %247, %cst_49 {dimension_numbers = #tpu.dot_dimension_numbers<[1], [0], [0], [1], [0, 0, 1, 1], [], []>} : vector<1x16xf32>, vector<16x16xf32>, vector<1x16xf32> -> vector<1x16xf32>
    %250 = vector.broadcast %249 : vector<1x16xf32> to vector<16x16xf32>
    %251 = arith.subf %247, %250 : vector<16x16xf32>
    %252 = arith.mulf %251, %251 : vector<16x16xf32>
    %cst_50 = arith.constant dense<0.000000e+00> : vector<1x16xf32>
    %253 = tpu.matmul %248, %252, %cst_50 {dimension_numbers = #tpu.dot_dimension_numbers<[1], [0], [0], [1], [0, 0, 1, 1], [], []>} : vector<1x16xf32>, vector<16x16xf32>, vector<1x16xf32> -> vector<1x16xf32>
    %cst_51 = arith.constant 9.99999974E-6 : f32
    %254 = vector.broadcast %cst_51 : f32 to vector<1x16xf32>
    %255 = arith.addf %253, %254 : vector<1x16xf32>
    %256 = math.rsqrt %255 : vector<1x16xf32>
    %257 = vector.broadcast %256 : vector<1x16xf32> to vector<16x16xf32>
    %258 = arith.mulf %251, %257 : vector<16x16xf32>
    %c0_52 = arith.constant 0 : index
    %c0_53 = arith.constant 0 : index
    %259 = vector.load %arg16[%c0_52, %c0_53] : memref<1x16xf32, #tpu.memory_space<vmem>>, vector<1x16xf32>
    %260 = vector.broadcast %259 : vector<1x16xf32> to vector<16x16xf32>
    %261 = arith.mulf %258, %260 : vector<16x16xf32>
    %c0_54 = arith.constant 0 : index
    %c0_55 = arith.constant 0 : index
    %262 = vector.load %arg17[%c0_54, %c0_55] : memref<1x16xf32, #tpu.memory_space<vmem>>, vector<1x16xf32>
    %263 = vector.broadcast %262 : vector<1x16xf32> to vector<16x16xf32>
    %264 = arith.addf %261, %263 : vector<16x16xf32>
    %cst_56 = arith.constant 0.000000e+00 : f32
    %265 = vector.broadcast %cst_56 : f32 to vector<16x16xf32>
    %266 = arith.maximumf %264, %265 : vector<16x16xf32>
    %267 = vector.shape_cast %266 : vector<16x16xf32> to vector<4x4x16xf32>
    %268 = vector.extract_strided_slice %267 {offsets = [1, 0, 0], sizes = [1, 4, 16], strides = [1, 1, 1]} : vector<4x4x16xf32> to vector<1x4x16xf32>
    %269 = vector.extract_strided_slice %267 {offsets = [2, 0, 0], sizes = [1, 4, 16], strides = [1, 1, 1]} : vector<4x4x16xf32> to vector<1x4x16xf32>
    %270 = tpu.concatenate %268, %267, %269 in 0 : vector<1x4x16xf32>, vector<4x4x16xf32>, vector<1x4x16xf32> -> vector<6x4x16xf32>
    %271 = vector.extract_strided_slice %270 {offsets = [0, 1, 0], sizes = [6, 1, 16], strides = [1, 1, 1]} : vector<6x4x16xf32> to vector<6x1x16xf32>
    %272 = vector.extract_strided_slice %270 {offsets = [0, 2, 0], sizes = [6, 1, 16], strides = [1, 1, 1]} : vector<6x4x16xf32> to vector<6x1x16xf32>
    %273 = tpu.concatenate %271, %270, %272 in 1 : vector<6x1x16xf32>, vector<6x4x16xf32>, vector<6x1x16xf32> -> vector<6x6x16xf32>
    %274 = vector.extract_strided_slice %273 {offsets = [0, 0, 0], sizes = [4, 4, 16], strides = [1, 1, 1]} : vector<6x6x16xf32> to vector<4x4x16xf32>
    %275 = vector.extract_strided_slice %273 {offsets = [0, 1, 0], sizes = [4, 4, 16], strides = [1, 1, 1]} : vector<6x6x16xf32> to vector<4x4x16xf32>
    %276 = vector.extract_strided_slice %273 {offsets = [0, 2, 0], sizes = [4, 4, 16], strides = [1, 1, 1]} : vector<6x6x16xf32> to vector<4x4x16xf32>
    %277 = vector.extract_strided_slice %273 {offsets = [1, 0, 0], sizes = [4, 4, 16], strides = [1, 1, 1]} : vector<6x6x16xf32> to vector<4x4x16xf32>
    %278 = vector.extract_strided_slice %273 {offsets = [1, 1, 0], sizes = [4, 4, 16], strides = [1, 1, 1]} : vector<6x6x16xf32> to vector<4x4x16xf32>
    %279 = vector.extract_strided_slice %273 {offsets = [1, 2, 0], sizes = [4, 4, 16], strides = [1, 1, 1]} : vector<6x6x16xf32> to vector<4x4x16xf32>
    %280 = vector.extract_strided_slice %273 {offsets = [2, 0, 0], sizes = [4, 4, 16], strides = [1, 1, 1]} : vector<6x6x16xf32> to vector<4x4x16xf32>
    %281 = vector.extract_strided_slice %273 {offsets = [2, 1, 0], sizes = [4, 4, 16], strides = [1, 1, 1]} : vector<6x6x16xf32> to vector<4x4x16xf32>
    %282 = vector.extract_strided_slice %273 {offsets = [2, 2, 0], sizes = [4, 4, 16], strides = [1, 1, 1]} : vector<6x6x16xf32> to vector<4x4x16xf32>
    %283 = tpu.concatenate %274, %275, %276, %277, %278, %279, %280, %281, %282 in 2 : vector<4x4x16xf32>, vector<4x4x16xf32>, vector<4x4x16xf32>, vector<4x4x16xf32>, vector<4x4x16xf32>, vector<4x4x16xf32>, vector<4x4x16xf32>, vector<4x4x16xf32>, vector<4x4x16xf32> -> vector<4x4x144xf32>
    %284 = vector.shape_cast %283 : vector<4x4x144xf32> to vector<16x144xf32>
    %c0_57 = arith.constant 0 : index
    %c0_58 = arith.constant 0 : index
    %285 = vector.load %arg18[%c0_57, %c0_58] : memref<144x16xf32, #tpu.memory_space<vmem>>, vector<144x16xf32>
    %cst_59 = arith.constant dense<0.000000e+00> : vector<16x16xf32>
    %286 = tpu.matmul %284, %285, %cst_59 {dimension_numbers = #tpu.dot_dimension_numbers<[1], [0], [0], [1], [0, 0, 1, 1], [], []>} : vector<16x144xf32>, vector<144x16xf32>, vector<16x16xf32> -> vector<16x16xf32>
    %c0_60 = arith.constant 0 : index
    %c0_61 = arith.constant 0 : index
    %287 = vector.load %arg19[%c0_60, %c0_61] : memref<1x16xf32, #tpu.memory_space<vmem>>, vector<1x16xf32>
    %288 = vector.broadcast %287 : vector<1x16xf32> to vector<16x16xf32>
    %289 = arith.addf %286, %288 : vector<16x16xf32>
    %cst_62 = arith.constant 6.250000e-02 : f32
    %290 = vector.broadcast %cst_62 : f32 to vector<1x16xf32>
    %cst_63 = arith.constant dense<0.000000e+00> : vector<1x16xf32>
    %291 = tpu.matmul %290, %289, %cst_63 {dimension_numbers = #tpu.dot_dimension_numbers<[1], [0], [0], [1], [0, 0, 1, 1], [], []>} : vector<1x16xf32>, vector<16x16xf32>, vector<1x16xf32> -> vector<1x16xf32>
    %292 = vector.broadcast %291 : vector<1x16xf32> to vector<16x16xf32>
    %293 = arith.subf %289, %292 : vector<16x16xf32>
    %294 = arith.mulf %293, %293 : vector<16x16xf32>
    %cst_64 = arith.constant dense<0.000000e+00> : vector<1x16xf32>
    %295 = tpu.matmul %290, %294, %cst_64 {dimension_numbers = #tpu.dot_dimension_numbers<[1], [0], [0], [1], [0, 0, 1, 1], [], []>} : vector<1x16xf32>, vector<16x16xf32>, vector<1x16xf32> -> vector<1x16xf32>
    %cst_65 = arith.constant 9.99999974E-6 : f32
    %296 = vector.broadcast %cst_65 : f32 to vector<1x16xf32>
    %297 = arith.addf %295, %296 : vector<1x16xf32>
    %298 = math.rsqrt %297 : vector<1x16xf32>
    %299 = vector.broadcast %298 : vector<1x16xf32> to vector<16x16xf32>
    %300 = arith.mulf %293, %299 : vector<16x16xf32>
    %c0_66 = arith.constant 0 : index
    %c0_67 = arith.constant 0 : index
    %301 = vector.load %arg20[%c0_66, %c0_67] : memref<1x16xf32, #tpu.memory_space<vmem>>, vector<1x16xf32>
    %302 = vector.broadcast %301 : vector<1x16xf32> to vector<16x16xf32>
    %303 = arith.mulf %300, %302 : vector<16x16xf32>
    %c0_68 = arith.constant 0 : index
    %c0_69 = arith.constant 0 : index
    %304 = vector.load %arg21[%c0_68, %c0_69] : memref<1x16xf32, #tpu.memory_space<vmem>>, vector<1x16xf32>
    %305 = vector.broadcast %304 : vector<1x16xf32> to vector<16x16xf32>
    %306 = arith.addf %303, %305 : vector<16x16xf32>
    %307 = vector.shape_cast %306 : vector<16x16xf32> to vector<4x4x16xf32>
    %308 = arith.addf %225, %307 : vector<4x4x16xf32>
    %cst_70 = arith.constant 0.000000e+00 : f32
    %309 = vector.broadcast %cst_70 : f32 to vector<4x4x16xf32>
    %310 = arith.maximumf %308, %309 : vector<4x4x16xf32>
    %311 = vector.extract_strided_slice %310 {offsets = [1, 0, 0], sizes = [1, 4, 16], strides = [1, 1, 1]} : vector<4x4x16xf32> to vector<1x4x16xf32>
    %312 = vector.extract_strided_slice %310 {offsets = [2, 0, 0], sizes = [1, 4, 16], strides = [1, 1, 1]} : vector<4x4x16xf32> to vector<1x4x16xf32>
    %313 = tpu.concatenate %311, %310, %312 in 0 : vector<1x4x16xf32>, vector<4x4x16xf32>, vector<1x4x16xf32> -> vector<6x4x16xf32>
    %314 = vector.extract_strided_slice %313 {offsets = [0, 1, 0], sizes = [6, 1, 16], strides = [1, 1, 1]} : vector<6x4x16xf32> to vector<6x1x16xf32>
    %315 = vector.extract_strided_slice %313 {offsets = [0, 2, 0], sizes = [6, 1, 16], strides = [1, 1, 1]} : vector<6x4x16xf32> to vector<6x1x16xf32>
    %316 = tpu.concatenate %314, %313, %315 in 1 : vector<6x1x16xf32>, vector<6x4x16xf32>, vector<6x1x16xf32> -> vector<6x6x16xf32>
    %317 = vector.extract_strided_slice %316 {offsets = [0, 0, 0], sizes = [4, 4, 16], strides = [1, 1, 1]} : vector<6x6x16xf32> to vector<4x4x16xf32>
    %318 = vector.extract_strided_slice %316 {offsets = [0, 1, 0], sizes = [4, 4, 16], strides = [1, 1, 1]} : vector<6x6x16xf32> to vector<4x4x16xf32>
    %319 = vector.extract_strided_slice %316 {offsets = [0, 2, 0], sizes = [4, 4, 16], strides = [1, 1, 1]} : vector<6x6x16xf32> to vector<4x4x16xf32>
    %320 = vector.extract_strided_slice %316 {offsets = [1, 0, 0], sizes = [4, 4, 16], strides = [1, 1, 1]} : vector<6x6x16xf32> to vector<4x4x16xf32>
    %321 = vector.extract_strided_slice %316 {offsets = [1, 1, 0], sizes = [4, 4, 16], strides = [1, 1, 1]} : vector<6x6x16xf32> to vector<4x4x16xf32>
    %322 = vector.extract_strided_slice %316 {offsets = [1, 2, 0], sizes = [4, 4, 16], strides = [1, 1, 1]} : vector<6x6x16xf32> to vector<4x4x16xf32>
    %323 = vector.extract_strided_slice %316 {offsets = [2, 0, 0], sizes = [4, 4, 16], strides = [1, 1, 1]} : vector<6x6x16xf32> to vector<4x4x16xf32>
    %324 = vector.extract_strided_slice %316 {offsets = [2, 1, 0], sizes = [4, 4, 16], strides = [1, 1, 1]} : vector<6x6x16xf32> to vector<4x4x16xf32>
    %325 = vector.extract_strided_slice %316 {offsets = [2, 2, 0], sizes = [4, 4, 16], strides = [1, 1, 1]} : vector<6x6x16xf32> to vector<4x4x16xf32>
    %326 = tpu.concatenate %317, %318, %319, %320, %321, %322, %323, %324, %325 in 2 : vector<4x4x16xf32>, vector<4x4x16xf32>, vector<4x4x16xf32>, vector<4x4x16xf32>, vector<4x4x16xf32>, vector<4x4x16xf32>, vector<4x4x16xf32>, vector<4x4x16xf32>, vector<4x4x16xf32> -> vector<4x4x144xf32>
    %327 = vector.shape_cast %326 : vector<4x4x144xf32> to vector<16x144xf32>
    %c0_71 = arith.constant 0 : index
    %c0_72 = arith.constant 0 : index
    %328 = vector.load %arg22[%c0_71, %c0_72] : memref<144x16xf32, #tpu.memory_space<vmem>>, vector<144x16xf32>
    %cst_73 = arith.constant dense<0.000000e+00> : vector<16x16xf32>
    %329 = tpu.matmul %327, %328, %cst_73 {dimension_numbers = #tpu.dot_dimension_numbers<[1], [0], [0], [1], [0, 0, 1, 1], [], []>} : vector<16x144xf32>, vector<144x16xf32>, vector<16x16xf32> -> vector<16x16xf32>
    %c0_74 = arith.constant 0 : index
    %c0_75 = arith.constant 0 : index
    %330 = vector.load %arg23[%c0_74, %c0_75] : memref<1x16xf32, #tpu.memory_space<vmem>>, vector<1x16xf32>
    %331 = vector.broadcast %330 : vector<1x16xf32> to vector<16x16xf32>
    %332 = arith.addf %329, %331 : vector<16x16xf32>
    %cst_76 = arith.constant 6.250000e-02 : f32
    %333 = vector.broadcast %cst_76 : f32 to vector<1x16xf32>
    %cst_77 = arith.constant dense<0.000000e+00> : vector<1x16xf32>
    %334 = tpu.matmul %333, %332, %cst_77 {dimension_numbers = #tpu.dot_dimension_numbers<[1], [0], [0], [1], [0, 0, 1, 1], [], []>} : vector<1x16xf32>, vector<16x16xf32>, vector<1x16xf32> -> vector<1x16xf32>
    %335 = vector.broadcast %334 : vector<1x16xf32> to vector<16x16xf32>
    %336 = arith.subf %332, %335 : vector<16x16xf32>
    %337 = arith.mulf %336, %336 : vector<16x16xf32>
    %cst_78 = arith.constant dense<0.000000e+00> : vector<1x16xf32>
    %338 = tpu.matmul %333, %337, %cst_78 {dimension_numbers = #tpu.dot_dimension_numbers<[1], [0], [0], [1], [0, 0, 1, 1], [], []>} : vector<1x16xf32>, vector<16x16xf32>, vector<1x16xf32> -> vector<1x16xf32>
    %cst_79 = arith.constant 9.99999974E-6 : f32
    %339 = vector.broadcast %cst_79 : f32 to vector<1x16xf32>
    %340 = arith.addf %338, %339 : vector<1x16xf32>
    %341 = math.rsqrt %340 : vector<1x16xf32>
    %342 = vector.broadcast %341 : vector<1x16xf32> to vector<16x16xf32>
    %343 = arith.mulf %336, %342 : vector<16x16xf32>
    %c0_80 = arith.constant 0 : index
    %c0_81 = arith.constant 0 : index
    %344 = vector.load %arg24[%c0_80, %c0_81] : memref<1x16xf32, #tpu.memory_space<vmem>>, vector<1x16xf32>
    %345 = vector.broadcast %344 : vector<1x16xf32> to vector<16x16xf32>
    %346 = arith.mulf %343, %345 : vector<16x16xf32>
    %c0_82 = arith.constant 0 : index
    %c0_83 = arith.constant 0 : index
    %347 = vector.load %arg25[%c0_82, %c0_83] : memref<1x16xf32, #tpu.memory_space<vmem>>, vector<1x16xf32>
    %348 = vector.broadcast %347 : vector<1x16xf32> to vector<16x16xf32>
    %349 = arith.addf %346, %348 : vector<16x16xf32>
    %cst_84 = arith.constant 0.000000e+00 : f32
    %350 = vector.broadcast %cst_84 : f32 to vector<16x16xf32>
    %351 = arith.maximumf %349, %350 : vector<16x16xf32>
    %352 = vector.shape_cast %351 : vector<16x16xf32> to vector<4x4x16xf32>
    %353 = vector.extract_strided_slice %352 {offsets = [1, 0, 0], sizes = [1, 4, 16], strides = [1, 1, 1]} : vector<4x4x16xf32> to vector<1x4x16xf32>
    %354 = vector.extract_strided_slice %352 {offsets = [2, 0, 0], sizes = [1, 4, 16], strides = [1, 1, 1]} : vector<4x4x16xf32> to vector<1x4x16xf32>
    %355 = tpu.concatenate %353, %352, %354 in 0 : vector<1x4x16xf32>, vector<4x4x16xf32>, vector<1x4x16xf32> -> vector<6x4x16xf32>
    %356 = vector.extract_strided_slice %355 {offsets = [0, 1, 0], sizes = [6, 1, 16], strides = [1, 1, 1]} : vector<6x4x16xf32> to vector<6x1x16xf32>
    %357 = vector.extract_strided_slice %355 {offsets = [0, 2, 0], sizes = [6, 1, 16], strides = [1, 1, 1]} : vector<6x4x16xf32> to vector<6x1x16xf32>
    %358 = tpu.concatenate %356, %355, %357 in 1 : vector<6x1x16xf32>, vector<6x4x16xf32>, vector<6x1x16xf32> -> vector<6x6x16xf32>
    %359 = vector.extract_strided_slice %358 {offsets = [0, 0, 0], sizes = [4, 4, 16], strides = [1, 1, 1]} : vector<6x6x16xf32> to vector<4x4x16xf32>
    %360 = vector.extract_strided_slice %358 {offsets = [0, 1, 0], sizes = [4, 4, 16], strides = [1, 1, 1]} : vector<6x6x16xf32> to vector<4x4x16xf32>
    %361 = vector.extract_strided_slice %358 {offsets = [0, 2, 0], sizes = [4, 4, 16], strides = [1, 1, 1]} : vector<6x6x16xf32> to vector<4x4x16xf32>
    %362 = vector.extract_strided_slice %358 {offsets = [1, 0, 0], sizes = [4, 4, 16], strides = [1, 1, 1]} : vector<6x6x16xf32> to vector<4x4x16xf32>
    %363 = vector.extract_strided_slice %358 {offsets = [1, 1, 0], sizes = [4, 4, 16], strides = [1, 1, 1]} : vector<6x6x16xf32> to vector<4x4x16xf32>
    %364 = vector.extract_strided_slice %358 {offsets = [1, 2, 0], sizes = [4, 4, 16], strides = [1, 1, 1]} : vector<6x6x16xf32> to vector<4x4x16xf32>
    %365 = vector.extract_strided_slice %358 {offsets = [2, 0, 0], sizes = [4, 4, 16], strides = [1, 1, 1]} : vector<6x6x16xf32> to vector<4x4x16xf32>
    %366 = vector.extract_strided_slice %358 {offsets = [2, 1, 0], sizes = [4, 4, 16], strides = [1, 1, 1]} : vector<6x6x16xf32> to vector<4x4x16xf32>
    %367 = vector.extract_strided_slice %358 {offsets = [2, 2, 0], sizes = [4, 4, 16], strides = [1, 1, 1]} : vector<6x6x16xf32> to vector<4x4x16xf32>
    %368 = tpu.concatenate %359, %360, %361, %362, %363, %364, %365, %366, %367 in 2 : vector<4x4x16xf32>, vector<4x4x16xf32>, vector<4x4x16xf32>, vector<4x4x16xf32>, vector<4x4x16xf32>, vector<4x4x16xf32>, vector<4x4x16xf32>, vector<4x4x16xf32>, vector<4x4x16xf32> -> vector<4x4x144xf32>
    %369 = vector.shape_cast %368 : vector<4x4x144xf32> to vector<16x144xf32>
    %c0_85 = arith.constant 0 : index
    %c0_86 = arith.constant 0 : index
    %370 = vector.load %arg26[%c0_85, %c0_86] : memref<144x16xf32, #tpu.memory_space<vmem>>, vector<144x16xf32>
    %cst_87 = arith.constant dense<0.000000e+00> : vector<16x16xf32>
    %371 = tpu.matmul %369, %370, %cst_87 {dimension_numbers = #tpu.dot_dimension_numbers<[1], [0], [0], [1], [0, 0, 1, 1], [], []>} : vector<16x144xf32>, vector<144x16xf32>, vector<16x16xf32> -> vector<16x16xf32>
    %c0_88 = arith.constant 0 : index
    %c0_89 = arith.constant 0 : index
    %372 = vector.load %arg27[%c0_88, %c0_89] : memref<1x16xf32, #tpu.memory_space<vmem>>, vector<1x16xf32>
    %373 = vector.broadcast %372 : vector<1x16xf32> to vector<16x16xf32>
    %374 = arith.addf %371, %373 : vector<16x16xf32>
    %cst_90 = arith.constant 6.250000e-02 : f32
    %375 = vector.broadcast %cst_90 : f32 to vector<1x16xf32>
    %cst_91 = arith.constant dense<0.000000e+00> : vector<1x16xf32>
    %376 = tpu.matmul %375, %374, %cst_91 {dimension_numbers = #tpu.dot_dimension_numbers<[1], [0], [0], [1], [0, 0, 1, 1], [], []>} : vector<1x16xf32>, vector<16x16xf32>, vector<1x16xf32> -> vector<1x16xf32>
    %377 = vector.broadcast %376 : vector<1x16xf32> to vector<16x16xf32>
    %378 = arith.subf %374, %377 : vector<16x16xf32>
    %379 = arith.mulf %378, %378 : vector<16x16xf32>
    %cst_92 = arith.constant dense<0.000000e+00> : vector<1x16xf32>
    %380 = tpu.matmul %375, %379, %cst_92 {dimension_numbers = #tpu.dot_dimension_numbers<[1], [0], [0], [1], [0, 0, 1, 1], [], []>} : vector<1x16xf32>, vector<16x16xf32>, vector<1x16xf32> -> vector<1x16xf32>
    %cst_93 = arith.constant 9.99999974E-6 : f32
    %381 = vector.broadcast %cst_93 : f32 to vector<1x16xf32>
    %382 = arith.addf %380, %381 : vector<1x16xf32>
    %383 = math.rsqrt %382 : vector<1x16xf32>
    %384 = vector.broadcast %383 : vector<1x16xf32> to vector<16x16xf32>
    %385 = arith.mulf %378, %384 : vector<16x16xf32>
    %c0_94 = arith.constant 0 : index
    %c0_95 = arith.constant 0 : index
    %386 = vector.load %arg28[%c0_94, %c0_95] : memref<1x16xf32, #tpu.memory_space<vmem>>, vector<1x16xf32>
    %387 = vector.broadcast %386 : vector<1x16xf32> to vector<16x16xf32>
    %388 = arith.mulf %385, %387 : vector<16x16xf32>
    %c0_96 = arith.constant 0 : index
    %c0_97 = arith.constant 0 : index
    %389 = vector.load %arg29[%c0_96, %c0_97] : memref<1x16xf32, #tpu.memory_space<vmem>>, vector<1x16xf32>
    %390 = vector.broadcast %389 : vector<1x16xf32> to vector<16x16xf32>
    %391 = arith.addf %388, %390 : vector<16x16xf32>
    %392 = vector.shape_cast %391 : vector<16x16xf32> to vector<4x4x16xf32>
    %393 = arith.addf %310, %392 : vector<4x4x16xf32>
    %cst_98 = arith.constant 0.000000e+00 : f32
    %394 = vector.broadcast %cst_98 : f32 to vector<4x4x16xf32>
    %395 = arith.maximumf %393, %394 : vector<4x4x16xf32>
    %396 = vector.shape_cast %395 : vector<4x4x16xf32> to vector<16x16xf32>
    %397 = tpu.transpose %396, [1, 0] : vector<16x16xf32> -> vector<16x16xf32>
    %c0_99 = arith.constant 0 : index
    %c0_100 = arith.constant 0 : index
    %c0_101 = arith.constant 0 : index
    %398 = vector.load %arg30[%c0_99, %c0_100, %c0_101] : memref<1x16x16xf32, #tpu.memory_space<vmem>>, vector<1x16x16xf32>
    %399 = vector.shape_cast %398 : vector<1x16x16xf32> to vector<16x16xf32>
    %400 = vector.shape_cast %397 : vector<16x16xf32> to vector<1x16x16xf32>
    tpu.vector_store %arg30[%c0_99, %c0_100, %c0_101], %400 {strides = array<i32>} : memref<1x16x16xf32, #tpu.memory_space<vmem>>, vector<1x16x16xf32>,
    return
  }
  func.func @transform_0(%arg0: i32) -> (i32, i32, i32) {
    %c0_i32 = arith.constant 0 : i32
    %c0_i32_0 = arith.constant 0 : i32
    %c0_i32_1 = arith.constant 0 : i32
    return %arg0, %c0_i32, %c0_i32_0 : i32, i32, i32
  }
  func.func @transform_1(%arg0: i32) -> (i32, i32) {
    %c0_i32 = arith.constant 0 : i32
    %c0_i32_0 = arith.constant 0 : i32
    %c0_i32_1 = arith.constant 0 : i32
    return %c0_i32, %c0_i32_0 : i32, i32
  }
  func.func @transform_2(%arg0: i32) -> (i32, i32) {
    %c0_i32 = arith.constant 0 : i32
    %c0_i32_0 = arith.constant 0 : i32
    %c0_i32_1 = arith.constant 0 : i32
    return %c0_i32, %c0_i32_0 : i32, i32
  }
  func.func @transform_3(%arg0: i32) -> (i32, i32) {
    %c0_i32 = arith.constant 0 : i32
    %c0_i32_0 = arith.constant 0 : i32
    %c0_i32_1 = arith.constant 0 : i32
    return %c0_i32, %c0_i32_0 : i32, i32
  }
  func.func @transform_4(%arg0: i32) -> (i32, i32) {
    %c0_i32 = arith.constant 0 : i32
    %c0_i32_0 = arith.constant 0 : i32
    %c0_i32_1 = arith.constant 0 : i32
    return %c0_i32, %c0_i32_0 : i32, i32
  }
  func.func @transform_5(%arg0: i32) -> (i32, i32) {
    %c0_i32 = arith.constant 0 : i32
    %c0_i32_0 = arith.constant 0 : i32
    %c0_i32_1 = arith.constant 0 : i32
    return %c0_i32, %c0_i32_0 : i32, i32
  }
  func.func @transform_6(%arg0: i32) -> (i32, i32) {
    %c0_i32 = arith.constant 0 : i32
    %c0_i32_0 = arith.constant 0 : i32
    %c0_i32_1 = arith.constant 0 : i32
    return %c0_i32, %c0_i32_0 : i32, i32
  }
  func.func @transform_7(%arg0: i32) -> (i32, i32) {
    %c0_i32 = arith.constant 0 : i32
    %c0_i32_0 = arith.constant 0 : i32
    %c0_i32_1 = arith.constant 0 : i32
    return %c0_i32, %c0_i32_0 : i32, i32
  }
  func.func @transform_8(%arg0: i32) -> (i32, i32) {
    %c0_i32 = arith.constant 0 : i32
    %c0_i32_0 = arith.constant 0 : i32
    %c0_i32_1 = arith.constant 0 : i32
    return %c0_i32, %c0_i32_0 : i32, i32
  }
  func.func @transform_9(%arg0: i32) -> (i32, i32) {
    %c0_i32 = arith.constant 0 : i32
    %c0_i32_0 = arith.constant 0 : i32
    %c0_i32_1 = arith.constant 0 : i32
    return %c0_i32, %c0_i32_0 : i32, i32
  }
  func.func @transform_10(%arg0: i32) -> (i32, i32) {
    %c0_i32 = arith.constant 0 : i32
    %c0_i32_0 = arith.constant 0 : i32
    %c0_i32_1 = arith.constant 0 : i32
    return %c0_i32, %c0_i32_0 : i32, i32
  }
  func.func @transform_11(%arg0: i32) -> (i32, i32) {
    %c0_i32 = arith.constant 0 : i32
    %c0_i32_0 = arith.constant 0 : i32
    %c0_i32_1 = arith.constant 0 : i32
    return %c0_i32, %c0_i32_0 : i32, i32
  }
  func.func @transform_12(%arg0: i32) -> (i32, i32) {
    %c0_i32 = arith.constant 0 : i32
    %c0_i32_0 = arith.constant 0 : i32
    %c0_i32_1 = arith.constant 0 : i32
    return %c0_i32, %c0_i32_0 : i32, i32
  }
  func.func @transform_13(%arg0: i32) -> (i32, i32) {
    %c0_i32 = arith.constant 0 : i32
    %c0_i32_0 = arith.constant 0 : i32
    %c0_i32_1 = arith.constant 0 : i32
    return %c0_i32, %c0_i32_0 : i32, i32
  }
  func.func @transform_14(%arg0: i32) -> (i32, i32) {
    %c0_i32 = arith.constant 0 : i32
    %c0_i32_0 = arith.constant 0 : i32
    %c0_i32_1 = arith.constant 0 : i32
    return %c0_i32, %c0_i32_0 : i32, i32
  }
  func.func @transform_15(%arg0: i32) -> (i32, i32) {
    %c0_i32 = arith.constant 0 : i32
    %c0_i32_0 = arith.constant 0 : i32
    %c0_i32_1 = arith.constant 0 : i32
    return %c0_i32, %c0_i32_0 : i32, i32
  }
  func.func @transform_16(%arg0: i32) -> (i32, i32) {
    %c0_i32 = arith.constant 0 : i32
    %c0_i32_0 = arith.constant 0 : i32
    %c0_i32_1 = arith.constant 0 : i32
    return %c0_i32, %c0_i32_0 : i32, i32
  }
  func.func @transform_17(%arg0: i32) -> (i32, i32) {
    %c0_i32 = arith.constant 0 : i32
    %c0_i32_0 = arith.constant 0 : i32
    %c0_i32_1 = arith.constant 0 : i32
    return %c0_i32, %c0_i32_0 : i32, i32
  }
  func.func @transform_18(%arg0: i32) -> (i32, i32) {
    %c0_i32 = arith.constant 0 : i32
    %c0_i32_0 = arith.constant 0 : i32
    %c0_i32_1 = arith.constant 0 : i32
    return %c0_i32, %c0_i32_0 : i32, i32
  }
  func.func @transform_19(%arg0: i32) -> (i32, i32) {
    %c0_i32 = arith.constant 0 : i32
    %c0_i32_0 = arith.constant 0 : i32
    %c0_i32_1 = arith.constant 0 : i32
    return %c0_i32, %c0_i32_0 : i32, i32
  }
  func.func @transform_20(%arg0: i32) -> (i32, i32) {
    %c0_i32 = arith.constant 0 : i32
    %c0_i32_0 = arith.constant 0 : i32
    %c0_i32_1 = arith.constant 0 : i32
    return %c0_i32, %c0_i32_0 : i32, i32
  }
  func.func @transform_21(%arg0: i32) -> (i32, i32) {
    %c0_i32 = arith.constant 0 : i32
    %c0_i32_0 = arith.constant 0 : i32
    %c0_i32_1 = arith.constant 0 : i32
    return %c0_i32, %c0_i32_0 : i32, i32
  }
  func.func @transform_22(%arg0: i32) -> (i32, i32) {
    %c0_i32 = arith.constant 0 : i32
    %c0_i32_0 = arith.constant 0 : i32
    %c0_i32_1 = arith.constant 0 : i32
    return %c0_i32, %c0_i32_0 : i32, i32
  }
  func.func @transform_23(%arg0: i32) -> (i32, i32) {
    %c0_i32 = arith.constant 0 : i32
    %c0_i32_0 = arith.constant 0 : i32
    %c0_i32_1 = arith.constant 0 : i32
    return %c0_i32, %c0_i32_0 : i32, i32
  }
  func.func @transform_24(%arg0: i32) -> (i32, i32) {
    %c0_i32 = arith.constant 0 : i32
    %c0_i32_0 = arith.constant 0 : i32
    %c0_i32_1 = arith.constant 0 : i32
    return %c0_i32, %c0_i32_0 : i32, i32
  }
  func.func @transform_25(%arg0: i32) -> (i32, i32) {
    %c0_i32 = arith.constant 0 : i32
    %c0_i32_0 = arith.constant 0 : i32
    %c0_i32_1 = arith.constant 0 : i32
    return %c0_i32, %c0_i32_0 : i32, i32
  }
  func.func @transform_26(%arg0: i32) -> (i32, i32) {
    %c0_i32 = arith.constant 0 : i32
    %c0_i32_0 = arith.constant 0 : i32
    %c0_i32_1 = arith.constant 0 : i32
    return %c0_i32, %c0_i32_0 : i32, i32
  }
  func.func @transform_27(%arg0: i32) -> (i32, i32) {
    %c0_i32 = arith.constant 0 : i32
    %c0_i32_0 = arith.constant 0 : i32
    %c0_i32_1 = arith.constant 0 : i32
    return %c0_i32, %c0_i32_0 : i32, i32
  }
  func.func @transform_28(%arg0: i32) -> (i32, i32) {
    %c0_i32 = arith.constant 0 : i32
    %c0_i32_0 = arith.constant 0 : i32
    %c0_i32_1 = arith.constant 0 : i32
    return %c0_i32, %c0_i32_0 : i32, i32
  }
  func.func @transform_29(%arg0: i32) -> (i32, i32, i32) {
    %c0_i32 = arith.constant 0 : i32
    %c0_i32_0 = arith.constant 0 : i32
    %c0_i32_1 = arith.constant 0 : i32
    return %arg0, %c0_i32, %c0_i32_0 : i32, i32, i32
  }
}

</mosaic_0001>

<bundles_post_ra>
// kernel: tpu_custom_call.1
= control target key start
LH: loop header
LB: loop body
LE: loop exit
PB: predicated region body
PF: predicated region fallthrough
CT: control target
= control target key end

     0   :  { %s8208_s6 = smov 1   ;;  %s8209_s10 = smov 2   ;;  %s12971_s0 = inlined_call_operand.smem [shape: u32[30], index: -1, kind: input, shape index: {}] }
   0x1   :  { %s8276_s5 = sld [smem:[%s12971_s0]]   ;;  %s8210_s14 = smov 3  }
   0x2   :  { %s8281_s9 = sld [smem:[%s12971_s0 + %s8208_s6]]   ;;  %s8211_s18 = smov 4  }
   0x3   :  { %s8286_s13 = sld [smem:[%s12971_s0 + %s8209_s10]]   ;;  %s8212_s22 = smov 5  }
   0x4   :  { %s8291_s17 = sld [smem:[%s12971_s0 + %s8210_s14]]   ;;  %s8213_s26 = smov 6  }
   0x5   :  { %s8296_s21 = sld [smem:[%s12971_s0 + %s8211_s18]]   ;;  %s8214_s30 = smov 7  }
   0x6   :  { %s8301_s25 = sld [smem:[%s12971_s0 + %s8212_s22]]   ;;  %s8215_s4 = smov 8  }
   0x7   :  { %13104 = sst [smem:[#allocation5_spill]] %s8276_s5  ;;  %s8216_s10 = smov 9  }
   0x8   :  { %13105 = sst [smem:[#allocation6_spill]] %s8281_s9  ;;  %s8217_s15 = smov 10  }
   0x9   :  { %s8306_s29 = sld [smem:[%s12971_s0 + %s8213_s26]]   ;;  %s8218_s20 = smov 11  }
   0xa   :  { %s8311_s3 = sld [smem:[%s12971_s0 + %s8214_s30]]   ;;  %s8219_s26 = smov 12  }
   0xb   :  { %s8316_s8 = sld [smem:[%s12971_s0 + %s8215_s4]]   ;;  %s8220_s1 = smov 13  }
   0xc   :  { %s8321_s14 = sld [smem:[%s12971_s0 + %s8216_s10]]   ;;  %s8221_s7 = smov 14  }
   0xd   :  { %s8326_s19 = sld [smem:[%s12971_s0 + %s8217_s15]]   ;;  %s8222_s15 = smov 15  }
   0xe   :  { %s8331_s24 = sld [smem:[%s12971_s0 + %s8218_s20]]   ;;  %s8223_s22 = smov 16  }
   0xf   :  { %s8336_s30 = sld [smem:[%s12971_s0 + %s8219_s26]]   ;;  %s8224_s28 = smov 17  }
  0x10   :  { %13106 = sst [smem:[#allocation7_spill]] %s8311_s3 }
  0x11   :  { %s8341_s6 = sld [smem:[%s12971_s0 + %s8220_s1]]  }
  0x12   :  { %s8346_s12 = sld [smem:[%s12971_s0 + %s8221_s7]]   ;;  %s8225_s7 = smov 18  }
  0x13   :  { %s8351_s20 = sld [smem:[%s12971_s0 + %s8222_s15]]   ;;  %s8226_s15 = smov 19  }
  0x14   :  { %s8356_s27 = sld [smem:[%s12971_s0 + %s8223_s22]]   ;;  %s8227_s22 = smov 20  }
  0x15   :  { %s8361_s4 = sld [smem:[%s12971_s0 + %s8224_s28]]   ;;  %s8228_s28 = smov 21  }
  0x17   :  { %13107 = sst [smem:[#allocation8_spill]] %s8341_s6 }
  0x18   :  { %13108 = sst [smem:[#allocation9_spill]] %s8346_s12 }
  0x19   :  { %13109 = sst [smem:[#allocation10_spill]] %s8351_s20 }
  0x1a   :  { %13110 = sst [smem:[#allocation11_spill]] %s8356_s27 }
  0x1b   :  { %13111 = sst [smem:[#allocation12_spill]] %s8361_s4 }
  0x1c   :  { %s8366_s12 = sld [smem:[%s12971_s0 + %s8225_s7]]   ;;  %s8229_s7 = smov 22  }
  0x1d   :  { %s8371_s20 = sld [smem:[%s12971_s0 + %s8226_s15]]   ;;  %s8230_s15 = smov 23  }
  0x1e   :  { %s8376_s27 = sld [smem:[%s12971_s0 + %s8227_s22]]   ;;  %s8231_s22 = smov 24  }
  0x1f   :  { %s8381_s4 = sld [smem:[%s12971_s0 + %s8228_s28]]   ;;  %s8232_s28 = smov 25  }
  0x22   :  { %13112 = sst [smem:[#allocation13_spill]] %s8366_s12 }
  0x23   :  { %13113 = sst [smem:[#allocation14_spill]] %s8371_s20 }
  0x24   :  { %13114 = sst [smem:[#allocation15_spill]] %s8376_s27 }
  0x25   :  { %13115 = sst [smem:[#allocation16_spill]] %s8381_s4 }
  0x26   :  { %s8386_s12 = sld [smem:[%s12971_s0 + %s8229_s7]]   ;;  %s8233_s7 = smov 26  }
  0x27   :  { %s8391_s20 = sld [smem:[%s12971_s0 + %s8230_s15]]   ;;  %s8234_s15 = smov 27  }
  0x28   :  { %s8396_s27 = sld [smem:[%s12971_s0 + %s8231_s22]]   ;;  %s8235_s22 = smov 28  }
  0x29   :  { %s8401_s4 = sld [smem:[%s12971_s0 + %s8232_s28]]   ;;  %s8236_s28 = smov 29  }
  0x2c   :  { %13116 = sst [smem:[#allocation17_spill]] %s8386_s12 }
  0x2d   :  { %13117 = sst [smem:[#allocation18_spill]] %s8391_s20 }
  0x2e   :  { %13118 = sst [smem:[#allocation19_spill]] %s8396_s27 }
  0x2f   :  { %13119 = sst [smem:[#allocation20_spill]] %s8401_s4 }
  0x30   :  { %s8406_s12 = sld [smem:[%s12971_s0 + %s8233_s7]]  }
  0x31   :  { %s8411_s20 = sld [smem:[%s12971_s0 + %s8234_s15]]  }
  0x32   :  { %s8416_s27 = sld [smem:[%s12971_s0 + %s8235_s22]]  }
  0x33   :  { %s8421_s4 = sld [smem:[%s12971_s0 + %s8236_s28]]  }
  0x34   :  { %64 = vsyncpa [#allocation3], 0 }
  0x35   :  { %66 = vsyncpa [#allocation3 + $0x1], 0  ;;  %s8423_s7 = smov 0   ;;  %s8425_s10 = smov 0  }
  0x36   :  { %s8427_s11 = smov 0   ;;  %s8429_s15 = smov 0  }
  0x37 LB: > { %s13120_s6 = sld [smem:[#allocation8_spill]]  ;;  %s13121_s9 = sld [smem:[#allocation6_spill]]  ;;  %s8198_s10 = sphi %s8425_s10, %s13364_s10   ;;  %s8194_s7 = sphi %s8423_s7, %s13363_s7   ;;  %s8206_s15 = sphi %s8429_s15, %s13365_s15   ;;  %s8202_s11 = sphi %s8427_s11, %s13362_s11  }
  0x38   : > { %13122 = sst [smem:[#allocation21_spill]] %s8202_s11  ;;  %s8444_s0 = sadd.s32 4294967295, %s8206_s15  }
  0x39   : > { %s7222_s16 = sadd.s32 4294967294, %s8206_s15   ;;  %s8448_s18 = sadd.s32 1, %s8206_s15  }
  0x3a   : > { %s693_s22 = sadd.s32 1, %s8202_s11  ;;  %s690_s23 = ssub.s32 %s8206_s15, %s8448_s18 }
  0x3b   : > { %p703_p0 = scmp.ne.s32.totalorder %s8202_s11, %s8198_s10  ;;  %p691_p1 = scmp.eq.s32.totalorder %s690_s23, 0 }
  0x3c   : > { %p704_p2 = scmp.eq.s32.totalorder %s8444_s0, 1  ;;  %p709_p3 = scmp.ne.s32.totalorder %s8198_s10, %s8194_s7 }
  0x3d   : > { %p710_p4 = scmp.eq.s32.totalorder %s7222_s16, 1  ;;  %p7225_p7 = scmp.ge.s32.totalorder %s8206_s15, 1 }
  0x3e   : > { %s8459_s26 = scalar_select %p691_p1, %s8202_s11, %s693_s22  }
  0x3f   : > { %p8461_p5 = por %p704_p2, %p703_p0  ;;  %p8465_p6 = por %p710_p4, %p709_p3 }
  0x40   : > { %13123 = sst [smem:[#allocation22_spill]] %s8459_s26  ;;  %p820_p8 = scmp.lt.s32.totalorder %s8206_s15, 3 }
  0x42   : > { %p821_p9 = pnand %p7225_p7, %p820_p8 }
  0x44   : > { %824 = sbr.rel (%p821_p9) target bundleno = 7027 (0x1b73), region = 136 }
  0x4b   : > { %s13126_s5 = sld [smem:[#allocation5_spill]]  ;;  %p896_p10 = scmp.lt.s32.totalorder %s8444_s0, 1  ;;  %vm1033_vm0 = vcmask 1040384   ;;  %vm1223_vm1 = vcmask 1046528   ;;  %vm1389_vm2 = vcmask 1045504   ;;  %vm2493_vm3 = vcmask 1042432  }
  0x4c   : > { %s12977_s23 = smov 9   ;;  %s13136_s26 = smov 21   ;;  %vm8245_vm4 = vmmov 1   ;;  %vm2125_vm6 = vcmask 23552   ;;  %vm2156_vm7 = vcmask 48128   ;;  %vm2187_vm8 = vcmask 72704  }
  0x4d   : > { %s897_s2 = scalar_select %p896_p10, %s8444_s0, 1  ;;  %vm7754_vm5 = vmpackc.low %vm2493_vm3, %vm8245_vm4  ;;  %vm2220_vm9 = vcmask 97280   ;;  %vm2253_vm10 = vcmask 121856   ;;  %vm2286_vm11 = vcmask 146432   ;;  %vm2319_vm12 = vcmask 171008  }
  0x4e   : > { %s13138_s11 = smov 15   ;;  %vm2352_vm13 = vcmask 195584   ;;  %vm2396_vm14 = vcmask 220160   ;;  %vm3429_vm15 = vcmask 1041408   ;;  %s13339_s3 = sld [smem:[#allocation7_spill]] }
  0x4f   : > { %s7335_s16 = sshll.u32 %s897_s2, 3  ;;  %s12975_s2 = smov 12  }
  0x51   : > { %s900_s22 = scalar_lea.vmem %s13126_s5, %s7335_s16  ;;  %s12979_s16 = smov 3  }
  0x52   : > { %v901_v0 = vld [vmem:[%s900_s22] sm:$0x77]  ;;  %s12981_s22 = smov 15   ;;  %s13130_s5 = smov 12  }
  0x53   : > { %905 = vxpose.xlu0.b32.start.end [1/1] (short) %v901_v0, 128  ;;  %v903_v1 = vcombine.high %v901_v0, %v901_v0 }
  0x90   : > { %937 = vxpose.xlu0.b32.start.end [1/1] (short) %v903_v1, 128 }
  0xd3   : > { %v921_v2 = vpop.trf.xlu0 }
  0xd4   : > { %v986_v3 = vrot.slane %v921_v2, 1  ;;  %v1037_v4 = vrot.slane %v921_v2, 7 }
  0xd6   : > { %v8475_v5 = vsel %vm1033_vm0, %v986_v3, %v1037_v4 }
  0xd7   : > { %1556 = vrot.lane.b32.xlu1 %v8475_v5, %s12977_s23  ;;  %v922_v6 = vpop.trf.xlu0  ;;  %v1229_v10 = vrot.slane %v8475_v5, 1  ;;  %v1395_v24 = vrot.slane %v8475_v5, 2 }
  0xd8   : > { %v1038_v7 = vrot.slane %v922_v6, 7  ;;  %v1130_v9 = vrot.slane %v922_v6, 5 }
  0xda   : > { %v8480_v8 = vsel %vm1033_vm0, %v1037_v4, %v1038_v7  ;;  %v1178_v15 = vsel %vm1033_vm0, %v1038_v7, %v1130_v9 }
  0xdb   : > { %1558 = vrot.lane.b32.xlu1 %v8480_v8, %s12977_s23  ;;  %v1230_v11 = vrot.slane %v8480_v8, 1  ;;  %v923_v12 = vpop.trf.xlu0  ;;  %v1232_v16 = vrot.slane %v1178_v15, 1  ;;  %v1396_v19 = vrot.slane %v8480_v8, 2  ;;  %v1398_v36 = vrot.slane %v1178_v15, 2  ;;  %s12983_s23 = smov 21  }
  0xdc   : > { %v985_v20 = vrot.slane %v923_v12, 1  ;;  %v1034_v21 = vrot.slane %v923_v12, 7 }
  0xdd   : > { %v1231_v13 = vsel %vm1223_vm1, %v1229_v10, %v1230_v11  ;;  %v1233_v18 = vsel %vm1223_vm1, %v1230_v11, %v1232_v16  ;;  %v1397_v25 = vsel %vm1389_vm2, %v1395_v24, %v1396_v19  ;;  %v1399_v40 = vsel %vm1389_vm2, %v1396_v19, %v1398_v36 }
  0xde   : > { %v8503_v26 = vsel %vm1033_vm0, %v985_v20, %v1034_v21  ;;  %v2385_v20 = vld [vmem:[%s13121_s9] sm:$0xff] }
  0xdf   : > { %1658 = vrot.lane.b32.xlu1 %v1231_v13, %s12975_s2  ;;  %v8488_v14 = vpop.trf.xlu0  ;;  %v1224_v29 = vrot.slane %v8503_v26, 1  ;;  %v1390_v62 = vrot.slane %v8503_v26, 2 }
  0xe0   : > { %v1035_v22 = vrot.slane %v8488_v14, 7  ;;  %v1129_v53 = vrot.slane %v8488_v14, 5 }
  0xe2   : > { %v8506_v27 = vsel %vm1033_vm0, %v1034_v21, %v1035_v22  ;;  %v1177_v57 = vsel %vm1033_vm0, %v1035_v22, %v1129_v53  ;;  %v2386_v21 = vld [vmem:[%s13121_s9 + $0x8] sm:$0xff] }
  0xe3   : > { %1303 = vrot.lane.b32.xlu1 %v1231_v13, %s12979_s16  ;;  %v8492_v17 = vpop.trf.xlu0  ;;  %v1225_v30 = vrot.slane %v8506_v27, 1  ;;  %v1227_v60 = vrot.slane %v1177_v57, 1  ;;  %v1391_v2 = vrot.slane %v8506_v27, 2  ;;  %v1393_v9 = vrot.slane %v1177_v57, 2 }
  0xe4   : > { %v7749_v22 = vpack.c.bf16 %v2386_v21, %v2385_v20  ;;  %v987_v53 = vrot.slane %v8492_v17, 1 }
  0xe5   : > { %v8513_v35 = vsel %vm1223_vm1, %v1224_v29, %v1225_v30  ;;  %v1228_v1 = vsel %vm1223_vm1, %v1225_v30, %v1227_v60  ;;  %v1392_v6 = vsel %vm1389_vm2, %v1390_v62, %v1391_v2  ;;  %v1394_v12 = vsel %vm1389_vm2, %v1391_v2, %v1393_v9  ;;  %v2387_v30 = vld [vmem:[%s13121_s9 + $0x10] sm:$0xff] }
  0xe6   : > { %7750 = vmatprep.subr.bf16.mxu0 %v7749_v22 }
  0xe7   : > { %1660 = vrot.lane.b32.xlu1 %v1233_v18, %s12975_s2  ;;  %v8498_v23 = vpop.trf.xlu0  ;;  %s12985_s2 = smov 6   ;;  %7752 = vmatpush3.bf16.msra.mxu0 %v7749_v22 }
  0xeb   : > { %1759 = vrot.lane.b32.xlu1 %v1397_v25, %s12981_s22  ;;  %v927_v28 = vpop.trf.xlu0 }
  0xec   : > { %v988_v31 = vrot.slane %v927_v28, 1  ;;  %v1043_v32 = vrot.slane %v927_v28, 7 }
  0xee   : > { %v8520_v38 = vsel %vm1033_vm0, %v988_v31, %v1043_v32  ;;  %v2388_v31 = vld [vmem:[%s13121_s9 + $0x18] sm:$0x7]  ;;  %s13137_s9 = smov 24  }
  0xef   : > { %1305 = vrot.lane.b32.xlu1 %v1233_v18, %s12979_s16  ;;  %v928_v33 = vpop.trf.xlu0  ;;  %13128 = vst [vmem:[#allocation24_spill] sm:$0xff] %v8520_v38  ;;  %v1239_v41 = vrot.slane %v8520_v38, 1  ;;  %s13129_s16 = smov 9   ;;  %v1405_v47 = vrot.slane %v8520_v38, 2 }
  0xf0   : > { %v1044_v34 = vrot.slane %v928_v33, 7  ;;  %v1132_v45 = vrot.slane %v928_v33, 5 }
  0xf2   : > { %v8517_v37 = vsel %vm1033_vm0, %v1043_v32, %v1044_v34  ;;  %v1180_v49 = vsel %vm1033_vm0, %v1044_v34, %v1132_v45  ;;  %v7753_v32 = vpack.c.bf16 %v2388_v31, %v2387_v30 }
  0xf3   : > { %1469 = vrot.lane.b32.xlu1 %v1397_v25, %s12985_s2  ;;  %13127 = vst [vmem:[#allocation23_spill] sm:$0xff] %v8517_v37  ;;  %v929_v39 = vpop.trf.xlu0  ;;  %v1240_v42 = vrot.slane %v8517_v37, 1  ;;  %v1406_v48 = vrot.slane %v8517_v37, 2  ;;  %v1242_v52 = vrot.slane %v1180_v49, 1  ;;  %v1408_v56 = vrot.slane %v1180_v49, 2 }
  0xf4   : > { %v989_v63 = vrot.slane %v929_v39, 1  ;;  %v1046_v0 = vrot.slane %v929_v39, 7  ;;  %7755 = vmatprep.subr.msk.bf16.mxu0 %vm7754_vm5, %v7753_v32 }
  0xf5   : > { %1945 = vrot.lane.b32.xlu0 %v8513_v35, %s12983_s23  ;;  %v8533_v44 = vsel %vm1223_vm1, %v1239_v41, %v1240_v42  ;;  %v8550_v51 = vsel %vm1389_vm2, %v1405_v47, %v1406_v48  ;;  %v8560_v55 = vsel %vm1223_vm1, %v1240_v42, %v1242_v52  ;;  %v8570_v59 = vsel %vm1389_vm2, %v1406_v48, %v1408_v56 }
  0xf6   : > { %v8589_v7 = vsel %vm1033_vm0, %v989_v63, %v1046_v0  ;;  %7758 = vmatpush3.bf16.msk.msra.mxu0 %vm7754_vm5, %v7753_v32  ;;  %vm3446_vm5 = vcmask 1043456  }
  0xf7   : > { %1761 = vrot.lane.b32.xlu1 %v1399_v40, %s12981_s22  ;;  %v8528_v43 = vpop.trf.xlu0  ;;  %s12987_s22 = smov 18   ;;  %13133 = vst [vmem:[#allocation25_spill] sm:$0xff] %v8589_v7  ;;  %v1244_v13 = vrot.slane %v8589_v7, 1  ;;  %v1410_v24 = vrot.slane %v8589_v7, 2 }
  0xf8   : > { %v1047_v3 = vrot.slane %v8528_v43, 7  ;;  %v1133_v18 = vrot.slane %v8528_v43, 5 }
  0xf9   : > { %1568 = vrot.lane.b32.xlu0 %v8520_v38, %s13129_s16 }
  0xfa   : > { %v8592_v10 = vsel %vm1033_vm0, %v1046_v0, %v1047_v3  ;;  %v1181_v28 = vsel %vm1033_vm0, %v1047_v3, %v1133_v18  ;;  %v1041_v0 = vrot.slane %v8498_v23, 7 }
  0xfb   : > { %1471 = vrot.lane.b32.xlu1 %v1399_v40, %s12985_s2  ;;  %v8536_v46 = vpop.trf.xlu0  ;;  %s13131_s2 = smov 3   ;;  %13134 = vst [vmem:[#allocation26_spill] sm:$0xff] %v8592_v10  ;;  %v1245_v14 = vrot.slane %v8592_v10, 1  ;;  %v1411_v25 = vrot.slane %v8592_v10, 2  ;;  %v1247_v34 = vrot.slane %v1181_v28, 1  ;;  %v1413_v39 = vrot.slane %v1181_v28, 2 }
  0xfc   : > { %v990_v43 = vrot.slane %v8536_v46, 1  ;;  %v1049_v45 = vrot.slane %v8536_v46, 7  ;;  %v1040_v46 = vrot.slane %v8492_v17, 7 }
  0xfd   : > { %1953 = vrot.lane.b32.xlu0 %v8533_v44, %s12983_s23  ;;  %s12989_s23 = smov 24   ;;  %v8608_v16 = vsel %vm1223_vm1, %v1244_v13, %v1245_v14  ;;  %v8631_v33 = vsel %vm1389_vm2, %v1410_v24, %v1411_v25  ;;  %v8641_v36 = vsel %vm1223_vm1, %v1245_v14, %v1247_v34  ;;  %v8649_v41 = vsel %vm1389_vm2, %v1411_v25, %v1413_v39 }
  0xfe   : > { %v8665_v49 = vsel %vm1033_vm0, %v990_v43, %v1049_v45  ;;  %v8681_v62 = vsel %vm1033_vm0, %v987_v53, %v1040_v46  ;;  %v8702_v9 = vsel %vm1033_vm0, %v1040_v46, %v1041_v0  ;;  %v1131_v25 = vrot.slane %v8498_v23, 5 }
  0xff   : > { %1855 = vrot.lane.b32.xlu1 %v8503_v26, %s12987_s22  ;;  %v8545_v50 = vpop.trf.xlu0  ;;  %13139 = vst [vmem:[#allocation27_spill] sm:$0xff] %v8665_v49  ;;  %v1249_v57 = vrot.slane %v8665_v49, 1  ;;  %v1415_v2 = vrot.slane %v8665_v49, 2  ;;  %13143 = vst [vmem:[#allocation31_spill] sm:$0xff] %v8702_v9  ;;  %v1234_v13 = vrot.slane %v8681_v62, 1  ;;  %v1235_v14 = vrot.slane %v8702_v9, 1 }
 0x100   : > { %v1050_v47 = vrot.slane %v8545_v50, 7  ;;  %v1179_v31 = vsel %vm1033_vm0, %v1041_v0, %v1131_v25 }
 0x101   : > { %1670 = vrot.lane.b32.xlu0 %v8533_v44, %s13130_s5  ;;  %v1236_v20 = vsel %vm1223_vm1, %v1234_v13, %v1235_v14  ;;  %v1237_v43 = vrot.slane %v1179_v31, 1 }
 0x102   : > { %v8668_v52 = vsel %vm1033_vm0, %v1049_v45, %v1050_v47 }
 0x103   : > { %1560 = vrot.lane.b32.xlu1 %v8503_v26, %s13129_s16  ;;  %v8555_v54 = vpop.trf.xlu0  ;;  %13140 = vst [vmem:[#allocation28_spill] sm:$0xff] %v8668_v52  ;;  %v1250_v60 = vrot.slane %v8668_v52, 1  ;;  %v1416_v3 = vrot.slane %v8668_v52, 2  ;;  %v1238_v53 = vsel %vm1223_vm1, %v1235_v14, %v1237_v43 }
 0x104   : > { %v991_v23 = vrot.slane %v8555_v54, 1  ;;  %v1052_v39 = vrot.slane %v8555_v54, 7 }
 0x105   : > { %2043 = vrot.lane.b32.xlu0 %v8550_v51, %s12989_s23  ;;  %v8686_v63 = vsel %vm1223_vm1, %v1249_v57, %v1250_v60  ;;  %v1400_v57 = vrot.slane %v8681_v62, 2 }
 0x106   : > { %v8751_v46 = vsel %vm1033_vm0, %v991_v23, %v1052_v39 }
 0x107   : > { %1857 = vrot.lane.b32.xlu1 %v8506_v27, %s12987_s22  ;;  %v8565_v58 = vpop.trf.xlu0  ;;  %s13132_s22 = smov 6   ;;  %13147 = vst [vmem:[#allocation35_spill] sm:$0xff] %v8751_v46 }
 0x108   : > { %v1053_v45 = vrot.slane %v8565_v58, 7 }
 0x109   : > { %1672 = vrot.lane.b32.xlu0 %v8560_v55, %s13130_s5 }
 0x10a   : > { %v8758_v0 = vsel %vm1033_vm0, %v1052_v39, %v1053_v45  ;;  %v1420_v39 = vrot.slane %v8751_v46, 2 }
 0x10b   : > { %1299 = vrot.lane.b32.xlu1 %v8513_v35, %s13131_s2  ;;  %v8574_v61 = vpop.trf.xlu0  ;;  %v1421_v43 = vrot.slane %v8758_v0, 2 }
 0x10d   : > { %2045 = vrot.lane.b32.xlu0 %v8570_v59, %s12989_s23  ;;  %s13135_s23 = smov 18  }
 0x10f   : > { %1301 = vrot.lane.b32.xlu1 %v1228_v1, %s13131_s2  ;;  %v8583_v4 = vpop.trf.xlu0 }
 0x111   : > { %1477 = vrot.lane.b32.xlu0 %v8550_v51, %s13132_s22 }
 0x113   : > { %1465 = vrot.lane.b32.xlu1 %v1392_v6, %s13132_s22  ;;  %v8595_v11 = vpop.trf.xlu0 }
 0x115   : > { %1867 = vrot.lane.b32.xlu0 %v8589_v7, %s13135_s23 }
 0x117   : > { %1467 = vrot.lane.b32.xlu1 %v1394_v12, %s13132_s22  ;;  %v8603_v15 = vpop.trf.xlu0 }
 0x119   : > { %1572 = vrot.lane.b32.xlu0 %v8589_v7, %s13129_s16 }
 0x11b   : > { %1562 = vrot.lane.b32.xlu1 %v8506_v27, %s13129_s16  ;;  %v8613_v19 = vpop.trf.xlu0 }
 0x11d   : > { %1957 = vrot.lane.b32.xlu0 %v8608_v16, %s13136_s26 }
 0x11f   : > { %1662 = vrot.lane.b32.xlu1 %v8513_v35, %s13130_s5  ;;  %v8624_v29 = vpop.trf.xlu0 }
 0x121   : > { %1674 = vrot.lane.b32.xlu0 %v8608_v16, %s13130_s5 }
 0x123   : > { %1947 = vrot.lane.b32.xlu1 %v1228_v1, %s13136_s26  ;;  %v8636_v35 = vpop.trf.xlu0 }
 0x125   : > { %2047 = vrot.lane.b32.xlu0 %v8631_v33, %s13137_s9 }
 0x127   : > { %2035 = vrot.lane.b32.xlu1 %v1392_v6, %s13137_s9  ;;  %v8644_v40 = vpop.trf.xlu0 }
 0x129   : > { %1676 = vrot.lane.b32.xlu0 %v8641_v36, %s13130_s5 }
 0x12b   : > { %1664 = vrot.lane.b32.xlu1 %v1228_v1, %s13130_s5  ;;  %v8652_v42 = vpop.trf.xlu0  ;;  %v1134_v1 = vrot.slane %v8545_v50, 5  ;;  %v8709_v50 = vsel %vm1389_vm2, %v1415_v2, %v1416_v3 }
 0x12d   : > { %2049 = vrot.lane.b32.xlu0 %v8649_v41, %s13137_s9 }
 0x12f   : > { %1763 = vrot.lane.b32.xlu1 %v1392_v6, %s13138_s11  ;;  %v8660_v48 = vpop.trf.xlu0  ;;  %v1182_v6 = vsel %vm1033_vm0, %v1050_v47, %v1134_v1 }
 0x130   : > { %v1252_v18 = vrot.slane %v1182_v6, 1  ;;  %v1418_v22 = vrot.slane %v1182_v6, 2  ;;  %v1255_v6 = vrot.slane %v8758_v0, 1 }
 0x131   : > { %1481 = vrot.lane.b32.xlu0 %v8631_v33, %s13132_s22 }
 0x132   : > { %v8719_v21 = vsel %vm1223_vm1, %v1250_v60, %v1252_v18  ;;  %v8730_v30 = vsel %vm1389_vm2, %v1416_v3, %v1418_v22  ;;  %v1401_v60 = vrot.slane %v8702_v9, 2  ;;  %v1254_v3 = vrot.slane %v8751_v46, 1 }
 0x133   : > { %2037 = vrot.lane.b32.xlu1 %v1394_v12, %s13137_s9  ;;  %v8673_v56 = vpop.trf.xlu0  ;;  %v1135_v22 = vrot.slane %v8565_v58, 5 }
 0x134   : > { %13141 = vst [vmem:[#allocation29_spill] sm:$0xff] %v8673_v56  ;;  %v1402_v2 = vsel %vm1389_vm2, %v1400_v57, %v1401_v60  ;;  %v8776_v18 = vsel %vm1223_vm1, %v1254_v3, %v1255_v6 }
 0x135   : > { %1871 = vrot.lane.b32.xlu0 %v8665_v49, %s13135_s23  ;;  %v1183_v57 = vsel %vm1033_vm0, %v1053_v45, %v1135_v22 }
 0x136   : > { %v1423_v7 = vrot.slane %v1183_v57, 2 }
 0x137   : > { %1765 = vrot.lane.b32.xlu1 %v1394_v12, %s13138_s11  ;;  %v8688_v17 = vpop.trf.xlu0 }
 0x138   : > { %13142 = vst [vmem:[#allocation30_spill] sm:$0xff] %v8688_v17 }
 0x139   : > { %1576 = vrot.lane.b32.xlu0 %v8665_v49, %s13129_s16 }
 0x13b   : > { %1859 = vrot.lane.b32.xlu1 %v8681_v62, %s13135_s23  ;;  %v8704_v12 = vpop.trf.xlu0 }
 0x13c   : > { %13144 = vst [vmem:[#allocation32_spill] sm:$0xff] %v8704_v12  ;;  %v1136_v12 = vrot.slane %v8583_v4, 5 }
 0x13d   : > { %1961 = vrot.lane.b32.xlu0 %v8686_v63, %s13136_s26 }
 0x13f   : > { %1564 = vrot.lane.b32.xlu1 %v8681_v62, %s13129_s16  ;;  %v8721_v24 = vpop.trf.xlu0 }
 0x140   : > { %13145 = vst [vmem:[#allocation33_spill] sm:$0xff] %v8721_v24 }
 0x141   : > { %1678 = vrot.lane.b32.xlu0 %v8686_v63, %s13130_s5 }
 0x143   : > { %1861 = vrot.lane.b32.xlu1 %v8702_v9, %s13135_s23  ;;  %v8735_v32 = vpop.trf.xlu0 }
 0x144   : > { %13146 = vst [vmem:[#allocation34_spill] sm:$0xff] %v8735_v32  ;;  %v1403_v32 = vrot.slane %v1179_v31, 2 }
 0x145   : > { %2051 = vrot.lane.b32.xlu0 %v8709_v50, %s13137_s9 }
 0x147   : > { %1949 = vrot.lane.b32.xlu1 %v1236_v20, %s13136_s26  ;;  %v8755_v54 = vpop.trf.xlu0 }
 0x148   : > { %13148 = vst [vmem:[#allocation36_spill] sm:$0xff] %v8755_v54 }
 0x149   : > { %v8725_v28 = vpop.permute.xlu1 %1556  ;;  %1680 = vrot.lane.b32.xlu0 %v8719_v21, %s13130_s5 }
 0x14b   : > { %1566 = vrot.lane.b32.xlu1 %v8702_v9, %s13129_s16  ;;  %v8769_v13 = vpop.trf.xlu0 }
 0x14c   : > { %13149 = vst [vmem:[#allocation37_spill] sm:$0xff] %v8769_v13  ;;  %v12999_v3 = vrot.slane %v8769_v13, 7 }
 0x14d   : > { %v8737_v34 = vpop.permute.xlu1 %1558  ;;  %2053 = vrot.lane.b32.xlu0 %v8730_v30, %s13137_s9 }
 0x14f   : > { %1666 = vrot.lane.b32.xlu1 %v1236_v20, %s13130_s5  ;;  %v968_v23 = vpop.trf.xlu0 }
 0x150   : > { %v1080_v49 = vrot.slane %v968_v23, 7  ;;  %v1144_v58 = vrot.slane %v968_v23, 5 }
 0x151   : > { %v8745_v47 = vpop.permute.xlu1 %1658  ;;  %1485 = vrot.lane.b32.xlu0 %v8709_v50, %s13132_s22 }
 0x152   : > { %v8800_v45 = vsel %vm1033_vm0, %v12999_v3, %v1080_v49  ;;  %v8803_v22 = vsel %vm1033_vm0, %v1080_v49, %v1144_v58 }
 0x153   : > { %1951 = vrot.lane.b32.xlu1 %v1238_v53, %s13136_s26  ;;  %13150 = vst [vmem:[#allocation38_spill] sm:$0xff] %v8800_v45  ;;  %13151 = vst [vmem:[#allocation39_spill] sm:$0xff] %v8803_v22  ;;  %v13003_v24 = vrot.slane %v8800_v45, 1  ;;  %v1656_v49 = vrot.slane %v8803_v22, 1  ;;  %v1055_v22 = vrot.slane %v8574_v61, 7  ;;  %v1056_v45 = vrot.slane %v8583_v4, 7 }
 0x155   : > { %v8761_v1 = vpop.permute.xlu1 %1303  ;;  %1875 = vrot.lane.b32.xlu0 %v8751_v46, %s13135_s23 }
 0x157   : > { %2039 = vrot.lane.b32.xlu1 %v1402_v2, %s13137_s9 }
 0x159   : > { %v8771_v14 = vpop.permute.xlu1 %1660  ;;  %1580 = vrot.lane.b32.xlu0 %v8751_v46, %s13129_s16  ;;  %v1257_v46 = vrot.slane %v1183_v57, 1  ;;  %v992_v57 = vrot.slane %v8574_v61, 1 }
 0x15b   : > { %1307 = vrot.lane.b32.xlu1 %v1236_v20, %s13131_s2  ;;  %v8794_v20 = vsel %vm1389_vm2, %v1420_v39, %v1421_v43  ;;  %v1404_v39 = vsel %vm1389_vm2, %v1401_v60, %v1403_v32  ;;  %v8811_v31 = vsel %vm1223_vm1, %v1255_v6, %v1257_v46  ;;  %v8825_v32 = vsel %vm1223_vm1, %v13003_v24, %v1656_v49 }
 0x15c   : > { %13152 = vst [vmem:[#allocation40_spill] sm:$0xff] %v8825_v32  ;;  %v8828_v46 = vsel %vm1389_vm2, %v1421_v43, %v1423_v7  ;;  %v8851_v43 = vsel %vm1033_vm0, %v1055_v22, %v1056_v45 }
 0x15d   : > { %v8780_v25 = vpop.permute.xlu1 %1759  ;;  %1965 = vrot.lane.b32.xlu0 %v8776_v18, %s13136_s26  ;;  %13154 = vst [vmem:[#allocation42_spill] sm:$0xff] %v8851_v43  ;;  %v1260_v32 = vrot.slane %v8851_v43, 1  ;;  %v1426_v56 = vrot.slane %v8851_v43, 2 }
 0x15f   : > { %1668 = vrot.lane.b32.xlu1 %v1238_v53, %s13130_s5 }
 0x161   : > { %v8789_v54 = vpop.permute.xlu1 %1305  ;;  %1682 = vrot.lane.b32.xlu0 %v8776_v18, %s13130_s5 }
 0x163   : > { %1767 = vrot.lane.b32.xlu1 %v1402_v2, %s13138_s11 }
 0x165   : > { %v8805_v23 = vpop.permute.xlu1 %1469  ;;  %2055 = vrot.lane.b32.xlu0 %v8794_v20, %s13137_s9 }
 0x167   : > { %2041 = vrot.lane.b32.xlu1 %v1404_v39, %s13137_s9  ;;  %v8815_v3 = vpop.permute.xlu0 %1945 }
 0x169   : > { %v8818_v58 = vpop.permute.xlu1 %1761  ;;  %1684 = vrot.lane.b32.xlu0 %v8811_v31, %s13130_s5 }
 0x16b   : > { %1309 = vrot.lane.b32.xlu1 %v1238_v53, %s13131_s2  ;;  %v8831_v60 = vpop.permute.xlu0 %1568  ;;  %v8848_v53 = vsel %vm1033_vm0, %v992_v57, %v1055_v22 }
 0x16c   : > { %13153 = vst [vmem:[#allocation41_spill] sm:$0xff] %v8848_v53 }
 0x16d   : > { %v8833_v6 = vpop.permute.xlu1 %1471  ;;  %2057 = vrot.lane.b32.xlu0 %v8828_v46, %s13137_s9 }
 0x16f   : > { %1473 = vrot.lane.b32.xlu1 %v1402_v2, %s13132_s22  ;;  %v8841_v49 = vpop.permute.xlu0 %1953  ;;  %v1259_v2 = vrot.slane %v8848_v53, 1 }
 0x171   : > { %v8843_v7 = vpop.permute.xlu1 %1855  ;;  %1489 = vrot.lane.b32.xlu0 %v8794_v20, %s13132_s22  ;;  %v8871_v13 = vsel %vm1223_vm1, %v1259_v2, %v1260_v32 }
 0x172   : > { %13156 = vst [vmem:[#allocation44_spill] sm:$0xff] %v8871_v13 }
 0x173   : > { %1769 = vrot.lane.b32.xlu1 %v1404_v39, %s13138_s11  ;;  %v8854_v61 = vpop.permute.xlu0 %1670 }
 0x174   : > { %13155 = vst [vmem:[#allocation43_spill] sm:$0xff] %v8854_v61  ;;  %v1184_v61 = vsel %vm1033_vm0, %v1056_v45, %v1136_v12 }
 0x175   : > { %v8856_v24 = vpop.permute.xlu1 %1560  ;;  %1879 = vrot.lane.b32.xlu0 %v8848_v53, %s13135_s23  ;;  %v1428_v45 = vrot.slane %v1184_v61, 2 }
 0x177   : > { %1863 = vrot.lane.b32.xlu1 %v8520_v38, %s13135_s23  ;;  %v8864_v57 = vpop.permute.xlu0 %2043  ;;  %v1425_v38 = vrot.slane %v8848_v53, 2 }
 0x179   : > { %v8866_v22 = vpop.permute.xlu1 %1857  ;;  %1584 = vrot.lane.b32.xlu0 %v8848_v53, %s13129_s16 }
 0x17b   : > { %1475 = vrot.lane.b32.xlu1 %v1404_v39, %s13132_s22  ;;  %v8875_v9 = vpop.permute.xlu0 %1672  ;;  %v8889_v39 = vsel %vm1389_vm2, %v1425_v38, %v1426_v56 }
 0x17c   : > { %13157 = vst [vmem:[#allocation45_spill] sm:$0xff] %v8875_v9  ;;  %v1262_v9 = vrot.slane %v1184_v61, 1  ;;  %v1059_v61 = vrot.slane %v8603_v15, 7 }
 0x17d   : > { %v1300_v17 = vpop.permute.xlu1 %1299  ;;  %1969 = vrot.lane.b32.xlu0 %v8871_v13, %s13136_s26 }
 0x17e   : > { %v8898_v12 = vsel %vm1223_vm1, %v1260_v32, %v1262_v9  ;;  %v2126_v38 = vsel %vm2125_vm6, %v8503_v26, %v1300_v17  ;;  %v8912_v9 = vsel %vm1389_vm2, %v1426_v56, %v1428_v45  ;;  %v1058_v56 = vrot.slane %v8595_v11, 7 }
 0x17f   : > { %1865 = vrot.lane.b32.xlu1 %v8517_v37, %s13135_s23  ;;  %v8884_v2 = vpop.permute.xlu0 %2045  ;;  %13159 = vst [vmem:[#allocation47_spill] sm:$0xff] %v8912_v9 }
 0x181   : > { %v1302_v4 = vpop.permute.xlu1 %1301  ;;  %1686 = vrot.lane.b32.xlu0 %v8871_v13, %s13130_s5 }
 0x183   : > { %1570 = vrot.lane.b32.xlu1 %v8517_v37, %s13129_s16  ;;  %v8893_v53 = vpop.permute.xlu0 %1477 }
 0x184   : > { %13158 = vst [vmem:[#allocation46_spill] sm:$0xff] %v8893_v53 }
 0x185   : > { %v1466_v43 = vpop.permute.xlu1 %1465  ;;  %2059 = vrot.lane.b32.xlu0 %v8889_v39, %s13137_s9 }
 0x186   : > { %v8909_v53 = vsel %vm2156_vm7, %v2126_v38, %v1466_v43  ;;  %v993_v43 = vrot.slane %v8595_v11, 1  ;;  %v8942_v11 = vsel %vm1033_vm0, %v1058_v56, %v1059_v61 }
 0x187   : > { %1955 = vrot.lane.b32.xlu1 %v8560_v55, %s13136_s26  ;;  %v8902_v13 = vpop.permute.xlu0 %1867  ;;  %v2188_v26 = vsel %vm2187_vm8, %v8909_v53, %v8725_v28  ;;  %13162 = vst [vmem:[#allocation50_spill] sm:$0xff] %v8942_v11 }
 0x188   : > { %v2221_v45 = vsel %vm2220_vm9, %v2188_v26, %v8745_v47  ;;  %v8939_v38 = vsel %vm1033_vm0, %v993_v43, %v1058_v56 }
 0x189   : > { %v1468_v37 = vpop.permute.xlu1 %1467  ;;  %1688 = vrot.lane.b32.xlu0 %v8898_v12, %s13130_s5  ;;  %13161 = vst [vmem:[#allocation49_spill] sm:$0xff] %v8939_v38  ;;  %v2254_v47 = vsel %vm2253_vm10, %v2221_v45, %v8780_v25  ;;  %v1264_v56 = vrot.slane %v8939_v38, 1 }
 0x18a   : > { %v2287_v43 = vsel %vm2286_vm11, %v2254_v47, %v8843_v7 }
 0x18b   : > { %1311 = vrot.lane.b32.xlu1 %v8533_v44, %s13131_s2  ;;  %v8916_v32 = vpop.permute.xlu0 %1572  ;;  %v2320_v7 = vsel %vm2319_vm12, %v2287_v43, %v8815_v3  ;;  %v1431_v43 = vrot.slane %v8942_v11, 2 }
 0x18c   : > { %13160 = vst [vmem:[#allocation48_spill] sm:$0xff] %v8916_v32  ;;  %v1265_v32 = vrot.slane %v8942_v11, 1 }
 0x18d   : > { %v8921_v17 = vpop.permute.xlu1 %1562  ;;  %2061 = vrot.lane.b32.xlu0 %v8912_v9, %s13137_s9 }
 0x18f   : > { %1771 = vrot.lane.b32.xlu1 %v8550_v51, %s13138_s11  ;;  %v8930_v44 = vpop.permute.xlu0 %1957 }
 0x191   : > { %v8934_v28 = vpop.permute.xlu1 %1662  ;;  %1493 = vrot.lane.b32.xlu0 %v8889_v39, %s13132_s22 }
 0x193   : > { %1313 = vrot.lane.b32.xlu1 %v8560_v55, %s13131_s2  ;;  %v8946_v51 = vpop.permute.xlu0 %1674  ;;  %v2127_v55 = vsel %vm2125_vm6, %v8506_v27, %v1302_v4  ;;  %v8971_v27 = vsel %vm1223_vm1, %v1264_v56, %v1265_v32  ;;  %v1137_v4 = vrot.slane %v8603_v15, 5  ;;  %v1430_v15 = vrot.slane %v8939_v38, 2 }
 0x194   : > { %13163 = vst [vmem:[#allocation51_spill] sm:$0xff] %v8946_v51  ;;  %v8963_v25 = vsel %vm2156_vm7, %v2127_v55, %v1468_v37 }
 0x195   : > { %v1948_v26 = vpop.permute.xlu1 %1947  ;;  %1883 = vrot.lane.b32.xlu0 %v8939_v38, %s13135_s23  ;;  %v2189_v37 = vsel %vm2187_vm8, %v8963_v25, %v8737_v34  ;;  %v1185_v34 = vsel %vm1033_vm0, %v1059_v61, %v1137_v4 }
 0x196   : > { %v2222_v3 = vsel %vm2220_vm9, %v2189_v37, %v8771_v14  ;;  %v9002_v14 = vsel %vm1389_vm2, %v1430_v15, %v1431_v43  ;;  %v1433_v15 = vrot.slane %v1185_v34, 2 }
 0x197   : > { %1773 = vrot.lane.b32.xlu1 %v8570_v59, %s13138_s11  ;;  %v8960_v51 = vpop.permute.xlu0 %2047  ;;  %v2255_v56 = vsel %vm2253_vm10, %v2222_v3, %v8818_v58 }
 0x199   : > { %v2036_v45 = vpop.permute.xlu1 %2035  ;;  %1588 = vrot.lane.b32.xlu0 %v8939_v38, %s13129_s16 }
 0x19a   : > { %v2353_v47 = vsel %vm2352_vm13, %v2320_v7, %v2036_v45  ;;  %v1267_v7 = vrot.slane %v1185_v34, 1 }
 0x19b   : > { %1479 = vrot.lane.b32.xlu1 %v8570_v59, %s13132_s22  ;;  %7532 = vmatprep.mubr.msk.f32.mxu0 %vm2396_vm14, %v2353_v47  ;;  %v8980_v55 = vpop.permute.xlu0 %1676  ;;  %v2288_v47 = vsel %vm2286_vm11, %v2255_v56, %v8866_v22  ;;  %v994_v56 = vrot.slane %v8613_v19, 1 }
 0x19c   : > { %13164 = vst [vmem:[#allocation52_spill] sm:$0xff] %v8980_v55  ;;  %v2321_v4 = vsel %vm2319_vm12, %v2288_v47, %v1948_v26  ;;  %v9015_v3 = vsel %vm1223_vm1, %v1265_v32, %v1267_v7  ;;  %v9027_v26 = vsel %vm1389_vm2, %v1431_v43, %v1433_v15  ;;  %v1061_v7 = vrot.slane %v8613_v19, 7 }
 0x19d   : > { %v8982_v9 = vpop.permute.xlu1 %1664  ;;  %1973 = vrot.lane.b32.xlu0 %v8971_v27, %s13136_s26  ;;  %13166 = vst [vmem:[#allocation54_spill] sm:$0xff] %v9027_v26  ;;  %v1062_v43 = vrot.slane %v8624_v29, 7 }
 0x19f   : > { %1869 = vrot.lane.b32.xlu1 %v8592_v10, %s13135_s23  ;;  %v8993_v59 = vpop.permute.xlu0 %2049  ;;  %v9054_v19 = vsel %vm1033_vm0, %v1061_v7, %v1062_v43 }
 0x1a0   : > { %13170 = vst [vmem:[#allocation58_spill] sm:$0xff] %v9054_v19 }
 0x1a1   : > { %v8997_v45 = vpop.permute.xlu1 %1763  ;;  %1690 = vrot.lane.b32.xlu0 %v8971_v27, %s13130_s5 }
 0x1a3   : > { %1574 = vrot.lane.b32.xlu1 %v8592_v10, %s13129_s16  ;;  %v9006_v61 = vpop.permute.xlu0 %1481 }
 0x1a4   : > { %13165 = vst [vmem:[#allocation53_spill] sm:$0xff] %v9006_v61 }
 0x1a5   : > { %v2038_v58 = vpop.permute.xlu1 %2037  ;;  %2063 = vrot.lane.b32.xlu0 %v9002_v14, %s13137_s9 }
 0x1a6   : > { %v2354_v37 = vsel %vm2352_vm13, %v2321_v4, %v2038_v58 }
 0x1a7   : > { %1959 = vrot.lane.b32.xlu1 %v8641_v36, %s13136_s26  ;;  %7533 = vmatmul.mubr.msk.f32.vlgmr.msra.gmra.mrb[0].mxu0 %vm2396_vm14, %v2354_v37  ;;  %v9020_v38 = vpop.permute.xlu0 %1871 }
 0x1a9   : > { %v9022_v22 = vpop.permute.xlu1 %1765  ;;  %1692 = vrot.lane.b32.xlu0 %v9015_v3, %s13130_s5 }
 0x1ab   : > { %1315 = vrot.lane.b32.xlu1 %v8608_v16, %s13131_s2  ;;  %v9031_v32 = vpop.permute.xlu0 %1576  ;;  %v9047_v16 = vsel %vm1033_vm0, %v994_v56, %v1061_v7  ;;  %v1270_v56 = vrot.slane %v9054_v19, 1 }
 0x1ac   : > { %13167 = vst [vmem:[#allocation55_spill] sm:$0xff] %v9031_v32  ;;  %13168 = vst [vmem:[#allocation56_spill] sm:$0xff] %v9047_v16  ;;  %v1269_v15 = vrot.slane %v9047_v16, 1 }
 0x1ad   : > { %v1860_v34 = vpop.permute.xlu1 %1859  ;;  %2065 = vrot.lane.b32.xlu0 %v9027_v26, %s13137_s9  ;;  %v1435_v26 = vrot.slane %v9047_v16, 2 }
 0x1ae   : > { %v9073_v10 = vsel %vm1223_vm1, %v1269_v15, %v1270_v56 }
 0x1af   : > { %1775 = vrot.lane.b32.xlu1 %v8631_v33, %s13138_s11  ;;  %v9039_v47 = vpop.permute.xlu0 %1961  ;;  %13172 = vst [vmem:[#allocation60_spill] sm:$0xff] %v9073_v10 }
 0x1b1   : > { %v9042_v4 = vpop.permute.xlu1 %1564  ;;  %1497 = vrot.lane.b32.xlu0 %v9002_v14, %s13132_s22 }
 0x1b3   : > { %1317 = vrot.lane.b32.xlu1 %v8641_v36, %s13131_s2  ;;  %v9051_v58 = vpop.permute.xlu0 %1678 }
 0x1b4   : > { %13169 = vst [vmem:[#allocation57_spill] sm:$0xff] %v9051_v58  ;;  %v1138_v58 = vrot.slane %v8624_v29, 5  ;;  %v2128_v29 = vsel %vm2125_vm6, %v8475_v5, %v8761_v1 }
 0x1b5   : > { %v9056_v33 = vpop.permute.xlu1 %1861  ;;  %1887 = vrot.lane.b32.xlu0 %v9047_v16, %s13135_s23 }
 0x1b7   : > { %1777 = vrot.lane.b32.xlu1 %v8649_v41, %s13138_s11  ;;  %v9062_v37 = vpop.permute.xlu0 %2051 }
 0x1b9   : > { %v1950_v36 = vpop.permute.xlu1 %1949  ;;  %1592 = vrot.lane.b32.xlu0 %v9047_v16, %s13129_s16  ;;  %v2159_v16 = vsel %vm2156_vm7, %v2128_v29, %v8805_v23 }
 0x1bb   : > { %1483 = vrot.lane.b32.xlu1 %v8649_v41, %s13132_s22  ;;  %v9070_v7 = vpop.permute.xlu0 %1680  ;;  %v1436_v41 = vrot.slane %v9054_v19, 2 }
 0x1bc   : > { %13171 = vst [vmem:[#allocation59_spill] sm:$0xff] %v9070_v7  ;;  %v1186_v7 = vsel %vm1033_vm0, %v1062_v43, %v1138_v58  ;;  %v2190_v58 = vsel %vm2187_vm8, %v2159_v16, %v8856_v24 }
 0x1bd   : > { %v9076_v32 = vpop.permute.xlu1 %1566  ;;  %1977 = vrot.lane.b32.xlu0 %v9073_v10, %s13136_s26  ;;  %v9101_v19 = vsel %vm1389_vm2, %v1435_v26, %v1436_v41  ;;  %v1272_v43 = vrot.slane %v1186_v7, 1  ;;  %v2223_v5 = vsel %vm2220_vm9, %v2190_v58, %v8934_v28  ;;  %v1438_v24 = vrot.slane %v1186_v7, 2 }
 0x1be   : > { %v2256_v1 = vsel %vm2253_vm10, %v2223_v5, %v8997_v45  ;;  %v1065_v7 = vrot.slane %v8644_v40, 7 }
 0x1bf   : > { %1873 = vrot.lane.b32.xlu1 %v8668_v52, %s13135_s23  ;;  %v9082_v61 = vpop.permute.xlu0 %2053  ;;  %v2289_v26 = vsel %vm2286_vm11, %v2256_v1, %v1860_v34  ;;  %v9117_v29 = vsel %vm1223_vm1, %v1270_v56, %v1272_v43  ;;  %v9129_v34 = vsel %vm1389_vm2, %v1436_v41, %v1438_v24  ;;  %v2129_v41 = vsel %vm2125_vm6, %v8480_v8, %v8789_v54 }
 0x1c0   : > { %v2322_v16 = vsel %vm2319_vm12, %v2289_v26, %v1950_v36  ;;  %v2160_v58 = vsel %vm2156_vm7, %v2129_v41, %v8833_v6 }
 0x1c1   : > { %v9087_v15 = vpop.permute.xlu1 %1666  ;;  %1694 = vrot.lane.b32.xlu0 %v9073_v10, %s13130_s5  ;;  %v2191_v1 = vsel %vm2187_vm8, %v2160_v58, %v8921_v17 }
 0x1c2   : > { %v2224_v8 = vsel %vm2220_vm9, %v2191_v1, %v8982_v9 }
 0x1c3   : > { %1578 = vrot.lane.b32.xlu1 %v8668_v52, %s13129_s16  ;;  %v9096_v55 = vpop.permute.xlu0 %1485 }
 0x1c5   : > { %v1952_v10 = vpop.permute.xlu1 %1951  ;;  %2067 = vrot.lane.b32.xlu0 %v9101_v19, %s13137_s9 }
 0x1c7   : > { %1963 = vrot.lane.b32.xlu1 %v8719_v21, %s13136_s26  ;;  %v9113_v23 = vpop.permute.xlu0 %1875 }
 0x1c9   : > { %v2040_v52 = vpop.permute.xlu1 %2039  ;;  %1696 = vrot.lane.b32.xlu0 %v9117_v29, %s13130_s5 }
 0x1ca   : > { %v2355_v28 = vsel %vm2352_vm13, %v2322_v16, %v2040_v52  ;;  %v995_v52 = vrot.slane %v8636_v35, 1 }
 0x1cb   : > { %1319 = vrot.lane.b32.xlu1 %v8686_v63, %s13131_s2  ;;  %7535 = vmatprep.mubr.msk.f32.mxu0 %vm2396_vm14, %v2355_v28  ;;  %v9126_v45 = vpop.permute.xlu0 %1580  ;;  %v1064_v63 = vrot.slane %v8636_v35, 7 }
 0x1cd   : > { %v9131_v56 = vpop.permute.xlu1 %1307  ;;  %2069 = vrot.lane.b32.xlu0 %v9129_v34, %s13137_s9  ;;  %v9156_v35 = vsel %vm1033_vm0, %v995_v52, %v1064_v63  ;;  %v9159_v5 = vsel %vm1033_vm0, %v1064_v63, %v1065_v7  ;;  %v1139_v52 = vrot.slane %v8644_v40, 5 }
 0x1ce   : > { %13173 = vst [vmem:[#allocation61_spill] sm:$0xff] %v9156_v35  ;;  %v1274_v17 = vrot.slane %v9156_v35, 1  ;;  %v1275_v24 = vrot.slane %v9159_v5, 1  ;;  %v1441_v41 = vrot.slane %v9159_v5, 2 }
 0x1cf   : > { %1779 = vrot.lane.b32.xlu1 %v8709_v50, %s13138_s11  ;;  %v9137_v36 = vpop.permute.xlu0 %1965  ;;  %v1187_v58 = vsel %vm1033_vm0, %v1065_v7, %v1139_v52  ;;  %v2192_v7 = vsel %vm2187_vm8, %v8909_v53, %v9042_v4 }
 0x1d1   : > { %v9142_v43 = vpop.permute.xlu1 %1668  ;;  %1501 = vrot.lane.b32.xlu0 %v9101_v19, %s13132_s22 }
 0x1d3   : > { %1321 = vrot.lane.b32.xlu1 %v8719_v21, %s13131_s2  ;;  %v9151_v50 = vpop.permute.xlu0 %1682  ;;  %v2257_v21 = vsel %vm2253_vm10, %v2224_v8, %v9022_v22 }
 0x1d4   : > { %v2290_v6 = vsel %vm2286_vm11, %v2257_v21, %v9056_v33  ;;  %v9187_v33 = vsel %vm1223_vm1, %v1274_v17, %v1275_v24  ;;  %v1277_v21 = vrot.slane %v1187_v58, 1 }
 0x1d5   : > { %v1768_v26 = vpop.permute.xlu1 %1767  ;;  %1891 = vrot.lane.b32.xlu0 %v9156_v35, %s13135_s23  ;;  %v2323_v16 = vsel %vm2319_vm12, %v2290_v6, %v1952_v10 }
 0x1d7   : > { %1781 = vrot.lane.b32.xlu1 %v8730_v30, %s13138_s11  ;;  %v9171_v54 = vpop.permute.xlu0 %2055 }
 0x1d9   : > { %v2042_v28 = vpop.permute.xlu1 %2041  ;;  %1596 = vrot.lane.b32.xlu0 %v9156_v35, %s13129_s16 }
 0x1da   : > { %v2356_v9 = vsel %vm2352_vm13, %v2323_v16, %v2042_v28  ;;  %v2225_v16 = vsel %vm2220_vm9, %v2192_v7, %v9087_v15  ;;  %v9222_v28 = vsel %vm1223_vm1, %v1275_v24, %v1277_v21 }
 0x1db   : > { %1487 = vrot.lane.b32.xlu1 %v8730_v30, %s13132_s22  ;;  %7536 = vmatmul.mubr.msk.f32.gmra.mrb[2].mxu0 %vm2396_vm14, %v2356_v9  ;;  %v9184_v22 = vpop.permute.xlu0 %1684  ;;  %v1440_v30 = vrot.slane %v9156_v35, 2  ;;  %v1443_v9 = vrot.slane %v1187_v58, 2  ;;  %v2258_v52 = vsel %vm2253_vm10, %v2225_v16, %v1768_v26  ;;  %v1067_v58 = vrot.slane %v8652_v42, 7 }
 0x1dd   : > { %v9190_v63 = vpop.permute.xlu1 %1309  ;;  %1981 = vrot.lane.b32.xlu0 %v9187_v33, %s13136_s26  ;;  %v9208_v8 = vsel %vm1389_vm2, %v1440_v30, %v1441_v41  ;;  %v9237_v24 = vsel %vm1389_vm2, %v1441_v41, %v1443_v9 }
 0x1df   : > { %1877 = vrot.lane.b32.xlu1 %v8758_v0, %s13135_s23  ;;  %v9196_v10 = vpop.permute.xlu0 %2057 }
 0x1e1   : > { %v1474_v1 = vpop.permute.xlu1 %1473  ;;  %1698 = vrot.lane.b32.xlu0 %v9187_v33, %s13130_s5 }
 0x1e3   : > { %1582 = vrot.lane.b32.xlu1 %v8758_v0, %s13129_s16  ;;  %v9205_v40 = vpop.permute.xlu0 %1489 }
 0x1e5   : > { %v1770_v6 = vpop.permute.xlu1 %1769  ;;  %2071 = vrot.lane.b32.xlu0 %v9208_v8, %s13137_s9 }
 0x1e7   : > { %1967 = vrot.lane.b32.xlu1 %v8811_v31, %s13136_s26  ;;  %v9217_v17 = vpop.permute.xlu0 %1879 }
 0x1e9   : > { %v1864_v30 = vpop.permute.xlu1 %1863  ;;  %1700 = vrot.lane.b32.xlu0 %v9222_v28, %s13130_s5 }
 0x1ea   : > { %v2291_v53 = vsel %vm2286_vm11, %v2258_v52, %v1864_v30 }
 0x1eb   : > { %v2324_v4 = vsel %vm2319_vm12, %v2291_v53, %v8841_v49  ;;  %1323 = vrot.lane.b32.xlu1 %v8776_v18, %s13131_s2  ;;  %v9232_v35 = vpop.permute.xlu0 %1584  ;;  %v996_v18 = vrot.slane %v8652_v42, 1  ;;  %v2193_v42 = vsel %vm2187_vm8, %v8963_v25, %v9076_v32  ;;  %v2130_v25 = vsel %vm2125_vm6, %v8681_v62, %v9131_v56 }
 0x1ec   : > { %v2357_v15 = vsel %vm2352_vm13, %v2324_v4, %v8864_v57  ;;  %v1068_v57 = vrot.slane %v8660_v48, 7 }
 0x1ed   : > { %v9239_v26 = vpop.permute.xlu1 %1475  ;;  %7538 = vmatprep.mubr.msk.f32.mxu0 %vm2396_vm14, %v2357_v15  ;;  %2073 = vrot.lane.b32.xlu0 %v9237_v24, %s13137_s9  ;;  %v9258_v7 = vsel %vm1033_vm0, %v996_v18, %v1067_v58 }
 0x1ee   : > { %13174 = vst [vmem:[#allocation62_spill] sm:$0xff] %v9258_v7  ;;  %v1279_v30 = vrot.slane %v9258_v7, 1 }
 0x1ef   : > { %1783 = vrot.lane.b32.xlu1 %v8794_v20, %s13138_s11  ;;  %v9246_v49 = vpop.permute.xlu0 %1969  ;;  %v9261_v20 = vsel %vm1033_vm0, %v1067_v58, %v1068_v57 }
 0x1f0   : > { %v1280_v53 = vrot.slane %v9261_v20, 1 }
 0x1f1   : > { %v1866_v41 = vpop.permute.xlu1 %1865  ;;  %1505 = vrot.lane.b32.xlu0 %v9208_v8, %s13132_s22 }
 0x1f2   : > { %v9295_v58 = vsel %vm1223_vm1, %v1279_v30, %v1280_v53 }
 0x1f3   : > { %1325 = vrot.lane.b32.xlu1 %v8811_v31, %s13131_s2  ;;  %v9255_v21 = vpop.permute.xlu0 %1686  ;;  %v2226_v31 = vsel %vm2220_vm9, %v2193_v42, %v9142_v43  ;;  %v2161_v43 = vsel %vm2156_vm7, %v2130_v25, %v1474_v1  ;;  %v1446_v42 = vrot.slane %v9261_v20, 2 }
 0x1f4   : > { %v2259_v52 = vsel %vm2253_vm10, %v2226_v31, %v1770_v6  ;;  %v2194_v56 = vsel %vm2187_vm8, %v2161_v43, %v8831_v60 }
 0x1f5   : > { %v9263_v16 = vpop.permute.xlu1 %1570  ;;  %1895 = vrot.lane.b32.xlu0 %v9258_v7, %s13135_s23  ;;  %v2292_v4 = vsel %vm2286_vm11, %v2259_v52, %v1866_v41  ;;  %v1140_v41 = vrot.slane %v8660_v48, 5  ;;  %v13176_v48 = vld [vmem:[#allocation43_spill] sm:$0xff] }
 0x1f6   : > { %v2227_v30 = vsel %vm2220_vm9, %v2194_v56, %v13176_v48 }
 0x1f7   : > { %1785 = vrot.lane.b32.xlu1 %v8828_v46, %s13138_s11  ;;  %v9274_v9 = vpop.permute.xlu0 %2059  ;;  %v1188_v31 = vsel %vm1033_vm0, %v1068_v57, %v1140_v41 }
 0x1f9   : > { %v1956_v15 = vpop.permute.xlu1 %1955  ;;  %1600 = vrot.lane.b32.xlu0 %v9258_v7, %s13129_s16 }
 0x1fa   : > { %v2325_v32 = vsel %vm2319_vm12, %v2292_v4, %v1956_v15 }
 0x1fb   : > { %1491 = vrot.lane.b32.xlu1 %v8828_v46, %s13132_s22  ;;  %v9289_v6 = vpop.permute.xlu0 %1688  ;;  %v2358_v18 = vsel %vm2352_vm13, %v2325_v32, %v8884_v2  ;;  %v13175_v46 = vld [vmem:[#allocation42_spill] sm:$0xff]  ;;  %v1445_v2 = vrot.slane %v9258_v7, 2  ;;  %v1282_v32 = vrot.slane %v1188_v31, 1 }
 0x1fc   : > { %7539 = vmatmul.mubr.msk.f32.gmra.mrb[4].mxu0 %vm2396_vm14, %v2358_v18 }
 0x1fd   : > { %v1312_v62 = vpop.permute.xlu1 %1311  ;;  %1985 = vrot.lane.b32.xlu0 %v9295_v58, %s13136_s26  ;;  %v9321_v25 = vsel %vm1389_vm2, %v1445_v2, %v1446_v42  ;;  %v9337_v41 = vsel %vm1223_vm1, %v1280_v53, %v1282_v32  ;;  %v13178_v2 = vld [vmem:[#allocation44_spill] sm:$0xff] }
 0x1ff   : > { %1881 = vrot.lane.b32.xlu1 %v13175_v46, %s13135_s23  ;;  %v9304_v1 = vpop.permute.xlu0 %2061 }
 0x201   : > { %v1772_v52 = vpop.permute.xlu1 %1771  ;;  %1702 = vrot.lane.b32.xlu0 %v9295_v58, %s13130_s5 }
 0x202   : > { %v2260_v60 = vsel %vm2253_vm10, %v2227_v30, %v1772_v52 }
 0x203   : > { %v2293_v4 = vsel %vm2286_vm11, %v2260_v60, %v8902_v13  ;;  %1586 = vrot.lane.b32.xlu1 %v13175_v46, %s13129_s16  ;;  %v9318_v15 = vpop.permute.xlu0 %1493 }
 0x204   : > { %13177 = vst [vmem:[#allocation43_spill] sm:$0xff] %v9318_v15  ;;  %v2326_v57 = vsel %vm2319_vm12, %v2293_v4, %v8930_v44  ;;  %v1448_v44 = vrot.slane %v1188_v31, 2  ;;  %v13180_v31 = vld [vmem:[#allocation29_spill] sm:$0xff]  ;;  %v13181_v4 = vld [vmem:[#allocation30_spill] sm:$0xff] }
 0x205   : > { %v9325_v43 = vpop.permute.xlu1 %1313  ;;  %2075 = vrot.lane.b32.xlu0 %v9321_v25, %s13137_s9  ;;  %v2359_v13 = vsel %vm2352_vm13, %v2326_v57, %v8960_v51  ;;  %v997_v30 = vrot.slane %v13180_v31, 1  ;;  %v1070_v60 = vrot.slane %v13180_v31, 7  ;;  %v1071_v57 = vrot.slane %v13181_v4, 7 }
 0x206   : > { %7541 = vmatprep.mubr.msk.f32.mxu0 %vm2396_vm14, %v2359_v13  ;;  %v9346_v51 = vsel %vm1389_vm2, %v1446_v42, %v1448_v44  ;;  %v13182_v42 = vld [vmem:[#allocation31_spill] sm:$0xff] }
 0x207   : > { %1971 = vrot.lane.b32.xlu1 %v8898_v12, %s13136_s26  ;;  %v9334_v18 = vpop.permute.xlu0 %1883  ;;  %v2131_v13 = vsel %vm2125_vm6, %v13182_v42, %v9190_v63  ;;  %v9373_v31 = vsel %vm1033_vm0, %v997_v30, %v1070_v60  ;;  %v9376_v7 = vsel %vm1033_vm0, %v1070_v60, %v1071_v57  ;;  %v13185_v63 = vld [vmem:[#allocation45_spill] sm:$0xff] }
 0x208   : > { %v2162_v44 = vsel %vm2156_vm7, %v2131_v13, %v9239_v26  ;;  %13184 = vst [vmem:[#allocation30_spill] sm:$0xff] %v9373_v31  ;;  %v1284_v60 = vrot.slane %v9373_v31, 1 }
 0x209   : > { %v1774_v56 = vpop.permute.xlu1 %1773  ;;  %1704 = vrot.lane.b32.xlu0 %v9337_v41, %s13130_s5 }
 0x20b   : > { %1327 = vrot.lane.b32.xlu1 %v13178_v2, %s13131_s2  ;;  %v9343_v52 = vpop.permute.xlu0 %1588  ;;  %v2195_v2 = vsel %vm2187_vm8, %v2162_v44, %v9263_v16  ;;  %v13187_v16 = vld [vmem:[#allocation24_spill] sm:$0xff]  ;;  %v1285_v44 = vrot.slane %v9376_v7, 1 }
 0x20c   : > { %13179 = vst [vmem:[#allocation44_spill] sm:$0xff] %v9343_v52  ;;  %v2228_v26 = vsel %vm2220_vm9, %v2195_v2, %v13185_v63  ;;  %v2132_v30 = vsel %vm2125_vm6, %v13187_v16, %v1312_v62  ;;  %v13188_v63 = vld [vmem:[#allocation46_spill] sm:$0xff] }
 0x20d   : > { %v9348_v48 = vpop.permute.xlu1 %1479  ;;  %2077 = vrot.lane.b32.xlu0 %v9346_v51, %s13137_s9  ;;  %v2261_v13 = vsel %vm2253_vm10, %v2228_v26, %v1774_v56  ;;  %v2163_v15 = vsel %vm2156_vm7, %v2132_v30, %v13188_v63  ;;  %v1141_v26 = vrot.slane %v13181_v4, 5  ;;  %v1451_v30 = vrot.slane %v9376_v7, 2  ;;  %v13190_v4 = vld [vmem:[#allocation51_spill] sm:$0xff] }
 0x20f   : > { %1787 = vrot.lane.b32.xlu1 %v8889_v39, %s13138_s11  ;;  %v9354_v53 = vpop.permute.xlu0 %1973 }
 0x211   : > { %v1870_v32 = vpop.permute.xlu1 %1869  ;;  %1509 = vrot.lane.b32.xlu0 %v9321_v25, %s13132_s22 }
 0x213   : > { %1329 = vrot.lane.b32.xlu1 %v8898_v12, %s13131_s2  ;;  %v9368_v39 = vpop.permute.xlu0 %1690  ;;  %v13186_v12 = vld [vmem:[#allocation47_spill] sm:$0xff] }
 0x214   : > { %13183 = vst [vmem:[#allocation29_spill] sm:$0xff] %v9368_v39  ;;  %v2294_v39 = vsel %vm2286_vm11, %v2261_v13, %v1870_v32  ;;  %v9407_v32 = vsel %vm1223_vm1, %v1284_v60, %v1285_v44  ;;  %v1189_v13 = vsel %vm1033_vm0, %v1071_v57, %v1141_v26 }
 0x215   : > { %v9378_v46 = vpop.permute.xlu1 %1574  ;;  %1899 = vrot.lane.b32.xlu0 %v9373_v31, %s13135_s23  ;;  %v1287_v26 = vrot.slane %v1189_v13, 1 }
 0x217   : > { %1789 = vrot.lane.b32.xlu1 %v13186_v12, %s13138_s11  ;;  %v9386_v42 = vpop.permute.xlu0 %2063 }
 0x219   : > { %v1960_v52 = vpop.permute.xlu1 %1959  ;;  %1604 = vrot.lane.b32.xlu0 %v9373_v31, %s13129_s16 }
 0x21a   : > { %v2327_v2 = vsel %vm2319_vm12, %v2294_v39, %v1960_v52  ;;  %v13189_v52 = vld [vmem:[#allocation48_spill] sm:$0xff] }
 0x21b   : > { %1495 = vrot.lane.b32.xlu1 %v13186_v12, %s13132_s22  ;;  %v9401_v62 = vpop.permute.xlu0 %1692  ;;  %v2360_v56 = vsel %vm2352_vm13, %v2327_v2, %v8993_v59  ;;  %v2196_v39 = vsel %vm2187_vm8, %v2163_v15, %v13189_v52  ;;  %v1450_v59 = vrot.slane %v9373_v31, 2 }
 0x21c   : > { %7542 = vmatmul.mubr.msk.f32.gmra.mrb[6].mxu0 %vm2396_vm14, %v2360_v56  ;;  %v2229_v2 = vsel %vm2220_vm9, %v2196_v39, %v13190_v4 }
 0x21d   : > { %v1316_v16 = vpop.permute.xlu1 %1315  ;;  %1989 = vrot.lane.b32.xlu0 %v9407_v32, %s13136_s26  ;;  %v9431_v56 = vsel %vm1389_vm2, %v1450_v59, %v1451_v30 }
 0x21f   : > { %1885 = vrot.lane.b32.xlu1 %v8942_v11, %s13135_s23  ;;  %v9416_v12 = vpop.permute.xlu0 %2065 }
 0x221   : > { %v1776_v60 = vpop.permute.xlu1 %1775  ;;  %1706 = vrot.lane.b32.xlu0 %v9407_v32, %s13130_s5 }
 0x222   : > { %v2262_v15 = vsel %vm2253_vm10, %v2229_v2, %v1776_v60 }
 0x223   : > { %v2295_v63 = vsel %vm2286_vm11, %v2262_v15, %v9020_v38  ;;  %1590 = vrot.lane.b32.xlu1 %v8942_v11, %s13129_s16  ;;  %v9441_v60 = vpop.permute.xlu0 %1497  ;;  %v9447_v38 = vsel %vm1223_vm1, %v1285_v44, %v1287_v26  ;;  %v13193_v44 = vld [vmem:[#allocation32_spill] sm:$0xff] }
 0x224   : > { %v2328_v57 = vsel %vm2319_vm12, %v2295_v63, %v9039_v47  ;;  %13191 = vst [vmem:[#allocation31_spill] sm:$0xff] %v9441_v60  ;;  %v1453_v47 = vrot.slane %v1189_v13, 2  ;;  %v998_v13 = vrot.slane %v13193_v44, 1  ;;  %v1073_v15 = vrot.slane %v13193_v44, 7  ;;  %v13194_v63 = vld [vmem:[#allocation33_spill] sm:$0xff] }
 0x225   : > { %v9435_v52 = vpop.permute.xlu1 %1317  ;;  %2079 = vrot.lane.b32.xlu0 %v9431_v56, %s13137_s9  ;;  %v2361_v39 = vsel %vm2352_vm13, %v2328_v57, %v9062_v37  ;;  %v1074_v57 = vrot.slane %v13194_v63, 7 }
 0x226   : > { %7544 = vmatprep.mubr.msk.f32.mxu0 %vm2396_vm14, %v2361_v39  ;;  %v9456_v37 = vsel %vm1389_vm2, %v1451_v30, %v1453_v47  ;;  %v13195_v30 = vld [vmem:[#allocation23_spill] sm:$0xff]  ;;  %v9481_v44 = vsel %vm1033_vm0, %v998_v13, %v1073_v15 }
 0x227   : > { %1975 = vrot.lane.b32.xlu1 %v9015_v3, %s13136_s26  ;;  %v9453_v4 = vpop.permute.xlu0 %1887  ;;  %13192 = vst [vmem:[#allocation45_spill] sm:$0xff] %v9456_v37  ;;  %v2133_v26 = vsel %vm2125_vm6, %v13195_v30, %v9325_v43  ;;  %13197 = vst [vmem:[#allocation24_spill] sm:$0xff] %v9481_v44  ;;  %v9484_v31 = vsel %vm1033_vm0, %v1073_v15, %v1074_v57  ;;  %v13198_v43 = vld [vmem:[#allocation52_spill] sm:$0xff]  ;;  %v1289_v15 = vrot.slane %v9481_v44, 1 }
 0x228   : > { %v2164_v47 = vsel %vm2156_vm7, %v2133_v26, %v9348_v48  ;;  %v13199_v48 = vld [vmem:[#allocation54_spill] sm:$0xff] }
 0x229   : > { %v1778_v59 = vpop.permute.xlu1 %1777  ;;  %1708 = vrot.lane.b32.xlu0 %v9447_v38, %s13130_s5 }
 0x22b   : > { %1331 = vrot.lane.b32.xlu1 %v8971_v27, %s13131_s2  ;;  %v9472_v39 = vpop.permute.xlu0 %1592 }
 0x22c   : > { %13196 = vst [vmem:[#allocation47_spill] sm:$0xff] %v9472_v39 }
 0x22d   : > { %v9458_v2 = vpop.permute.xlu1 %1483  ;;  %2081 = vrot.lane.b32.xlu0 %v9456_v37, %s13137_s9 }
 0x22f   : > { %1791 = vrot.lane.b32.xlu1 %v9002_v14, %s13138_s11  ;;  %v2197_v14 = vsel %vm2187_vm8, %v2164_v47, %v9378_v46  ;;  %v9495_v13 = vpop.permute.xlu0 %1977  ;;  %v1290_v47 = vrot.slane %v9484_v31, 1 }
 0x230   : > { %v2230_v30 = vsel %vm2220_vm9, %v2197_v14, %v13198_v43  ;;  %v13201_v43 = vld [vmem:[#allocation53_spill] sm:$0xff] }
 0x231   : > { %v1874_v27 = vpop.permute.xlu1 %1873  ;;  %1513 = vrot.lane.b32.xlu0 %v9431_v56, %s13132_s22  ;;  %v2263_v46 = vsel %vm2253_vm10, %v2230_v30, %v1778_v59  ;;  %v9511_v59 = vsel %vm1223_vm1, %v1289_v15, %v1290_v47 }
 0x232   : > { %v2296_v39 = vsel %vm2286_vm11, %v2263_v46, %v1874_v27  ;;  %v1142_v27 = vrot.slane %v13194_v63, 5  ;;  %v13204_v63 = vld [vmem:[#allocation57_spill] sm:$0xff] }
 0x233   : > { %1333 = vrot.lane.b32.xlu1 %v9015_v3, %s13131_s2  ;;  %v13200_v3 = vld [vmem:[#allocation25_spill] sm:$0xff] }
 0x234   : > { %v2134_v26 = vsel %vm2125_vm6, %v13200_v3, %v1316_v16  ;;  %v1190_v46 = vsel %vm1033_vm0, %v1074_v57, %v1142_v27 }
 0x235   : > { %v1579_v11 = vpop.permute.xlu1 %1578  ;;  %1903 = vrot.lane.b32.xlu0 %v9481_v44, %s13135_s23  ;;  %v2165_v37 = vsel %vm2156_vm7, %v2134_v26, %v13201_v43  ;;  %v1456_v26 = vrot.slane %v9484_v31, 2  ;;  %v1292_v27 = vrot.slane %v1190_v46, 1 }
 0x237   : > { %1793 = vrot.lane.b32.xlu1 %v13199_v48, %s13138_s11 }
 0x239   : > { %v1964_v60 = vpop.permute.xlu1 %1963  ;;  %1608 = vrot.lane.b32.xlu0 %v9481_v44, %s13129_s16 }
 0x23a   : > { %v2329_v14 = vsel %vm2319_vm12, %v2296_v39, %v1964_v60  ;;  %v9516_v60 = vpop.permute.xlu0 %1694  ;;  %v13202_v39 = vld [vmem:[#allocation55_spill] sm:$0xff] }
 0x23b   : > { %1499 = vrot.lane.b32.xlu1 %v13199_v48, %s13132_s22  ;;  %v2362_v16 = vsel %vm2352_vm13, %v2329_v14, %v9082_v61  ;;  %v2198_v3 = vsel %vm2187_vm8, %v2165_v37, %v13202_v39  ;;  %v13203_v48 = vld [vmem:[#allocation58_spill] sm:$0xff]  ;;  %v1455_v61 = vrot.slane %v9481_v44, 2 }
 0x23c   : > { %7545 = vmatmul.mubr.msk.f32.gmra.mrb[8].mxu0 %vm2396_vm14, %v2362_v16  ;;  %v2231_v14 = vsel %vm2220_vm9, %v2198_v3, %v13204_v63 }
 0x23d   : > { %v1320_v30 = vpop.permute.xlu1 %1319  ;;  %1993 = vrot.lane.b32.xlu0 %v9511_v59, %s13136_s26  ;;  %v9537_v39 = vsel %vm1389_vm2, %v1455_v61, %v1456_v26  ;;  %v9551_v61 = vsel %vm1223_vm1, %v1290_v47, %v1292_v27  ;;  %v13208_v47 = vld [vmem:[#allocation34_spill] sm:$0xff]  ;;  %v13209_v27 = vld [vmem:[#allocation36_spill] sm:$0xff] }
 0x23e   : > { %v9534_v16 = vpop.permute.xlu0 %2067 }
 0x23f   : > { %1889 = vrot.lane.b32.xlu1 %v13203_v48, %s13135_s23 }
 0x241   : > { %v1780_v15 = vpop.permute.xlu1 %1779  ;;  %1710 = vrot.lane.b32.xlu0 %v9511_v59, %s13130_s5 }
 0x242   : > { %v2264_v43 = vsel %vm2253_vm10, %v2231_v14, %v1780_v15  ;;  %v1458_v15 = vrot.slane %v1190_v46, 2  ;;  %v13206_v14 = vld [vmem:[#allocation60_spill] sm:$0xff]  ;;  %v999_v46 = vrot.slane %v13208_v47, 1 }
 0x243   : > { %v2297_v37 = vsel %vm2286_vm11, %v2264_v43, %v9113_v23  ;;  %1594 = vrot.lane.b32.xlu1 %v13203_v48, %s13129_s16 }
 0x244   : > { %v2330_v57 = vsel %vm2319_vm12, %v2297_v37, %v9137_v36  ;;  %v9555_v36 = vpop.permute.xlu0 %1696  ;;  %v1076_v37 = vrot.slane %v13208_v47, 7 }
 0x245   : > { %v9541_v3 = vpop.permute.xlu1 %1321  ;;  %2083 = vrot.lane.b32.xlu0 %v9537_v39, %s13137_s9  ;;  %v2363_v23 = vsel %vm2352_vm13, %v2330_v57, %v9171_v54  ;;  %13205 = vst [vmem:[#allocation46_spill] sm:$0xff] %v9555_v36  ;;  %v9560_v54 = vsel %vm1389_vm2, %v1456_v26, %v1458_v15  ;;  %v13210_v26 = vld [vmem:[#allocation26_spill] sm:$0xff] }
 0x246   : > { %7547 = vmatprep.mubr.msk.f32.mxu0 %vm2396_vm14, %v2363_v23  ;;  %13207 = vst [vmem:[#allocation48_spill] sm:$0xff] %v9560_v54  ;;  %v1077_v23 = vrot.slane %v13209_v27, 7  ;;  %v2135_v15 = vsel %vm2125_vm6, %v13210_v26, %v9435_v52  ;;  %v9584_v47 = vsel %vm1033_vm0, %v999_v46, %v1076_v37  ;;  %v13211_v52 = vld [vmem:[#allocation59_spill] sm:$0xff] }
 0x247   : > { %1979 = vrot.lane.b32.xlu1 %v9117_v29, %s13136_s26  ;;  %v2166_v44 = vsel %vm2156_vm7, %v2135_v15, %v9458_v2  ;;  %v1294_v46 = vrot.slane %v9584_v47, 1 }
 0x248   : > { %v9570_v57 = vpop.permute.xlu0 %2069  ;;  %v9587_v48 = vsel %vm1033_vm0, %v1076_v37, %v1077_v23 }
 0x249   : > { %v1782_v63 = vpop.permute.xlu1 %1781  ;;  %1712 = vrot.lane.b32.xlu0 %v9551_v61, %s13130_s5  ;;  %v1295_v37 = vrot.slane %v9587_v48, 1 }
 0x24b   : > { %1335 = vrot.lane.b32.xlu1 %v13206_v14, %s13131_s2 }
 0x24c   : > { %v9591_v36 = vpop.permute.xlu0 %1501 }
 0x24d   : > { %v9562_v43 = vpop.permute.xlu1 %1487  ;;  %2085 = vrot.lane.b32.xlu0 %v9560_v54, %s13137_s9 }
 0x24f   : > { %1795 = vrot.lane.b32.xlu1 %v9101_v19, %s13138_s11  ;;  %v2199_v19 = vsel %vm2187_vm8, %v2166_v44, %v1579_v11 }
 0x250   : > { %v2232_v2 = vsel %vm2220_vm9, %v2199_v19, %v13211_v52 }
 0x251   : > { %v1878_v14 = vpop.permute.xlu1 %1877  ;;  %1517 = vrot.lane.b32.xlu0 %v9537_v39, %s13132_s22  ;;  %v2265_v44 = vsel %vm2253_vm10, %v2232_v2, %v1782_v63  ;;  %v9612_v63 = vpop.permute.xlu0 %1891  ;;  %v1143_v2 = vrot.slane %v13209_v27, 5 }
 0x252   : > { %v2298_v26 = vsel %vm2286_vm11, %v2265_v44, %v1878_v14  ;;  %v9616_v14 = vsel %vm1223_vm1, %v1294_v46, %v1295_v37 }
 0x253   : > { %1337 = vrot.lane.b32.xlu1 %v9117_v29, %s13131_s2  ;;  %v13212_v29 = vld [vmem:[#allocation27_spill] sm:$0xff] }
 0x254   : > { %v2136_v11 = vsel %vm2125_vm6, %v13212_v29, %v1320_v30 }
 0x255   : > { %v1583_v54 = vpop.permute.xlu1 %1582  ;;  %1907 = vrot.lane.b32.xlu0 %v9584_v47, %s13135_s23  ;;  %v2167_v52 = vsel %vm2156_vm7, %v2136_v11, %v9096_v55  ;;  %v1191_v11 = vsel %vm1033_vm0, %v1077_v23, %v1143_v2  ;;  %v9632_v46 = vpop.permute.xlu0 %1596 }
 0x256   : > { %v2200_v55 = vsel %vm2187_vm8, %v2167_v52, %v9126_v45 }
 0x257   : > { %1797 = vrot.lane.b32.xlu1 %v9129_v34, %s13138_s11  ;;  %v2233_v27 = vsel %vm2220_vm9, %v2200_v55, %v9151_v50  ;;  %v1297_v50 = vrot.slane %v1191_v11, 1 }
 0x259   : > { %v1968_v15 = vpop.permute.xlu1 %1967  ;;  %1612 = vrot.lane.b32.xlu0 %v9584_v47, %s13129_s16 }
 0x25a   : > { %v2331_v19 = vsel %vm2319_vm12, %v2298_v26, %v1968_v15 }
 0x25b   : > { %1503 = vrot.lane.b32.xlu1 %v9129_v34, %s13132_s22  ;;  %v2364_v30 = vsel %vm2352_vm13, %v2331_v19, %v9196_v10  ;;  %v1460_v34 = vrot.slane %v9584_v47, 2  ;;  %v1461_v10 = vrot.slane %v9587_v48, 2 }
 0x25c   : > { %7548 = vmatmul.mubr.msk.f32.gmra.mrb[10].mxu0 %vm2396_vm14, %v2364_v30  ;;  %v9656_v30 = vsel %vm1223_vm1, %v1295_v37, %v1297_v50  ;;  %v13213_v37 = vld [vmem:[#allocation37_spill] sm:$0xff] }
 0x25d   : > { %v1324_v29 = vpop.permute.xlu1 %1323  ;;  %1997 = vrot.lane.b32.xlu0 %v9616_v14, %s13136_s26  ;;  %v9640_v15 = vsel %vm1389_vm2, %v1460_v34, %v1461_v10 }
 0x25f   : > { %1893 = vrot.lane.b32.xlu1 %v9159_v5, %s13135_s23 }
 0x261   : > { %v1784_v44 = vpop.permute.xlu1 %1783  ;;  %1714 = vrot.lane.b32.xlu0 %v9616_v14, %s13130_s5 }
 0x262   : > { %v2266_v45 = vsel %vm2253_vm10, %v2233_v27, %v1784_v44 }
 0x263   : > { %v2299_v26 = vsel %vm2286_vm11, %v2266_v45, %v9217_v17  ;;  %1598 = vrot.lane.b32.xlu1 %v9159_v5, %s13129_s16  ;;  %v9653_v17 = vpop.permute.xlu0 %1981 }
 0x264   : > { %v2332_v23 = vsel %vm2319_vm12, %v2299_v26, %v9246_v49  ;;  %v1463_v49 = vrot.slane %v1191_v11, 2  ;;  %v1000_v11 = vrot.slane %v13213_v37, 1 }
 0x265   : > { %v9644_v19 = vpop.permute.xlu1 %1325  ;;  %2087 = vrot.lane.b32.xlu0 %v9640_v15, %s13137_s9  ;;  %v2365_v52 = vsel %vm2352_vm13, %v2332_v23, %v9274_v9 }
 0x266   : > { %7550 = vmatprep.mubr.msk.f32.mxu0 %vm2396_vm14, %v2365_v52  ;;  %v9663_v9 = vsel %vm1389_vm2, %v1461_v10, %v1463_v49 }
 0x267   : > { %1983 = vrot.lane.b32.xlu1 %v9222_v28, %s13136_s26  ;;  %v9669_v34 = vpop.permute.xlu0 %1698 }
 0x269   : > { %v1786_v2 = vpop.permute.xlu1 %1785  ;;  %1716 = vrot.lane.b32.xlu0 %v9656_v30, %s13130_s5 }
 0x26b   : > { %1339 = vrot.lane.b32.xlu1 %v9187_v33, %s13131_s2  ;;  %v13214_v33 = vld [vmem:[#allocation28_spill] sm:$0xff]  ;;  %v9684_v26 = vpop.permute.xlu0 %2071 }
 0x26c   : > { %v2137_v10 = vsel %vm2125_vm6, %v13214_v33, %v9541_v3 }
 0x26d   : > { %v9665_v55 = vpop.permute.xlu1 %1491  ;;  %2089 = vrot.lane.b32.xlu0 %v9663_v9, %s13137_s9  ;;  %v2168_v27 = vsel %vm2156_vm7, %v2137_v10, %v9562_v43  ;;  %v13216_v43 = vld [vmem:[#allocation35_spill] sm:$0xff] }
 0x26e   : > { %v2201_v45 = vsel %vm2187_vm8, %v2168_v27, %v1583_v54 }
 0x26f   : > { %1799 = vrot.lane.b32.xlu1 %v9208_v8, %s13138_s11  ;;  %v13215_v8 = vrot.slane %v13213_v37, 7  ;;  %v2234_v3 = vsel %vm2220_vm9, %v2201_v45, %v9184_v22 }
 0x270   : > { %v2267_v54 = vsel %vm2253_vm10, %v2234_v3, %v1786_v2 }
 0x271   : > { %v1882_v44 = vpop.permute.xlu1 %1881  ;;  %1521 = vrot.lane.b32.xlu0 %v9640_v15, %s13132_s22  ;;  %v1176_v23 = vsel %vm1033_vm0, %v1000_v11, %v13215_v8  ;;  %v9699_v11 = vpop.permute.xlu0 %1700 }
 0x272   : > { %v1653_v52 = vrot.slane %v1176_v23, 1  ;;  %v2300_v49 = vsel %vm2286_vm11, %v2267_v54, %v1882_v44  ;;  %v13217_v44 = vld [vmem:[#allocation38_spill] sm:$0xff]  ;;  %v1754_v3 = vrot.slane %v1176_v23, 2 }
 0x273   : > { %1341 = vrot.lane.b32.xlu1 %v9222_v28, %s13131_s2  ;;  %v2138_v28 = vsel %vm2125_vm6, %v13216_v43, %v1324_v29  ;;  %v13218_v27 = vrot.slane %v13217_v44, 1 }
 0x274   : > { %v2169_v22 = vsel %vm2156_vm7, %v2138_v28, %v9205_v40 }
 0x275   : > { %v1587_v50 = vpop.permute.xlu1 %1586  ;;  %1911 = vrot.lane.b32.xlu0 %v1176_v23, %s13135_s23  ;;  %v1655_v45 = vsel %vm1223_vm1, %v1653_v52, %v13218_v27  ;;  %v2202_v40 = vsel %vm2187_vm8, %v2169_v22, %v9232_v35 }
 0x276   : > { %v2235_v28 = vsel %vm2220_vm9, %v2202_v40, %v9255_v21 }
 0x277   : > { %1801 = vrot.lane.b32.xlu1 %v9237_v24, %s13138_s11 }
 0x279   : > { %v1972_v37 = vpop.permute.xlu1 %1971  ;;  %1616 = vrot.lane.b32.xlu0 %v1176_v23, %s13129_s16 }
 0x27a   : > { %v2333_v33 = vsel %vm2319_vm12, %v2300_v49, %v1972_v37  ;;  %v9702_v10 = vpop.f32.mrb[0].mxu0 }
 0x27b   : > { %1507 = vrot.lane.b32.xlu1 %v9237_v24, %s13132_s22  ;;  %v9708_v29 = vpop.f32.mrb[1].mxu0  ;;  %v2366_v2 = vsel %vm2352_vm13, %v2333_v33, %v9304_v1  ;;  %v9721_v24 = vpop.permute.xlu0 %2073  ;;  %v1755_v1 = vrot.slane %v13217_v44, 2 }
 0x27c   : > { %7551 = vmatmul.mubr.msk.f32.gmra.mrb[12].mxu0 %vm2396_vm14, %v2366_v2 }
 0x27d   : > { %v1328_v8 = vpop.permute.xlu1 %1327  ;;  %2001 = vrot.lane.b32.xlu0 %v1655_v45, %s13136_s26  ;;  %v1756_v35 = vsel %vm1389_vm2, %v1754_v3, %v1755_v1 }
 0x27f   : > { %1897 = vrot.lane.b32.xlu1 %v9261_v20, %s13135_s23  ;;  %v9738_v37 = vpop.permute.xlu0 %1505 }
 0x281   : > { %v1788_v43 = vpop.permute.xlu1 %1787  ;;  %1718 = vrot.lane.b32.xlu0 %v1655_v45, %s13130_s5  ;;  %v2139_v45 = vsel %vm2125_vm6, %v8758_v0, %v9644_v19  ;;  %v13220_v0 = vld [vmem:[#allocation41_spill] sm:$0xff] }
 0x282   : > { %v2268_v54 = vsel %vm2253_vm10, %v2235_v28, %v1788_v43  ;;  %v2140_v19 = vsel %vm2125_vm6, %v13220_v0, %v1328_v8 }
 0x283   : > { %v2301_v52 = vsel %vm2286_vm11, %v2268_v54, %v9334_v18  ;;  %1602 = vrot.lane.b32.xlu1 %v9261_v20, %s13129_s16  ;;  %v13219_v18 = vld [vmem:[#allocation39_spill] sm:$0xff] }
 0x284   : > { %v2334_v23 = vsel %vm2319_vm12, %v2301_v52, %v9354_v53  ;;  %v1757_v33 = vrot.slane %v13219_v18, 2  ;;  %v9747_v53 = vpop.permute.xlu0 %1895 }
 0x285   : > { %v1330_v49 = vpop.permute.xlu1 %1329  ;;  %2091 = vrot.lane.b32.xlu0 %v1756_v35, %s13137_s9  ;;  %v2367_v21 = vsel %vm2352_vm13, %v2334_v23, %v9386_v42  ;;  %v13222_v23 = vld [vmem:[#allocation44_spill] sm:$0xff] }
 0x286   : > { %7553 = vmatprep.mubr.msk.f32.mxu0 %vm2396_vm14, %v2367_v21  ;;  %v9750_v2 = vsel %vm1389_vm2, %v1755_v1, %v1757_v33  ;;  %v13223_v33 = vld [vmem:[#allocation29_spill] sm:$0xff] }
 0x287   : > { %1987 = vrot.lane.b32.xlu1 %v9337_v41, %s13136_s26 }
 0x288   : > { %v9759_v40 = vpop.permute.xlu0 %1600 }
 0x289   : > { %v1790_v22 = vpop.permute.xlu1 %1789  ;;  %1819 = vrot.lane.b32.xlu0 %v1756_v35, %s13138_s11 }
 0x28b   : > { %1343 = vrot.lane.b32.xlu1 %v9295_v58, %s13131_s2  ;;  %v2170_v58 = vsel %vm2156_vm7, %v2139_v45, %v9665_v55 }
 0x28c   : > { %v2203_v3 = vsel %vm2187_vm8, %v2170_v58, %v1587_v50  ;;  %v13221_v50 = vld [vmem:[#allocation43_spill] sm:$0xff] }
 0x28d   : > { %v1496_v42 = vpop.permute.xlu1 %1495  ;;  %1821 = vrot.lane.b32.xlu0 %v9750_v2, %s13138_s11  ;;  %v2236_v43 = vsel %vm2220_vm9, %v2203_v3, %v9289_v6  ;;  %v2171_v52 = vsel %vm2156_vm7, %v2140_v19, %v13221_v50 }
 0x28e   : > { %v2269_v28 = vsel %vm2253_vm10, %v2236_v43, %v1790_v22  ;;  %v2204_v21 = vsel %vm2187_vm8, %v2171_v52, %v13222_v23  ;;  %v13226_v23 = vld [vmem:[#allocation49_spill] sm:$0xff] }
 0x28f   : > { %1803 = vrot.lane.b32.xlu1 %v9321_v25, %s13138_s11  ;;  %v9770_v25 = vpop.permute.xlu0 %1985  ;;  %v2237_v22 = vsel %vm2220_vm9, %v2204_v21, %v13223_v33 }
 0x291   : > { %v1886_v27 = vpop.permute.xlu1 %1885 }
 0x292   : > { %v2302_v55 = vsel %vm2286_vm11, %v2269_v28, %v1886_v27 }
 0x293   : > { %1345 = vrot.lane.b32.xlu1 %v9337_v41, %s13131_s2  ;;  %v9784_v8 = vpop.permute.xlu0 %1702 }
 0x295   : > { %v1591_v1 = vpop.permute.xlu1 %1590 }
 0x297   : > { %1805 = vrot.lane.b32.xlu1 %v9346_v51, %s13138_s11  ;;  %v9797_v27 = vpop.permute.xlu0 %2075 }
 0x299   : > { %v1976_v54 = vpop.permute.xlu1 %1975 }
 0x29a   : > { %v2335_v41 = vsel %vm2319_vm12, %v2302_v55, %v1976_v54  ;;  %v13224_v55 = vld [vmem:[#allocation42_spill] sm:$0xff] }
 0x29b   : > { %1511 = vrot.lane.b32.xlu1 %v9346_v51, %s13132_s22  ;;  %v2368_v6 = vsel %vm2352_vm13, %v2335_v41, %v9416_v12  ;;  %v9806_v0 = vpop.permute.xlu0 %1704  ;;  %v2141_v54 = vsel %vm2125_vm6, %v13224_v55, %v1330_v49 }
 0x29c   : > { %7554 = vmatmul.mubr.msk.f32.gmra.mrb[14].mxu0 %vm2396_vm14, %v2368_v6  ;;  %v2172_v41 = vsel %vm2156_vm7, %v2141_v54, %v1496_v42  ;;  %v13225_v6 = vld [vmem:[#allocation45_spill] sm:$0xff] }
 0x29d   : > { %v1332_v35 = vpop.permute.xlu1 %1331 }
 0x29e   : > { %v2142_v21 = vsel %vm2125_vm6, %v13226_v23, %v1332_v35  ;;  %v13229_v23 = vld [vmem:[#allocation50_spill] sm:$0xff] }
 0x29f   : > { %1901 = vrot.lane.b32.xlu1 %v9376_v7, %s13135_s23 }
 0x2a1   : > { %v1792_v18 = vpop.permute.xlu1 %1791 }
 0x2a2   : > { %v2270_v51 = vsel %vm2253_vm10, %v2237_v22, %v1792_v18 }
 0x2a3   : > { %v2303_v12 = vsel %vm2286_vm11, %v2270_v51, %v9453_v4  ;;  %1606 = vrot.lane.b32.xlu1 %v9376_v7, %s13129_s16  ;;  %v13228_v51 = vld [vmem:[#allocation47_spill] sm:$0xff] }
 0x2a4   : > { %v2336_v45 = vsel %vm2319_vm12, %v2303_v12, %v9495_v13 }
 0x2a5   : > { %v1334_v58 = vpop.permute.xlu1 %1333  ;;  %v2369_v3 = vsel %vm2352_vm13, %v2336_v45, %v9534_v16  ;;  %v9816_v16 = vpop.permute.xlu0 %2077 }
 0x2a6   : > { %7556 = vmatprep.mubr.msk.f32.mxu0 %vm2396_vm14, %v2369_v3 }
 0x2a7   : > { %1991 = vrot.lane.b32.xlu1 %v9447_v38, %s13136_s26 }
 0x2a9   : > { %v1794_v43 = vpop.permute.xlu1 %1793  ;;  %v9824_v52 = vpop.permute.xlu0 %1509 }
 0x2ab   : > { %1347 = vrot.lane.b32.xlu1 %v9407_v32, %s13131_s2  ;;  %v2205_v32 = vsel %vm2187_vm8, %v2172_v41, %v1591_v1  ;;  %v13227_v1 = vld [vmem:[#allocation31_spill] sm:$0xff] }
 0x2ac   : > { %v2173_v33 = vsel %vm2156_vm7, %v2142_v21, %v13227_v1  ;;  %v2143_v21 = vsel %vm2125_vm6, %v13229_v23, %v1334_v58  ;;  %v13231_v1 = vld [vmem:[#allocation48_spill] sm:$0xff] }
 0x2ad   : > { %v1500_v4 = vpop.permute.xlu1 %1499  ;;  %v9841_v22 = vpop.permute.xlu0 %1899  ;;  %v2206_v12 = vsel %vm2187_vm8, %v2173_v33, %v13228_v51  ;;  %v13232_v33 = vld [vmem:[#allocation56_spill] sm:$0xff] }
 0x2ae   : > { %v9810_v19 = vpop.f32.mrb[2].mxu0  ;;  %v2239_v3 = vsel %vm2220_vm9, %v2206_v12, %v9516_v60 }
 0x2af   : > { %1807 = vrot.lane.b32.xlu1 %v9431_v56, %s13138_s11  ;;  %v9814_v13 = vpop.f32.mrb[3].mxu0  ;;  %v2238_v56 = vsel %vm2220_vm9, %v2205_v32, %v9401_v62 }
 0x2b0   : > { %v2271_v49 = vsel %vm2253_vm10, %v2238_v56, %v1794_v43 }
 0x2b1   : > { %v1890_v28 = vpop.permute.xlu1 %1889  ;;  %v9850_v43 = vpop.permute.xlu0 %1604 }
 0x2b2   : > { %v2304_v42 = vsel %vm2286_vm11, %v2271_v49, %v1890_v28  ;;  %v2174_v49 = vsel %vm2156_vm7, %v2143_v21, %v1500_v4 }
 0x2b3   : > { %1349 = vrot.lane.b32.xlu1 %v9447_v38, %s13131_s2 }
 0x2b5   : > { %v1595_v50 = vpop.permute.xlu1 %1594  ;;  %v9864_v60 = vpop.permute.xlu0 %1989 }
 0x2b7   : > { %1809 = vrot.lane.b32.xlu1 %v13225_v6, %s13138_s11 }
 0x2b9   : > { %v1980_v18 = vpop.permute.xlu1 %1979  ;;  %v9868_v56 = vpop.permute.xlu0 %1706 }
 0x2ba   : > { %v2337_v38 = vsel %vm2319_vm12, %v2304_v42, %v1980_v18  ;;  %v2207_v42 = vsel %vm2187_vm8, %v2174_v49, %v1595_v50 }
 0x2bb   : > { %1515 = vrot.lane.b32.xlu1 %v13225_v6, %s13132_s22  ;;  %v2370_v62 = vsel %vm2352_vm13, %v2337_v38, %v9570_v57  ;;  %v13230_v38 = vld [vmem:[#allocation46_spill] sm:$0xff] }
 0x2bc   : > { %7557 = vmatmul.mubr.msk.f32.gmra.mrb[16].mxu0 %vm2396_vm14, %v2370_v62 }
 0x2bd   : > { %v1336_v35 = vpop.permute.xlu1 %1335 }
 0x2be   : > { %v2144_v62 = vsel %vm2125_vm6, %v13232_v33, %v1336_v35 }
 0x2bf   : > { %1905 = vrot.lane.b32.xlu1 %v9484_v31, %s13135_s23  ;;  %v2175_v50 = vsel %vm2156_vm7, %v2144_v62, %v9591_v36  ;;  %v13234_v62 = vld [vmem:[#allocation61_spill] sm:$0xff] }
 0x2c1   : > { %v1796_v45 = vpop.permute.xlu1 %1795 }
 0x2c2   : > { %v2272_v28 = vsel %vm2253_vm10, %v2239_v3, %v1796_v45  ;;  %v2208_v3 = vsel %vm2187_vm8, %v2175_v50, %v9632_v46 }
 0x2c3   : > { %v2305_v57 = vsel %vm2286_vm11, %v2272_v28, %v9612_v63  ;;  %1610 = vrot.lane.b32.xlu1 %v9484_v31, %s13129_s16  ;;  %v2241_v36 = vsel %vm2220_vm9, %v2208_v3, %v9669_v34 }
 0x2c4   : > { %v2338_v55 = vsel %vm2319_vm12, %v2305_v57, %v9653_v17 }
 0x2c5   : > { %v1338_v54 = vpop.permute.xlu1 %1337  ;;  %v2371_v41 = vsel %vm2352_vm13, %v2338_v55, %v9684_v26 }
 0x2c6   : > { %7559 = vmatprep.mubr.msk.f32.mxu0 %vm2396_vm14, %v2371_v41 }
 0x2c7   : > { %1995 = vrot.lane.b32.xlu1 %v9551_v61, %s13136_s26 }
 0x2c9   : > { %v1798_v32 = vpop.permute.xlu1 %1797 }
 0x2cb   : > { %1351 = vrot.lane.b32.xlu1 %v9511_v59, %s13131_s2  ;;  %v9881_v59 = vpop.permute.xlu0 %2079 }
 0x2cd   : > { %v1504_v63 = vpop.permute.xlu1 %1503 }
 0x2cf   : > { %1811 = vrot.lane.b32.xlu1 %v9537_v39, %s13138_s11  ;;  %v9872_v17 = vpop.f32.mrb[4].mxu0  ;;  %v2240_v39 = vsel %vm2220_vm9, %v2207_v42, %v13230_v38  ;;  %v13233_v42 = vld [vmem:[#allocation58_spill] sm:$0xff] }
 0x2d0   : > { %v9874_v26 = vpop.f32.mrb[5].mxu0  ;;  %v2273_v58 = vsel %vm2253_vm10, %v2240_v39, %v1798_v32  ;;  %v2145_v38 = vsel %vm2125_vm6, %v13233_v42, %v1338_v54 }
 0x2d1   : > { %v1894_v6 = vpop.permute.xlu1 %1893  ;;  %v2176_v39 = vsel %vm2156_vm7, %v2145_v38, %v1504_v63 }
 0x2d2   : > { %v2306_v4 = vsel %vm2286_vm11, %v2273_v58, %v1894_v6 }
 0x2d3   : > { %1353 = vrot.lane.b32.xlu1 %v9551_v61, %s13131_s2  ;;  %v9892_v61 = vpop.permute.xlu0 %1708 }
 0x2d5   : > { %v1599_v18 = vpop.permute.xlu1 %1598 }
 0x2d7   : > { %1813 = vrot.lane.b32.xlu1 %v13231_v1, %s13138_s11  ;;  %v9906_v28 = vpop.permute.xlu0 %2081 }
 0x2d9   : > { %v1984_v51 = vpop.permute.xlu1 %1983 }
 0x2da   : > { %v2339_v12 = vsel %vm2319_vm12, %v2306_v4, %v1984_v51 }
 0x2db   : > { %1519 = vrot.lane.b32.xlu1 %v13231_v1, %s13132_s22  ;;  %v2372_v45 = vsel %vm2352_vm13, %v2339_v12, %v9721_v24  ;;  %v9919_v6 = vpop.permute.xlu0 %1513 }
 0x2dc   : > { %7560 = vmatmul.mubr.msk.f32.gmra.mrb[18].mxu0 %vm2396_vm14, %v2372_v45 }
 0x2dd   : > { %v1340_v35 = vpop.permute.xlu1 %1339 }
 0x2de   : > { %v2146_v58 = vsel %vm2125_vm6, %v13234_v62, %v1340_v35 }
 0x2df   : > { %1909 = vrot.lane.b32.xlu1 %v9587_v48, %s13135_s23 }
 0x2e1   : > { %v1800_v57 = vpop.permute.xlu1 %1799 }
 0x2e2   : > { %v2274_v55 = vsel %vm2253_vm10, %v2241_v36, %v1800_v57 }
 0x2e3   : > { %v2307_v24 = vsel %vm2286_vm11, %v2274_v55, %v9747_v53  ;;  %1614 = vrot.lane.b32.xlu1 %v9587_v48, %s13129_s16  ;;  %v9926_v53 = vpop.permute.xlu0 %1903 }
 0x2e4   : > { %v2340_v46 = vsel %vm2319_vm12, %v2307_v24, %v9770_v25 }
 0x2e5   : > { %v1342_v41 = vpop.permute.xlu1 %1341  ;;  %v2373_v32 = vsel %vm2352_vm13, %v2340_v46, %v9797_v27 }
 0x2e6   : > { %7562 = vmatprep.mubr.msk.f32.mxu0 %vm2396_vm14, %v2373_v32  ;;  %v2147_v46 = vsel %vm2125_vm6, %v9159_v5, %v1342_v41 }
 0x2e7   : > { %1999 = vrot.lane.b32.xlu1 %v9656_v30, %s13136_s26  ;;  %v9934_v49 = vpop.permute.xlu0 %1608 }
 0x2e9   : > { %v1802_v34 = vpop.permute.xlu1 %1801 }
 0x2eb   : > { %1355 = vrot.lane.b32.xlu1 %v9616_v14, %s13131_s2  ;;  %v2209_v14 = vsel %vm2187_vm8, %v2176_v39, %v1599_v18  ;;  %v1994_v33 = vpop.permute.xlu0 %1993  ;;  %v2177_v18 = vsel %vm2156_vm7, %v2146_v58, %v9738_v37 }
 0x2ec   : > { %v2210_v50 = vsel %vm2187_vm8, %v2177_v18, %v9759_v40 }
 0x2ed   : > { %v1508_v23 = vpop.permute.xlu1 %1507  ;;  %v2243_v37 = vsel %vm2220_vm9, %v2210_v50, %v9784_v8  ;;  %v13235_v8 = vld [vmem:[#allocation40_spill] sm:$0xff] }
 0x2ee   : > { %v2178_v32 = vsel %vm2156_vm7, %v2147_v46, %v1508_v23 }
 0x2ef   : > { %1815 = vrot.lane.b32.xlu1 %v9640_v15, %s13138_s11  ;;  %v9930_v25 = vpop.f32.mrb[6].mxu0  ;;  %v2242_v15 = vsel %vm2220_vm9, %v2209_v14, %v9699_v11  ;;  %v9958_v12 = vpop.permute.xlu0 %1710 }
 0x2f0   : > { %v9932_v27 = vpop.f32.mrb[7].mxu0  ;;  %v2275_v54 = vsel %vm2253_vm10, %v2242_v15, %v1802_v34 }
 0x2f1   : > { %v1898_v21 = vpop.permute.xlu1 %1897 }
 0x2f2   : > { %v2308_v63 = vsel %vm2286_vm11, %v2275_v54, %v1898_v21 }
 0x2f3   : > { %1357 = vrot.lane.b32.xlu1 %v9656_v30, %s13131_s2  ;;  %v2084_v35 = vpop.permute.xlu0 %2083  ;;  %s8250_s2 = smov 56  }
 0x2f5   : > { %v1603_v1 = vpop.permute.xlu1 %1602 }
 0x2f6   : > { %v2211_v34 = vsel %vm2187_vm8, %v2178_v32, %v1603_v1 }
 0x2f7   : > { %1817 = vrot.lane.b32.xlu1 %v9663_v9, %s13138_s11  ;;  %v9978_v55 = vpop.permute.xlu0 %1712  ;;  %v2244_v38 = vsel %vm2220_vm9, %v2211_v34, %v9806_v0  ;;  %s13086_s11 = smov 8  }
 0x2f9   : > { %v1988_v4 = vpop.permute.xlu1 %1987 }
 0x2fa   : > { %v2341_v30 = vsel %vm2319_vm12, %v2308_v63, %v1988_v4 }
 0x2fb   : > { %1523 = vrot.lane.b32.xlu1 %v9663_v9, %s13132_s22  ;;  %v2374_v11 = vsel %vm2352_vm13, %v2341_v30, %v9816_v16  ;;  %s8252_s22 = smov 40  }
 0x2fc   : > { %7563 = vmatmul.mubr.msk.f32.gmra.mrb[20].mxu0 %vm2396_vm14, %v2374_v11 }
 0x2fd   : > { %v1344_v51 = vpop.permute.xlu1 %1343 }
 0x2ff   : > { %1913 = vrot.lane.b32.xlu1 %v13217_v44, %s13135_s23  ;;  %s13093_s23 = smov 32  }
 0x301   : > { %v1804_v45 = vpop.permute.xlu1 %1803 }
 0x302   : > { %v2276_v9 = vsel %vm2253_vm10, %v2243_v37, %v1804_v45 }
 0x303   : > { %v2309_v16 = vsel %vm2286_vm11, %v2276_v9, %v9841_v22  ;;  %1618 = vrot.lane.b32.xlu1 %v13217_v44, %s13129_s16  ;;  %s13097_s16 = smov 16  }
 0x304   : > { %v2342_v3 = vsel %vm2319_vm12, %v2309_v16, %v9864_v60  ;;  %v2086_v60 = vpop.permute.xlu0 %2085 }
 0x305   : > { %v1346_v40 = vpop.permute.xlu1 %1345  ;;  %v2375_v57 = vsel %vm2352_vm13, %v2342_v3, %v9881_v59 }
 0x306   : > { %7565 = vmatprep.mubr.msk.f32.mxu0 %vm2396_vm14, %v2375_v57 }
 0x307   : > { %2003 = vrot.lane.b32.xlu1 %v13235_v8, %s13136_s26  ;;  %s13099_s26 = smov 48  }
 0x308   : > { %v9992_v42 = vpop.permute.xlu0 %1517 }
 0x309   : > { %v1806_v36 = vpop.permute.xlu1 %1805 }
 0x30a   : > { %v2277_v14 = vsel %vm2253_vm10, %v2244_v38, %v1806_v36 }
 0x30b   : > { %1720 = vrot.lane.b32.xlu1 %v13235_v8, %s13130_s5  ;;  %v13237_v8 = vld [vmem:[#allocation30_spill] sm:$0xff] }
 0x30c   : > { %v10005_v1 = vpop.permute.xlu0 %1907 }
 0x30d   : > { %v1512_v44 = vpop.permute.xlu1 %1511 }
 0x30f   : > { %2093 = vrot.lane.b32.xlu1 %v9750_v2, %s13137_s9  ;;  %v9984_v22 = vpop.f32.mrb[8].mxu0  ;;  %v13236_v2 = vld [vmem:[#allocation62_spill] sm:$0xff] }
 0x310   : > { %v9986_v24 = vpop.f32.mrb[9].mxu0  ;;  %v2148_v39 = vsel %vm2125_vm6, %v13236_v2, %v1344_v51  ;;  %v10012_v4 = vpop.permute.xlu0 %1612 }
 0x311   : > { %v1902_v59 = vpop.permute.xlu1 %1901  ;;  %v2179_v41 = vsel %vm2156_vm7, %v2148_v39, %v9824_v52 }
 0x312   : > { %v2310_v15 = vsel %vm2286_vm11, %v2277_v14, %v1902_v59  ;;  %v2212_v58 = vsel %vm2187_vm8, %v2179_v41, %v9850_v43 }
 0x313   : > { %v2245_v63 = vsel %vm2220_vm9, %v2212_v58, %v9868_v56 }
 0x314   : > { %v10020_v51 = vpop.permute.xlu0 %1997 }
 0x315   : > { %v1607_v21 = vpop.permute.xlu1 %1606 }
 0x318   : > { %v1715_v45 = vpop.permute.xlu0 %1714 }
 0x319   : > { %v1992_v62 = vpop.permute.xlu1 %1991 }
 0x31a   : > { %v2343_v5 = vsel %vm2319_vm12, %v2310_v15, %v1992_v62 }
 0x31b   : > { %v2376_v23 = vsel %vm2352_vm13, %v2343_v5, %v9906_v28 }
 0x31c   : > { %7566 = vmatmul.mubr.msk.f32.gmra.mrb[22].mxu0 %vm2396_vm14, %v2376_v23  ;;  %v10029_v16 = vpop.permute.xlu0 %2087 }
 0x31d   : > { %v1348_v0 = vpop.permute.xlu1 %1347 }
 0x31e   : > { %v2150_v36 = vsel %vm2125_vm6, %v13237_v8, %v1348_v0 }
 0x320   : > { %v10038_v34 = vpop.permute.xlu0 %1716 }
 0x321   : > { %v1808_v54 = vpop.permute.xlu1 %1807 }
 0x322   : > { %v2278_v30 = vsel %vm2253_vm10, %v2245_v63, %v1808_v54 }
 0x323   : > { %v2311_v52 = vsel %vm2286_vm11, %v2278_v30, %v9926_v53  ;;  %v2149_v53 = vsel %vm2125_vm6, %v9261_v20, %v1346_v40  ;;  %v2181_v40 = vsel %vm2156_vm7, %v2150_v36, %v9919_v6 }
 0x324   : > { %v2344_v28 = vsel %vm2319_vm12, %v2311_v52, %v1994_v33  ;;  %v2180_v33 = vsel %vm2156_vm7, %v2149_v53, %v1512_v44  ;;  %v10047_v38 = vpop.permute.xlu0 %2089 }
 0x325   : > { %v1350_v18 = vpop.permute.xlu1 %1349  ;;  %v2377_v11 = vsel %vm2352_vm13, %v2344_v28, %v2084_v35  ;;  %v2213_v35 = vsel %vm2187_vm8, %v2180_v33, %v1607_v21  ;;  %v2214_v21 = vsel %vm2187_vm8, %v2181_v40, %v9934_v49 }
 0x326   : > { %7568 = vmatprep.mubr.msk.f32.mxu0 %vm2396_vm14, %v2377_v11  ;;  %v2246_v57 = vsel %vm2220_vm9, %v2213_v35, %v9892_v61  ;;  %v2247_v39 = vsel %vm2220_vm9, %v2214_v21, %v9958_v12  ;;  %v2151_v63 = vsel %vm2125_vm6, %v9376_v7, %v1350_v18 }
 0x328   : > { %v1522_v5 = vpop.permute.xlu0 %1521 }
 0x329   : > { %v1810_v43 = vpop.permute.xlu1 %1809 }
 0x32a   : > { %v2279_v59 = vsel %vm2253_vm10, %v2246_v57, %v1810_v43 }
 0x32c   : > { %v1912_v41 = vpop.permute.xlu0 %1911 }
 0x32d   : > { %v1516_v50 = vpop.permute.xlu1 %1515 }
 0x32e   : > { %v2182_v30 = vsel %vm2156_vm7, %v2151_v63, %v1516_v50 }
 0x32f   : > { %v10022_v56 = vpop.f32.mrb[10].mxu0 }
 0x330   : > { %v10024_v37 = vpop.f32.mrb[11].mxu0  ;;  %v1617_v54 = vpop.permute.xlu0 %1616 }
 0x331   : > { %v1906_v9 = vpop.permute.xlu1 %1905 }
 0x332   : > { %v2312_v46 = vsel %vm2286_vm11, %v2279_v59, %v1906_v9  ;;  %v13238_v9 = vld [vmem:[#allocation24_spill] sm:$0xff] }
 0x334   : > { %v2002_v43 = vpop.permute.xlu0 %2001 }
 0x335   : > { %v1611_v3 = vpop.permute.xlu1 %1610 }
 0x336   : > { %v2215_v52 = vsel %vm2187_vm8, %v2182_v30, %v1611_v3 }
 0x337   : > { %v2248_v11 = vsel %vm2220_vm9, %v2215_v52, %v9978_v55 }
 0x338   : > { %v1719_v50 = vpop.permute.xlu0 %1718 }
 0x339   : > { %v1996_v32 = vpop.permute.xlu1 %1995 }
 0x33a   : > { %v2345_v20 = vsel %vm2319_vm12, %v2312_v46, %v1996_v32 }
 0x33b   : > { %v2378_v44 = vsel %vm2352_vm13, %v2345_v20, %v2086_v60 }
 0x33c   : > { %7569 = vmatmul.mubr.msk.f32.gmra.mrb[24].mxu0 %vm2396_vm14, %v2378_v44  ;;  %v2092_v20 = vpop.permute.xlu0 %2091 }
 0x33d   : > { %v1352_v61 = vpop.permute.xlu1 %1351 }
 0x33e   : > { %v2152_v53 = vsel %vm2125_vm6, %v13238_v9, %v1352_v61 }
 0x33f   : > { %v2183_v7 = vsel %vm2156_vm7, %v2152_v53, %v9992_v42 }
 0x340   : > { %v2216_v3 = vsel %vm2187_vm8, %v2183_v7, %v10012_v4 }
 0x341   : > { %v1812_v2 = vpop.permute.xlu1 %1811  ;;  %v2249_v59 = vsel %vm2220_vm9, %v2216_v3, %v1715_v45 }
 0x342   : > { %v2280_v14 = vsel %vm2253_vm10, %v2247_v39, %v1812_v2 }
 0x343   : > { %v2313_v15 = vsel %vm2286_vm11, %v2280_v14, %v10005_v1 }
 0x344   : > { %v2346_v6 = vsel %vm2319_vm12, %v2313_v15, %v10020_v51 }
 0x345   : > { %v1354_v60 = vpop.permute.xlu1 %1353  ;;  %v2379_v62 = vsel %vm2352_vm13, %v2346_v6, %v10029_v16 }
 0x346   : > { %7571 = vmatprep.mubr.msk.f32.mxu0 %vm2396_vm14, %v2379_v62 }
 0x349   : > { %v1814_v49 = vpop.permute.xlu1 %1813 }
 0x34a   : > { %v2281_v33 = vsel %vm2253_vm10, %v2248_v11, %v1814_v49  ;;  %v1820_v49 = vpop.permute.xlu0 %1819 }
 0x34d   : > { %v1520_v23 = vpop.permute.xlu1 %1519 }
 0x34e   : > { %v1822_v53 = vpop.permute.xlu0 %1821 }
 0x34f   : > { %v10059_v0 = vpop.f32.mrb[12].mxu0 }
 0x350   : > { %v10061_v12 = vpop.f32.mrb[13].mxu0 }
 0x351   : > { %v1910_v58 = vpop.permute.xlu1 %1909 }
 0x352   : > { %v2314_v35 = vsel %vm2286_vm11, %v2281_v33, %v1910_v58 }
 0x355   : > { %v1615_v28 = vpop.permute.xlu1 %1614 }
 0x359   : > { %v2000_v57 = vpop.permute.xlu1 %1999 }
 0x35a   : > { %v2347_v8 = vsel %vm2319_vm12, %v2314_v35, %v2000_v57 }
 0x35b   : > { %v2380_v18 = vsel %vm2352_vm13, %v2347_v8, %v10047_v38 }
 0x35c   : > { %7572 = vmatmul.mubr.msk.f32.gmra.mrb[26].mxu0 %vm2396_vm14, %v2380_v18 }
 0x35d   : > { %v1356_v55 = vpop.permute.xlu1 %1355 }
 0x35e   : > { %v2154_v4 = vsel %vm2125_vm6, %v9584_v47, %v1356_v55 }
 0x35f   : > { %v2185_v39 = vsel %vm2156_vm7, %v2154_v4, %v1522_v5 }
 0x360   : > { %v2218_v15 = vsel %vm2187_vm8, %v2185_v39, %v1617_v54 }
 0x361   : > { %v1816_v36 = vpop.permute.xlu1 %1815  ;;  %v2251_v62 = vsel %vm2220_vm9, %v2218_v15, %v1719_v50 }
 0x362   : > { %v2282_v46 = vsel %vm2253_vm10, %v2249_v59, %v1816_v36  ;;  %v2284_v47 = vsel %vm2253_vm10, %v2251_v62, %v1820_v49 }
 0x363   : > { %v2315_v32 = vsel %vm2286_vm11, %v2282_v46, %v1912_v41  ;;  %v2153_v41 = vsel %vm2125_vm6, %v9484_v31, %v1354_v60  ;;  %v2317_v9 = vsel %vm2286_vm11, %v2284_v47, %v10005_v1 }
 0x364   : > { %v2348_v42 = vsel %vm2319_vm12, %v2315_v32, %v2002_v43  ;;  %v2184_v30 = vsel %vm2156_vm7, %v2153_v41, %v1520_v23  ;;  %v2350_v35 = vsel %vm2319_vm12, %v2317_v9, %v10020_v51  ;;  %v10127_v51 = vld [vmem:[%s8286_s13] ss:$0 sm:$0xff] }
 0x365   : > { %v1358_v40 = vpop.permute.xlu1 %1357  ;;  %v2381_v44 = vsel %vm2352_vm13, %v2348_v42, %v2092_v20  ;;  %v2217_v52 = vsel %vm2187_vm8, %v2184_v30, %v1615_v28  ;;  %v10131_v50 = vadd.f32 %v9702_v10, %v10127_v51  ;;  %v10135_v3 = vadd.f32 %v10127_v51, %v9708_v29 }
 0x366   : > { %7574 = vmatprep.mubr.msk.f32.mxu0 %vm2396_vm14, %v2381_v44  ;;  %v2155_v5 = vsel %vm2125_vm6, %v9587_v48, %v1358_v40  ;;  %v2250_v31 = vsel %vm2220_vm9, %v2217_v52, %v10038_v34  ;;  %v2383_v34 = vsel %vm2352_vm13, %v2350_v35, %v10029_v16  ;;  %v10149_v29 = vadd.f32 %v9810_v19, %v10127_v51 }
 0x367   : > { %v7761_v59 = vpack.c.bf16 %v10131_v50, %v10135_v3  ;;  %v10153_v46 = vadd.f32 %v10127_v51, %v9814_v13  ;;  %v10167_v13 = vadd.f32 %v9872_v17, %v10127_v51  ;;  %v8246_v17 = vmov 0.00390625  }
 0x368   : > { %2786 = vmatprep.mubr.f32.mxu1 %v8246_v17  ;;  %v10190_v62 = vadd.f32 %v10127_v51, %v9932_v27  ;;  %v10204_v27 = vadd.f32 %v9984_v22, %v10127_v51  ;;  %v10208_v52 = vadd.f32 %v10127_v51, %v9986_v24  ;;  %v10222_v24 = vadd.f32 %v10022_v56, %v10127_v51 }
 0x369   : > { %v1818_v61 = vpop.permute.xlu1 %1817  ;;  %v7765_v44 = vpack.c.bf16 %v10149_v29, %v10153_v46  ;;  %vm3455_vm6 = vcmask 1044480  }
 0x36a   : > { %v2283_v23 = vsel %vm2253_vm10, %v2250_v31, %v1818_v61  ;;  %v10171_v61 = vadd.f32 %v10127_v51, %v9874_v26  ;;  %v7777_v9 = vpack.c.bf16 %v10204_v27, %v10208_v52 }
 0x36c   : > { %v7769_v15 = vpack.c.bf16 %v10167_v13, %v10171_v61 }
 0x36d   : > { %v1524_v21 = vpop.permute.xlu1 %1523 }
 0x36e   : > { %v2186_v11 = vsel %vm2156_vm7, %v2155_v5, %v1524_v21  ;;  %vm4106_vm7 = vcmask 261120  }
 0x36f   : > { %v10089_v2 = vpop.f32.mrb[14].mxu0 }
 0x370   : > { %v10091_v45 = vpop.f32.mrb[15].mxu0 }
 0x371   : > { %v1914_v14 = vpop.permute.xlu1 %1913 }
 0x372   : > { %v2316_v48 = vsel %vm2286_vm11, %v2283_v23, %v1914_v14 }
 0x375   : > { %v1619_v6 = vpop.permute.xlu1 %1618 }
 0x376   : > { %v2219_v54 = vsel %vm2187_vm8, %v2186_v11, %v1619_v6  ;;  %v10186_v6 = vadd.f32 %v9930_v25, %v10127_v51  ;;  %vm4115_vm8 = vcmask 326656  }
 0x378   : > { %v7773_v47 = vpack.c.bf16 %v10186_v6, %v10190_v62 }
 0x379   : > { %v2004_v63 = vpop.permute.xlu1 %2003 }
 0x37a   : > { %v2349_v1 = vsel %vm2319_vm12, %v2316_v48, %v2004_v63 }
 0x37d   : > { %v1721_v43 = vpop.permute.xlu1 %1720 }
 0x37e   : > { %v2252_v60 = vsel %vm2220_vm9, %v2219_v54, %v1721_v43 }
 0x37f   : > { %v2285_v28 = vsel %vm2253_vm10, %v2252_v60, %v1822_v53  ;;  %v10226_v53 = vadd.f32 %v10127_v51, %v10024_v37  ;;  %v10240_v37 = vadd.f32 %v10059_v0, %v10127_v51  ;;  %v10258_v0 = vadd.f32 %v10089_v2, %v10127_v51 }
 0x380   : > { %v2318_v33 = vsel %vm2286_vm11, %v2285_v28, %v1910_v58  ;;  %vm4124_vm10 = vcmask 392192   ;;  %vm4133_vm11 = vcmask 457728  }
 0x381   : > { %v2094_v8 = vpop.permute.xlu1 %2093  ;;  %v2351_v18 = vsel %vm2319_vm12, %v2318_v33, %v2000_v57  ;;  %v7781_v48 = vpack.c.bf16 %v10222_v24, %v10226_v53  ;;  %v10244_v33 = vadd.f32 %v10127_v51, %v10061_v12  ;;  %v10262_v12 = vadd.f32 %v10127_v51, %v10091_v45 }
 0x382   : > { %v2382_v7 = vsel %vm2352_vm13, %v2349_v1, %v2094_v8  ;;  %v2384_v58 = vsel %vm2352_vm13, %v2351_v18, %v10047_v38  ;;  %v2792_v45 = vlaneseq  ;;  %vm4142_vm12 = vcmask 523264  }
 0x383   : > { %7575 = vmatmul.mubr.msk.f32.gmra.mrb[28].mxu0 %vm2396_vm14, %v2382_v7  ;;  %v7785_v18 = vpack.c.bf16 %v10240_v37, %v10244_v33  ;;  %v7789_v2 = vpack.c.bf16 %v10258_v0, %v10262_v12 }
 0x384   : > { %7577 = vmatprep.mubr.msk.f32.mxu0 %vm2396_vm14, %v2383_v34 }
 0x387   : > { %7578 = vmatmul.mubr.msk.f32.gmra.mrb[30].mxu0 %vm2396_vm14, %v2384_v58  ;;  %vm4167_vm14 = vcmask 588800  }
 0x38f   : > { %v7558_v55 = vpop.f32.mrb[16].mxu0 }
 0x390   : > { %v10138_v16 = vadd.f32 %v7558_v55, %v10127_v51  ;;  %v2643_v57 = vpop.f32.mrb[17].mxu0 }
 0x391   : > { %v10141_v36 = vadd.f32 %v10127_v51, %v2643_v57 }
 0x393   : > { %v7759_v38 = vpack.c.bf16 %v10138_v16, %v10141_v36 }
 0x395   : > { %7760 = vmatprep.subr.bf16.mxu1 %v7759_v38 }
 0x396   : > { %7762 = vmatpush3.bf16.msra.mxu1 %v7761_v59 }
 0x3af   : > { %v7561_v10 = vpop.f32.mrb[18].mxu0 }
 0x3b0   : > { %v10156_v32 = vadd.f32 %v7561_v10, %v10127_v51  ;;  %v2653_v20 = vpop.f32.mrb[19].mxu0 }
 0x3b1   : > { %v10159_v42 = vadd.f32 %v10127_v51, %v2653_v20 }
 0x3b3   : > { %v7763_v40 = vpack.c.bf16 %v10156_v32, %v10159_v42 }
 0x3b5   : > { %7764 = vmatprep.subr.bf16.mxu1 %v7763_v40 }
 0x3b6   : > { %7766 = vmatpush3.bf16.msra.mxu1 %v7765_v44 }
 0x3cf   : > { %v7564_v19 = vpop.f32.mrb[20].mxu0 }
 0x3d0   : > { %v10174_v21 = vadd.f32 %v7564_v19, %v10127_v51  ;;  %v2663_v4 = vpop.f32.mrb[21].mxu0 }
 0x3d1   : > { %v10177_v39 = vadd.f32 %v10127_v51, %v2663_v4 }
 0x3d3   : > { %v7767_v14 = vpack.c.bf16 %v10174_v21, %v10177_v39 }
 0x3d5   : > { %7768 = vmatprep.subr.bf16.mxu1 %v7767_v14 }
 0x3d6   : > { %7770 = vmatpush3.bf16.msra.mxu1 %v7769_v15 }
 0x3ef   : > { %v7567_v26 = vpop.f32.mrb[22].mxu0 }
 0x3f0   : > { %v10193_v49 = vadd.f32 %v7567_v26, %v10127_v51  ;;  %v2673_v41 = vpop.f32.mrb[23].mxu0 }
 0x3f1   : > { %v10196_v63 = vadd.f32 %v10127_v51, %v2673_v41 }
 0x3f3   : > { %v7771_v30 = vpack.c.bf16 %v10193_v49, %v10196_v63 }
 0x3f5   : > { %7772 = vmatprep.subr.bf16.mxu1 %v7771_v30 }
 0x3f6   : > { %7774 = vmatpush3.bf16.msra.mxu1 %v7773_v47 }
 0x40f   : > { %v7570_v25 = vpop.f32.mrb[24].mxu0 }
 0x410   : > { %v10211_v5 = vadd.f32 %v7570_v25, %v10127_v51  ;;  %v2683_v11 = vpop.f32.mrb[25].mxu0 }
 0x411   : > { %v10214_v54 = vadd.f32 %v10127_v51, %v2683_v11 }
 0x413   : > { %v7775_v43 = vpack.c.bf16 %v10211_v5, %v10214_v54 }
 0x415   : > { %7776 = vmatprep.subr.bf16.mxu1 %v7775_v43 }
 0x416   : > { %7778 = vmatpush3.bf16.msra.mxu1 %v7777_v9 }
 0x42f   : > { %v7573_v22 = vpop.f32.mrb[26].mxu0 }
 0x430   : > { %v10229_v31 = vadd.f32 %v7573_v22, %v10127_v51  ;;  %v2693_v60 = vpop.f32.mrb[27].mxu0 }
 0x431   : > { %v10232_v23 = vadd.f32 %v10127_v51, %v2693_v60 }
 0x433   : > { %v7779_v28 = vpack.c.bf16 %v10229_v31, %v10232_v23 }
 0x435   : > { %7780 = vmatprep.subr.bf16.mxu1 %v7779_v28 }
 0x436   : > { %7782 = vmatpush3.bf16.msra.mxu1 %v7781_v48 }
 0x456   : > { %v7576_v56 = vpop.f32.mrb[28].mxu0 }
 0x457   : > { %v10247_v35 = vadd.f32 %v7576_v56, %v10127_v51  ;;  %v2703_v1 = vpop.f32.mrb[29].mxu0 }
 0x458   : > { %v10250_v8 = vadd.f32 %v10127_v51, %v2703_v1 }
 0x45a   : > { %v7783_v7 = vpack.c.bf16 %v10247_v35, %v10250_v8  ;;  %v7579_v34 = vpop.f32.mrb[30].mxu0 }
 0x45b   : > { %v10265_v58 = vadd.f32 %v7579_v34, %v10127_v51  ;;  %v2713_v55 = vpop.f32.mrb[31].mxu0 }
 0x45c   : > { %v10268_v57 = vadd.f32 %v10127_v51, %v2713_v55  ;;  %7784 = vmatprep.subr.bf16.mxu1 %v7783_v7  ;;  %v10276_v51 = vshrl.u32 %v2792_v45, 7 }
 0x45d   : > { %7786 = vmatpush3.bf16.msra.mxu1 %v7785_v18 }
 0x45e   : > { %v7787_v38 = vpack.c.bf16 %v10265_v58, %v10268_v57  ;;  %13239 = vst [vmem:[#allocation51_spill] sm:$0xff] %v10276_v51  ;;  %v10279_v40 = vsub.s32 0, %v10276_v51 }
 0x460   : > { %7788 = vmatprep.subr.bf16.mxu1 %v7787_v38  ;;  %13240 = vst [vmem:[#allocation32_spill] sm:$0xff] %v10279_v40 }
 0x461   : > { %7790 = vmatpush3.bf16.msra.mxu1 %v7789_v2 }
 0x464   : > { %2787 = vmatmul.mubr.f32.vlgmr.msra.gmra.mrb[0].mxu1 %v8246_v17 }
 0x465   : > { %2924 = vmatprep.mubr.f32.mxu1 %v8246_v17 }
 0x537   : > { %v7405_v59 = vpop.f32.mrb[0].mxu1 }
 0x538   : > { %v7406_v10 = vpop.f32.mrb[1].mxu1 }
 0x539   : > { %v7407_v20 = vadd.f32 %v7406_v10, %v7405_v59 }
 0x53b   : > { %v10282_v44 = vrot.slane %v7407_v20, %v10279_v40 }
 0x53d   : > { %v10286_v19 = vsub.f32 %v10135_v3, %v10282_v44  ;;  %v10290_v4 = vsub.f32 %v10131_v50, %v10282_v44  ;;  %v10294_v14 = vsub.f32 %v10141_v36, %v10282_v44  ;;  %v10298_v15 = vsub.f32 %v10138_v16, %v10282_v44 }
 0x53e   : > { %v10302_v26 = vsub.f32 %v10159_v42, %v10282_v44  ;;  %v10306_v3 = vsub.f32 %v10156_v32, %v10282_v44  ;;  %v10318_v42 = vsub.f32 %v10153_v46, %v10282_v44  ;;  %v10322_v32 = vsub.f32 %v10149_v29, %v10282_v44 }
 0x53f   : > { %v2828_v50 = vmul.f32 %v10286_v19, %v10286_v19  ;;  %v2829_v41 = vmul.f32 %v10290_v4, %v10290_v4  ;;  %v2844_v36 = vmul.f32 %v10294_v14, %v10294_v14  ;;  %v2845_v16 = vmul.f32 %v10298_v15, %v10298_v15 }
 0x540   : > { %v10326_v30 = vsub.f32 %v10177_v39, %v10282_v44  ;;  %v10330_v47 = vsub.f32 %v10174_v21, %v10282_v44  ;;  %v2846_v25 = vmul.f32 %v10302_v26, %v10302_v26  ;;  %v2847_v11 = vmul.f32 %v10306_v3, %v10306_v3 }
 0x541   : > { %v10338_v46 = vsub.f32 %v10171_v61, %v10282_v44  ;;  %v7791_v29 = vpack.c.bf16 %v2845_v16, %v2844_v36  ;;  %v7793_v43 = vpack.c.bf16 %v2829_v41, %v2828_v50  ;;  %v10342_v39 = vsub.f32 %v10167_v13, %v10282_v44 }
 0x542   : > { %v10346_v21 = vsub.f32 %v10196_v63, %v10282_v44  ;;  %v2830_v9 = vmul.f32 %v10318_v42, %v10318_v42  ;;  %v2831_v22 = vmul.f32 %v10322_v32, %v10322_v32  ;;  %v10354_v61 = vsub.f32 %v10193_v49, %v10282_v44 }
 0x543   : > { %v2848_v60 = vmul.f32 %v10326_v30, %v10326_v30  ;;  %v2849_v13 = vmul.f32 %v10330_v47, %v10330_v47  ;;  %7792 = vmatprep.subr.bf16.mxu1 %v7791_v29  ;;  %v7795_v28 = vpack.c.bf16 %v2847_v11, %v2846_v25  ;;  %v10362_v63 = vsub.f32 %v10190_v62, %v10282_v44 }
 0x544   : > { %7794 = vmatpush3.bf16.msra.mxu1 %v7793_v43  ;;  %v10366_v48 = vsub.f32 %v10186_v6, %v10282_v44  ;;  %v10370_v49 = vsub.f32 %v10214_v54, %v10282_v44  ;;  %v2832_v56 = vmul.f32 %v10338_v46, %v10338_v46  ;;  %v2833_v1 = vmul.f32 %v10342_v39, %v10342_v39 }
 0x545   : > { %7796 = vmatprep.subr.bf16.mxu1 %v7795_v28  ;;  %v7797_v7 = vpack.c.bf16 %v2831_v22, %v2830_v9  ;;  %v10378_v62 = vsub.f32 %v10211_v5, %v10282_v44  ;;  %v2850_v6 = vmul.f32 %v10346_v21, %v10346_v21  ;;  %v2851_v34 = vmul.f32 %v10354_v61, %v10354_v61 }
 0x546   : > { %v7799_v18 = vpack.c.bf16 %v2849_v13, %v2848_v60  ;;  %v10386_v54 = vsub.f32 %v10208_v52, %v10282_v44  ;;  %v10390_v55 = vsub.f32 %v10204_v27, %v10282_v44  ;;  %v10394_v5 = vsub.f32 %v10232_v23, %v10282_v44 }
 0x547   : > { %v2834_v38 = vmul.f32 %v10362_v63, %v10362_v63  ;;  %v2835_v2 = vmul.f32 %v10366_v48, %v10366_v48  ;;  %v7801_v45 = vpack.c.bf16 %v2833_v1, %v2832_v56  ;;  %v10402_v52 = vsub.f32 %v10229_v31, %v10282_v44 }
 0x548   : > { %7798 = vmatpush3.bf16.msra.mxu1 %v7797_v7  ;;  %v2852_v27 = vmul.f32 %v10370_v49, %v10370_v49  ;;  %v2853_v59 = vmul.f32 %v10378_v62, %v10378_v62  ;;  %v7803_v10 = vpack.c.bf16 %v2851_v34, %v2850_v6  ;;  %v10410_v23 = vsub.f32 %v10226_v53, %v10282_v44 }
 0x549   : > { %7800 = vmatprep.subr.bf16.mxu1 %v7799_v18  ;;  %v10414_v20 = vsub.f32 %v10222_v24, %v10282_v44  ;;  %v10418_v31 = vsub.f32 %v10250_v8, %v10282_v44  ;;  %v2836_v50 = vmul.f32 %v10386_v54, %v10386_v54  ;;  %v2837_v41 = vmul.f32 %v10390_v55, %v10390_v55 }
 0x54a   : > { %v7805_v36 = vpack.c.bf16 %v2835_v2, %v2834_v38  ;;  %v10426_v53 = vsub.f32 %v10247_v35, %v10282_v44  ;;  %v2854_v24 = vmul.f32 %v10394_v5, %v10394_v5  ;;  %v2855_v16 = vmul.f32 %v10402_v52, %v10402_v52 }
 0x54b   : > { %v7807_v25 = vpack.c.bf16 %v2853_v59, %v2852_v27  ;;  %v2808_v8 = vsub.f32 %v10244_v33, %v10282_v44  ;;  %v2809_v11 = vsub.f32 %v10240_v37, %v10282_v44  ;;  %v10438_v29 = vsub.f32 %v10268_v57, %v10282_v44 }
 0x54c   : > { %7802 = vmatpush3.bf16.msra.mxu1 %v7801_v45  ;;  %v2838_v35 = vmul.f32 %v10410_v23, %v10410_v23  ;;  %v2839_v43 = vmul.f32 %v10414_v20, %v10414_v20  ;;  %v7809_v9 = vpack.c.bf16 %v2837_v41, %v2836_v50  ;;  %v10446_v22 = vsub.f32 %v10265_v58, %v10282_v44 }
 0x54d   : > { %7804 = vmatprep.subr.bf16.mxu1 %v7803_v10  ;;  %v2856_v33 = vmul.f32 %v10418_v31, %v10418_v31  ;;  %v2857_v37 = vmul.f32 %v10426_v53, %v10426_v53  ;;  %v7811_v60 = vpack.c.bf16 %v2855_v16, %v2854_v24  ;;  %v2810_v57 = vsub.f32 %v10262_v12, %v10282_v44 }
 0x54e   : > { %v2811_v13 = vsub.f32 %v10258_v0, %v10282_v44  ;;  %v2840_v28 = vmul.f32 %v2808_v8, %v2808_v8  ;;  %v2841_v56 = vmul.f32 %v2809_v11, %v2809_v11  ;;  %v7813_v1 = vpack.c.bf16 %v2839_v43, %v2838_v35 }
 0x54f   : > { %v2858_v58 = vmul.f32 %v10438_v29, %v10438_v29  ;;  %v2859_v7 = vmul.f32 %v10446_v22, %v10446_v22  ;;  %v7815_v6 = vpack.c.bf16 %v2857_v37, %v2856_v33  ;;  %v2842_v34 = vmul.f32 %v2810_v57, %v2810_v57 }
 0x550   : > { %7806 = vmatpush3.bf16.msra.mxu1 %v7805_v36  ;;  %v2843_v18 = vmul.f32 %v2811_v13, %v2811_v13  ;;  %v7817_v38 = vpack.c.bf16 %v2841_v56, %v2840_v28 }
 0x551   : > { %7808 = vmatprep.subr.bf16.mxu1 %v7807_v25  ;;  %v7819_v12 = vpack.c.bf16 %v2859_v7, %v2858_v58  ;;  %v10489_v25 = vld [vmem:[%s8291_s17] ss:$0 sm:$0xff] }
 0x552   : > { %v7821_v2 = vpack.c.bf16 %v2843_v18, %v2842_v34 }
 0x554   : > { %7810 = vmatpush3.bf16.msra.mxu1 %v7809_v9 }
 0x555   : > { %7812 = vmatprep.subr.bf16.mxu1 %v7811_v60 }
 0x558   : > { %7814 = vmatpush3.bf16.msra.mxu1 %v7813_v1 }
 0x559   : > { %7816 = vmatprep.subr.bf16.mxu1 %v7815_v6 }
 0x55c   : > { %7818 = vmatpush3.bf16.msra.mxu1 %v7817_v38 }
 0x55d   : > { %7820 = vmatprep.subr.bf16.mxu1 %v7819_v12 }
 0x560   : > { %7822 = vmatpush3.bf16.msra.mxu1 %v7821_v2 }
 0x563   : > { %2925 = vmatmul.mubr.f32.vlgmr.msra.gmra.mrb[2].mxu1 %v8246_v17 }
 0x636   : > { %v7440_v0 = vpop.f32.mrb[2].mxu1 }
 0x637   : > { %v7441_v44 = vpop.f32.mrb[3].mxu1 }
 0x638   : > { %v7442_v45 = vadd.f32 %v7441_v44, %v7440_v0 }
 0x63a   : > { %v2927_v27 = vadd.f32 1e-05, %v7442_v45 }
 0x63c   : > { %8130 = vrsqrt.f32 %v2927_v27 }
 0x646   : > { %v8131_v59 = vpop.eup %8130 }
 0x647   : > { %v10462_v10 = vrot.slane %v8131_v59, %v10279_v40 }
 0x649   : > { %v10466_v50 = vmul.f32 %v10462_v10, %v10286_v19  ;;  %v10470_v41 = vmul.f32 %v10462_v10, %v10290_v4  ;;  %v2937_v17 = vmul.f32 %v10462_v10, %v10318_v42  ;;  %v2938_v36 = vmul.f32 %v10462_v10, %v10322_v32 }
 0x64a   : > { %v2939_v24 = vmul.f32 %v10462_v10, %v10338_v46  ;;  %v2940_v16 = vmul.f32 %v10462_v10, %v10342_v39  ;;  %v10482_v19 = vmul.f32 %v10462_v10, %v10362_v63  ;;  %v10486_v4 = vmul.f32 %v10462_v10, %v10366_v48 }
 0x64b   : > { %v10493_v42 = vmul.f32 %v10462_v10, %v10386_v54  ;;  %v10497_v32 = vmul.f32 %v10462_v10, %v10390_v55  ;;  %v2947_v46 = vmul.f32 %v10462_v10, %v2808_v8  ;;  %v2948_v39 = vmul.f32 %v10462_v10, %v2809_v11  ;;  %v10508_v54 = vld [vmem:[%s8296_s21] ss:$0 sm:$0xff] }
 0x64c   : > { %v2949_v63 = vmul.f32 %v10462_v10, %v2810_v57  ;;  %v2950_v35 = vmul.f32 %v10462_v10, %v2811_v13  ;;  %v2951_v48 = vmul.f32 %v10462_v10, %v10294_v14  ;;  %v2952_v43 = vmul.f32 %v10462_v10, %v10298_v15 }
 0x64d   : > { %v2953_v55 = vmul.f32 %v10462_v10, %v10302_v26  ;;  %v2954_v8 = vmul.f32 %v10462_v10, %v10306_v3  ;;  %v2955_v11 = vmul.f32 %v10462_v10, %v10326_v30  ;;  %v2956_v9 = vmul.f32 %v10462_v10, %v10330_v47 }
 0x64e   : > { %v2957_v14 = vmul.f32 %v10462_v10, %v10346_v21  ;;  %v2958_v15 = vmul.f32 %v10462_v10, %v10354_v61  ;;  %v2978_v33 = vmul.f32 %v10489_v25, %v2939_v24  ;;  %v2979_v37 = vmul.f32 %v10489_v25, %v2940_v16 }
 0x64f   : > { %v2959_v26 = vmul.f32 %v10462_v10, %v10370_v49  ;;  %v2960_v3 = vmul.f32 %v10462_v10, %v10378_v62  ;;  %v2961_v30 = vmul.f32 %v10462_v10, %v10394_v5  ;;  %v2962_v47 = vmul.f32 %v10462_v10, %v10402_v52 }
 0x650   : > { %v2963_v21 = vmul.f32 %v10462_v10, %v10418_v31  ;;  %v2964_v61 = vmul.f32 %v10462_v10, %v10426_v53  ;;  %v3017_v60 = vadd.f32 %v10508_v54, %v2978_v33  ;;  %v10538_v49 = vadd.f32 %v10508_v54, %v2979_v37 }
 0x651   : > { %v2965_v62 = vmul.f32 %v10462_v10, %v10438_v29  ;;  %v2966_v5 = vmul.f32 %v10462_v10, %v10446_v22  ;;  %v2986_v52 = vmul.f32 %v10489_v25, %v2947_v46  ;;  %v2987_v57 = vmul.f32 %v10489_v25, %v2948_v39 }
 0x652   : > { %v3049_v31 = vmax.f32 %v3017_v60, 0.0  ;;  %v3050_v13 = vmax.f32 %v10538_v49, 0.0  ;;  %v2988_v53 = vmul.f32 %v10489_v25, %v2949_v63  ;;  %v10549_v28 = vmul.f32 %v10489_v25, %v2950_v35 }
 0x653   : > { %v10552_v56 = vmul.f32 %v10489_v25, %v2951_v48  ;;  %v10555_v29 = vmul.f32 %v10489_v25, %v2952_v43  ;;  %v10558_v22 = vmul.f32 %v10489_v25, %v2953_v55  ;;  %v10561_v1 = vmul.f32 %v10489_v25, %v2954_v8 }
 0x654   : > { %v3095_v58 = vrot.slane %v3049_v31, 1  ;;  %v3147_v7 = vrot.slane %v3049_v31, 7  ;;  %v10565_v6 = vrot.slane %v3050_v13, 7  ;;  %v10568_v34 = vmul.f32 %v10489_v25, %v2955_v11 }
 0x655   : > { %v10571_v18 = vmul.f32 %v10489_v25, %v2956_v9  ;;  %v10574_v38 = vmul.f32 %v10489_v25, %v2957_v14  ;;  %v10577_v12 = vmul.f32 %v10489_v25, %v2958_v15  ;;  %v10580_v2 = vmul.f32 %v10489_v25, %v2959_v26 }
 0x656   : > { %13241 = vst [vmem:[#allocation33_spill] sm:$0xff] %v10565_v6  ;;  %v10583_v0 = vsel %vm1033_vm0, %v3095_v58, %v3147_v7  ;;  %v2976_v44 = vmul.f32 %v10489_v25, %v2937_v17  ;;  %v10587_v45 = vmul.f32 %v10489_v25, %v2960_v3  ;;  %v10590_v27 = vmul.f32 %v10489_v25, %v2961_v30 }
 0x657   : > { %v10594_v59 = vsel %vm1033_vm0, %v3147_v7, %v10565_v6  ;;  %v13043_v24 = vrot.slane %v10583_v0, 1  ;;  %v13047_v16 = vrot.slane %v10583_v0, 2  ;;  %v2977_v46 = vmul.f32 %v10489_v25, %v2938_v36 }
 0x658   : > { %v10601_v39 = vmul.f32 %v10462_v10, %v10410_v23  ;;  %v10605_v17 = vmul.f32 %v10462_v10, %v10414_v20  ;;  %v13042_v63 = vrot.slane %v10583_v0, 3  ;;  %v3001_v35 = vmul.f32 %v10489_v25, %v2962_v47 }
 0x659   : > { %v3673_v48 = vsel %vm1033_vm0, %v10583_v0, %v13043_v24  ;;  %v3002_v43 = vmul.f32 %v10489_v25, %v2963_v21  ;;  %v3003_v36 = vmul.f32 %v10489_v25, %v2964_v61  ;;  %v3004_v23 = vmul.f32 %v10489_v25, %v2965_v62 }
 0x65a   : > { %v3609_v55 = vrot.slane %v10594_v59, 4  ;;  %v3681_v20 = vsel %vm3429_vm15, %v3673_v48, %v13047_v16  ;;  %v3005_v10 = vmul.f32 %v10489_v25, %v2966_v5  ;;  %v3015_v8 = vadd.f32 %v10508_v54, %v2976_v44 }
 0x65b   : > { %v13041_v11 = vrot.slane %v10594_v59, 5  ;;  %v3689_v9 = vsel %vm2493_vm3, %v3681_v20, %v13042_v63  ;;  %v2980_v14 = vmul.f32 %v10489_v25, %v10482_v19  ;;  %v10629_v15 = vadd.f32 %v10508_v54, %v2977_v46 }
 0x65c   : > { %v13040_v33 = vrot.slane %v10594_v59, 6  ;;  %v3697_v37 = vsel %vm3446_vm5, %v3689_v9, %v3609_v55  ;;  %v2981_v26 = vmul.f32 %v10489_v25, %v10486_v4  ;;  %v3047_v3 = vmax.f32 %v3015_v8, 0.0 }
 0x65d   : > { %v13039_v30 = vrot.slane %v10594_v59, 7  ;;  %v3705_v47 = vsel %vm3455_vm6, %v3697_v37, %v13041_v11  ;;  %v2974_v19 = vmul.f32 %v10489_v25, %v10466_v50  ;;  %v3048_v21 = vmax.f32 %v10629_v15, 0.0 }
 0x65e   : > { %v3713_v61 = vsel %vm1389_vm2, %v3705_v47, %v13040_v33  ;;  %v2975_v60 = vmul.f32 %v10489_v25, %v10470_v41  ;;  %v3093_v4 = vrot.slane %v3047_v3, 1  ;;  %v3141_v62 = vrot.slane %v3047_v3, 7 }
 0x65f   : > { %v10650_v5 = vsel %vm1223_vm1, %v3713_v61, %v13039_v30  ;;  %v10654_v31 = vrot.slane %v3048_v21, 7  ;;  %v3019_v50 = vadd.f32 %v10508_v54, %v2980_v14  ;;  %v10658_v58 = vadd.f32 %v10508_v54, %v2986_v52 }
 0x660   : > { %13242 = vst [vmem:[#allocation23_spill] sm:$0xff] %v10650_v5  ;;  %3894 = vrot.lane.b32.xlu0 %v10650_v5, %s13137_s9  ;;  %v10663_v41 = vsel %vm1033_vm0, %v3093_v4, %v3141_v62  ;;  %v10666_v7 = vadd.f32 %v10508_v54, %v2981_v26  ;;  %v10669_v44 = vadd.f32 %v10508_v54, %v2987_v57  ;;  %v10824_v49 = vrot.slane %v3048_v21, 5 }
 0x661   : > { %13243 = vst [vmem:[#allocation52_spill] sm:$0xff] %v10654_v31  ;;  %v10672_v46 = vadd.f32 %v10508_v54, %v2988_v53  ;;  %v10676_v48 = vsel %vm1033_vm0, %v3141_v62, %v10654_v31  ;;  %v13057_v52 = vrot.slane %v10663_v41, 1  ;;  %v13056_v55 = vrot.slane %v10663_v41, 2 }
 0x662   : > { %v13055_v20 = vrot.slane %v10663_v41, 3  ;;  %v13053_v8 = vrot.slane %v10676_v48, 5  ;;  %v13052_v9 = vrot.slane %v10676_v48, 6  ;;  %v13051_v57 = vrot.slane %v10676_v48, 7  ;;  %13253 = vst [vmem:[#allocation59_spill] sm:$0xff] %v10824_v49 }
 0x663   : > { %v3480_v14 = vrot.slane %v10663_v41, 4  ;;  %v3496_v53 = vsel %vm1033_vm0, %v13057_v52, %v13056_v55  ;;  %v10692_v37 = vadd.f32 %v10508_v54, %v10549_v28  ;;  %v10696_v26 = vadd.f32 %v10508_v54, %v10552_v56 }
 0x664   : > { %v10700_v3 = vadd.f32 %v10508_v54, %v10555_v29  ;;  %v3504_v47 = vsel %vm3429_vm15, %v3496_v53, %v13055_v20  ;;  %v10707_v61 = vadd.f32 %v10508_v54, %v10558_v22  ;;  %v10711_v28 = vadd.f32 %v10508_v54, %v10561_v1 }
 0x665   : > { %v10715_v56 = vadd.f32 %v10508_v54, %v10568_v34  ;;  %v3512_v4 = vsel %vm2493_vm3, %v3504_v47, %v3480_v14  ;;  %v10720_v29 = vadd.f32 %v10508_v54, %v10571_v18  ;;  %v10724_v62 = vadd.f32 %v10508_v54, %v10574_v38 }
 0x666   : > { %13244 = vst [vmem:[#allocation54_spill] sm:$0xff] %v10711_v28  ;;  %v10728_v22 = vadd.f32 %v10508_v54, %v10577_v12  ;;  %v3520_v1 = vsel %vm3446_vm5, %v3512_v4, %v13053_v8  ;;  %v10735_v34 = vadd.f32 %v10508_v54, %v10580_v2  ;;  %v10739_v18 = vadd.f32 %v10508_v54, %v10587_v45 }
 0x667   : > { %13245 = vst [vmem:[#allocation25_spill] sm:$0xff] %v10720_v29  ;;  %v10743_v38 = vadd.f32 %v10508_v54, %v10590_v27  ;;  %v3528_v12 = vsel %vm3455_vm6, %v3520_v1, %v13052_v9  ;;  %v10749_v14 = vadd.f32 %v10508_v54, %v3001_v35  ;;  %v10752_v53 = vadd.f32 %v10508_v54, %v3002_v43 }
 0x668   : > { %13246 = vst [vmem:[#allocation53_spill] sm:$0xff] %v10728_v22  ;;  %13247 = vst [vmem:[#allocation55_spill] sm:$0xff] %v10739_v18  ;;  %v10755_v2 = vadd.f32 %v10508_v54, %v3003_v36  ;;  %v2982_v45 = vmul.f32 %v10489_v25, %v10493_v42  ;;  %v3536_v27 = vsel %vm1389_vm2, %v3528_v12, %v13051_v57  ;;  %v3051_v36 = vmax.f32 %v3019_v50, 0.0 }
 0x669   : > { %13248 = vst [vmem:[#allocation57_spill] sm:$0xff] %v10749_v14  ;;  %v10763_v47 = vadd.f32 %v10508_v54, %v3004_v23  ;;  %v10766_v4 = vadd.f32 %v10508_v54, %v3005_v10  ;;  %v2983_v35 = vmul.f32 %v10489_v25, %v10497_v32  ;;  %v10772_v43 = vsel %vm1223_vm1, %v3536_v27, %v10676_v48 }
 0x66a   : > { %v3052_v42 = vmax.f32 %v10666_v7, 0.0  ;;  %v2984_v1 = vmul.f32 %v10489_v25, %v10601_v39  ;;  %3807 = vrot.lane.b32.xlu1 %v10772_v43, %s13086_s11  ;;  %v2985_v23 = vmul.f32 %v10489_v25, %v10605_v17  ;;  %v3096_v10 = vrot.slane %v3051_v36, 1 }
 0x66b   : > { %13249 = vst [vmem:[#allocation60_spill] sm:$0xff] %v10766_v4  ;;  %v3150_v12 = vrot.slane %v3051_v36, 7  ;;  %v3013_v50 = vadd.f32 %v10508_v54, %v2974_v19  ;;  %v10787_v27 = vadd.f32 %v10508_v54, %v2975_v60  ;;  %v10790_v39 = vadd.f32 %v10508_v54, %v2982_v45 }
 0x66c   : > { %v10783_v32 = vrot.slane %v3052_v42, 7  ;;  %v10793_v30 = vadd.f32 %v10508_v54, %v2983_v35  ;;  %v10807_v45 = vrot.slane %v3050_v13, 5  ;;  %v10810_v35 = vadd.f32 %v10508_v54, %v2984_v1 }
 0x66d   : > { %v10796_v33 = vsel %vm1033_vm0, %v3096_v10, %v3150_v12  ;;  %v10813_v36 = vadd.f32 %v10508_v54, %v2985_v23  ;;  %v3045_v63 = vmax.f32 %v3013_v50, 0.0  ;;  %v13054_v1 = vmax.f32 %v10787_v27, 0.0 }
 0x66e   : > { %13250 = vst [vmem:[#allocation34_spill] sm:$0xff] %v10783_v32  ;;  %v10800_v25 = vsel %vm1033_vm0, %v3150_v12, %v10783_v32  ;;  %v13046_v17 = vrot.slane %v10796_v33, 1  ;;  %v13044_v19 = vrot.slane %v10796_v33, 2  ;;  %v13045_v60 = vrot.slane %v10796_v33, 3  ;;  %13251 = vst [vmem:[#allocation36_spill] sm:$0xff] %v10807_v45 }
 0x66f   : > { %13252 = vst [vmem:[#allocation26_spill] sm:$0xff] %v10813_v36  ;;  %v3481_v12 = vrot.slane %v10796_v33, 4  ;;  %v13048_v13 = vrot.slane %v10800_v25, 5  ;;  %v13049_v23 = vrot.slane %v10800_v25, 6  ;;  %v3053_v24 = vmax.f32 %v10790_v39, 0.0 }
 0x670   : > { %v3497_v11 = vsel %vm1033_vm0, %v13046_v17, %v13044_v19  ;;  %v13071_v50 = vmax.f32 %v10793_v30, 0.0  ;;  %v13050_v15 = vrot.slane %v10800_v25, 7  ;;  %v3055_v19 = vmax.f32 %v10810_v35, 0.0 }
 0x671   : > { %v3505_v54 = vsel %vm3429_vm15, %v3497_v11, %v13045_v60  ;;  %v13072_v11 = vmax.f32 %v10813_v36, 0.0  ;;  %v3059_v16 = vmax.f32 %v10672_v46, 0.0  ;;  %v10852_v35 = vrot.slane %v13054_v1, 7 }
 0x672   : > { %v3513_v10 = vsel %vm2493_vm3, %v3505_v54, %v3481_v12  ;;  %v3057_v12 = vmax.f32 %v10658_v58, 0.0  ;;  %v3094_v54 = vrot.slane %v3045_v63, 1  ;;  %v3063_v46 = vmax.f32 %v10707_v61, 0.0 }
 0x673   : > { %v3521_v21 = vsel %vm3446_vm5, %v3513_v10, %v13048_v13  ;;  %v3144_v10 = vrot.slane %v3045_v63, 7  ;;  %13254 = vst [vmem:[#allocation27_spill] sm:$0xff] %v10852_v35  ;;  %v3067_v8 = vmax.f32 %v10724_v62, 0.0  ;;  %v3069_v1 = vmax.f32 %v10735_v34, 0.0 }
 0x674   : > { %v3529_v60 = vsel %vm3455_vm6, %v3521_v21, %v13049_v23  ;;  %v3061_v21 = vmax.f32 %v10696_v26, 0.0  ;;  %v3073_v52 = vmax.f32 %v10752_v53, 0.0  ;;  %v10901_v53 = vrot.slane %v3052_v42, 5 }
 0x675   : > { %v3537_v17 = vsel %vm1389_vm2, %v3529_v60, %v13050_v15  ;;  %v3065_v60 = vmax.f32 %v10715_v56, 0.0  ;;  %v10867_v15 = vsel %vm1033_vm0, %v3094_v54, %v3144_v10  ;;  %v10872_v57 = vsel %vm1033_vm0, %v3144_v10, %v10852_v35 }
 0x676   : > { %v10856_v13 = vsel %vm1223_vm1, %v3537_v17, %v10800_v25  ;;  %v13058_v26 = vrot.slane %v10867_v15, 1  ;;  %v13059_v9 = vrot.slane %v10867_v15, 2  ;;  %v3071_v54 = vmax.f32 %v10743_v38, 0.0  ;;  %13255 = vst [vmem:[#allocation37_spill] sm:$0xff] %v10901_v53 }
 0x677   : > { %3809 = vrot.lane.b32.xlu0 %v10856_v13, %s13086_s11  ;;  %v13060_v55 = vrot.slane %v10867_v15, 3  ;;  %v3608_v61 = vrot.slane %v10872_v57, 4  ;;  %v3075_v38 = vmax.f32 %v10763_v47, 0.0  ;;  %v13061_v56 = vrot.slane %v10872_v57, 5 }
 0x678   : > { %v3672_v10 = vsel %vm1033_vm0, %v10867_v15, %v13058_v26  ;;  %v13062_v62 = vrot.slane %v10872_v57, 6  ;;  %v3097_v63 = vrot.slane %v3053_v24, 1  ;;  %v3099_v20 = vrot.slane %v3057_v12, 1 }
 0x679   : > { %v3680_v34 = vsel %vm3429_vm15, %v3672_v10, %v13059_v9  ;;  %v13063_v10 = vrot.slane %v10872_v57, 7  ;;  %v3098_v9 = vrot.slane %v3055_v19, 1  ;;  %v10912_v7 = vrot.slane %v3059_v16, 1 }
 0x67a   : > { %v3688_v26 = vsel %vm2493_vm3, %v3680_v34, %v13060_v55  ;;  %v10914_v42 = vrot.slane %v3061_v21, 1  ;;  %v10916_v55 = vrot.slane %v3063_v46, 1  ;;  %v10935_v23 = vrot.slane %v3075_v38, 1 }
 0x67b   : > { %v3696_v17 = vsel %vm3446_vm5, %v3688_v26, %v3608_v61  ;;  %v10923_v61 = vrot.slane %v3065_v60, 1  ;;  %v3153_v58 = vrot.slane %v3053_v24, 7  ;;  %v10943_v39 = vrot.slane %v13072_v11, 7 }
 0x67c   : > { %v3704_v47 = vsel %vm3455_vm6, %v3696_v17, %v13061_v56  ;;  %v10925_v17 = vrot.slane %v3067_v8, 1  ;;  %v10927_v56 = vrot.slane %v3069_v1, 1  ;;  %v10945_v51 = vrot.slane %v3057_v12, 7 }
 0x67d   : > { %v3712_v34 = vsel %vm1389_vm2, %v3704_v47, %v13062_v62  ;;  %v10931_v47 = vrot.slane %v3071_v54, 1  ;;  %v10933_v62 = vrot.slane %v3073_v52, 1  ;;  %v13258_v40 = vmax.f32 %v10669_v44, 0.0 }
 0x67e   : > { %v10921_v26 = vsel %vm1223_vm1, %v3712_v34, %v13063_v10  ;;  %v10939_v34 = vrot.slane %v13071_v50, 7  ;;  %v3156_v10 = vrot.slane %v3055_v19, 7  ;;  %v10951_v32 = vrot.slane %v3059_v16, 7 }
 0x67f   : > { %13256 = vst [vmem:[#allocation28_spill] sm:$0xff] %v10921_v26  ;;  %3892 = vrot.lane.b32.xlu1 %v10921_v26, %s13137_s9  ;;  %v10949_v5 = vrot.slane %v13258_v40, 7  ;;  %v13259_v53 = vmax.f32 %v10692_v37, 0.0  ;;  %v10957_v6 = vrot.slane %v3061_v21, 7  ;;  %v13260_v19 = vmax.f32 %v10700_v3, 0.0 }
 0x680   : > { %13257 = vst [vmem:[#allocation35_spill] sm:$0xff] %v10939_v34  ;;  %v10963_v11 = vrot.slane %v3063_v46, 7  ;;  %v13261_v12 = vmax.f32 %v10711_v28, 0.0  ;;  %v10969_v40 = vrot.slane %v3065_v60, 7  ;;  %v13262_v45 = vmax.f32 %v10720_v29, 0.0 }
 0x681   : > { %v10955_v24 = vrot.slane %v13259_v53, 7  ;;  %v10961_v50 = vrot.slane %v13260_v19, 7  ;;  %v10976_v21 = vrot.slane %v3067_v8, 7  ;;  %v13263_v35 = vmax.f32 %v10728_v22, 0.0 }
 0x682   : > { %v10967_v36 = vrot.slane %v13261_v12, 7  ;;  %v10974_v53 = vrot.slane %v13262_v45, 7  ;;  %v10982_v46 = vrot.slane %v3069_v1, 7  ;;  %v13264_v31 = vmax.f32 %v10739_v18, 0.0 }
 0x683   : > { %v10980_v19 = vrot.slane %v13263_v35, 7  ;;  %v10988_v60 = vrot.slane %v3071_v54, 7  ;;  %v13265_v16 = vrot.slane %v10663_v41, 1  ;;  %v13266_v8 = vmax.f32 %v10749_v14, 0.0 }
 0x684   : > { %v10986_v12 = vrot.slane %v13264_v31, 7  ;;  %v10998_v22 = vrot.slane %v3073_v52, 7  ;;  %v3357_v1 = vrot.slane %v10676_v48, 4  ;;  %v13267_v35 = vrot.slane %v10663_v41, 2 }
 0x685   : > { %v3421_v45 = vsel %vm1033_vm0, %v10663_v41, %v13265_v16  ;;  %v10996_v26 = vrot.slane %v13266_v8, 7  ;;  %v13268_v54 = vmax.f32 %v10755_v2, 0.0  ;;  %v11008_v18 = vrot.slane %v3075_v38, 7 }
 0x686   : > { %v3430_v31 = vsel %vm3429_vm15, %v3421_v45, %v13267_v35  ;;  %v13269_v16 = vmax.f32 %v10766_v4, 0.0  ;;  %v13270_v8 = vrot.slane %v10663_v41, 3  ;;  %v13271_v14 = vmax.f32 %v10787_v27, 0.0 }
 0x687   : > { %v11006_v49 = vrot.slane %v13268_v54, 7  ;;  %v13273_v45 = vmax.f32 %v10793_v30, 0.0  ;;  %v11027_v38 = vsel %vm1033_vm0, %v3097_v63, %v3153_v58  ;;  %v13277_v41 = vmax.f32 %v10692_v37, 0.0 }
 0x688   : > { %v11012_v29 = vrot.slane %v13269_v16, 7  ;;  %v3438_v52 = vsel %vm2493_vm3, %v3430_v31, %v13270_v8  ;;  %v11019_v28 = vrot.slane %v13271_v14, 5  ;;  %v13275_v16 = vmax.f32 %v10669_v44, 0.0 }
 0x689   : > { %v11023_v35 = vrot.slane %v13273_v45, 5  ;;  %v3447_v54 = vsel %vm3446_vm5, %v3438_v52, %v3357_v1  ;;  %v11035_v31 = vrot.slane %v13277_v41, 5  ;;  %v13279_v14 = vmax.f32 %v10700_v3, 0.0 }
 0x68a   : > { %13272 = vst [vmem:[#allocation38_spill] sm:$0xff] %v11019_v28  ;;  %v11031_v4 = vrot.slane %v13275_v16, 5  ;;  %v13281_v30 = vrot.slane %v10676_v48, 5  ;;  %v13282_v1 = vrot.slane %v10676_v48, 6  ;;  %v3728_v44 = vrot.slane %v10867_v15, 4 }
 0x68b   : > { %13274 = vst [vmem:[#allocation39_spill] sm:$0xff] %v11023_v35  ;;  %13278 = vst [vmem:[#allocation43_spill] sm:$0xff] %v11035_v31  ;;  %v11039_v27 = vrot.slane %v13279_v14, 5  ;;  %v13283_v52 = vrot.slane %v10867_v15, 2  ;;  %v13284_v37 = vrot.slane %v10867_v15, 1  ;;  %v11055_v3 = vsel %vm1033_vm0, %v3153_v58, %v10939_v34 }
 0x68c   : > { %13276 = vst [vmem:[#allocation41_spill] sm:$0xff] %v11031_v4  ;;  %v3456_v8 = vsel %vm3455_vm6, %v3447_v54, %v13281_v30  ;;  %v13285_v16 = vrot.slane %v10676_v48, 7  ;;  %v13286_v41 = vrot.slane %v10867_v15, 3  ;;  %v3562_v30 = vrot.slane %v11027_v38, 1 }
 0x68d   : > { %13280 = vst [vmem:[#allocation44_spill] sm:$0xff] %v11039_v27  ;;  %v3464_v63 = vsel %vm1389_vm2, %v3456_v8, %v13282_v1  ;;  %v3744_v45 = vsel %vm1033_vm0, %v13284_v37, %v13283_v52  ;;  %v3578_v8 = vrot.slane %v11027_v38, 2  ;;  %v11070_v58 = vsel %vm1033_vm0, %v3098_v9, %v3156_v10 }
 0x68e   : > { %v11060_v54 = vsel %vm1223_vm1, %v3464_v63, %v13285_v16  ;;  %v3752_v14 = vsel %vm3429_vm15, %v3744_v45, %v13286_v41  ;;  %v11074_v48 = vsel %vm1033_vm0, %v3099_v20, %v10945_v51  ;;  %v3594_v15 = vrot.slane %v11027_v38, 3 }
 0x68f   : > { %4005 = vrot.lane.b32.xlu0 %v11060_v54, %s13099_s26  ;;  %v3760_v1 = vsel %vm2493_vm3, %v3752_v14, %v3728_v44  ;;  %v13287_v63 = vrot.slane %v10872_v57, 5  ;;  %v3610_v37 = vrot.slane %v11055_v3, 4  ;;  %v3626_v45 = vrot.slane %v11055_v3, 5 }
 0x690   : > { %v3642_v16 = vrot.slane %v11055_v3, 6  ;;  %v13288_v9 = vrot.slane %v10872_v57, 6  ;;  %v3674_v20 = vsel %vm1033_vm0, %v11027_v38, %v3562_v30  ;;  %v3729_v44 = vrot.slane %v10583_v0, 4 }
 0x691   : > { %v3768_v52 = vsel %vm3446_vm5, %v3760_v1, %v13287_v63  ;;  %v13289_v14 = vrot.slane %v10583_v0, 2  ;;  %v13290_v27 = vrot.slane %v10583_v0, 1  ;;  %v13291_v63 = vrot.slane %v10872_v57, 7 }
 0x692   : > { %v3776_v41 = vsel %vm3455_vm6, %v3768_v52, %v13288_v9  ;;  %v3682_v31 = vsel %vm3429_vm15, %v3674_v20, %v3578_v8  ;;  %v13292_v34 = vrot.slane %v10583_v0, 3  ;;  %v11104_v9 = vsel %vm1033_vm0, %v3156_v10, %v10943_v39 }
 0x693   : > { %v3745_v1 = vsel %vm1033_vm0, %v13290_v27, %v13289_v14  ;;  %v3784_v4 = vsel %vm1389_vm2, %v3776_v41, %v13291_v63  ;;  %v3690_v28 = vsel %vm2493_vm3, %v3682_v31, %v3594_v15  ;;  %v3311_v14 = vrot.slane %v11070_v58, 1 }
 0x694   : > { %v3753_v52 = vsel %vm3429_vm15, %v3745_v1, %v13292_v34  ;;  %v3792_v35 = vsel %vm1223_vm1, %v3784_v4, %v10872_v57  ;;  %v3698_v0 = vsel %vm3446_vm5, %v3690_v28, %v3610_v37  ;;  %v13293_v34 = vrot.slane %v10594_v59, 5 }
 0x695   : > { %v3761_v27 = vsel %vm2493_vm3, %v3753_v52, %v3729_v44  ;;  %3924 = vrot.lane.b32.xlu1 %v3792_v35, %s13093_s23  ;;  %v13084_v10 = vrot.slane %v11070_v58, 2  ;;  %v3343_v20 = vrot.slane %v11070_v58, 3  ;;  %v3658_v57 = vrot.slane %v11055_v3, 7 }
 0x696   : > { %v3769_v41 = vsel %vm3446_vm5, %v3761_v27, %v13293_v34  ;;  %v3706_v4 = vsel %vm3455_vm6, %v3698_v0, %v3626_v45  ;;  %v13294_v31 = vrot.slane %v10594_v59, 6  ;;  %v3375_v35 = vrot.slane %v11104_v9, 5 }
 0x697   : > { %v3714_v28 = vsel %vm1389_vm2, %v3706_v4, %v3642_v16  ;;  %v13295_v37 = vrot.slane %v10594_v59, 7  ;;  %v3391_v63 = vrot.slane %v11104_v9, 6  ;;  %v3407_v52 = vrot.slane %v11104_v9, 7 }
 0x698   : > { %v3777_v44 = vsel %vm3455_vm6, %v3769_v41, %v13294_v31  ;;  %v11131_v27 = vsel %vm1223_vm1, %v3714_v28, %v3658_v57  ;;  %v3482_v34 = vrot.slane %v11070_v58, 4  ;;  %v3498_v41 = vsel %vm1033_vm0, %v3311_v14, %v13084_v10 }
 0x699   : > { %v3785_v1 = vsel %vm1389_vm2, %v3777_v44, %v13295_v37  ;;  %3896 = vrot.lane.b32.xlu0 %v11131_v27, %s13137_s9  ;;  %v3506_v4 = vsel %vm3429_vm15, %v3498_v41, %v3343_v20  ;;  %v3730_v31 = vrot.slane %v11027_v38, 4  ;;  %v3358_v44 = vrot.slane %v10800_v25, 4 }
 0x69a   : > { %v3793_v0 = vsel %vm1223_vm1, %v3785_v1, %v10594_v59  ;;  %v3746_v59 = vsel %vm1033_vm0, %v3562_v30, %v3578_v8  ;;  %v3514_v28 = vsel %vm2493_vm3, %v3506_v4, %v3482_v34  ;;  %v13296_v1 = vrot.slane %v10796_v33, 1 }
 0x69b   : > { %3926 = vrot.lane.b32.xlu1 %v3793_v0, %s13093_s23  ;;  %v3754_v37 = vsel %vm3429_vm15, %v3746_v59, %v3594_v15  ;;  %v3161_v0 = vsel %vm1033_vm0, %v10945_v51, %v10949_v5  ;;  %v3522_v38 = vsel %vm3446_vm5, %v3514_v28, %v3375_v35  ;;  %v13297_v8 = vrot.slane %v10796_v33, 2 }
 0x69c   : > { %v3422_v10 = vsel %vm1033_vm0, %v10796_v33, %v13296_v1  ;;  %v3762_v30 = vsel %vm2493_vm3, %v3754_v37, %v3730_v31  ;;  %v3563_v15 = vrot.slane %v11074_v48, 1  ;;  %v3530_v41 = vsel %vm3455_vm6, %v3522_v38, %v3391_v63 }
 0x69d   : > { %v3431_v34 = vsel %vm3429_vm15, %v3422_v10, %v13297_v8  ;;  %v3770_v4 = vsel %vm3446_vm5, %v3762_v30, %v3626_v45  ;;  %v13298_v51 = vrot.slane %v10796_v33, 3  ;;  %v3579_v28 = vrot.slane %v11074_v48, 2  ;;  %4030 = vrot.lane.b32.xlu0 %v10772_v43, %s8250_s2 }
 0x69e   : > { %v3538_v10 = vsel %vm1389_vm2, %v3530_v41, %v3407_v52  ;;  %v3778_v31 = vsel %vm3455_vm6, %v3770_v4, %v3642_v16  ;;  %v3595_v45 = vrot.slane %v11074_v48, 3  ;;  %v11186_v33 = vsel %vm1033_vm0, %v10912_v7, %v10951_v32 }
 0x69f   : > { %v3439_v59 = vsel %vm2493_vm3, %v3431_v34, %v13298_v51  ;;  %v11190_v1 = vsel %vm1223_vm1, %v3538_v10, %v11104_v9  ;;  %v3786_v43 = vsel %vm1389_vm2, %v3778_v31, %v3658_v57  ;;  %v13299_v38 = vrot.slane %v10800_v25, 5 }
 0x6a0   : > { %v3448_v37 = vsel %vm3446_vm5, %v3439_v59, %v3358_v44  ;;  %v11199_v16 = vsel %vm1033_vm0, %v10914_v42, %v10957_v6  ;;  %3811 = vrot.lane.b32.xlu1 %v11190_v1, %s13086_s11  ;;  %v3794_v7 = vsel %vm1223_vm1, %v3786_v43, %v11055_v3  ;;  %v13300_v44 = vrot.slane %v10800_v25, 6 }
 0x6a1   : > { %v3457_v30 = vsel %vm3455_vm6, %v3448_v37, %v13299_v38  ;;  %v3627_v57 = vrot.slane %v3161_v0, 5  ;;  %v3643_v34 = vrot.slane %v3161_v0, 6  ;;  %v3659_v41 = vrot.slane %v3161_v0, 7  ;;  %3928 = vrot.lane.b32.xlu0 %v3794_v7, %s13093_s23 }
 0x6a2   : > { %v3465_v8 = vsel %vm1389_vm2, %v3457_v30, %v13300_v44  ;;  %v3731_v4 = vrot.slane %v11074_v48, 4  ;;  %v3747_v51 = vsel %vm1033_vm0, %v3563_v15, %v3579_v28  ;;  %v13301_v42 = vrot.slane %v10800_v25, 7 }
 0x6a3   : > { %v3755_v3 = vsel %vm3429_vm15, %v3747_v51, %v3595_v45  ;;  %v3611_v10 = vrot.slane %v3161_v0, 4  ;;  %v3675_v31 = vsel %vm1033_vm0, %v11074_v48, %v3563_v15  ;;  %v3423_v38 = vsel %vm1033_vm0, %v11070_v58, %v3311_v14 }
 0x6a4   : > { %v11214_v59 = vsel %vm1223_vm1, %v3465_v8, %v13301_v42  ;;  %v3763_v37 = vsel %vm2493_vm3, %v3755_v3, %v3731_v4  ;;  %v3683_v43 = vsel %vm3429_vm15, %v3675_v31, %v3579_v28  ;;  %v11228_v25 = vsel %vm1033_vm0, %v10957_v6, %v10961_v50 }
 0x6a5   : > { %4007 = vrot.lane.b32.xlu1 %v11214_v59, %s13099_s26  ;;  %v3771_v30 = vsel %vm3446_vm5, %v3763_v37, %v3627_v57  ;;  %v3691_v48 = vsel %vm2493_vm3, %v3683_v43, %v3595_v45  ;;  %v3359_v15 = vrot.slane %v11104_v9, 4  ;;  %v13302_v28 = vrot.slane %v11070_v58, 2 }
 0x6a6   : > { %v3779_v14 = vsel %vm3455_vm6, %v3771_v30, %v3643_v34  ;;  %v3699_v44 = vsel %vm3446_vm5, %v3691_v48, %v3611_v10  ;;  %v3564_v8 = vrot.slane %v11199_v16, 1  ;;  %v3580_v42 = vrot.slane %v11199_v16, 2 }
 0x6a7   : > { %v3432_v7 = vsel %vm3429_vm15, %v3423_v38, %v13302_v28  ;;  %v3787_v4 = vsel %vm1389_vm2, %v3779_v14, %v3659_v41  ;;  %v3707_v45 = vsel %vm3455_vm6, %v3699_v44, %v3627_v57  ;;  %v11251_v3 = vsel %vm1033_vm0, %v10916_v55, %v10963_v11 }
 0x6a8   : > { %v3440_v6 = vsel %vm2493_vm3, %v3432_v7, %v3343_v20  ;;  %v3795_v10 = vsel %vm1223_vm1, %v3787_v4, %v3161_v0  ;;  %v3715_v58 = vsel %vm1389_vm2, %v3707_v45, %v3643_v34  ;;  %v11261_v57 = vsel %vm1033_vm0, %v10923_v61, %v10969_v40 }
 0x6a9   : > { %v3449_v51 = vsel %vm3446_vm5, %v3440_v6, %v3359_v15  ;;  %3930 = vrot.lane.b32.xlu0 %v3795_v10, %s13093_s23  ;;  %v11265_v31 = vsel %vm1223_vm1, %v3715_v58, %v3659_v41  ;;  %v3596_v0 = vrot.slane %v11199_v16, 3  ;;  %v3628_v34 = vrot.slane %v11228_v25, 5 }
 0x6aa   : > { %v3458_v20 = vsel %vm3455_vm6, %v3449_v51, %v3375_v35  ;;  %3898 = vrot.lane.b32.xlu1 %v11265_v31, %s13137_s9  ;;  %v3612_v35 = vrot.slane %v11228_v25, 4  ;;  %v3644_v61 = vrot.slane %v11228_v25, 6  ;;  %v3676_v37 = vsel %vm1033_vm0, %v11199_v16, %v3564_v8 }
 0x6ab   : > { %v3466_v55 = vsel %vm1389_vm2, %v3458_v20, %v3391_v63  ;;  %v3684_v63 = vsel %vm3429_vm15, %v3676_v37, %v3580_v42  ;;  %v11287_v43 = vsel %vm1033_vm0, %v10951_v32, %v10955_v24  ;;  %v3312_v38 = vrot.slane %v11186_v33, 1 }
 0x6ac   : > { %v11281_v41 = vsel %vm1223_vm1, %v3466_v55, %v3407_v52  ;;  %v3660_v30 = vrot.slane %v11228_v25, 7  ;;  %v3692_v48 = vsel %vm2493_vm3, %v3684_v63, %v3596_v0  ;;  %v3328_v15 = vrot.slane %v11186_v33, 2 }
 0x6ad   : > { %v3344_v9 = vrot.slane %v11186_v33, 3  ;;  %4009 = vrot.lane.b32.xlu0 %v11281_v41, %s13099_s26  ;;  %v3700_v52 = vsel %vm3446_vm5, %v3692_v48, %v3612_v35  ;;  %v3376_v28 = vrot.slane %v11287_v43, 5  ;;  %v3392_v32 = vrot.slane %v11287_v43, 6 }
 0x6ae   : > { %v3483_v7 = vrot.slane %v11186_v33, 4  ;;  %4032 = vrot.lane.b32.xlu1 %v10856_v13, %s8250_s2  ;;  %v3708_v14 = vsel %vm3455_vm6, %v3700_v52, %v3628_v34  ;;  %v3499_v44 = vsel %vm1033_vm0, %v3312_v38, %v3328_v15  ;;  %v11307_v6 = vsel %vm1033_vm0, %v10963_v11, %v10967_v36 }
 0x6af   : > { %v3313_v4 = vrot.slane %v11251_v3, 1  ;;  %v3716_v45 = vsel %vm1389_vm2, %v3708_v14, %v3644_v61  ;;  %v3507_v51 = vsel %vm3429_vm15, %v3499_v44, %v3344_v9  ;;  %v13085_v10 = vrot.slane %v11251_v3, 2 }
 0x6b0   : > { %v3345_v58 = vrot.slane %v11251_v3, 3  ;;  %v11315_v13 = vsel %vm1223_vm1, %v3716_v45, %v3660_v30  ;;  %v3408_v20 = vrot.slane %v11287_v43, 7  ;;  %v3515_v55 = vsel %vm2493_vm3, %v3507_v51, %v3483_v7 }
 0x6b1   : > { %v3377_v11 = vrot.slane %v11307_v6, 5  ;;  %3900 = vrot.lane.b32.xlu0 %v11315_v13, %s13137_s9  ;;  %v3523_v35 = vsel %vm3446_vm5, %v3515_v55, %v3376_v28  ;;  %v3393_v37 = vrot.slane %v11307_v6, 6  ;;  %v3484_v48 = vrot.slane %v11251_v3, 4 }
 0x6b2   : > { %v3531_v52 = vsel %vm3455_vm6, %v3523_v35, %v3392_v32  ;;  %v3500_v14 = vsel %vm1033_vm0, %v3313_v4, %v13085_v10  ;;  %v3732_v7 = vrot.slane %v11199_v16, 4  ;;  %v3748_v44 = vsel %vm1033_vm0, %v3564_v8, %v3580_v42 }
 0x6b3   : > { %v3539_v45 = vsel %vm1389_vm2, %v3531_v52, %v3408_v20  ;;  %v3508_v51 = vsel %vm3429_vm15, %v3500_v14, %v3345_v58  ;;  %v3756_v55 = vsel %vm3429_vm15, %v3748_v44, %v3596_v0  ;;  %v3360_v63 = vrot.slane %v11287_v43, 4 }
 0x6b4   : > { %v11340_v35 = vsel %vm1223_vm1, %v3539_v45, %v11287_v43  ;;  %v3516_v10 = vsel %vm2493_vm3, %v3508_v51, %v3484_v48  ;;  %v3764_v16 = vsel %vm2493_vm3, %v3756_v55, %v3732_v7  ;;  %v3424_v8 = vsel %vm1033_vm0, %v11186_v33, %v3312_v38 }
 0x6b5   : > { %3813 = vrot.lane.b32.xlu1 %v11340_v35, %s13086_s11  ;;  %4034 = vrot.lane.b32.xlu0 %v11190_v1, %s8250_s2  ;;  %v3524_v42 = vsel %vm3446_vm5, %v3516_v10, %v3377_v11  ;;  %v3772_v0 = vsel %vm3446_vm5, %v3764_v16, %v3628_v34  ;;  %v3433_v43 = vsel %vm3429_vm15, %v3424_v8, %v3328_v15  ;;  %v3565_v48 = vrot.slane %v11261_v57, 1 }
 0x6b6   : > { %v3532_v33 = vsel %vm3455_vm6, %v3524_v42, %v3393_v37  ;;  %v3780_v38 = vsel %vm3455_vm6, %v3772_v0, %v3644_v61  ;;  %v3441_v52 = vsel %vm2493_vm3, %v3433_v43, %v3344_v9  ;;  %v3173_v1 = vsel %vm1033_vm0, %v10969_v40, %v10974_v53 }
 0x6b7   : > { %v13303_v10 = vrot.slane %v11307_v6, 7  ;;  %v3788_v15 = vsel %vm1389_vm2, %v3780_v38, %v3660_v30  ;;  %v3450_v14 = vsel %vm3446_vm5, %v3441_v52, %v3360_v63  ;;  %v3581_v7 = vrot.slane %v11261_v57, 2 }
 0x6b8   : > { %v3796_v61 = vsel %vm1223_vm1, %v3788_v15, %v11228_v25  ;;  %v3459_v9 = vsel %vm3455_vm6, %v3450_v14, %v3376_v28  ;;  %v3597_v40 = vrot.slane %v11261_v57, 3  ;;  %v11381_v45 = vsel %vm1033_vm0, %v10925_v17, %v10976_v21 }
 0x6b9   : > { %v3540_v34 = vsel %vm1389_vm2, %v3532_v33, %v13303_v10  ;;  %v11386_v30 = vsel %vm1033_vm0, %v10927_v56, %v10982_v46  ;;  %3932 = vrot.lane.b32.xlu0 %v3796_v61, %s13093_s23  ;;  %v3467_v25 = vsel %vm1389_vm2, %v3459_v9, %v3392_v32  ;;  %v3629_v28 = vrot.slane %v3173_v1, 5 }
 0x6ba   : > { %v11372_v44 = vsel %vm1223_vm1, %v3540_v34, %v11307_v6  ;;  %v11393_v63 = vsel %vm1223_vm1, %v3467_v25, %v3408_v20  ;;  %v3645_v51 = vrot.slane %v3173_v1, 6  ;;  %v3733_v17 = vrot.slane %v11261_v57, 4 }
 0x6bb   : > { %3815 = vrot.lane.b32.xlu1 %v11372_v44, %s13086_s11  ;;  %v3749_v55 = vsel %vm1033_vm0, %v3565_v48, %v3581_v7  ;;  %v3661_v16 = vrot.slane %v3173_v1, 7  ;;  %v3613_v8 = vrot.slane %v3173_v1, 4  ;;  %v3677_v42 = vsel %vm1033_vm0, %v11261_v57, %v3565_v48 }
 0x6bc   : > { %v3757_v56 = vsel %vm3429_vm15, %v3749_v55, %v3597_v40  ;;  %v3685_v32 = vsel %vm3429_vm15, %v3677_v42, %v3581_v7  ;;  %v3425_v20 = vsel %vm1033_vm0, %v11251_v3, %v3313_v4  ;;  %v11407_v43 = vsel %vm1033_vm0, %v10982_v46, %v10986_v12 }
 0x6bd   : > { %v3765_v0 = vsel %vm2493_vm3, %v3757_v56, %v3733_v17  ;;  %v3693_v38 = vsel %vm2493_vm3, %v3685_v32, %v3597_v40  ;;  %v3361_v57 = vrot.slane %v11307_v6, 4  ;;  %v13304_v48 = vrot.slane %v11251_v3, 2 }
 0x6be   : > { %v3773_v33 = vsel %vm3446_vm5, %v3765_v0, %v3629_v28  ;;  %v3701_v10 = vsel %vm3446_vm5, %v3693_v38, %v3613_v8  ;;  %v3566_v34 = vrot.slane %v11386_v30, 1  ;;  %v3582_v61 = vrot.slane %v11386_v30, 2 }
 0x6bf   : > { %4011 = vrot.lane.b32.xlu1 %v11393_v63, %s13099_s26  ;;  %v3434_v52 = vsel %vm3429_vm15, %v3425_v20, %v13304_v48  ;;  %v3781_v4 = vsel %vm3455_vm6, %v3773_v33, %v3645_v51  ;;  %v3709_v14 = vsel %vm3455_vm6, %v3701_v10, %v3629_v28  ;;  %v11430_v9 = vsel %vm1033_vm0, %v10931_v47, %v10988_v60 }
 0x6c0   : > { %v3442_v46 = vsel %vm2493_vm3, %v3434_v52, %v3345_v58  ;;  %v3789_v15 = vsel %vm1389_vm2, %v3781_v4, %v3661_v16  ;;  %v3717_v3 = vsel %vm1389_vm2, %v3709_v14, %v3645_v51  ;;  %v11440_v25 = vsel %vm1033_vm0, %v10935_v23, %v11008_v18 }
 0x6c1   : > { %v3451_v7 = vsel %vm3446_vm5, %v3442_v46, %v3361_v57  ;;  %v3797_v40 = vsel %vm1223_vm1, %v3789_v15, %v3173_v1  ;;  %v11444_v28 = vsel %vm1223_vm1, %v3717_v3, %v3661_v16  ;;  %v3598_v1 = vrot.slane %v11386_v30, 3 }
 0x6c2   : > { %v3460_v58 = vsel %vm3455_vm6, %v3451_v7, %v3377_v11  ;;  %3934 = vrot.lane.b32.xlu0 %v3797_v40, %s13093_s23  ;;  %v13305_v11 = vrot.slane %v11307_v6, 7  ;;  %v3614_v23 = vrot.slane %v11407_v43, 4  ;;  %v3630_v17 = vrot.slane %v11407_v43, 5 }
 0x6c3   : > { %v3468_v47 = vsel %vm1389_vm2, %v3460_v58, %v3393_v37  ;;  %3902 = vrot.lane.b32.xlu1 %v11444_v28, %s13137_s9  ;;  %v3678_v55 = vsel %vm1033_vm0, %v11386_v30, %v3566_v34  ;;  %v3646_v16 = vrot.slane %v11407_v43, 6  ;;  %v11466_v56 = vsel %vm1033_vm0, %v10976_v21, %v10980_v19 }
 0x6c4   : > { %v11455_v51 = vsel %vm1223_vm1, %v3468_v47, %v13305_v11  ;;  %v3686_v37 = vsel %vm3429_vm15, %v3678_v55, %v3582_v61  ;;  %v3314_v6 = vrot.slane %v11381_v45, 1  ;;  %v3662_v8 = vrot.slane %v11407_v43, 7 }
 0x6c5   : > { %v3694_v42 = vsel %vm2493_vm3, %v3686_v37, %v3598_v1  ;;  %v3330_v0 = vrot.slane %v11381_v45, 2  ;;  %v3346_v32 = vrot.slane %v11381_v45, 3  ;;  %v3378_v33 = vrot.slane %v11466_v56, 5 }
 0x6c6   : > { %4013 = vrot.lane.b32.xlu0 %v11455_v51, %s13099_s26  ;;  %v3702_v20 = vsel %vm3446_vm5, %v3694_v42, %v3614_v23  ;;  %v3394_v21 = vrot.slane %v11466_v56, 6  ;;  %v3485_v38 = vrot.slane %v11381_v45, 4  ;;  %v11486_v52 = vsel %vm1033_vm0, %v10988_v60, %v10996_v26 }
 0x6c7   : > { %4036 = vrot.lane.b32.xlu1 %v11340_v35, %s8250_s2  ;;  %v3710_v57 = vsel %vm3455_vm6, %v3702_v20, %v3630_v17  ;;  %v3501_v48 = vsel %vm1033_vm0, %v3314_v6, %v3330_v0  ;;  %v3315_v4 = vrot.slane %v11430_v9, 1  ;;  %v3331_v15 = vrot.slane %v11430_v9, 2 }
 0x6c8   : > { %v3718_v10 = vsel %vm1389_vm2, %v3710_v57, %v3646_v16  ;;  %v3509_v46 = vsel %vm3429_vm15, %v3501_v48, %v3346_v32  ;;  %v3347_v14 = vrot.slane %v11430_v9, 3  ;;  %v3410_v7 = vrot.slane %v11466_v56, 7 }
 0x6c9   : > { %v11494_v35 = vsel %vm1223_vm1, %v3718_v10, %v3662_v8  ;;  %v3517_v40 = vsel %vm2493_vm3, %v3509_v46, %v3485_v38  ;;  %v3379_v60 = vrot.slane %v11486_v52, 5  ;;  %v3395_v58 = vrot.slane %v11486_v52, 6 }
 0x6ca   : > { %3904 = vrot.lane.b32.xlu0 %v11494_v35, %s13137_s9  ;;  %v3525_v3 = vsel %vm3446_vm5, %v3517_v40, %v3378_v33  ;;  %v3411_v47 = vrot.slane %v11486_v52, 7  ;;  %v3486_v11 = vrot.slane %v11430_v9, 4  ;;  %v3502_v55 = vsel %vm1033_vm0, %v3315_v4, %v3331_v15 }
 0x6cb   : > { %v3533_v23 = vsel %vm3455_vm6, %v3525_v3, %v3394_v21  ;;  %v3734_v37 = vrot.slane %v11386_v30, 4  ;;  %v3750_v42 = vsel %vm1033_vm0, %v3566_v34, %v3582_v61  ;;  %v3510_v38 = vsel %vm3429_vm15, %v3502_v55, %v3347_v14 }
 0x6cc   : > { %v3541_v20 = vsel %vm1389_vm2, %v3533_v23, %v3410_v7  ;;  %v3758_v57 = vsel %vm3429_vm15, %v3750_v42, %v3598_v1  ;;  %v3362_v48 = vrot.slane %v11466_v56, 4  ;;  %v3518_v46 = vsel %vm2493_vm3, %v3510_v38, %v3486_v11 }
 0x6cd   : > { %v11521_v10 = vsel %vm1223_vm1, %v3541_v20, %v11466_v56  ;;  %v3766_v30 = vsel %vm2493_vm3, %v3758_v57, %v3734_v37  ;;  %v3426_v34 = vsel %vm1033_vm0, %v11381_v45, %v3314_v6  ;;  %v3526_v61 = vsel %vm3446_vm5, %v3518_v46, %v3379_v60  ;;  %v13306_v37 = vld [vmem:[#allocation54_spill] sm:$0xff]  ;;  %v13308_v20 = vld [vmem:[#allocation25_spill] sm:$0xff] }
 0x6ce   : > { %3817 = vrot.lane.b32.xlu1 %v11521_v10, %s13086_s11  ;;  %4038 = vrot.lane.b32.xlu0 %v11372_v44, %s8250_s2  ;;  %v3774_v1 = vsel %vm3446_vm5, %v3766_v30, %v3630_v17  ;;  %v3435_v56 = vsel %vm3429_vm15, %v3426_v34, %v3330_v0  ;;  %v3316_v40 = vrot.slane %v11440_v25, 1  ;;  %v3534_v45 = vsel %vm3455_vm6, %v3526_v61, %v3395_v58 }
 0x6cf   : > { %v3782_v6 = vsel %vm3455_vm6, %v3774_v1, %v3646_v16  ;;  %v3443_v3 = vsel %vm2493_vm3, %v3435_v56, %v3346_v32  ;;  %v3188_v44 = vsel %vm1033_vm0, %v11008_v18, %v11012_v29  ;;  %v3542_v17 = vsel %vm1389_vm2, %v3534_v45, %v3411_v47 }
 0x6d0   : > { %v3790_v0 = vsel %vm1389_vm2, %v3782_v6, %v3662_v8  ;;  %v3452_v11 = vsel %vm3446_vm5, %v3443_v3, %v3362_v48  ;;  %v3332_v23 = vrot.slane %v11440_v25, 2  ;;  %v3283_v16 = vsel %vm1033_vm0, %v10933_v62, %v10998_v22  ;;  %v13310_v48 = vld [vmem:[#allocation55_spill] sm:$0xff] }
 0x6d1   : > { %v11556_v32 = vsel %vm1223_vm1, %v3542_v17, %v11486_v52  ;;  %v3798_v18 = vsel %vm1223_vm1, %v3790_v0, %v11407_v43  ;;  %v3461_v55 = vsel %vm3455_vm6, %v3452_v11, %v3378_v33  ;;  %v13307_v42 = vmax.f32 %v13306_v37, 0.0 }
 0x6d2   : > { %v13309_v38 = vmax.f32 %v13308_v20, 0.0  ;;  %v13311_v46 = vmax.f32 %v13310_v48, 0.0  ;;  %3819 = vrot.lane.b32.xlu1 %v11556_v32, %s13086_s11  ;;  %3936 = vrot.lane.b32.xlu0 %v3798_v18, %s13093_s23  ;;  %v3469_v43 = vsel %vm1389_vm2, %v3461_v55, %v3394_v21  ;;  %v3348_v30 = vrot.slane %v11440_v25, 3  ;;  %s13091_s11 = smov 64  }
 0x6d3   : > { %v11563_v8 = vrot.slane %v13307_v42, 5  ;;  %v11578_v33 = vsel %vm1223_vm1, %v3469_v43, %v3410_v7  ;;  %v3428_v34 = vsel %vm1033_vm0, %v11440_v25, %v3316_v40  ;;  %v3185_v61 = vsel %vm1033_vm0, %v10998_v22, %v11006_v49 }
 0x6d4   : > { %v11567_v57 = vrot.slane %v13309_v38, 5  ;;  %v11571_v62 = vrot.slane %v13311_v46, 5  ;;  %v3364_v1 = vrot.slane %v3188_v44, 4  ;;  %v3437_v56 = vsel %vm3429_vm15, %v3428_v34, %v3332_v23 }
 0x6d5   : > { %v3567_v45 = vrot.slane %v3283_v16, 1  ;;  %v3583_v6 = vrot.slane %v3283_v16, 2  ;;  %v3380_v3 = vrot.slane %v3188_v44, 5  ;;  %v3396_v17 = vrot.slane %v3188_v44, 6 }
 0x6d6   : > { %v3412_v21 = vrot.slane %v3188_v44, 7  ;;  %v3445_v7 = vsel %vm2493_vm3, %v3437_v56, %v3348_v30  ;;  %4015 = vrot.lane.b32.xlu1 %v11578_v33, %s13099_s26  ;;  %v3599_v11 = vrot.slane %v3283_v16, 3  ;;  %v3615_v18 = vrot.slane %v3185_v61, 4 }
 0x6d7   : > { %v3454_v0 = vsel %vm3446_vm5, %v3445_v7, %v3364_v1  ;;  %v3679_v55 = vsel %vm1033_vm0, %v3283_v16, %v3567_v45  ;;  %v3487_v42 = vrot.slane %v11440_v25, 4  ;;  %v3503_v20 = vsel %vm1033_vm0, %v3316_v40, %v3332_v23 }
 0x6d8   : > { %v3463_v22 = vsel %vm3455_vm6, %v3454_v0, %v3380_v3  ;;  %v3687_v37 = vsel %vm3429_vm15, %v3679_v55, %v3583_v6  ;;  %v3631_v48 = vrot.slane %v3185_v61, 5  ;;  %v3511_v43 = vsel %vm3429_vm15, %v3503_v20, %v3348_v30  ;;  %v13313_v20 = vld [vmem:[#allocation59_spill] sm:$0xff] }
 0x6d9   : > { %v3471_v38 = vsel %vm1389_vm2, %v3463_v22, %v3396_v17  ;;  %v3695_v46 = vsel %vm2493_vm3, %v3687_v37, %v3599_v11  ;;  %v3647_v1 = vrot.slane %v3185_v61, 6  ;;  %v3519_v7 = vsel %vm2493_vm3, %v3511_v43, %v3487_v42 }
 0x6da   : > { %v11600_v34 = vsel %vm1223_vm1, %v3471_v38, %v3412_v21  ;;  %v3703_v56 = vsel %vm3446_vm5, %v3695_v46, %v3615_v18  ;;  %v13312_v0 = vmax.f32 %v10755_v2, 0.0  ;;  %v3663_v40 = vrot.slane %v3185_v61, 7  ;;  %v13314_v38 = vld [vmem:[#allocation52_spill] sm:$0xff] }
 0x6db   : > { %4019 = vrot.lane.b32.xlu0 %v11600_v34, %s13099_s26  ;;  %v3711_v23 = vsel %vm3455_vm6, %v3703_v56, %v3631_v48  ;;  %v3527_v30 = vsel %vm3446_vm5, %v3519_v7, %v3380_v3  ;;  %v3735_v37 = vrot.slane %v3283_v16, 4  ;;  %v3751_v18 = vsel %vm1033_vm0, %v3567_v45, %v3583_v6  ;;  %v13315_v56 = vld [vmem:[#allocation38_spill] sm:$0xff]  ;;  %v13316_v7 = vld [vmem:[#allocation27_spill] sm:$0xff] }
 0x6dc   : > { %v11606_v25 = vrot.slane %v13312_v0, 5  ;;  %v3719_v55 = vsel %vm1389_vm2, %v3711_v23, %v3647_v1  ;;  %v3535_v22 = vsel %vm3455_vm6, %v3527_v30, %v3396_v17  ;;  %v3285_v46 = vsel %vm1033_vm0, %v13314_v38, %v13313_v20 }
 0x6dd   : > { %v11616_v42 = vsel %vm1223_vm1, %v3719_v55, %v3663_v40  ;;  %v3543_v2 = vsel %vm1389_vm2, %v3535_v22, %v3412_v21  ;;  %v3759_v43 = vsel %vm3429_vm15, %v3751_v18, %v3599_v11  ;;  %v3842_v3 = vrot.slane %v11060_v54, 1 }
 0x6de   : > { %3906 = vrot.lane.b32.xlu1 %v11616_v42, %s13137_s9  ;;  %v3551_v16 = vsel %vm1223_vm1, %v3543_v2, %v3188_v44  ;;  %v3767_v45 = vsel %vm2493_vm3, %v3759_v43, %v3735_v37  ;;  %v3427_v6 = vsel %vm1033_vm0, %v11430_v9, %v3315_v4  ;;  %v3363_v21 = vrot.slane %v11486_v52, 4  ;;  %v13317_v37 = vld [vmem:[#allocation36_spill] sm:$0xff] }
 0x6df   : > { %4044 = vrot.lane.b32.xlu0 %v3551_v16, %s8250_s2  ;;  %v3775_v17 = vsel %vm3446_vm5, %v3767_v45, %v3631_v48  ;;  %v3436_v11 = vsel %vm3429_vm15, %v3427_v6, %v3331_v15  ;;  %v3286_v44 = vsel %vm1033_vm0, %v13316_v7, %v13315_v56  ;;  %v3843_v0 = vrot.slane %v3285_v46, 1  ;;  %v13318_v15 = vld [vmem:[#allocation33_spill] sm:$0xff]  ;;  %v13321_v46 = vld [vmem:[#allocation39_spill] sm:$0xff] }
 0x6e0   : > { %v3783_v23 = vsel %vm3455_vm6, %v3775_v17, %v3647_v1  ;;  %v3444_v4 = vsel %vm2493_vm3, %v3436_v11, %v3347_v14  ;;  %v3957_v30 = vrot.slane %v3286_v44, 1  ;;  %v3962_v48 = vrot.slane %v11131_v27, 1  ;;  %v13319_v27 = vld [vmem:[#allocation28_spill] sm:$0xff]  ;;  %v13323_v16 = vld [vmem:[#allocation43_spill] sm:$0xff]  ;;  %v13324_v45 = vld [vmem:[#allocation41_spill] sm:$0xff] }
 0x6e1   : > { %v3791_v55 = vsel %vm1389_vm2, %v3783_v23, %v3663_v40  ;;  %v3453_v22 = vsel %vm3446_vm5, %v3444_v4, %v3363_v21  ;;  %v3287_v18 = vsel %vm1033_vm0, %v13318_v15, %v13317_v37  ;;  %v3844_v1 = vsel %vm1223_vm1, %v3842_v3, %v3843_v0  ;;  %v13325_v21 = vld [vmem:[#allocation37_spill] sm:$0xff]  ;;  %v13326_v11 = vld [vmem:[#allocation34_spill] sm:$0xff]  ;;  %v13329_v44 = vld [vmem:[#allocation44_spill] sm:$0xff] }
 0x6e2   : > { %4040 = vrot.lane.b32.xlu1 %v11521_v10, %s8250_s2  ;;  %v3799_v9 = vsel %vm1223_vm1, %v3791_v55, %v3185_v61  ;;  %v3462_v14 = vsel %vm3455_vm6, %v3453_v22, %v3379_v60  ;;  %v13320_v2 = vrot.slane %v13319_v27, 1  ;;  %v3965_v20 = vrot.slane %v11265_v31, 1  ;;  %v13322_v61 = vld [vmem:[#allocation35_spill] sm:$0xff] }
 0x6e3   : > { %3863 = vrot.lane.b32.xlu0 %v3844_v1, %s13097_s16  ;;  %v3470_v10 = vsel %vm1389_vm2, %v3462_v14, %v3395_v58  ;;  %v3960_v38 = vrot.slane %v3287_v18, 1  ;;  %v3289_v43 = vsel %vm1033_vm0, %v13322_v61, %v13321_v46  ;;  %v11677_v31 = vsel %vm1033_vm0, %v10955_v24, %v13323_v16  ;;  %v4152_v18 = vld [vmem:[%s8301_s25 + $0x8] sm:$0xff]  ;;  %v4154_v14 = vld [vmem:[%s8301_s25 + $0x18] sm:$0xff] }
 0x6e4   : > { %v3958_v40 = vsel %vm1223_vm1, %v13320_v2, %v3957_v30  ;;  %v11672_v60 = vsel %vm1223_vm1, %v3470_v10, %v3411_v47  ;;  %v3963_v3 = vrot.slane %v3289_v43, 1  ;;  %v3291_v58 = vsel %vm1033_vm0, %v10949_v5, %v13324_v45  ;;  %v13327_v47 = vld [vmem:[#allocation23_spill] sm:$0xff]  ;;  %v13330_v30 = vld [vmem:[#allocation60_spill] sm:$0xff] }
 0x6e5   : > { %v3845_v6 = vrot.slane %v11214_v59, 1  ;;  %v3968_v17 = vrot.slane %v11315_v13, 1  ;;  %v3288_v52 = vsel %vm1033_vm0, %v13326_v11, %v13325_v21  ;;  %v13328_v56 = vrot.slane %v13327_v47, 1  ;;  %v4155_v43 = vld [vmem:[%s8301_s25 + $0x20] sm:$0xff]  ;;  %v13334_v47 = vld [vmem:[#allocation53_spill] sm:$0xff] }
 0x6e6   : > { %3938 = vrot.lane.b32.xlu1 %v3799_v9, %s13093_s23  ;;  %v11692_v24 = vsel %vm1223_vm1, %v3962_v48, %v3963_v3  ;;  %v3966_v5 = vrot.slane %v3291_v58, 1  ;;  %v11697_v13 = vsel %vm1033_vm0, %v10967_v36, %v11563_v8  ;;  %v3293_v0 = vsel %vm1033_vm0, %v10961_v50, %v13329_v44  ;;  %v4151_v8 = vld [vmem:[%s8301_s25] sm:$0xff]  ;;  %v4153_v9 = vld [vmem:[%s8301_s25 + $0x10] sm:$0xff]  ;;  %v4156_v3 = vld [vmem:[%s8301_s25 + $0x28] sm:$0xff] }
 0x6e7   : > { %v3961_v7 = vsel %vm1223_vm1, %v13328_v56, %v3960_v38  ;;  %v3971_v23 = vrot.slane %v11444_v28, 1  ;;  %3980 = vrot.lane.b32.xlu0 %v3958_v40, %s8252_s22  ;;  %v3969_v4 = vrot.slane %v3293_v0, 1  ;;  %v13331_v48 = vmax.f32 %v13330_v30, 0.0  ;;  %v11769_v0 = vpop.permute.xlu0 %3894 }
 0x6e8   : > { %v3846_v22 = vrot.slane %v3288_v52, 1  ;;  %v11707_v37 = vsel %vm1223_vm1, %v3965_v20, %v3966_v5  ;;  %v3295_v36 = vsel %vm1033_vm0, %v10974_v53, %v11567_v57  ;;  %v3974_v50 = vrot.slane %v11494_v35, 1  ;;  %v13332_v57 = vld [vmem:[#allocation26_spill] sm:$0xff]  ;;  %v4159_v5 = vld [vmem:[%s8301_s25 + $0x40] sm:$0xff] }
 0x6e9   : > { %v3252_v55 = vrot.slane %v13331_v48, 5  ;;  %v11715_v28 = vsel %vm1223_vm1, %v3968_v17, %v3969_v4  ;;  %v3972_v15 = vrot.slane %v3295_v36, 1  ;;  %v3977_v27 = vrot.slane %v11616_v42, 1  ;;  %v4158_v17 = vld [vmem:[%s8301_s25 + $0x38] sm:$0xff] }
 0x6ea   : > { %4017 = vrot.lane.b32.xlu1 %v11672_v60, %s13099_s26  ;;  %v3847_v2 = vsel %vm1223_vm1, %v3845_v6, %v3846_v22  ;;  %v3297_v53 = vsel %vm1033_vm0, %v10986_v12, %v11571_v62  ;;  %v3299_v35 = vsel %vm1033_vm0, %v11006_v49, %v11606_v25  ;;  %v13333_v40 = vmax.f32 %v13332_v57, 0.0  ;;  %v4157_v6 = vld [vmem:[%s8301_s25 + $0x30] sm:$0xff] }
 0x6eb   : > { %v4055_v42 = vrot.slane %v11600_v34, 1  ;;  %3865 = vrot.lane.b32.xlu0 %v3847_v2, %s13097_s16  ;;  %v11735_v10 = vsel %vm1223_vm1, %v3971_v23, %v3972_v15  ;;  %v3975_v38 = vrot.slane %v3297_v53, 1  ;;  %v3978_v46 = vrot.slane %v3299_v35, 1  ;;  %v13336_v22 = vld [vmem:[#allocation57_spill] sm:$0xff] }
 0x6ec   : > { %v3242_v20 = vrot.slane %v13333_v40, 5  ;;  %v3300_v61 = vsel %vm1033_vm0, %v11012_v29, %v3252_v55  ;;  %v7823_v12 = vpack.c.bf16 %v4152_v18, %v4151_v8  ;;  %v7827_v62 = vpack.c.bf16 %v4154_v14, %v4153_v9  ;;  %v11780_v55 = vpop.permute.xlu0 %3809 }
 0x6ed   : > { %v3976_v49 = vsel %vm1223_vm1, %v3974_v50, %v3975_v38  ;;  %v4056_v25 = vrot.slane %v3300_v61, 1  ;;  %v3979_v34 = vsel %vm1223_vm1, %v3977_v27, %v3978_v46  ;;  %v7831_v45 = vpack.c.bf16 %v4156_v3, %v4155_v43 }
 0x6ee   : > { %4042 = vrot.lane.b32.xlu1 %v11556_v32, %s8250_s2  ;;  %7824 = vmatprep.subr.bf16.mxu0 %v7823_v12  ;;  %v3290_v16 = vsel %vm1033_vm0, %v10943_v39, %v3242_v20  ;;  %v3848_v58 = vrot.slane %v11281_v41, 1  ;;  %v3851_v32 = vrot.slane %v11393_v63, 1  ;;  %v7835_v11 = vpack.c.bf16 %v4158_v17, %v4157_v6  ;;  %s8258_s2 = smov 36  }
 0x6ef   : > { %4058 = vrot.lane.b32.xlu0 %v3844_v1, %s13091_s11  ;;  %v4057_v29 = vsel %vm1223_vm1, %v4055_v42, %v4056_v25  ;;  %7826 = vmatpush3.bf16.msra.mxu0 %v7823_v12  ;;  %v3849_v21 = vrot.slane %v3290_v16, 1  ;;  %v3852_v1 = vrot.slane %v11677_v31, 1  ;;  %v13335_v56 = vmax.f32 %v13334_v47, 0.0 }
 0x6f0   : > { %7828 = vmatprep.subr.bf16.mxu0 %v7827_v62  ;;  %v3854_v31 = vrot.slane %v11455_v51, 1  ;;  %v3857_v23 = vrot.slane %v11578_v33, 1  ;;  %v3855_v4 = vrot.slane %v11697_v13, 1  ;;  %v13337_v36 = vmax.f32 %v13336_v22, 0.0 }
 0x6f1   : > { %v3850_v39 = vsel %vm1223_vm1, %v3848_v58, %v3849_v21  ;;  %v3853_v52 = vsel %vm1223_vm1, %v3851_v32, %v3852_v1  ;;  %v3860_v50 = vrot.slane %v11672_v60, 1  ;;  %vm4090_vm2 = vcmask 130048  }
 0x6f2   : > { %3982 = vrot.lane.b32.xlu1 %v3961_v7, %s8252_s22  ;;  %v3248_v7 = vrot.slane %v13335_v56, 5  ;;  %v3856_v48 = vsel %vm1223_vm1, %v3854_v31, %v3855_v4 }
 0x6f3   : > { %4060 = vrot.lane.b32.xlu0 %v3847_v2, %s13091_s11  ;;  %7830 = vmatpush3.bf16.msra.mxu0 %v7827_v62 }
 0x6f4   : > { %7832 = vmatprep.subr.bf16.mxu0 %v7831_v45  ;;  %v3296_v44 = vsel %vm1033_vm0, %v10980_v19, %v3248_v7 }
 0x6f5   : > { %v3858_v30 = vrot.slane %v3296_v44, 1 }
 0x6f6   : > { %3867 = vrot.lane.b32.xlu1 %v3850_v39, %s13097_s16 }
 0x6f7   : > { %3869 = vrot.lane.b32.xlu0 %v3853_v52, %s13097_s16  ;;  %7834 = vmatpush3.bf16.msra.mxu0 %v7831_v45  ;;  %v3859_v19 = vsel %vm1223_vm1, %v3857_v23, %v3858_v30 }
 0x6f8   : > { %7836 = vmatprep.subr.bf16.mxu0 %v7835_v11 }
 0x6fa   : > { %3984 = vrot.lane.b32.xlu1 %v11692_v24, %s8252_s22  ;;  %v3808_v24 = vpop.permute.xlu1 %3807 }
 0x6fb   : > { %4062 = vrot.lane.b32.xlu0 %v3850_v39, %s13091_s11  ;;  %7838 = vmatpush3.bf16.msra.mxu0 %v7835_v11 }
 0x6fc   : > { %7596 = vmatprep.subr.mxu0 %v4159_v5 }
 0x6fe   : > { %3986 = vrot.lane.b32.xlu1 %v11707_v37, %s8252_s22  ;;  %v3250_v37 = vrot.slane %v13337_v36, 5  ;;  %v3893_v8 = vpop.permute.xlu1 %3892 }
 0x6ff   : > { %4064 = vrot.lane.b32.xlu0 %v3853_v52, %s13091_s11  ;;  %7597 = vmatpush3.msra.mxu0 %v4159_v5 }
 0x700   : > { %v3298_v13 = vsel %vm1033_vm0, %v10996_v26, %v3250_v37 }
 0x701   : > { %v4006_v15 = vpop.permute.xlu0 %4005  ;;  %v3861_v18 = vrot.slane %v3298_v13, 1 }
 0x702   : > { %3871 = vrot.lane.b32.xlu1 %v3856_v48, %s13097_s16 }
 0x703   : > { %3873 = vrot.lane.b32.xlu0 %v3859_v19, %s13097_s16  ;;  %v3862_v14 = vsel %vm1223_vm1, %v3860_v50, %v3861_v18  ;;  %vm4082_vm1 = vcmask 64512  }
 0x704   : > { %v4083_v11 = vsel %vm4082_vm1, %v11060_v54, %v3808_v24  ;;  %v4084_v37 = vsel %vm4082_vm1, %v11214_v59, %v11780_v55 }
 0x706   : > { %3988 = vrot.lane.b32.xlu1 %v11715_v28, %s8252_s22 }
 0x707   : > { %4066 = vrot.lane.b32.xlu0 %v3856_v48, %s13091_s11  ;;  %v3925_v9 = vpop.permute.xlu1 %3924 }
 0x70a   : > { %3990 = vrot.lane.b32.xlu1 %v11735_v10, %s8252_s22 }
 0x70b   : > { %3992 = vrot.lane.b32.xlu0 %v3976_v49, %s8252_s22  ;;  %v11796_v28 = vpop.permute.xlu0 %3896 }
 0x70d   : > { %v3927_v27 = vpop.permute.xlu1 %3926 }
 0x70e   : > { %3875 = vrot.lane.b32.xlu1 %v3862_v14, %s13097_s16 }
 0x70f   : > { %3994 = vrot.lane.b32.xlu0 %v3979_v34, %s8252_s22  ;;  %v4031_v26 = vpop.permute.xlu0 %4030  ;;  %s8260_s22 = smov 84  }
 0x712   : > { %4068 = vrot.lane.b32.xlu1 %v3859_v19, %s13091_s11  ;;  %v11800_v2 = vpop.permute.xlu1 %3811 }
 0x713   : > { %4072 = vrot.lane.b32.xlu0 %v4057_v29, %s13091_s11  ;;  %v11803_v53 = vpop.permute.xlu0 %3928 }
 0x716   : > { %4070 = vrot.lane.b32.xlu1 %v3862_v14, %s13091_s11  ;;  %v4085_v14 = vsel %vm4082_vm1, %v11281_v41, %v11800_v2 }
 0x717   : > { %v4008_v35 = vpop.permute.xlu1 %4007 }
 0x71b   : > { %v11805_v57 = vpop.permute.xlu0 %3930 }
 0x71c   : > { %v11807_v40 = vpop.permute.xlu1 %3898 }
 0x71f   : > { %v11809_v20 = vpop.permute.xlu0 %4009 }
 0x720   : > { %v4033_v42 = vpop.permute.xlu1 %4032 }
 0x723   : > { %v11811_v10 = vpop.permute.xlu0 %3900 }
 0x727   : > { %v11813_v38 = vpop.permute.xlu1 %3813  ;;  %v11815_v46 = vpop.permute.xlu0 %4034 }
 0x72b   : > { %v11819_v12 = vpop.permute.xlu0 %3932 }
 0x72d   : > { %v11817_v61 = vpop.permute.xlu1 %3815 }
 0x731   : > { %v11821_v62 = vpop.permute.xlu1 %4011 }
 0x734   : > { %v11823_v49 = vpop.permute.xlu0 %3934 }
 0x735   : > { %v11825_v25 = vpop.permute.xlu1 %3902 }
 0x738   : > { %v11827_v43 = vpop.permute.xlu0 %4013 }
 0x739   : > { %v11829_v3 = vpop.permute.xlu1 %4036 }
 0x73c   : > { %v11831_v34 = vpop.permute.xlu0 %3904 }
 0x740   : > { %v11833_v29 = vpop.permute.xlu1 %3817  ;;  %v11835_v16 = vpop.permute.xlu0 %4038 }
 0x744   : > { %v11837_v45 = vpop.permute.xlu1 %3819  ;;  %v11839_v58 = vpop.permute.xlu0 %3936 }
 0x748   : > { %v11841_v6 = vpop.permute.xlu1 %4015 }
 0x74d   : > { %v11843_v17 = vpop.permute.xlu0 %4019 }
 0x750   : > { %v11845_v32 = vpop.permute.xlu1 %3906 }
 0x751   : > { %v11847_v21 = vpop.permute.xlu0 %4044 }
 0x754   : > { %v11849_v1 = vpop.permute.xlu1 %4040 }
 0x755   : > { %v3864_v39 = vpop.permute.xlu0 %3863 }
 0x756   : > { %v4091_v52 = vsel %vm4090_vm2, %v4083_v11, %v3864_v39 }
 0x757   : > { %v4098_v47 = vsel %vm2352_vm13, %v4091_v52, %v3893_v8  ;;  %v4099_v24 = vsel %vm2352_vm13, %v4091_v52, %v11769_v0 }
 0x758   : > { %v11855_v56 = vpop.permute.xlu1 %3938  ;;  %v4107_v7 = vsel %vm4106_vm7, %v4098_v47, %v3925_v9  ;;  %v4108_v22 = vsel %vm4106_vm7, %v4099_v24, %v3927_v27 }
 0x759   : > { %v3981_v5 = vpop.permute.xlu0 %3980 }
 0x75a   : > { %v4116_v31 = vsel %vm4115_vm8, %v4107_v7, %v3981_v5 }
 0x75b   : > { %v4125_v54 = vsel %vm4124_vm10, %v4116_v31, %v4006_v15 }
 0x75c   : > { %v11859_v44 = vpop.permute.xlu1 %4017  ;;  %v4134_v30 = vsel %vm4133_vm11, %v4125_v54, %v4031_v26 }
 0x75d   : > { %v3866_v23 = vpop.permute.xlu0 %3865 }
 0x75e   : > { %v4092_v50 = vsel %vm4090_vm2, %v4084_v37, %v3866_v23 }
 0x75f   : > { %v4100_v27 = vsel %vm2352_vm13, %v4092_v50, %v11796_v28 }
 0x760   : > { %v11862_v4 = vpop.permute.xlu1 %4042 }
 0x761   : > { %v4059_v48 = vpop.permute.xlu0 %4058 }
 0x762   : > { %v4143_v19 = vsel %vm4142_vm12, %v4134_v30, %v4059_v48 }
 0x763   : > { %7598 = vmatprep.mubr.msk.f32.mxu0 %vm4167_vm14, %v4143_v19 }
 0x764   : > { %v3983_v36 = vpop.permute.xlu1 %3982 }
 0x765   : > { %v4117_v8 = vsel %vm4115_vm8, %v4108_v22, %v3983_v36  ;;  %v4061_v13 = vpop.permute.xlu0 %4060 }
 0x766   : > { %v4126_v0 = vsel %vm4124_vm10, %v4117_v8, %v4008_v35  ;;  %v4109_v35 = vsel %vm4106_vm7, %v4100_v27, %v11803_v53  ;;  %v4086_v53 = vsel %vm4082_vm1, %v11393_v63, %v11813_v38  ;;  %v4087_v38 = vsel %vm4082_vm1, %v11455_v51, %v11817_v61 }
 0x767   : > { %v4135_v15 = vsel %vm4133_vm11, %v4126_v0, %v4033_v42  ;;  %v8256_v27 = vmov 0.0  }
 0x768   : > { %v3868_v18 = vpop.permute.xlu1 %3867  ;;  %v4144_v9 = vsel %vm4142_vm12, %v4135_v15, %v4061_v13 }
 0x769   : > { %7599 = vmatmul.mubr.msk.f32.vlgmr.msra.gmra.mrb[32].mxu0 %vm4167_vm14, %v4144_v9  ;;  %v3870_v59 = vpop.permute.xlu0 %3869  ;;  %v4093_v55 = vsel %vm4090_vm2, %v4085_v14, %v3868_v18 }
 0x76a   : > { %v4101_v42 = vsel %vm2352_vm13, %v4093_v55, %v11807_v40 }
 0x76b   : > { %v4110_v2 = vsel %vm4106_vm7, %v4101_v42, %v11805_v57 }
 0x76c   : > { %v3985_v26 = vpop.permute.xlu1 %3984 }
 0x76d   : > { %v4118_v11 = vsel %vm4115_vm8, %v4109_v35, %v3985_v26  ;;  %v4063_v39 = vpop.permute.xlu0 %4062 }
 0x76e   : > { %v4127_v41 = vsel %vm4124_vm10, %v4118_v11, %v11809_v20  ;;  %v4094_v20 = vsel %vm4090_vm2, %v4086_v53, %v3870_v59 }
 0x76f   : > { %v4136_v28 = vsel %vm4133_vm11, %v4127_v41, %v11815_v46  ;;  %v4102_v23 = vsel %vm2352_vm13, %v4094_v20, %v11811_v10  ;;  %v4088_v10 = vsel %vm4082_vm1, %v11578_v33, %v11833_v29 }
 0x770   : > { %v3987_v52 = vpop.permute.xlu1 %3986  ;;  %v4145_v47 = vsel %vm4142_vm12, %v4136_v28, %v4063_v39 }
 0x771   : > { %v4119_v40 = vsel %vm4115_vm8, %v4110_v2, %v3987_v52  ;;  %7601 = vmatprep.mubr.msk.f32.mxu0 %vm4167_vm14, %v4145_v47  ;;  %v4065_v7 = vpop.permute.xlu0 %4064 }
 0x772   : > { %v4128_v46 = vsel %vm4124_vm10, %v4119_v40, %v11821_v62  ;;  %v4111_v62 = vsel %vm4106_vm7, %v4102_v23, %v11819_v12 }
 0x773   : > { %v4137_v57 = vsel %vm4133_vm11, %v4128_v46, %v11829_v3 }
 0x774   : > { %v3872_v5 = vpop.permute.xlu1 %3871  ;;  %v4146_v31 = vsel %vm4142_vm12, %v4137_v57, %v4065_v7 }
 0x775   : > { %7602 = vmatmul.mubr.msk.f32.gmra.mrb[34].mxu0 %vm4167_vm14, %v4146_v31  ;;  %v3874_v63 = vpop.permute.xlu0 %3873  ;;  %v4095_v54 = vsel %vm4090_vm2, %v4087_v38, %v3872_v5  ;;  %v8257_v31 = vmov 0.015625  }
 0x776   : > { %v4103_v48 = vsel %vm2352_vm13, %v4095_v54, %v11825_v25  ;;  %v4096_v51 = vsel %vm4090_vm2, %v4088_v10, %v3874_v63  ;;  %v13338_v63 = vld [vmem:[#allocation32_spill] sm:$0xff] }
 0x777   : > { %v4112_v36 = vsel %vm4106_vm7, %v4103_v48, %v11823_v49  ;;  %v4104_v25 = vsel %vm2352_vm13, %v4096_v51, %v11831_v34 }
 0x778   : > { %v3989_v24 = vpop.permute.xlu1 %3988  ;;  %v4113_v49 = vsel %vm4106_vm7, %v4104_v25, %v11839_v58 }
 0x779   : > { %v4120_v3 = vsel %vm4115_vm8, %v4111_v62, %v3989_v24  ;;  %v4067_v30 = vpop.permute.xlu0 %4066 }
 0x77a   : > { %v4129_v19 = vsel %vm4124_vm10, %v4120_v3, %v11827_v43  ;;  %v4089_v43 = vsel %vm4082_vm1, %v11672_v60, %v11837_v45  ;;  %vm8255_vm1 = vmmov 0  }
 0x77b   : > { %v4138_v61 = vsel %vm4133_vm11, %v4129_v19, %v11835_v16  ;;  %7626 = vmatprep.mubr.msk.f32.mxu1 %vm8255_vm1, %v8256_v27 }
 0x77c   : > { %v3991_v22 = vpop.permute.xlu1 %3990  ;;  %v4147_v12 = vsel %vm4142_vm12, %v4138_v61, %v4067_v30 }
 0x77d   : > { %7604 = vmatprep.mubr.msk.f32.mxu0 %vm4167_vm14, %v4147_v12  ;;  %v3993_v33 = vpop.permute.xlu0 %3992  ;;  %v4121_v29 = vsel %vm4115_vm8, %v4112_v36, %v3991_v22 }
 0x77e   : > { %v4130_v16 = vsel %vm4124_vm10, %v4121_v29, %v11841_v6  ;;  %v4122_v34 = vsel %vm4115_vm8, %v4113_v49, %v3993_v33 }
 0x77f   : > { %v4139_v60 = vsel %vm4133_vm11, %v4130_v16, %v11849_v1  ;;  %v4131_v15 = vsel %vm4124_vm10, %v4122_v34, %v11859_v44 }
 0x780   : > { %v3876_v37 = vpop.permute.xlu1 %3875  ;;  %v4140_v1 = vsel %vm4133_vm11, %v4131_v15, %v11862_v4 }
 0x781   : > { %v4097_v8 = vsel %vm4090_vm2, %v4089_v43, %v3876_v37  ;;  %v3995_v13 = vpop.permute.xlu0 %3994 }
 0x782   : > { %v4105_v50 = vsel %vm2352_vm13, %v4097_v8, %v11845_v32 }
 0x783   : > { %v4114_v0 = vsel %vm4106_vm7, %v4105_v50, %v11855_v56 }
 0x784   : > { %v4069_v45 = vpop.permute.xlu1 %4068  ;;  %v4123_v6 = vsel %vm4115_vm8, %v4114_v0, %v3995_v13  ;;  %vm5355_vm8 = vcmask 654336  }
 0x785   : > { %v4148_v58 = vsel %vm4142_vm12, %v4139_v60, %v4069_v45  ;;  %v4132_v18 = vsel %vm4124_vm10, %v4123_v6, %v11843_v17  ;;  %v4073_v32 = vpop.permute.xlu0 %4072  ;;  %v8254_v17 = vmov 0.0|0.0   ;;  %v11986_v45 = vld [vmem:[%s13339_s3] ss:$0 sm:$0xff]  ;;  %s13353_s3 = smov 96  }
 0x786   : > { %7605 = vmatmul.mubr.msk.f32.gmra.mrb[36].mxu0 %vm4167_vm14, %v4148_v58  ;;  %v4141_v56 = vsel %vm4133_vm11, %v4132_v18, %v11847_v21  ;;  %7839 = vmatprep.subr.bf16.mxu1 %v8254_v17  ;;  %v7265_v21 = vld [vmem:[%s8306_s29] ss:$0 sm:$0xff]  ;;  %vm5364_vm11 = vcmask 916480  }
 0x787   : > { %v4150_v14 = vsel %vm4142_vm12, %v4141_v56, %v4073_v32  ;;  %7851 = vmatprep.subr.bf16.mxu0 %v8254_v17  ;;  %v11989_v32 = vld [vmem:[%s8316_s8] ss:$0 sm:$0xff] }
 0x788   : > { %v4071_v9 = vpop.permute.xlu1 %4070 }
 0x789   : > { %v4149_v44 = vsel %vm4142_vm12, %v4140_v1, %v4071_v9 }
 0x78a   : > { %7607 = vmatprep.mubr.msk.f32.mxu0 %vm4167_vm14, %v4149_v44 }
 0x78b   : > { %7608 = vmatmul.mubr.msk.f32.gmra.mrb[38].mxu0 %vm4167_vm14, %v4150_v14 }
 0x78c   : > { %7645 = vmatprep.mubr.msk.f32.mxu0 %vm8255_vm1, %v8256_v27 }
 0x83c   : > { %v7600_v4 = vpop.f32.mrb[32].mxu0 }
 0x83d   : > { %v4264_v59 = vadd.f32 %v7600_v4, %v7265_v21  ;;  %v4258_v55 = vpop.f32.mrb[33].mxu0 }
 0x83e   : > { %v4259_v26 = vadd.f32 %v7265_v21, %v4258_v55 }
 0x840   : > { %v7840_v35 = vpack.c.bf16 %v4264_v59, %v4259_v26 }
 0x842   : > { %7841 = vmatpush3.bf16.msra.mxu1 %v7840_v35 }
 0x843   : > { %7842 = vmatprep.subr.bf16.mxu1 %v8254_v17 }
 0x848   : > { %v7603_v42 = vpop.f32.mrb[34].mxu0 }
 0x849   : > { %v4274_v11 = vadd.f32 %v7603_v42, %v7265_v21  ;;  %v4268_v39 = vpop.f32.mrb[35].mxu0 }
 0x84a   : > { %v4269_v41 = vadd.f32 %v7265_v21, %v4268_v39 }
 0x84c   : > { %v7843_v28 = vpack.c.bf16 %v4274_v11, %v4269_v41 }
 0x84e   : > { %7844 = vmatpush3.bf16.msra.mxu1 %v7843_v28 }
 0x84f   : > { %7845 = vmatprep.subr.bf16.mxu1 %v8254_v17 }
 0x859   : > { %v7606_v2 = vpop.f32.mrb[36].mxu0 }
 0x85a   : > { %v4284_v52 = vadd.f32 %v7606_v2, %v7265_v21  ;;  %v4278_v47 = vpop.f32.mrb[37].mxu0 }
 0x85b   : > { %v4279_v53 = vadd.f32 %v7265_v21, %v4278_v47 }
 0x85d   : > { %v7846_v40 = vpack.c.bf16 %v4284_v52, %v4279_v53 }
 0x85e   : > { %v7609_v7 = vpop.f32.mrb[38].mxu0 }
 0x85f   : > { %v4294_v20 = vadd.f32 %v7609_v7, %v7265_v21  ;;  %v4288_v46 = vpop.f32.mrb[39].mxu0  ;;  %7847 = vmatpush3.bf16.msra.mxu1 %v7846_v40 }
 0x860   : > { %v4289_v57 = vadd.f32 %v7265_v21, %v4288_v46  ;;  %7848 = vmatprep.subr.bf16.mxu1 %v8254_v17 }
 0x862   : > { %v7849_v5 = vpack.c.bf16 %v4294_v20, %v4289_v57 }
 0x864   : > { %7850 = vmatpush3.bf16.msra.mxu1 %v7849_v5 }
 0x867   : > { %7627 = vmatmul.mubr.msk.f32.vlgmr.msra.gmra.mrb[4].mxu1 %vm4142_vm12, %v8257_v31 }
 0x93a   : > { %v4366_v23 = vpop.f32.mrb[4].mxu1 }
 0x93b   : > { %v4373_v38 = vrot.slane %v4366_v23, %v13338_v63  ;;  %v7628_v54 = vpop.f32.mrb[5].mxu1 }
 0x93d   : > { %v4374_v24 = vsub.f32 %v4259_v26, %v4373_v38  ;;  %v4375_v62 = vsub.f32 %v4264_v59, %v4373_v38  ;;  %v4376_v3 = vsub.f32 %v4269_v41, %v4373_v38  ;;  %v4377_v30 = vsub.f32 %v4274_v11, %v4373_v38 }
 0x93e   : > { %v4378_v19 = vsub.f32 %v4279_v53, %v4373_v38  ;;  %v4379_v12 = vsub.f32 %v4284_v52, %v4373_v38  ;;  %v4380_v36 = vsub.f32 %v4289_v57, %v4373_v38  ;;  %v4381_v43 = vsub.f32 %v4294_v20, %v4373_v38 }
 0x93f   : > { %v4382_v10 = vmul.f32 %v4374_v24, %v4374_v24  ;;  %v4383_v48 = vmul.f32 %v4375_v62, %v4375_v62  ;;  %v4384_v61 = vmul.f32 %v4376_v3, %v4376_v3  ;;  %v4385_v22 = vmul.f32 %v4377_v30, %v4377_v30 }
 0x940   : > { %v4386_v25 = vmul.f32 %v4378_v19, %v4378_v19  ;;  %v4387_v29 = vmul.f32 %v4379_v12, %v4379_v12  ;;  %v4388_v16 = vmul.f32 %v4380_v36, %v4380_v36  ;;  %v4389_v8 = vmul.f32 %v4381_v43, %v4381_v43 }
 0x941   : > { %v7852_v51 = vpack.c.bf16 %v4383_v48, %v4382_v10  ;;  %v7855_v33 = vpack.c.bf16 %v4385_v22, %v4384_v61 }
 0x942   : > { %v7858_v37 = vpack.c.bf16 %v4387_v29, %v4386_v25  ;;  %v7861_v49 = vpack.c.bf16 %v4389_v8, %v4388_v16 }
 0x943   : > { %7853 = vmatpush3.bf16.msra.mxu0 %v7852_v51 }
 0x944   : > { %7854 = vmatprep.subr.bf16.mxu0 %v8254_v17 }
 0x947   : > { %7856 = vmatpush3.bf16.msra.mxu0 %v7855_v33 }
 0x948   : > { %7857 = vmatprep.subr.bf16.mxu0 %v8254_v17 }
 0x94b   : > { %7859 = vmatpush3.bf16.msra.mxu0 %v7858_v37 }
 0x94c   : > { %7860 = vmatprep.subr.bf16.mxu0 %v8254_v17 }
 0x94f   : > { %7862 = vmatpush3.bf16.msra.mxu0 %v7861_v49 }
 0x950   : > { %7893 = vmatprep.subr.bf16.mxu0 %v8254_v17 }
 0x952   : > { %7646 = vmatmul.mubr.msk.f32.vlgmr.msra.gmra.mrb[40].mxu0 %vm4142_vm12, %v8257_v31 }
 0x953   : > { %7683 = vmatprep.mubr.msk.f32.mxu0 %vm8255_vm1, %v8256_v27 }
 0xa25   : > { %v4456_v13 = vpop.f32.mrb[40].mxu0 }
 0xa26   : > { %v4457_v50 = vadd.f32 1e-05, %v4456_v13  ;;  %v7647_v34 = vpop.f32.mrb[41].mxu0 }
 0xa28   : > { %8132 = vrsqrt.f32 %v4457_v50 }
 0xa32   : > { %v8133_v0 = vpop.eup %8132 }
 0xa33   : > { %v4464_v60 = vrot.slane %v8133_v0, %v13338_v63 }
 0xa35   : > { %v4468_v6 = vmul.f32 %v4464_v60, %v4377_v30  ;;  %v4466_v15 = vmul.f32 %v4464_v60, %v4375_v62  ;;  %v4467_v58 = vmul.f32 %v4464_v60, %v4376_v3  ;;  %v4470_v18 = vmul.f32 %v4464_v60, %v4379_v12 }
 0xa36   : > { %v4471_v56 = vmul.f32 %v4464_v60, %v4380_v36  ;;  %v4465_v9 = vmul.f32 %v4464_v60, %v4374_v24  ;;  %v4469_v1 = vmul.f32 %v4464_v60, %v4378_v19  ;;  %v4472_v46 = vmul.f32 %v4464_v60, %v4381_v43 }
 0xa37   : > { %v4483_v14 = vmul.f32 %v11986_v45, %v4468_v6  ;;  %v4481_v44 = vmul.f32 %v11986_v45, %v4466_v15  ;;  %v4482_v21 = vmul.f32 %v11986_v45, %v4467_v58  ;;  %v4485_v4 = vmul.f32 %v11986_v45, %v4470_v18 }
 0xa38   : > { %v4486_v59 = vmul.f32 %v11986_v45, %v4471_v56  ;;  %v4480_v55 = vmul.f32 %v11986_v45, %v4465_v9  ;;  %v4484_v26 = vmul.f32 %v11986_v45, %v4469_v1 }
 0xa39   : > { %v4498_v35 = vadd.f32 %v11989_v32, %v4483_v14  ;;  %v4496_v42 = vadd.f32 %v11989_v32, %v4481_v44  ;;  %v4497_v11 = vadd.f32 %v11989_v32, %v4482_v21  ;;  %v4500_v39 = vadd.f32 %v11989_v32, %v4485_v4 }
 0xa3a   : > { %v4501_v41 = vadd.f32 %v11989_v32, %v4486_v59  ;;  %v4495_v28 = vadd.f32 %v11989_v32, %v4480_v55  ;;  %v4499_v20 = vadd.f32 %v11989_v32, %v4484_v26 }
 0xa3b   : > { %v4506_v2 = vmax.f32 %v4498_v35, 0.0  ;;  %v4504_v52 = vmax.f32 %v4496_v42, 0.0  ;;  %v4505_v47 = vmax.f32 %v4497_v11, 0.0  ;;  %v4508_v53 = vmax.f32 %v4500_v39, 0.0 }
 0xa3c   : > { %v12004_v40 = vmax.f32 %v4501_v41, 0.0  ;;  %v12006_v7 = vmax.f32 %v4495_v28, 0.0 }
 0xa3d   : > { %v4522_v57 = vrot.slane %v4506_v2, 1  ;;  %v4538_v5 = vrot.slane %v4506_v2, 7  ;;  %v4554_v31 = vrot.slane %v4506_v2, 5  ;;  %v4519_v23 = vrot.slane %v4504_v52, 1 }
 0xa3e   : > { %v4535_v38 = vrot.slane %v4504_v52, 7  ;;  %v4551_v54 = vrot.slane %v4504_v52, 5  ;;  %v4521_v24 = vrot.slane %v4505_v47, 1  ;;  %v4537_v62 = vrot.slane %v4505_v47, 7 }
 0xa3f   : > { %v12010_v3 = vsel %vm1033_vm0, %v4522_v57, %v4538_v5  ;;  %v12013_v30 = vsel %vm1033_vm0, %v4538_v5, %v4554_v31  ;;  %v4553_v10 = vrot.slane %v4505_v47, 5  ;;  %v4524_v48 = vrot.slane %v4508_v53, 1 }
 0xa40   : > { %v4588_v19 = vrot.slane %v12010_v3, 1  ;;  %v4596_v51 = vrot.slane %v12010_v3, 2  ;;  %v4604_v61 = vrot.slane %v12010_v3, 3  ;;  %v4640_v22 = vrot.slane %v12010_v3, 4 }
 0xa41   : > { %v4648_v12 = vrot.slane %v12013_v30, 5  ;;  %v12021_v36 = vsel %vm1033_vm0, %v4519_v23, %v4535_v38  ;;  %v12024_v33 = vsel %vm1033_vm0, %v4535_v38, %v4551_v54  ;;  %v12027_v25 = vsel %vm1033_vm0, %v4521_v24, %v4537_v62 }
 0xa42   : > { %v4656_v29 = vsel %vm1033_vm0, %v4588_v19, %v4596_v51  ;;  %v4587_v43 = vrot.slane %v12021_v36, 1  ;;  %v4595_v37 = vrot.slane %v12021_v36, 2  ;;  %v4603_v16 = vrot.slane %v12021_v36, 3 }
 0xa43   : > { %v4660_v8 = vsel %vm3429_vm15, %v4656_v29, %v4604_v61  ;;  %v4639_v49 = vrot.slane %v12021_v36, 4  ;;  %v4647_v13 = vrot.slane %v12024_v33, 5  ;;  %v12043_v50 = vsel %vm1033_vm0, %v4537_v62, %v4553_v10 }
 0xa44   : > { %v4664_v34 = vsel %vm2493_vm3, %v4660_v8, %v4640_v22  ;;  %v4655_v0 = vsel %vm1033_vm0, %v4587_v43, %v4595_v37  ;;  %v4676_v60 = vrot.slane %v12027_v25, 1  ;;  %v4684_v6 = vrot.slane %v12027_v25, 2 }
 0xa45   : > { %v12054_v15 = vsel %vm3446_vm5, %v4664_v34, %v4648_v12  ;;  %v4659_v58 = vsel %vm3429_vm15, %v4655_v0, %v4603_v16  ;;  %v4692_v18 = vrot.slane %v12027_v25, 3  ;;  %v4704_v56 = vrot.slane %v12043_v50, 4 }
 0xa46   : > { %4764 = vrot.lane.b32.xlu0 %v12054_v15, %s13130_s5  ;;  %v4663_v9 = vsel %vm2493_vm3, %v4659_v58, %v4639_v49  ;;  %v4712_v1 = vsel %vm1033_vm0, %v12027_v25, %v4676_v60  ;;  %v4540_v14 = vrot.slane %v4508_v53, 7  ;;  %v4556_v44 = vrot.slane %v4508_v53, 5 }
 0xa47   : > { %v12067_v21 = vsel %vm3446_vm5, %v4663_v9, %v4647_v13  ;;  %v4716_v4 = vsel %vm3429_vm15, %v4712_v1, %v4684_v6  ;;  %v4525_v59 = vrot.slane %v12004_v40, 1  ;;  %v4541_v55 = vrot.slane %v12004_v40, 7 }
 0xa48   : > { %4762 = vrot.lane.b32.xlu1 %v12067_v21, %s13130_s5  ;;  %v4720_v26 = vsel %vm2493_vm3, %v4716_v4, %v4692_v18  ;;  %v12076_v35 = vsel %vm1033_vm0, %v4524_v48, %v4540_v14  ;;  %v12079_v42 = vsel %vm1033_vm0, %v4540_v14, %v4556_v44  ;;  %v4557_v11 = vrot.slane %v12004_v40, 5 }
 0xa49   : > { %v12083_v39 = vsel %vm3446_vm5, %v4720_v26, %v4704_v56  ;;  %v4589_v41 = vrot.slane %v12076_v35, 1  ;;  %v4597_v28 = vrot.slane %v12076_v35, 2  ;;  %v4605_v2 = vrot.slane %v12076_v35, 3 }
 0xa4a   : > { %4792 = vrot.lane.b32.xlu0 %v12083_v39, %s8258_s2  ;;  %v4641_v52 = vrot.slane %v12076_v35, 4  ;;  %v4573_v47 = vsel %vm1033_vm0, %v4525_v59, %v4541_v55  ;;  %v4507_v53 = vmax.f32 %v4499_v20, 0.0  ;;  %v4487_v40 = vmul.f32 %v11986_v45, %v4472_v46 }
 0xa4b   : > { %v4657_v57 = vsel %vm1033_vm0, %v4589_v41, %v4597_v28  ;;  %v4581_v5 = vsel %vm1033_vm0, %v4541_v55, %v4557_v11  ;;  %v4678_v31 = vrot.slane %v4573_v47, 1  ;;  %v4686_v23 = vrot.slane %v4573_v47, 2 }
 0xa4c   : > { %v4649_v38 = vrot.slane %v12079_v42, 5  ;;  %v4661_v54 = vsel %vm3429_vm15, %v4657_v57, %v4605_v2  ;;  %v4694_v24 = vrot.slane %v4573_v47, 3  ;;  %v4520_v20 = vrot.slane %v12006_v7, 1 }
 0xa4d   : > { %v4665_v45 = vsel %vm2493_vm3, %v4661_v54, %v4641_v52  ;;  %v4714_v46 = vsel %vm1033_vm0, %v4573_v47, %v4678_v31  ;;  %v4536_v62 = vrot.slane %v12006_v7, 7  ;;  %v4552_v10 = vrot.slane %v12006_v7, 5 }
 0xa4e   : > { %v12109_v48 = vsel %vm3446_vm5, %v4665_v45, %v4649_v38  ;;  %v4706_v22 = vrot.slane %v4581_v5, 4  ;;  %v4718_v12 = vsel %vm3429_vm15, %v4714_v46, %v4686_v23  ;;  %v4502_v29 = vadd.f32 %v11989_v32, %v4487_v40 }
 0xa4f   : > { %4766 = vrot.lane.b32.xlu1 %v12109_v48, %s13130_s5  ;;  %v4722_v8 = vsel %vm2493_vm3, %v4718_v12, %v4694_v24  ;;  %v4568_v49 = vsel %vm1033_vm0, %v4520_v20, %v4536_v62  ;;  %v4728_v13 = vrot.slane %v12027_v25, 4  ;;  %v4744_v34 = vsel %vm1033_vm0, %v4676_v60, %v4684_v6  ;;  %s8259_s5 = smov 72  }
 0xa50   : > { %v12120_v7 = vsel %vm3446_vm5, %v4722_v8, %v4706_v22  ;;  %v4576_v0 = vsel %vm1033_vm0, %v4536_v62, %v4552_v10  ;;  %v4675_v58 = vrot.slane %v4568_v49, 1  ;;  %v4683_v56 = vrot.slane %v4568_v49, 2 }
 0xa51   : > { %4796 = vrot.lane.b32.xlu0 %v12120_v7, %s8258_s2  ;;  %v4691_v32 = vrot.slane %v4568_v49, 3  ;;  %v4736_v9 = vrot.slane %v12043_v50, 5  ;;  %v4748_v1 = vsel %vm3429_vm15, %v4744_v34, %v4692_v18  ;;  %v4523_v14 = vrot.slane %v4507_v53, 1 }
 0xa52   : > { %v4711_v25 = vsel %vm1033_vm0, %v4568_v49, %v4675_v58  ;;  %v4752_v60 = vsel %vm2493_vm3, %v4748_v1, %v4728_v13  ;;  %v4539_v6 = vrot.slane %v4507_v53, 7  ;;  %v4555_v44 = vrot.slane %v4507_v53, 5 }
 0xa53   : > { %v4703_v4 = vrot.slane %v4576_v0, 4  ;;  %v4715_v59 = vsel %vm3429_vm15, %v4711_v25, %v4683_v56  ;;  %v4756_v55 = vsel %vm3446_vm5, %v4752_v60, %v4736_v9  ;;  %v4730_v52 = vrot.slane %v4573_v47, 4 }
 0xa54   : > { %v4719_v26 = vsel %vm2493_vm3, %v4715_v59, %v4691_v32  ;;  %v4571_v11 = vsel %vm1033_vm0, %v4523_v14, %v4539_v6  ;;  %v4746_v50 = vsel %vm1033_vm0, %v4678_v31, %v4686_v23  ;;  %v4579_v40 = vsel %vm1033_vm0, %v4539_v6, %v4555_v44  ;;  %v4907_v59 = vld [vmem:[%s8321_s14] sm:$0xff] }
 0xa55   : > { %v12135_v18 = vsel %vm3446_vm5, %v4719_v26, %v4703_v4  ;;  %4808 = vrot.lane.b32.xlu0 %v4756_v55, %s13099_s26  ;;  %v4677_v53 = vrot.slane %v4571_v11, 1  ;;  %v4685_v57 = vrot.slane %v4571_v11, 2  ;;  %v4738_v38 = vrot.slane %v4581_v5, 5 }
 0xa56   : > { %4790 = vrot.lane.b32.xlu1 %v12135_v18, %s8258_s2  ;;  %v4750_v54 = vsel %vm3429_vm15, %v4746_v50, %v4694_v24  ;;  %v4510_v20 = vmax.f32 %v4502_v29, 0.0  ;;  %v4693_v45 = vrot.slane %v4571_v11, 3  ;;  %v4743_v23 = vsel %vm1033_vm0, %v4675_v58, %v4683_v56  ;;  %v4910_v50 = vld [vmem:[%s8321_s14 + $0x18] sm:$0xff] }
 0xa57   : > { %v4713_v47 = vsel %vm1033_vm0, %v4571_v11, %v4677_v53  ;;  %v4754_v31 = vsel %vm2493_vm3, %v4750_v54, %v4730_v52  ;;  %v4705_v46 = vrot.slane %v4579_v40, 4  ;;  %v4747_v22 = vsel %vm3429_vm15, %v4743_v23, %v4691_v32  ;;  %v4909_v52 = vld [vmem:[%s8321_s14 + $0x10] sm:$0xff]  ;;  %v4912_v23 = vld [vmem:[%s8321_s14 + $0x28] sm:$0xff] }
 0xa58   : > { %v4717_v62 = vsel %vm3429_vm15, %v4713_v47, %v4685_v57  ;;  %v4758_v10 = vsel %vm3446_vm5, %v4754_v31, %v4738_v38  ;;  %v4727_v5 = vrot.slane %v4568_v49, 4  ;;  %v4624_v24 = vsel %vm1033_vm0, %v12010_v3, %v4588_v19 }
 0xa59   : > { %v4721_v12 = vsel %vm2493_vm3, %v4717_v62, %v4693_v45  ;;  %4812 = vrot.lane.b32.xlu0 %v4758_v10, %s13099_s26  ;;  %v4735_v8 = vrot.slane %v4576_v0, 5  ;;  %v4616_v13 = vrot.slane %v12013_v30, 4  ;;  %v4628_v34 = vsel %vm3429_vm15, %v4624_v24, %v4596_v51 }
 0xa5a   : > { %v12155_v29 = vsel %vm3446_vm5, %v4721_v12, %v4705_v46  ;;  %v4751_v49 = vsel %vm2493_vm3, %v4747_v22, %v4727_v5  ;;  %v4632_v58 = vsel %vm2493_vm3, %v4628_v34, %v4604_v61  ;;  %v4745_v19 = vsel %vm1033_vm0, %v4677_v53, %v4685_v57 }
 0xa5b   : > { %4794 = vrot.lane.b32.xlu1 %v12155_v29, %s8258_s2  ;;  %v4526_v56 = vrot.slane %v4510_v20, 1  ;;  %v12169_v0 = vsel %vm3446_vm5, %v4632_v58, %v4616_v13  ;;  %v4749_v30 = vsel %vm3429_vm15, %v4745_v19, %v4693_v45  ;;  %v4542_v32 = vrot.slane %v4510_v20, 7  ;;  %v4916_v13 = vld [vmem:[%s8321_s14 + $0x48] sm:$0xff]  ;;  %v4917_v58 = vld [vmem:[%s8321_s14 + $0x50] sm:$0xff]  ;;  %v4918_v19 = vld [vmem:[%s8321_s14 + $0x58] sm:$0xff]  ;;  %s8261_s2 = smov 60  }
 0xa5c   : > { %v4558_v51 = vrot.slane %v4510_v20, 5  ;;  %v4729_v9 = vrot.slane %v4571_v11, 4  ;;  %v4623_v3 = vsel %vm1033_vm0, %v12021_v36, %v4587_v43  ;;  %v4755_v61 = vsel %vm3446_vm5, %v4751_v49, %v4735_v8  ;;  %v4908_v43 = vld [vmem:[%s8321_s14 + $0x8] sm:$0xff]  ;;  %v4911_v36 = vld [vmem:[%s8321_s14 + $0x20] sm:$0xff] }
 0xa5d   : > { %4837 = vrot.lane.b32.xlu0 %v12169_v0, %s8259_s5  ;;  %v4574_v1 = vsel %vm1033_vm0, %v4526_v56, %v4542_v32  ;;  %v4737_v44 = vrot.slane %v4579_v40, 5  ;;  %v4627_v4 = vsel %vm3429_vm15, %v4623_v3, %v4595_v37  ;;  %v4625_v11 = vsel %vm1033_vm0, %v12076_v35, %v4589_v41  ;;  %v4913_v35 = vld [vmem:[%s8321_s14 + $0x30] sm:$0xff]  ;;  %v4915_v8 = vld [vmem:[%s8321_s14 + $0x40] sm:$0xff] }
 0xa5e   : > { %v4753_v14 = vsel %vm2493_vm3, %v4749_v30, %v4729_v9  ;;  %v4582_v25 = vsel %vm1033_vm0, %v4542_v32, %v4558_v51  ;;  %v4590_v60 = vrot.slane %v4574_v1, 1  ;;  %v4598_v6 = vrot.slane %v4574_v1, 2  ;;  %v4919_v32 = vld [vmem:[%s8321_s14 + $0x60] sm:$0xff]  ;;  %v4920_v51 = vld [vmem:[%s8321_s14 + $0x68] sm:$0xf] }
 0xa5f   : > { %4806 = vrot.lane.b32.xlu1 %v4755_v61, %s13099_s26  ;;  %v4606_v55 = vrot.slane %v4574_v1, 3  ;;  %v4757_v40 = vsel %vm3446_vm5, %v4753_v14, %v4737_v44  ;;  %v4618_v53 = vrot.slane %v4582_v25, 4  ;;  %v4631_v38 = vsel %vm2493_vm3, %v4627_v4, %v4603_v16 }
 0xa60   : > { %v4626_v26 = vsel %vm1033_vm0, %v4574_v1, %v4590_v60  ;;  %v4658_v54 = vsel %vm1033_vm0, %v4590_v60, %v4598_v6  ;;  %v7863_v41 = vpack.c.bf16 %v4908_v43, %v4907_v59  ;;  %v4615_v45 = vrot.slane %v12024_v33, 4 }
 0xa61   : > { %v4630_v57 = vsel %vm3429_vm15, %v4626_v26, %v4598_v6  ;;  %v4629_v47 = vsel %vm3429_vm15, %v4625_v11, %v4597_v28  ;;  %v7867_v31 = vpack.c.bf16 %v4910_v50, %v4909_v52  ;;  %v4662_v46 = vsel %vm3429_vm15, %v4658_v54, %v4606_v55 }
 0xa62   : > { %v4634_v37 = vsel %vm2493_vm3, %v4630_v57, %v4606_v55  ;;  %7864 = vmatprep.subr.bf16.mxu1 %v7863_v41  ;;  %v12215_v16 = vsel %vm3446_vm5, %v4631_v38, %v4615_v45  ;;  %v4633_v33 = vsel %vm2493_vm3, %v4629_v47, %v4605_v2  ;;  %v4642_v28 = vrot.slane %v4574_v1, 4  ;;  %v4914_v2 = vld [vmem:[%s8321_s14 + $0x38] sm:$0xff] }
 0xa63   : > { %4810 = vrot.lane.b32.xlu1 %v4757_v40, %s13099_s26  ;;  %v12204_v20 = vsel %vm3446_vm5, %v4634_v37, %v4618_v53  ;;  %7866 = vmatpush3.bf16.msra.mxu1 %v7863_v41  ;;  %v7871_v62 = vpack.c.bf16 %v4912_v23, %v4911_v36  ;;  %v4617_v10 = vrot.slane %v12079_v42, 4  ;;  %v4650_v5 = vrot.slane %v4582_v25, 5 }
 0xa64   : > { %4841 = vrot.lane.b32.xlu0 %v12204_v20, %s8259_s5  ;;  %7868 = vmatprep.subr.bf16.mxu1 %v7867_v31  ;;  %v4666_v22 = vsel %vm2493_vm3, %v4662_v46, %v4642_v28  ;;  %v4774_v24 = vrot.slane %v12215_v16, 1  ;;  %v7879_v34 = vpack.c.bf16 %v4916_v13, %v4915_v8  ;;  %v7883_v56 = vpack.c.bf16 %v4918_v19, %v4917_v58  ;;  %vm7888_vm3 = vmpackc.low %vm3446_vm5, %vm8245_vm4 }
 0xa65   : > { %v12227_v12 = vsel %vm3446_vm5, %v4633_v33, %v4617_v10  ;;  %v4670_v42 = vsel %vm3446_vm5, %v4666_v22, %v4650_v5  ;;  %v4775_v30 = vrot.slane %v12169_v0, 1  ;;  %v7887_v9 = vpack.c.bf16 %v4920_v51, %v4919_v32 }
 0xa66   : > { %v4776_v49 = vrot.slane %v12227_v12, 1  ;;  %v4821_v3 = vrot.slane %v12120_v7, 1  ;;  %v4860_v61 = vrot.slane %v12204_v20, 1  ;;  %vm4879_vm4 = vcmask 293888  }
 0xa67   : > { %4835 = vrot.lane.b32.xlu1 %v12215_v16, %s8259_s5  ;;  %7870 = vmatpush3.bf16.msra.mxu1 %v7867_v31  ;;  %vm4888_vm15 = vcmask 490496   ;;  %vm4934_vm5 = vcmask 883712  }
 0xa68   : > { %4850 = vrot.lane.b32.xlu0 %v12054_v15, %s8260_s22  ;;  %7872 = vmatprep.subr.bf16.mxu1 %v7871_v62  ;;  %v7875_v15 = vpack.c.bf16 %v4914_v2, %v4913_v35 }
 0xa6b   : > { %4839 = vrot.lane.b32.xlu1 %v12227_v12, %s8259_s5  ;;  %7874 = vmatpush3.bf16.msra.mxu1 %v7871_v62  ;;  %s13089_s5 = smov 80  }
 0xa6c   : > { %4854 = vrot.lane.b32.xlu0 %v4670_v42, %s8260_s22  ;;  %7876 = vmatprep.subr.bf16.mxu1 %v7875_v15 }
 0xa6f   : > { %4848 = vrot.lane.b32.xlu1 %v12067_v21, %s8260_s22  ;;  %7878 = vmatpush3.bf16.msra.mxu1 %v7875_v15  ;;  %v4819_v21 = vrot.slane %v12083_v39, 1  ;;  %v4820_v39 = vrot.slane %v12155_v29, 1 }
 0xa70   : > { %4777 = vrot.lane.b32.xlu0 %v4774_v24, %s13137_s9  ;;  %7880 = vmatprep.subr.bf16.mxu1 %v7879_v34 }
 0xa73   : > { %4852 = vrot.lane.b32.xlu1 %v12109_v48, %s8260_s22  ;;  %7882 = vmatpush3.bf16.msra.mxu1 %v7879_v34  ;;  %v4818_v48 = vrot.slane %v12135_v18, 1  ;;  %s13087_s22 = smov 112  }
 0xa74   : > { %4781 = vrot.lane.b32.xlu0 %v4776_v49, %s13137_s9  ;;  %7884 = vmatprep.subr.bf16.mxu1 %v7883_v56 }
 0xa77   : > { %4779 = vrot.lane.b32.xlu1 %v4775_v30, %s13137_s9  ;;  %7886 = vmatpush3.bf16.msra.mxu1 %v7883_v56  ;;  %s13095_s9 = smov 96  }
 0xa78   : > { %4824 = vrot.lane.b32.xlu0 %v4819_v21, %s8261_s2  ;;  %7889 = vmatprep.subr.msk.bf16.mxu1 %vm7888_vm3, %v7887_v9 }
 0xa7b   : > { %4822 = vrot.lane.b32.xlu1 %v4818_v48, %s8261_s2  ;;  %7892 = vmatpush3.bf16.msk.msra.mxu1 %vm7888_vm3, %v7887_v9 }
 0xa7c   : > { %4828 = vrot.lane.b32.xlu0 %v4821_v3, %s8261_s2  ;;  %7929 = vmatprep.subr.bf16.mxu1 %v8254_v17 }
 0xa7f   : > { %4826 = vrot.lane.b32.xlu1 %v4820_v39, %s8261_s2  ;;  %s13341_s2 = sld [smem:[#allocation9_spill]] }
 0xa80   : > { %4863 = vrot.lane.b32.xlu0 %v4775_v30, %s13095_s9 }
 0xa83   : > { %4861 = vrot.lane.b32.xlu1 %v4774_v24, %s13095_s9 }
 0xa84   : > { %4867 = vrot.lane.b32.xlu0 %v4860_v61, %s13095_s9 }
 0xa87   : > { %4865 = vrot.lane.b32.xlu1 %v4776_v49, %s13095_s9 }
 0xab8   : > { %v4765_v7 = vpop.permute.xlu0 %4764 }
 0xab9   : > { %v4874_v31 = vsel %vm2220_vm9, %v12169_v0, %v4765_v7 }
 0xaba   : > { %v4763_v18 = vpop.permute.xlu1 %4762 }
 0xabb   : > { %v4873_v57 = vsel %vm2220_vm9, %v12215_v16, %v4763_v18  ;;  %v7278_v18 = vld [vmem:[%s8326_s19] ss:$0 sm:$0xff] }
 0xabc   : > { %v4793_v1 = vpop.permute.xlu0 %4792 }
 0xac1   : > { %v4767_v29 = vpop.permute.xlu1 %4766 }
 0xac2   : > { %v4875_v41 = vsel %vm2220_vm9, %v12227_v12, %v4767_v29  ;;  %vm4897_vm9 = vcmask 687104  }
 0xac3   : > { %v4797_v14 = vpop.permute.xlu0 %4796 }
 0xac7   : > { %v4809_v25 = vpop.permute.xlu0 %4808 }
 0xac8   : > { %v4791_v60 = vpop.permute.xlu1 %4790 }
 0xacb   : > { %v4813_v6 = vpop.permute.xlu0 %4812 }
 0xacd   : > { %v4795_v44 = vpop.permute.xlu1 %4794 }
 0xacf   : > { %v4838_v59 = vpop.permute.xlu0 %4837 }
 0xad1   : > { %v4807_v4 = vpop.permute.xlu1 %4806 }
 0xad5   : > { %v4811_v43 = vpop.permute.xlu1 %4810 }
 0xad6   : > { %v4842_v55 = vpop.permute.xlu0 %4841 }
 0xad9   : > { %v4836_v26 = vpop.permute.xlu1 %4835 }
 0xada   : > { %v4851_v11 = vpop.permute.xlu0 %4850 }
 0xadd   : > { %v4840_v52 = vpop.permute.xlu1 %4839 }
 0xade   : > { %v4855_v50 = vpop.permute.xlu0 %4854 }
 0xae1   : > { %v4849_v40 = vpop.permute.xlu1 %4848 }
 0xae2   : > { %v4778_v53 = vpop.permute.xlu0 %4777 }
 0xae3   : > { %v4876_v38 = vsel %vm2352_vm13, %v4873_v57, %v4778_v53 }
 0xae4   : > { %v4881_v20 = vsel %vm4879_vm4, %v4876_v38, %v4793_v1  ;;  %v4880_v36 = vsel %vm4879_vm4, %v4876_v38, %v4791_v60  ;;  %v7284_v38 = vld [vmem:[%s8331_s24] ss:$0 sm:$0xff] }
 0xae5   : > { %v4853_v37 = vpop.permute.xlu1 %4852  ;;  %v4885_v46 = vsel %vm4124_vm10, %v4881_v20, %v4809_v25  ;;  %v4884_v10 = vsel %vm4124_vm10, %v4880_v36, %v4807_v4  ;;  %v7285_v20 = vld [vmem:[%s8336_s30] ss:$0 sm:$0xff] }
 0xae6   : > { %v4782_v54 = vpop.permute.xlu0 %4781 }
 0xae7   : > { %v4878_v47 = vsel %vm2352_vm13, %v4875_v41, %v4782_v54 }
 0xae8   : > { %v4883_v33 = vsel %vm4879_vm4, %v4878_v47, %v4797_v14 }
 0xae9   : > { %v4780_v45 = vpop.permute.xlu1 %4779  ;;  %v4887_v35 = vsel %vm4124_vm10, %v4883_v33, %v4813_v6  ;;  %v8263_v6 = vmov 0.0625  }
 0xaea   : > { %v4825_v23 = vpop.permute.xlu0 %4824  ;;  %v4877_v16 = vsel %vm2352_vm13, %v4874_v31, %v4780_v45  ;;  %vm4902_vm13 = vcmask 785408  }
 0xaeb   : > { %v4890_v28 = vsel %vm4888_vm15, %v4885_v46, %v4825_v23  ;;  %v4882_v22 = vsel %vm4879_vm4, %v4877_v16, %v4795_v44  ;;  %v13340_v23 = vld [vmem:[#allocation51_spill] sm:$0xff] }
 0xaec   : > { %v4894_v0 = vsel %vm4167_vm14, %v4890_v28, %v4838_v59  ;;  %v4886_v24 = vsel %vm4124_vm10, %v4882_v22, %v4811_v43  ;;  %v12309_v16 = vsub.s32 1, %v13340_v23  ;;  %v12312_v46 = vsub.s32 2, %v13340_v23  ;;  %v5393_v23 = vld [vmem:[%s13120_s6 + $0x80] sm:$0xff] }
 0xaed   : > { %v4823_v62 = vpop.permute.xlu1 %4822  ;;  %v4899_v13 = vsel %vm4897_vm9, %v4894_v0, %v4851_v11 }
 0xaee   : > { %v4889_v12 = vsel %vm4888_vm15, %v4884_v10, %v4823_v62  ;;  %v4829_v5 = vpop.permute.xlu0 %4828  ;;  %v5377_v62 = vld [vmem:[%s13120_s6] sm:$0xff]  ;;  %v5378_v10 = vld [vmem:[%s13120_s6 + $0x8] sm:$0xff] }
 0xaef   : > { %v4892_v2 = vsel %vm4888_vm15, %v4887_v35, %v4829_v5  ;;  %v4893_v15 = vsel %vm4167_vm14, %v4889_v12, %v4836_v26 }
 0xaf0   : > { %v4896_v49 = vsel %vm4167_vm14, %v4892_v2, %v4842_v55  ;;  %v4898_v19 = vsel %vm4897_vm9, %v4893_v15, %v4849_v40 }
 0xaf1   : > { %v4827_v42 = vpop.permute.xlu1 %4826  ;;  %v4901_v51 = vsel %vm4897_vm9, %v4896_v49, %v4855_v50 }
 0xaf2   : > { %v4891_v8 = vsel %vm4888_vm15, %v4886_v24, %v4827_v42  ;;  %v4864_v34 = vpop.permute.xlu0 %4863 }
 0xaf3   : > { %v4904_v58 = vsel %vm4902_vm13, %v4899_v13, %v4864_v34  ;;  %v4895_v30 = vsel %vm4167_vm14, %v4891_v8, %v4840_v52  ;;  %v7900_v8 = vpack.c.bf16 %v5378_v10, %v5377_v62  ;;  %v5394_v62 = vld [vmem:[%s13120_s6 + $0x88] sm:$0xff] }
 0xaf4   : > { %v4900_v3 = vsel %vm4897_vm9, %v4895_v30, %v4853_v37  ;;  %v5379_v30 = vld [vmem:[%s13120_s6 + $0x10] sm:$0xff]  ;;  %v7924_v10 = vpack.c.bf16 %v5394_v62, %v5393_v23 }
 0xaf5   : > { %v4862_v56 = vpop.permute.xlu1 %4861 }
 0xaf6   : > { %v4903_v21 = vsel %vm4902_vm13, %v4898_v19, %v4862_v56  ;;  %v4868_v9 = vpop.permute.xlu0 %4867 }
 0xaf7   : > { %v4932_v32 = vcombine.low %v4903_v21, %v4904_v58  ;;  %v4906_v48 = vsel %vm4902_vm13, %v4901_v51, %v4868_v9  ;;  %v5380_v21 = vld [vmem:[%s13120_s6 + $0x18] sm:$0xff] }
 0xaf9   : > { %7676 = vmatprep.mubr.msk.f32.mxu1 %vm4934_vm5, %v4932_v32  ;;  %v4866_v39 = vpop.permute.xlu1 %4865 }
 0xafa   : > { %v4905_v61 = vsel %vm4902_vm13, %v4900_v3, %v4866_v39 }
 0xafb   : > { %v4933_v7 = vcombine.low %v4905_v61, %v4906_v48  ;;  %v7903_v61 = vpack.c.bf16 %v5380_v21, %v5379_v30 }
 0xafd   : > { %7677 = vmatmul.mubr.msk.f32.vlgmr.msra.gmra.mrb[6].mxu1 %vm4934_vm5, %v4933_v7 }
 0xafe   : > { %7704 = vmatprep.mubr.msk.f32.mxu1 %vm8255_vm1, %v8256_v27 }
 0xbd0   : > { %v7678_v1 = vpop.f32.mrb[6].mxu1 }
 0xbd1   : > { %v5014_v29 = vadd.f32 %v7678_v1, %v7278_v18  ;;  %v5008_v14 = vpop.f32.mrb[7].mxu1  ;;  %v5381_v1 = vld [vmem:[%s13120_s6 + $0x20] sm:$0xff] }
 0xbd2   : > { %v5009_v25 = vadd.f32 %v7278_v18, %v5008_v14 }
 0xbd4   : > { %v7894_v60 = vpack.c.bf16 %v5014_v29, %v5009_v25 }
 0xbd6   : > { %7895 = vmatpush3.bf16.msra.mxu0 %v7894_v60 }
 0xbd7   : > { %7896 = vmatprep.subr.bf16.mxu0 %v8254_v17 }
 0xbd9   : > { %7684 = vmatmul.mubr.msk.f32.vlgmr.msra.gmra.mrb[42].mxu0 %vm4090_vm2, %v8263_v6 }
 0xbda   : > { %7690 = vmatprep.mubr.msk.f32.mxu0 %vm8255_vm1, %v8256_v27 }
 0xcac   : > { %v5086_v44 = vpop.f32.mrb[42].mxu0 }
 0xcad   : > { %v5093_v4 = vrot.slane %v5086_v44, %v13338_v63  ;;  %v7685_v59 = vpop.f32.mrb[43].mxu0 }
 0xcaf   : > { %v5094_v43 = vsub.f32 %v5009_v25, %v5093_v4  ;;  %v5095_v55 = vsub.f32 %v5014_v29, %v5093_v4  ;;  %v5382_v29 = vld [vmem:[%s13120_s6 + $0x28] sm:$0xff] }
 0xcb0   : > { %v7906_v25 = vpack.c.bf16 %v5382_v29, %v5381_v1 }
 0xcb1   : > { %v5096_v26 = vmul.f32 %v5094_v43, %v5094_v43  ;;  %v5097_v11 = vmul.f32 %v5095_v55, %v5095_v55 }
 0xcb3   : > { %v7897_v52 = vpack.c.bf16 %v5097_v11, %v5096_v26 }
 0xcb5   : > { %7898 = vmatpush3.bf16.msra.mxu0 %v7897_v52 }
 0xcb6   : > { %7899 = vmatprep.subr.bf16.mxu0 %v8254_v17 }
 0xcb8   : > { %7691 = vmatmul.mubr.msk.f32.vlgmr.msra.gmra.mrb[44].mxu0 %vm4090_vm2, %v8263_v6 }
 0xcb9   : > { %7901 = vmatpush1.bf16.msra.mxu0 %v7900_v8 }
 0xcba   : > { %7902 = vmatprep.subr.bf16.mxu0 %v8254_v17 }
 0xcbd   : > { %7904 = vmatpush1.bf16.msra.mxu0 %v7903_v61 }
 0xcbe   : > { %7905 = vmatprep.subr.bf16.mxu0 %v8254_v17 }
 0xcc1   : > { %7907 = vmatpush1.bf16.msra.mxu0 %v7906_v25 }
 0xcc2   : > { %7908 = vmatprep.subr.bf16.mxu0 %v8254_v17 }
 0xd8b   : > { %v5164_v50 = vpop.f32.mrb[44].mxu0 }
 0xd8c   : > { %v5165_v40 = vadd.f32 1e-05, %v5164_v50  ;;  %v7692_v53 = vpop.f32.mrb[45].mxu0  ;;  %v5385_v50 = vld [vmem:[%s13120_s6 + $0x40] sm:$0xff] }
 0xd8e   : > { %8134 = vrsqrt.f32 %v5165_v40  ;;  %v5386_v40 = vld [vmem:[%s13120_s6 + $0x48] sm:$0xff] }
 0xd8f   : > { %v7912_v53 = vpack.c.bf16 %v5386_v40, %v5385_v50 }
 0xd98   : > { %v8135_v57 = vpop.eup %8134 }
 0xd99   : > { %v5172_v37 = vrot.slane %v8135_v57, %v13338_v63  ;;  %v5387_v57 = vld [vmem:[%s13120_s6 + $0x50] sm:$0xff] }
 0xd9b   : > { %v5173_v54 = vmul.f32 %v5172_v37, %v5094_v43  ;;  %v5174_v41 = vmul.f32 %v5172_v37, %v5095_v55  ;;  %v5383_v43 = vld [vmem:[%s13120_s6 + $0x30] sm:$0xff]  ;;  %v5384_v55 = vld [vmem:[%s13120_s6 + $0x38] sm:$0xff] }
 0xd9c   : > { %v7909_v26 = vpack.c.bf16 %v5384_v55, %v5383_v43  ;;  %v5388_v37 = vld [vmem:[%s13120_s6 + $0x58] sm:$0xff] }
 0xd9d   : > { %v5182_v45 = vmul.f32 %v7284_v38, %v5173_v54  ;;  %v5183_v47 = vmul.f32 %v7284_v38, %v5174_v41  ;;  %v7915_v38 = vpack.c.bf16 %v5388_v37, %v5387_v57  ;;  %v5389_v54 = vld [vmem:[%s13120_s6 + $0x60] sm:$0xff]  ;;  %v5390_v41 = vld [vmem:[%s13120_s6 + $0x68] sm:$0xff] }
 0xd9e   : > { %7910 = vmatpush1.bf16.msra.mxu0 %v7909_v26 }
 0xd9f   : > { %v5191_v31 = vadd.f32 %v7285_v20, %v5182_v45  ;;  %v5192_v36 = vadd.f32 %v7285_v20, %v5183_v47  ;;  %7911 = vmatprep.subr.bf16.mxu0 %v8254_v17  ;;  %v7918_v20 = vpack.c.bf16 %v5390_v41, %v5389_v54  ;;  %v5391_v45 = vld [vmem:[%s13120_s6 + $0x70] sm:$0xff]  ;;  %v5392_v47 = vld [vmem:[%s13120_s6 + $0x78] sm:$0xff] }
 0xda1   : > { %v12314_v33 = vmax.f32 %v5191_v31, 0.0  ;;  %v12316_v28 = vmax.f32 %v5192_v36, 0.0  ;;  %v7921_v31 = vpack.c.bf16 %v5392_v47, %v5391_v45 }
 0xda2   : > { %7913 = vmatpush1.bf16.msra.mxu0 %v7912_v53 }
 0xda3   : > { %v5212_v22 = vrot.slane %v12316_v28, %v12309_v16  ;;  %v5223_v12 = vrot.slane %v12316_v28, 7  ;;  %v5240_v5 = vrot.slane %v12316_v28, %v12312_v46  ;;  %v5208_v0 = vrot.slane %v12314_v33, %v12309_v16  ;;  %7914 = vmatprep.subr.bf16.mxu0 %v8254_v17 }
 0xda4   : > { %v5222_v35 = vrot.slane %v12314_v33, 7  ;;  %v5236_v2 = vrot.slane %v12314_v33, %v12312_v46  ;;  %v12332_v42 = vcombine.high %v12314_v33, %v12314_v33  ;;  %v12336_v15 = vcombine.high %v12316_v28, %v12316_v28 }
 0xda5   : > { %v5251_v24 = vsel %vm1033_vm0, %v5212_v22, %v5223_v12 }
 0xda6   : > { %v12340_v13 = vsel %vm3455_vm6, %v5251_v24, %v5240_v5  ;;  %v5250_v34 = vsel %vm1033_vm0, %v5208_v0, %v5222_v35  ;;  %v5204_v49 = vrot.slane %v12332_v42, %v12309_v16  ;;  %v5221_v58 = vrot.slane %v12332_v42, 7  ;;  %7916 = vmatpush1.bf16.msra.mxu0 %v7915_v38 }
 0xda7   : > { %5325 = vrot.lane.b32.xlu0 %v12340_v13, %s13095_s9  ;;  %v12349_v19 = vsel %vm3455_vm6, %v5250_v34, %v5236_v2  ;;  %v5232_v56 = vrot.slane %v12332_v42, %v12312_v46  ;;  %v5216_v9 = vrot.slane %v12336_v15, %v12309_v16  ;;  %v5224_v3 = vrot.slane %v12336_v15, 7  ;;  %7917 = vmatprep.subr.bf16.mxu0 %v8254_v17 }
 0xda8   : > { %5285 = vrot.lane.b32.xlu1 %v12349_v19, %s13099_s26  ;;  %v5261_v32 = vrot.slane %v12349_v19, 1  ;;  %v5249_v51 = vsel %vm1033_vm0, %v5204_v49, %v5221_v58  ;;  %v5244_v39 = vrot.slane %v12336_v15, %v12312_v46  ;;  %v5274_v7 = vrot.slane %v12340_v13, 2 }
 0xda9   : > { %v12363_v48 = vsel %vm3455_vm6, %v5249_v51, %v5232_v56  ;;  %v5252_v14 = vsel %vm1033_vm0, %v5216_v9, %v5224_v3  ;;  %v5273_v4 = vrot.slane %v12349_v19, 2  ;;  %v5262_v52 = vrot.slane %v12340_v13, 1 }
 0xdaa   : > { %v12370_v18 = vrot.slane %v12363_v48, 2  ;;  %v5256_v44 = vsel %vm3455_vm6, %v5252_v14, %v5244_v39  ;;  %7919 = vmatpush1.bf16.msra.mxu0 %v7918_v20  ;;  %v5260_v36 = vrot.slane %v12363_v48, 1 }
 0xdab   : > { %5265 = vrot.lane.b32.xlu0 %v5261_v32, %s13097_s16  ;;  %v5310_v59 = vrot.slane %v5256_v44, 2  ;;  %7920 = vmatprep.subr.bf16.mxu0 %v8254_v17  ;;  %v5297_v22 = vrot.slane %v5256_v44, 1 }
 0xdac   : > { %5289 = vrot.lane.b32.xlu1 %v12340_v13, %s13099_s26  ;;  %v7288_v60 = vcombine.low %v12370_v18, %v5274_v7 }
 0xdad   : > { %v12386_v11 = vcombine.low %v5310_v59, %v5274_v7 }
 0xdae   : > { %7291 = vmatprep.mubr.msk.f32.mxu0 %vm4090_vm2, %v7288_v60  ;;  %7922 = vmatpush1.bf16.msra.mxu0 %v7921_v31 }
 0xdaf   : > { %5277 = vrot.lane.b32.xlu0 %v5273_v4, %s13093_s23  ;;  %7923 = vmatprep.subr.bf16.mxu0 %v8254_v17 }
 0xdb0   : > { %5298 = vrot.lane.b32.xlu1 %v5261_v32, %s13091_s11 }
 0xdb2   : > { %7925 = vmatpush1.bf16.msra.mxu0 %v7924_v10 }
 0xdb3   : > { %5287 = vrot.lane.b32.xlu0 %v12363_v48, %s13099_s26  ;;  %7926 = vmatprep.subr.bf16.mxu0 %v8254_v17 }
 0xdb4   : > { %5267 = vrot.lane.b32.xlu1 %v5262_v52, %s13097_s16 }
 0xdb7   : > { %5311 = vrot.lane.b32.xlu0 %v5273_v4, %s13089_s5 }
 0xdb8   : > { %5323 = vrot.lane.b32.xlu1 %v12363_v48, %s13095_s9 }
 0xdbb   : > { %5279 = vrot.lane.b32.xlu0 %v5274_v7, %s13093_s23 }
 0xdbc   : > { %5302 = vrot.lane.b32.xlu1 %v5262_v52, %s13091_s11 }
 0xdbf   : > { %5291 = vrot.lane.b32.xlu0 %v5256_v44, %s13099_s26 }
 0xdc0   : > { %5315 = vrot.lane.b32.xlu1 %v5274_v7, %s13089_s5 }
 0xdc3   : > { %5334 = vrot.lane.b32.xlu0 %v5262_v52, %s13087_s22 }
 0xdc4   : > { %5263 = vrot.lane.b32.xlu1 %v5260_v36, %s13097_s16 }
 0xdc7   : > { %5300 = vrot.lane.b32.xlu0 %v5260_v36, %s13091_s11 }
 0xdc8   : > { %5275 = vrot.lane.b32.xlu1 %v12370_v18, %s13093_s23 }
 0xdcb   : > { %5304 = vrot.lane.b32.xlu0 %v5297_v22, %s13091_s11 }
 0xdcc   : > { %5313 = vrot.lane.b32.xlu1 %v12370_v18, %s13089_s5 }
 0xdcf   : > { %5317 = vrot.lane.b32.xlu0 %v5310_v59, %s13089_s5  ;;  %s13344_s5 = sld [smem:[#allocation12_spill]] }
 0xdd0   : > { %5332 = vrot.lane.b32.xlu1 %v5260_v36, %s13087_s22 }
 0xdd3   : > { %5336 = vrot.lane.b32.xlu0 %v5297_v22, %s13087_s22  ;;  %s13342_s22 = sld [smem:[#allocation10_spill]] }
 0xdd4   : > { %5327 = vrot.lane.b32.xlu1 %v5256_v44, %s13095_s9 }
 0xe19   : > { %v5326_v12 = vpop.permute.xlu0 %5325 }
 0xe1a   : > { %v5286_v5 = vpop.permute.xlu1 %5285 }
 0xe1d   : > { %v5266_v0 = vpop.permute.xlu0 %5265 }
 0xe1e   : > { %v5290_v35 = vpop.permute.xlu1 %5289  ;;  %v5342_v7 = vsel %vm4090_vm2, %v12349_v19, %v5266_v0 }
 0xe21   : > { %v5278_v2 = vpop.permute.xlu0 %5277 }
 0xe22   : > { %v5299_v24 = vpop.permute.xlu1 %5298  ;;  %v5345_v1 = vsel %vm4106_vm7, %v5342_v7, %v5278_v2  ;;  %v7295_v7 = vld [vmem:[%s13342_s22] ss:$0 sm:$0xff]  ;;  %s13345_s22 = smov 80  }
 0xe25   : > { %v5288_v8 = vpop.permute.xlu0 %5287 }
 0xe26   : > { %v5268_v34 = vpop.permute.xlu1 %5267  ;;  %v5348_v14 = vsel %vm4124_vm10, %v5345_v1, %v5288_v8 }
 0xe27   : > { %v5343_v44 = vsel %vm4090_vm2, %v12340_v13, %v5268_v34 }
 0xe29   : > { %v5312_v49 = vpop.permute.xlu0 %5311 }
 0xe2a   : > { %v5324_v58 = vpop.permute.xlu1 %5323 }
 0xe2d   : > { %v5280_v56 = vpop.permute.xlu0 %5279 }
 0xe2e   : > { %v5303_v30 = vpop.permute.xlu1 %5302  ;;  %v5346_v19 = vsel %vm4106_vm7, %v5343_v44, %v5280_v56 }
 0xe31   : > { %v5292_v21 = vpop.permute.xlu0 %5291 }
 0xe32   : > { %v5316_v32 = vpop.permute.xlu1 %5315  ;;  %v5350_v55 = vsel %vm4124_vm10, %v5346_v19, %v5292_v21  ;;  %v5840_v19 = vld [vmem:[%s13344_s5] sm:$0xff] }
 0xe35   : > { %v5335_v51 = vpop.permute.xlu0 %5334 }
 0xe36   : > { %v5264_v9 = vpop.permute.xlu1 %5263 }
 0xe37   : > { %v5341_v39 = vsel %vm4090_vm2, %v12363_v48, %v5264_v9 }
 0xe39   : > { %v5301_v3 = vpop.permute.xlu0 %5300 }
 0xe3a   : > { %v5276_v61 = vpop.permute.xlu1 %5275  ;;  %v5352_v48 = vsel %vm4142_vm12, %v5348_v14, %v5301_v3 }
 0xe3b   : > { %v5344_v18 = vsel %vm4106_vm7, %v5341_v39, %v5276_v61 }
 0xe3c   : > { %v5347_v29 = vsel %vm4124_vm10, %v5344_v18, %v5286_v5  ;;  %v5349_v26 = vsel %vm4124_vm10, %v5344_v18, %v5290_v35  ;;  %v7286_v5 = vld [vmem:[%s13341_s2] ss:$0 sm:$0xff]  ;;  %s13343_s2 = sld [smem:[#allocation11_spill]] }
 0xe3d   : > { %v5351_v25 = vsel %vm4142_vm12, %v5347_v29, %v5299_v24  ;;  %v5305_v60 = vpop.permute.xlu0 %5304  ;;  %v5353_v54 = vsel %vm4142_vm12, %v5349_v26, %v5303_v30 }
 0xe3e   : > { %v5314_v4 = vpop.permute.xlu1 %5313  ;;  %v5356_v43 = vsel %vm5355_vm8, %v5351_v25, %v5312_v49  ;;  %v5354_v50 = vsel %vm4142_vm12, %v5350_v55, %v5305_v60  ;;  %v5358_v47 = vsel %vm5355_vm8, %v5353_v54, %v5316_v32 }
 0xe3f   : > { %v5357_v59 = vsel %vm5355_vm8, %v5352_v48, %v5314_v4  ;;  %v5360_v53 = vsel %vm4902_vm13, %v5356_v43, %v5324_v58 }
 0xe40   : > { %v5361_v52 = vsel %vm4902_vm13, %v5357_v59, %v5326_v12  ;;  %v5841_v59 = vld [vmem:[%s13344_s5 + $0x8] sm:$0xff] }
 0xe41   : > { %v5318_v40 = vpop.permute.xlu0 %5317  ;;  %v5366_v37 = vsel %vm5364_vm11, %v5361_v52, %v5335_v51 }
 0xe42   : > { %v5359_v13 = vsel %vm5355_vm8, %v5354_v50, %v5318_v40  ;;  %v5333_v57 = vpop.permute.xlu1 %5332  ;;  %v7296_v29 = vld [vmem:[%s13343_s2] ss:$0 sm:$0xff]  ;;  %s13346_s2 = smov 112  }
 0xe43   : > { %v5365_v38 = vsel %vm5364_vm11, %v5360_v53, %v5333_v57  ;;  %v5363_v20 = vsel %vm4902_vm13, %v5359_v13, %v5326_v12 }
 0xe44   : > { %v7287_v41 = vcombine.low %v5365_v38, %v5366_v37  ;;  %v5368_v62 = vsel %vm5364_vm11, %v5363_v20, %v5335_v51  ;;  %v7933_v37 = vpack.c.bf16 %v5841_v59, %v5840_v19  ;;  %v5856_v59 = vld [vmem:[%s13344_s5 + $0x80] sm:$0xff] }
 0xe45   : > { %v5337_v45 = vpop.permute.xlu0 %5336 }
 0xe46   : > { %5477 = vmatmul.mubr.f32.vlgmr.msra.gmra.mrb[46].mxu0 %v7287_v41  ;;  %v5328_v31 = vpop.permute.xlu1 %5327 }
 0xe47   : > { %v5362_v36 = vsel %vm4902_vm13, %v5358_v47, %v5328_v31  ;;  %7292 = vmatprep.mubr.msk.f32.mxu0 %vm4090_vm2, %v12386_v11  ;;  %v5842_v31 = vld [vmem:[%s13344_s5 + $0x10] sm:$0xff] }
 0xe48   : > { %v5367_v23 = vsel %vm5364_vm11, %v5362_v36, %v5337_v45  ;;  %v5843_v36 = vld [vmem:[%s13344_s5 + $0x18] sm:$0xff] }
 0xe49   : > { %v7289_v10 = vcombine.low %v5367_v23, %v5368_v62 }
 0xe4b   : > { %5482 = vmatmul.mubr.f32.gmra.mrb[48].mxu0 %v7289_v10 }
 0xe4c   : > { %7697 = vmatprep.mubr.msk.f32.mxu0 %vm8255_vm1, %v8256_v27 }
 0xf19   : > { %v5478_v22 = vpop.f32.mrb[46].mxu0 }
 0xf1a   : > { %v5480_v12 = vpop.f32.mrb[47].mxu0  ;;  %v5479_v35 = vadd.f32 %v7286_v5, %v5478_v22 }
 0xf1e   : > { %v5483_v0 = vpop.f32.mrb[48].mxu0 }
 0xf1f   : > { %v5484_v2 = vadd.f32 %v7286_v5, %v5483_v0  ;;  %v5485_v24 = vpop.f32.mrb[49].mxu0  ;;  %v7936_v0 = vpack.c.bf16 %v5843_v36, %v5842_v31 }
 0xf20   : > { %v5844_v24 = vld [vmem:[%s13344_s5 + $0x20] sm:$0xff] }
 0xf21   : > { %v7927_v8 = vpack.c.bf16 %v5484_v2, %v5479_v35 }
 0xf23   : > { %7928 = vmatpush3.bf16.msra.mxu0 %v7927_v8  ;;  %v5845_v8 = vld [vmem:[%s13344_s5 + $0x28] sm:$0xff] }
 0xf24   : > { %7959 = vmatprep.subr.bf16.mxu0 %v8254_v17 }
 0xf26   : > { %7698 = vmatmul.mubr.msk.f32.vlgmr.msra.gmra.mrb[50].mxu0 %vm4090_vm2, %v8263_v6 }
 0xf27   : > { %7711 = vmatprep.mubr.msk.f32.mxu0 %vm8255_vm1, %v8256_v27 }
 0xff9   : > { %v5553_v11 = vpop.f32.mrb[50].mxu0 }
 0xffa   : > { %v5560_v34 = vrot.slane %v5553_v11, %v13338_v63  ;;  %v7699_v49 = vpop.f32.mrb[51].mxu0 }
 0xffc   : > { %v5561_v58 = vsub.f32 %v5479_v35, %v5560_v34  ;;  %v5562_v56 = vsub.f32 %v5484_v2, %v5560_v34  ;;  %v7939_v34 = vpack.c.bf16 %v5845_v8, %v5844_v24 }
 0xffe   : > { %v5563_v30 = vmul.f32 %v5561_v58, %v5561_v58  ;;  %v5564_v21 = vmul.f32 %v5562_v56, %v5562_v56 }
0x1000   : > { %v7930_v32 = vpack.c.bf16 %v5564_v21, %v5563_v30  ;;  %v5846_v21 = vld [vmem:[%s13344_s5 + $0x30] sm:$0xff] }
0x1002   : > { %7931 = vmatpush3.bf16.msra.mxu1 %v7930_v32  ;;  %v5847_v32 = vld [vmem:[%s13344_s5 + $0x38] sm:$0xff] }
0x1003   : > { %7932 = vmatprep.subr.bf16.mxu1 %v8254_v17 }
0x1005   : > { %7705 = vmatmul.mubr.msk.f32.vlgmr.msra.gmra.mrb[8].mxu1 %vm4090_vm2, %v8263_v6 }
0x1006   : > { %7934 = vmatpush1.bf16.msra.mxu1 %v7933_v37 }
0x1007   : > { %7935 = vmatprep.subr.bf16.mxu1 %v8254_v17 }
0x100a   : > { %7937 = vmatpush1.bf16.msra.mxu1 %v7936_v0 }
0x100b   : > { %7938 = vmatprep.subr.bf16.mxu1 %v8254_v17 }
0x100e   : > { %7940 = vmatpush1.bf16.msra.mxu1 %v7939_v34 }
0x100f   : > { %7941 = vmatprep.subr.bf16.mxu1 %v8254_v17 }
0x10d8   : > { %v5631_v51 = vpop.f32.mrb[8].mxu1 }
0x10d9   : > { %v5632_v9 = vadd.f32 1e-05, %v5631_v51  ;;  %v7706_v3 = vpop.f32.mrb[9].mxu1  ;;  %v7942_v51 = vpack.c.bf16 %v5847_v32, %v5846_v21 }
0x10db   : > { %8136 = vrsqrt.f32 %v5632_v9  ;;  %7943 = vmatpush1.bf16.msra.mxu1 %v7942_v51 }
0x10dc   : > { %7944 = vmatprep.subr.bf16.mxu1 %v8254_v17 }
0x10e5   : > { %v8137_v39 = vpop.eup %8136 }
0x10e6   : > { %v5639_v61 = vrot.slane %v8137_v39, %v13338_v63  ;;  %v5848_v39 = vld [vmem:[%s13344_s5 + $0x40] sm:$0xff] }
0x10e8   : > { %v5640_v18 = vmul.f32 %v5639_v61, %v5561_v58  ;;  %v5641_v1 = vmul.f32 %v5639_v61, %v5562_v56  ;;  %v5849_v61 = vld [vmem:[%s13344_s5 + $0x48] sm:$0xff] }
0x10ea   : > { %v5649_v14 = vmul.f32 %v7295_v7, %v5640_v18  ;;  %v5650_v25 = vmul.f32 %v7295_v7, %v5641_v1  ;;  %v7945_v7 = vpack.c.bf16 %v5849_v61, %v5848_v39  ;;  %v5850_v18 = vld [vmem:[%s13344_s5 + $0x50] sm:$0xff]  ;;  %v5851_v1 = vld [vmem:[%s13344_s5 + $0x58] sm:$0xff] }
0x10ec   : > { %v5659_v60 = vadd.f32 %v7296_v29, %v5650_v25  ;;  %v5658_v44 = vadd.f32 %v7296_v29, %v5649_v14  ;;  %7946 = vmatpush1.bf16.msra.mxu1 %v7945_v7  ;;  %v7948_v29 = vpack.c.bf16 %v5851_v1, %v5850_v18  ;;  %v5852_v14 = vld [vmem:[%s13344_s5 + $0x60] sm:$0xff]  ;;  %v5853_v25 = vld [vmem:[%s13344_s5 + $0x68] sm:$0xff] }
0x10ed   : > { %7947 = vmatprep.subr.bf16.mxu1 %v8254_v17 }
0x10ee   : > { %v5661_v48 = vmax.f32 %v5659_v60, 0.0  ;;  %v5660_v4 = vmax.f32 %v5658_v44, 0.0  ;;  %v7951_v60 = vpack.c.bf16 %v5853_v25, %v5852_v14  ;;  %v5854_v44 = vld [vmem:[%s13344_s5 + $0x70] sm:$0xff] }
0x10f0   : > { %v5677_v43 = vrot.slane %v5661_v48, %v12309_v16  ;;  %v5688_v55 = vrot.slane %v5661_v48, 7  ;;  %v5705_v26 = vrot.slane %v5661_v48, %v12312_v46  ;;  %v5673_v52 = vrot.slane %v5660_v4, %v12309_v16  ;;  %7949 = vmatpush1.bf16.msra.mxu1 %v7948_v29 }
0x10f1   : > { %v5687_v50 = vrot.slane %v5660_v4, 7  ;;  %v5701_v40 = vrot.slane %v5660_v4, %v12312_v46  ;;  %v5664_v13 = vcombine.high %v5660_v4, %v5660_v4  ;;  %v5665_v53 = vcombine.high %v5661_v48, %v5661_v48  ;;  %7950 = vmatprep.subr.bf16.mxu1 %v8254_v17  ;;  %v5855_v48 = vld [vmem:[%s13344_s5 + $0x78] sm:$0xff] }
0x10f2   : > { %v5716_v57 = vsel %vm1033_vm0, %v5677_v43, %v5688_v55  ;;  %v7954_v4 = vpack.c.bf16 %v5855_v48, %v5854_v44  ;;  %v5857_v43 = vld [vmem:[%s13344_s5 + $0x88] sm:$0xff]  ;;  %s13357_s5 = sld [smem:[#allocation20_spill]] }
0x10f3   : > { %v12484_v38 = vsel %vm3455_vm6, %v5716_v57, %v5705_v26  ;;  %v5715_v54 = vsel %vm1033_vm0, %v5673_v52, %v5687_v50  ;;  %v5669_v41 = vrot.slane %v5664_v13, %v12309_v16  ;;  %v5686_v20 = vrot.slane %v5664_v13, 7 }
0x10f4   : > { %5790 = vrot.lane.b32.xlu0 %v12484_v38, %s13095_s9  ;;  %v12491_v45 = vsel %vm3455_vm6, %v5715_v54, %v5701_v40  ;;  %v5697_v47 = vrot.slane %v5664_v13, %v12312_v46  ;;  %v5681_v10 = vrot.slane %v5665_v53, %v12309_v16  ;;  %v5689_v12 = vrot.slane %v5665_v53, 7  ;;  %7952 = vmatpush1.bf16.msra.mxu1 %v7951_v60 }
0x10f5   : > { %5750 = vrot.lane.b32.xlu1 %v12491_v45, %s13099_s26  ;;  %v5726_v23 = vrot.slane %v12491_v45, 1  ;;  %v5714_v62 = vsel %vm1033_vm0, %v5669_v41, %v5686_v20  ;;  %v5709_v5 = vrot.slane %v5665_v53, %v12312_v46  ;;  %v5739_v35 = vrot.slane %v12484_v38, 2  ;;  %7953 = vmatprep.subr.bf16.mxu1 %v8254_v17 }
0x10f6   : > { %v12503_v22 = vsel %vm3455_vm6, %v5714_v62, %v5697_v47  ;;  %v5717_v11 = vsel %vm1033_vm0, %v5681_v10, %v5689_v12  ;;  %v5738_v56 = vrot.slane %v12491_v45, 2  ;;  %v5727_v3 = vrot.slane %v12484_v38, 1 }
0x10f7   : > { %v12508_v2 = vrot.slane %v12503_v22, 2  ;;  %v5721_v58 = vsel %vm3455_vm6, %v5717_v11, %v5709_v5  ;;  %v5725_v19 = vrot.slane %v12503_v22, 1  ;;  %v7957_v55 = vpack.c.bf16 %v5857_v43, %v5856_v59 }
0x10f8   : > { %5730 = vrot.lane.b32.xlu0 %v5726_v23, %s13097_s16  ;;  %v5775_v30 = vrot.slane %v5721_v58, 2  ;;  %7955 = vmatpush1.bf16.msra.mxu1 %v7954_v4  ;;  %v5762_v26 = vrot.slane %v5721_v58, 1 }
0x10f9   : > { %5754 = vrot.lane.b32.xlu1 %v12484_v38, %s13099_s26  ;;  %v7299_v49 = vcombine.low %v12508_v2, %v5739_v35  ;;  %7956 = vmatprep.subr.bf16.mxu1 %v8254_v17 }
0x10fa   : > { %v12524_v9 = vcombine.low %v5775_v30, %v5739_v35 }
0x10fb   : > { %7302 = vmatprep.mubr.msk.f32.mxu1 %vm4090_vm2, %v7299_v49 }
0x10fc   : > { %5742 = vrot.lane.b32.xlu0 %v5738_v56, %s13093_s23  ;;  %7958 = vmatpush1.bf16.msra.mxu1 %v7957_v55 }
0x10fd   : > { %5763 = vrot.lane.b32.xlu1 %v5726_v23, %s13091_s11  ;;  %7992 = vmatprep.subr.bf16.mxu1 %v8254_v17 }
0x1100   : > { %5752 = vrot.lane.b32.xlu0 %v12503_v22, %s13099_s26 }
0x1101   : > { %5732 = vrot.lane.b32.xlu1 %v5727_v3, %s13097_s16 }
0x1104   : > { %5776 = vrot.lane.b32.xlu0 %v5738_v56, %s13345_s22 }
0x1105   : > { %5788 = vrot.lane.b32.xlu1 %v12503_v22, %s13095_s9 }
0x1108   : > { %5744 = vrot.lane.b32.xlu0 %v5739_v35, %s13093_s23 }
0x1109   : > { %5767 = vrot.lane.b32.xlu1 %v5727_v3, %s13091_s11 }
0x110c   : > { %5756 = vrot.lane.b32.xlu0 %v5721_v58, %s13099_s26 }
0x110d   : > { %5780 = vrot.lane.b32.xlu1 %v5739_v35, %s13345_s22 }
0x1110   : > { %5799 = vrot.lane.b32.xlu0 %v5727_v3, %s13346_s2 }
0x1111   : > { %5728 = vrot.lane.b32.xlu1 %v5725_v19, %s13097_s16 }
0x1114   : > { %5765 = vrot.lane.b32.xlu0 %v5725_v19, %s13091_s11 }
0x1115   : > { %5740 = vrot.lane.b32.xlu1 %v12508_v2, %s13093_s23  ;;  %s13348_s23 = sld [smem:[#allocation14_spill]] }
0x1118   : > { %5769 = vrot.lane.b32.xlu0 %v5762_v26, %s13091_s11  ;;  %s13347_s11 = sld [smem:[#allocation13_spill]] }
0x1119   : > { %5778 = vrot.lane.b32.xlu1 %v12508_v2, %s13345_s22 }
0x111c   : > { %5782 = vrot.lane.b32.xlu0 %v5775_v30, %s13345_s22 }
0x111d   : > { %5797 = vrot.lane.b32.xlu1 %v5725_v19, %s13346_s2 }
0x1120   : > { %5801 = vrot.lane.b32.xlu0 %v5762_v26, %s13346_s2 }
0x1121   : > { %5792 = vrot.lane.b32.xlu1 %v5721_v58, %s13095_s9 }
0x1166   : > { %v5791_v52 = vpop.permute.xlu0 %5790 }
0x1167   : > { %v5751_v50 = vpop.permute.xlu1 %5750 }
0x116a   : > { %v5731_v40 = vpop.permute.xlu0 %5730 }
0x116b   : > { %v5755_v13 = vpop.permute.xlu1 %5754  ;;  %v5807_v35 = vsel %vm4090_vm2, %v12491_v45, %v5731_v40 }
0x116e   : > { %v5743_v53 = vpop.permute.xlu0 %5742 }
0x116f   : > { %v5764_v57 = vpop.permute.xlu1 %5763  ;;  %v5810_v24 = vsel %vm4106_vm7, %v5807_v35, %v5743_v53  ;;  %v7306_v35 = vld [vmem:[%s13348_s23] ss:$0 sm:$0xff]  ;;  %s13350_s23 = sld [smem:[#allocation16_spill]] }
0x1172   : > { %v5753_v37 = vpop.permute.xlu0 %5752 }
0x1173   : > { %v5733_v54 = vpop.permute.xlu1 %5732  ;;  %v5813_v11 = vsel %vm4124_vm10, %v5810_v24, %v5753_v37 }
0x1174   : > { %v5808_v58 = vsel %vm4090_vm2, %v12484_v38, %v5733_v54 }
0x1176   : > { %v5777_v41 = vpop.permute.xlu0 %5776 }
0x1177   : > { %v5789_v20 = vpop.permute.xlu1 %5788 }
0x117a   : > { %v5745_v47 = vpop.permute.xlu0 %5744 }
0x117b   : > { %v5768_v31 = vpop.permute.xlu1 %5767  ;;  %v5811_v30 = vsel %vm4106_vm7, %v5808_v58, %v5745_v47 }
0x117e   : > { %v5757_v36 = vpop.permute.xlu0 %5756 }
0x117f   : > { %v5781_v23 = vpop.permute.xlu1 %5780  ;;  %v5815_v32 = vsel %vm4124_vm10, %v5811_v30, %v5757_v36 }
0x1182   : > { %v5800_v62 = vpop.permute.xlu0 %5799 }
0x1183   : > { %v5729_v10 = vpop.permute.xlu1 %5728 }
0x1184   : > { %v5806_v5 = vsel %vm4090_vm2, %v12503_v22, %v5729_v10 }
0x1186   : > { %v5766_v12 = vpop.permute.xlu0 %5765 }
0x1187   : > { %v5741_v0 = vpop.permute.xlu1 %5740  ;;  %v5817_v22 = vsel %vm4142_vm12, %v5813_v11, %v5766_v12 }
0x1188   : > { %v5809_v2 = vsel %vm4106_vm7, %v5806_v5, %v5741_v0 }
0x1189   : > { %v5812_v8 = vsel %vm4124_vm10, %v5809_v2, %v5751_v50  ;;  %v5814_v51 = vsel %vm4124_vm10, %v5809_v2, %v5755_v13  ;;  %v7297_v50 = vld [vmem:[%s13347_s11] ss:$0 sm:$0xff]  ;;  %s13349_s11 = sld [smem:[#allocation15_spill]] }
0x118a   : > { %v5816_v34 = vsel %vm4142_vm12, %v5812_v8, %v5764_v57  ;;  %v5770_v49 = vpop.permute.xlu0 %5769  ;;  %v5818_v14 = vsel %vm4142_vm12, %v5814_v51, %v5768_v31 }
0x118b   : > { %v5779_v56 = vpop.permute.xlu1 %5778  ;;  %v5820_v21 = vsel %vm5355_vm8, %v5816_v34, %v5777_v41  ;;  %v5819_v39 = vsel %vm4142_vm12, %v5815_v32, %v5770_v49  ;;  %v5822_v48 = vsel %vm5355_vm8, %v5818_v14, %v5781_v23 }
0x118c   : > { %v5821_v45 = vsel %vm5355_vm8, %v5817_v22, %v5779_v56  ;;  %v5824_v7 = vsel %vm4902_vm13, %v5820_v21, %v5789_v20 }
0x118d   : > { %v5825_v3 = vsel %vm4902_vm13, %v5821_v45, %v5791_v52 }
0x118e   : > { %v5783_v61 = vpop.permute.xlu0 %5782  ;;  %v5829_v1 = vsel %vm5364_vm11, %v5825_v3, %v5800_v62 }
0x118f   : > { %v5823_v38 = vsel %vm5355_vm8, %v5819_v39, %v5783_v61  ;;  %v5798_v18 = vpop.permute.xlu1 %5797  ;;  %v7307_v8 = vld [vmem:[%s13349_s11] ss:$0 sm:$0xff]  ;;  %s13351_s11 = smov 32  }
0x1190   : > { %v5828_v29 = vsel %vm5364_vm11, %v5824_v7, %v5798_v18  ;;  %v5827_v60 = vsel %vm4902_vm13, %v5823_v38, %v5791_v52 }
0x1191   : > { %v7298_v25 = vcombine.low %v5828_v29, %v5829_v1  ;;  %v5831_v43 = vsel %vm5364_vm11, %v5827_v60, %v5800_v62 }
0x1192   : > { %v5802_v44 = vpop.permute.xlu0 %5801 }
0x1193   : > { %5940 = vmatmul.mubr.f32.vlgmr.msra.gmra.mrb[10].mxu1 %v7298_v25  ;;  %v5793_v4 = vpop.permute.xlu1 %5792 }
0x1194   : > { %v5826_v19 = vsel %vm4902_vm13, %v5822_v48, %v5793_v4  ;;  %7303 = vmatprep.mubr.msk.f32.mxu1 %vm4090_vm2, %v12524_v9  ;;  %v6315_v4 = vld [vmem:[%s13350_s23] sm:$0xff] }
0x1195   : > { %v5830_v59 = vsel %vm5364_vm11, %v5826_v19, %v5802_v44  ;;  %v6316_v19 = vld [vmem:[%s13350_s23 + $0x8] sm:$0xff] }
0x1196   : > { %v7300_v55 = vcombine.low %v5830_v59, %v5831_v43 }
0x1198   : > { %5945 = vmatmul.mubr.f32.gmra.mrb[12].mxu1 %v7300_v55 }
0x1199   : > { %7725 = vmatprep.mubr.msk.f32.mxu1 %vm8255_vm1, %v8256_v27 }
0x1266   : > { %v5941_v26 = vpop.f32.mrb[10].mxu1 }
0x1267   : > { %v5943_v52 = vpop.f32.mrb[11].mxu1  ;;  %v5942_v13 = vadd.f32 %v7297_v50, %v5941_v26 }
0x126b   : > { %v5946_v40 = vpop.f32.mrb[12].mxu1 }
0x126c   : > { %v5947_v53 = vadd.f32 %v7297_v50, %v5946_v40  ;;  %v5948_v57 = vpop.f32.mrb[13].mxu1  ;;  %v6317_v50 = vld [vmem:[%s13350_s23 + $0x10] sm:$0xff]  ;;  %v6318_v40 = vld [vmem:[%s13350_s23 + $0x18] sm:$0xff] }
0x126e   : > { %v7960_v37 = vpack.c.bf16 %v5947_v53, %v5942_v13 }
0x1270   : > { %7961 = vmatpush3.bf16.msra.mxu0 %v7960_v37  ;;  %v7966_v37 = vpack.c.bf16 %v6316_v19, %v6315_v4 }
0x1271   : > { %7962 = vmatprep.subr.bf16.mxu0 %v8254_v17 }
0x1273   : > { %7712 = vmatmul.mubr.msk.f32.vlgmr.msra.gmra.mrb[52].mxu0 %vm4090_vm2, %v8263_v6 }
0x1274   : > { %7718 = vmatprep.mubr.msk.f32.mxu0 %vm8255_vm1, %v8256_v27 }
0x1346   : > { %v6016_v9 = vpop.f32.mrb[52].mxu0 }
0x1347   : > { %v6023_v54 = vrot.slane %v6016_v9, %v13338_v63  ;;  %v7713_v41 = vpop.f32.mrb[53].mxu0 }
0x1349   : > { %v6024_v20 = vsub.f32 %v5942_v13, %v6023_v54  ;;  %v6025_v47 = vsub.f32 %v5947_v53, %v6023_v54 }
0x134b   : > { %v6026_v31 = vmul.f32 %v6024_v20, %v6024_v20  ;;  %v6027_v36 = vmul.f32 %v6025_v47, %v6025_v47 }
0x134d   : > { %v7963_v23 = vpack.c.bf16 %v6027_v36, %v6026_v31  ;;  %v6320_v31 = vld [vmem:[%s13350_s23 + $0x28] sm:$0xff] }
0x134f   : > { %7964 = vmatpush3.bf16.msra.mxu0 %v7963_v23 }
0x1350   : > { %7965 = vmatprep.subr.bf16.mxu0 %v8254_v17 }
0x1352   : > { %7719 = vmatmul.mubr.msk.f32.vlgmr.msra.gmra.mrb[54].mxu0 %vm4090_vm2, %v8263_v6 }
0x1353   : > { %7967 = vmatpush1.bf16.msra.mxu0 %v7966_v37 }
0x1354   : > { %7968 = vmatprep.subr.bf16.mxu0 %v8254_v17 }
0x1425   : > { %v6094_v62 = vpop.f32.mrb[54].mxu0 }
0x1426   : > { %v6095_v10 = vadd.f32 1e-05, %v6094_v62  ;;  %v7720_v12 = vpop.f32.mrb[55].mxu0 }
0x1427   : > { %v6322_v12 = vld [vmem:[%s13350_s23 + $0x38] sm:$0xff] }
0x1428   : > { %8138 = vrsqrt.f32 %v6095_v10  ;;  %v6321_v10 = vld [vmem:[%s13350_s23 + $0x30] sm:$0xff] }
0x1432   : > { %v8139_v5 = vpop.eup %8138 }
0x1433   : > { %v6102_v0 = vrot.slane %v8139_v5, %v13338_v63 }
0x1435   : > { %v6103_v2 = vmul.f32 %v6102_v0, %v6024_v20  ;;  %v6104_v24 = vmul.f32 %v6102_v0, %v6025_v47  ;;  %v7969_v20 = vpack.c.bf16 %v6318_v40, %v6317_v50  ;;  %v6319_v47 = vld [vmem:[%s13350_s23 + $0x20] sm:$0xff]  ;;  %v7975_v0 = vpack.c.bf16 %v6322_v12, %v6321_v10 }
0x1436   : > { %v7972_v62 = vpack.c.bf16 %v6320_v31, %v6319_v47 }
0x1437   : > { %v6112_v11 = vmul.f32 %v7306_v35, %v6103_v2  ;;  %v6113_v34 = vmul.f32 %v7306_v35, %v6104_v24  ;;  %7970 = vmatpush1.bf16.msra.mxu0 %v7969_v20  ;;  %v6323_v35 = vld [vmem:[%s13350_s23 + $0x40] sm:$0xff]  ;;  %v6324_v2 = vld [vmem:[%s13350_s23 + $0x48] sm:$0xff] }
0x1438   : > { %7971 = vmatprep.subr.bf16.mxu0 %v8254_v17  ;;  %v7978_v24 = vpack.c.bf16 %v6324_v2, %v6323_v35 }
0x1439   : > { %v6121_v49 = vadd.f32 %v7307_v8, %v6112_v11  ;;  %v6122_v58 = vadd.f32 %v7307_v8, %v6113_v34  ;;  %v6325_v8 = vld [vmem:[%s13350_s23 + $0x50] sm:$0xff]  ;;  %v6326_v11 = vld [vmem:[%s13350_s23 + $0x58] sm:$0xff] }
0x143a   : > { %v7981_v34 = vpack.c.bf16 %v6326_v11, %v6325_v8 }
0x143b   : > { %v6125_v22 = vcombine.high %v6121_v49, %v6121_v49  ;;  %v6131_v56 = vadd.f32 %v6122_v58, %v12316_v28  ;;  %v6129_v30 = vadd.f32 %v6121_v49, %v12314_v33  ;;  %v6126_v45 = vcombine.high %v6122_v58, %v6122_v58  ;;  %7973 = vmatpush1.bf16.msra.mxu0 %v7972_v62  ;;  %v6327_v49 = vld [vmem:[%s13350_s23 + $0x60] sm:$0xff]  ;;  %v6328_v58 = vld [vmem:[%s13350_s23 + $0x68] sm:$0xff] }
0x143c   : > { %7974 = vmatprep.subr.bf16.mxu0 %v8254_v17 }
0x143d   : > { %v6130_v21 = vadd.f32 %v6125_v22, %v12332_v42  ;;  %v12617_v32 = vmax.f32 %v6131_v56, 0.0  ;;  %v12619_v51 = vmax.f32 %v6129_v30, 0.0  ;;  %v6132_v3 = vadd.f32 %v6126_v45, %v12336_v15  ;;  %v6329_v56 = vld [vmem:[%s13350_s23 + $0x70] sm:$0xff]  ;;  %v6330_v30 = vld [vmem:[%s13350_s23 + $0x78] sm:$0xff] }
0x143e   : > { %v7984_v22 = vpack.c.bf16 %v6328_v58, %v6327_v49 }
0x143f   : > { %v12622_v39 = vmax.f32 %v6130_v21, 0.0  ;;  %v6152_v61 = vrot.slane %v12617_v32, %v12309_v16  ;;  %v6163_v28 = vrot.slane %v12617_v32, 7  ;;  %v6180_v33 = vrot.slane %v12617_v32, %v12312_v46  ;;  %7976 = vmatpush1.bf16.msra.mxu0 %v7975_v0 }
0x1440   : > { %v6148_v42 = vrot.slane %v12619_v51, %v12309_v16  ;;  %v6162_v38 = vrot.slane %v12619_v51, 7  ;;  %v6176_v15 = vrot.slane %v12619_v51, %v12312_v46  ;;  %v12634_v7 = vmax.f32 %v6132_v3, 0.0  ;;  %7977 = vmatprep.subr.bf16.mxu0 %v8254_v17  ;;  %v6331_v3 = vld [vmem:[%s13350_s23 + $0x80] sm:$0xff] }
0x1441   : > { %v6191_v18 = vsel %vm1033_vm0, %v6152_v61, %v6163_v28  ;;  %v6144_v1 = vrot.slane %v12622_v39, %v12309_v16  ;;  %v6161_v29 = vrot.slane %v12622_v39, 7  ;;  %v6172_v14 = vrot.slane %v12622_v39, %v12312_v46  ;;  %v6332_v61 = vld [vmem:[%s13350_s23 + $0x88] sm:$0xff] }
0x1442   : > { %v12643_v25 = vsel %vm3455_vm6, %v6191_v18, %v6180_v33  ;;  %v6190_v60 = vsel %vm1033_vm0, %v6148_v42, %v6162_v38  ;;  %v6156_v44 = vrot.slane %v12634_v7, %v12309_v16  ;;  %v6164_v48 = vrot.slane %v12634_v7, 7 }
0x1443   : > { %6265 = vrot.lane.b32.xlu0 %v12643_v25, %s13095_s9  ;;  %v12654_v59 = vsel %vm3455_vm6, %v6190_v60, %v6176_v15  ;;  %v6189_v43 = vsel %vm1033_vm0, %v6144_v1, %v6161_v29  ;;  %v6214_v55 = vrot.slane %v12643_v25, 2  ;;  %v6184_v52 = vrot.slane %v12634_v7, %v12312_v46  ;;  %s13352_s9 = smov 64   ;;  %7979 = vmatpush1.bf16.msra.mxu0 %v7978_v24 }
0x1444   : > { %6225 = vrot.lane.b32.xlu1 %v12654_v59, %s13099_s26  ;;  %v12661_v26 = vsel %vm3455_vm6, %v6189_v43, %v6172_v14  ;;  %v6201_v13 = vrot.slane %v12654_v59, 1  ;;  %v6192_v57 = vsel %vm1033_vm0, %v6156_v44, %v6164_v48  ;;  %v6213_v36 = vrot.slane %v12654_v59, 2  ;;  %7980 = vmatprep.subr.bf16.mxu0 %v8254_v17 }
0x1445   : > { %v12669_v53 = vrot.slane %v12661_v26, 2  ;;  %v12673_v9 = vsel %vm3455_vm6, %v6192_v57, %v6184_v52  ;;  %v6202_v5 = vrot.slane %v12643_v25, 1  ;;  %v6200_v45 = vrot.slane %v12661_v26, 1 }
0x1446   : > { %v6250_v41 = vrot.slane %v12673_v9, 2  ;;  %v7987_v21 = vpack.c.bf16 %v6330_v30, %v6329_v56  ;;  %v7990_v28 = vpack.c.bf16 %v6332_v61, %v6331_v3  ;;  %v6237_v33 = vrot.slane %v12673_v9, 1 }
0x1447   : > { %6205 = vrot.lane.b32.xlu0 %v6201_v13, %s13097_s16  ;;  %v7310_v54 = vcombine.low %v12669_v53, %v6214_v55  ;;  %7982 = vmatpush1.bf16.msra.mxu0 %v7981_v34 }
0x1448   : > { %6229 = vrot.lane.b32.xlu1 %v12643_v25, %s13099_s26  ;;  %v12687_v23 = vcombine.low %v6250_v41, %v6214_v55  ;;  %7983 = vmatprep.subr.bf16.mxu0 %v8254_v17 }
0x1449   : > { %7313 = vmatprep.mubr.msk.f32.mxu0 %vm4090_vm2, %v7310_v54 }
0x144b   : > { %6217 = vrot.lane.b32.xlu0 %v6213_v36, %s13351_s11  ;;  %7985 = vmatpush1.bf16.msra.mxu0 %v7984_v22 }
0x144c   : > { %6238 = vrot.lane.b32.xlu1 %v6201_v13, %s13352_s9  ;;  %7986 = vmatprep.subr.bf16.mxu0 %v8254_v17 }
0x144f   : > { %6227 = vrot.lane.b32.xlu0 %v12661_v26, %s13099_s26  ;;  %7988 = vmatpush1.bf16.msra.mxu0 %v7987_v21 }
0x1450   : > { %6207 = vrot.lane.b32.xlu1 %v6202_v5, %s13097_s16  ;;  %7989 = vmatprep.subr.bf16.mxu0 %v8254_v17 }
0x1453   : > { %6251 = vrot.lane.b32.xlu0 %v6213_v36, %s13345_s22  ;;  %7991 = vmatpush1.bf16.msra.mxu0 %v7990_v28 }
0x1454   : > { %6263 = vrot.lane.b32.xlu1 %v12661_v26, %s13353_s3  ;;  %8025 = vmatprep.subr.bf16.mxu0 %v8254_v17 }
0x1457   : > { %6219 = vrot.lane.b32.xlu0 %v6214_v55, %s13351_s11 }
0x1458   : > { %6242 = vrot.lane.b32.xlu1 %v6202_v5, %s13352_s9 }
0x145b   : > { %6231 = vrot.lane.b32.xlu0 %v12673_v9, %s13099_s26  ;;  %s13355_s26 = sld [smem:[#allocation18_spill]] }
0x145c   : > { %6255 = vrot.lane.b32.xlu1 %v6214_v55, %s13345_s22 }
0x145f   : > { %6274 = vrot.lane.b32.xlu0 %v6202_v5, %s13346_s2 }
0x1460   : > { %6203 = vrot.lane.b32.xlu1 %v6200_v45, %s13097_s16  ;;  %s13354_s16 = sld [smem:[#allocation17_spill]] }
0x1463   : > { %6240 = vrot.lane.b32.xlu0 %v6200_v45, %s13352_s9 }
0x1464   : > { %6215 = vrot.lane.b32.xlu1 %v12669_v53, %s13351_s11 }
0x1467   : > { %6244 = vrot.lane.b32.xlu0 %v6237_v33, %s13352_s9 }
0x1468   : > { %6253 = vrot.lane.b32.xlu1 %v12669_v53, %s13345_s22 }
0x146b   : > { %6257 = vrot.lane.b32.xlu0 %v6250_v41, %s13345_s22 }
0x146c   : > { %6272 = vrot.lane.b32.xlu1 %v6200_v45, %s13346_s2 }
0x146f   : > { %6276 = vrot.lane.b32.xlu0 %v6237_v33, %s13346_s2 }
0x1470   : > { %6267 = vrot.lane.b32.xlu1 %v12673_v9, %s13353_s3 }
0x14b5   : > { %v6266_v42 = vpop.permute.xlu0 %6265 }
0x14b6   : > { %v6226_v38 = vpop.permute.xlu1 %6225 }
0x14b9   : > { %v6206_v15 = vpop.permute.xlu0 %6205 }
0x14ba   : > { %v6230_v18 = vpop.permute.xlu1 %6229  ;;  %v6282_v57 = vsel %vm4090_vm2, %v12654_v59, %v6206_v15 }
0x14bd   : > { %v6218_v1 = vpop.permute.xlu0 %6217 }
0x14be   : > { %v6239_v29 = vpop.permute.xlu1 %6238  ;;  %v6285_v9 = vsel %vm4106_vm7, %v6282_v57, %v6218_v1  ;;  %v7317_v57 = vld [vmem:[%s13355_s26] ss:$0 sm:$0xff]  ;;  %s13358_s26 = smov 48  }
0x14c1   : > { %v6228_v14 = vpop.permute.xlu0 %6227 }
0x14c2   : > { %v6208_v60 = vpop.permute.xlu1 %6207  ;;  %v6288_v41 = vsel %vm4124_vm10, %v6285_v9, %v6228_v14 }
0x14c3   : > { %v6283_v31 = vsel %vm4090_vm2, %v12643_v25, %v6208_v60 }
0x14c5   : > { %v6252_v44 = vpop.permute.xlu0 %6251 }
0x14c6   : > { %v6264_v48 = vpop.permute.xlu1 %6263 }
0x14c9   : > { %v6220_v4 = vpop.permute.xlu0 %6219 }
0x14ca   : > { %v6243_v19 = vpop.permute.xlu1 %6242  ;;  %v6286_v62 = vsel %vm4106_vm7, %v6283_v31, %v6220_v4 }
0x14cd   : > { %v6232_v43 = vpop.permute.xlu0 %6231 }
0x14ce   : > { %v6256_v55 = vpop.permute.xlu1 %6255  ;;  %v6290_v12 = vsel %vm4124_vm10, %v6286_v62, %v6232_v43  ;;  %v6778_v62 = vld [vmem:[%s13357_s5] sm:$0xff] }
0x14d1   : > { %v6275_v52 = vpop.permute.xlu0 %6274 }
0x14d2   : > { %v6204_v50 = vpop.permute.xlu1 %6203 }
0x14d3   : > { %v6281_v13 = vsel %vm4090_vm2, %v12661_v26, %v6204_v50 }
0x14d5   : > { %v6241_v40 = vpop.permute.xlu0 %6240 }
0x14d6   : > { %v6216_v53 = vpop.permute.xlu1 %6215  ;;  %v6292_v26 = vsel %vm4142_vm12, %v6288_v41, %v6241_v40 }
0x14d7   : > { %v6284_v37 = vsel %vm4106_vm7, %v6281_v13, %v6216_v53 }
0x14d8   : > { %v6287_v54 = vsel %vm4124_vm10, %v6284_v37, %v6226_v38  ;;  %v6289_v5 = vsel %vm4124_vm10, %v6284_v37, %v6230_v18  ;;  %v7308_v38 = vld [vmem:[%s13354_s16] ss:$0 sm:$0xff]  ;;  %s13356_s16 = sld [smem:[#allocation19_spill]] }
0x14d9   : > { %v6291_v20 = vsel %vm4142_vm12, %v6287_v54, %v6239_v29  ;;  %v6245_v47 = vpop.permute.xlu0 %6244  ;;  %v6293_v49 = vsel %vm4142_vm12, %v6289_v5, %v6243_v19 }
0x14da   : > { %v6254_v36 = vpop.permute.xlu1 %6253  ;;  %v6295_v10 = vsel %vm5355_vm8, %v6291_v20, %v6252_v44  ;;  %v6294_v35 = vsel %vm4142_vm12, %v6290_v12, %v6245_v47  ;;  %v6297_v30 = vsel %vm5355_vm8, %v6293_v49, %v6256_v55 }
0x14db   : > { %v6296_v59 = vsel %vm5355_vm8, %v6292_v26, %v6254_v36  ;;  %v6299_v24 = vsel %vm4902_vm13, %v6295_v10, %v6264_v48 }
0x14dc   : > { %v6300_v0 = vsel %vm4902_vm13, %v6296_v59, %v6266_v42  ;;  %v6779_v59 = vld [vmem:[%s13357_s5 + $0x8] sm:$0xff] }
0x14dd   : > { %v6258_v2 = vpop.permute.xlu0 %6257  ;;  %v6304_v11 = vsel %vm5364_vm11, %v6300_v0, %v6275_v52 }
0x14de   : > { %v6298_v25 = vsel %vm5355_vm8, %v6294_v35, %v6258_v2  ;;  %v6273_v8 = vpop.permute.xlu1 %6272  ;;  %v7318_v54 = vld [vmem:[%s13356_s16] ss:$0 sm:$0xff]  ;;  %s13359_s16 = smov 16  }
0x14df   : > { %v6303_v34 = vsel %vm5364_vm11, %v6299_v24, %v6273_v8  ;;  %v6302_v22 = vsel %vm4902_vm13, %v6298_v25, %v6266_v42 }
0x14e0   : > { %v7309_v58 = vcombine.low %v6303_v34, %v6304_v11  ;;  %v6306_v61 = vsel %vm5364_vm11, %v6302_v22, %v6275_v52  ;;  %v7999_v11 = vpack.c.bf16 %v6779_v59, %v6778_v62  ;;  %v6795_v62 = vld [vmem:[%s13357_s5 + $0x88] sm:$0xff] }
0x14e1   : > { %v6277_v56 = vpop.permute.xlu0 %6276 }
0x14e2   : > { %6415 = vmatmul.mubr.f32.vlgmr.msra.gmra.mrb[56].mxu0 %v7309_v58  ;;  %v6268_v45 = vpop.permute.xlu1 %6267 }
0x14e3   : > { %v6301_v21 = vsel %vm4902_vm13, %v6297_v30, %v6268_v45  ;;  %7314 = vmatprep.mubr.msk.f32.mxu0 %vm4090_vm2, %v12687_v23  ;;  %v6780_v45 = vld [vmem:[%s13357_s5 + $0x10] sm:$0xff] }
0x14e4   : > { %v6305_v3 = vsel %vm5364_vm11, %v6301_v21, %v6277_v56  ;;  %v6781_v21 = vld [vmem:[%s13357_s5 + $0x18] sm:$0xff] }
0x14e5   : > { %v7311_v28 = vcombine.low %v6305_v3, %v6306_v61 }
0x14e7   : > { %6420 = vmatmul.mubr.f32.gmra.mrb[58].mxu0 %v7311_v28 }
0x14e8   : > { %7739 = vmatprep.mubr.msk.f32.mxu0 %vm8255_vm1, %v8256_v27 }
0x15b5   : > { %v6416_v33 = vpop.f32.mrb[56].mxu0 }
0x15b6   : > { %v6418_v42 = vpop.f32.mrb[57].mxu0  ;;  %v6417_v18 = vadd.f32 %v7308_v38, %v6416_v33 }
0x15ba   : > { %v6421_v15 = vpop.f32.mrb[58].mxu0 }
0x15bb   : > { %v6422_v1 = vadd.f32 %v7308_v38, %v6421_v15  ;;  %v6423_v29 = vpop.f32.mrb[59].mxu0  ;;  %v8002_v15 = vpack.c.bf16 %v6781_v21, %v6780_v45 }
0x15bc   : > { %v6782_v29 = vld [vmem:[%s13357_s5 + $0x20] sm:$0xff] }
0x15bd   : > { %v7993_v14 = vpack.c.bf16 %v6422_v1, %v6417_v18 }
0x15bf   : > { %7994 = vmatpush3.bf16.msra.mxu1 %v7993_v14  ;;  %v6783_v14 = vld [vmem:[%s13357_s5 + $0x28] sm:$0xff] }
0x15c0   : > { %7995 = vmatprep.subr.bf16.mxu1 %v8254_v17 }
0x15c2   : > { %7726 = vmatmul.mubr.msk.f32.vlgmr.msra.gmra.mrb[14].mxu1 %vm4090_vm2, %v8263_v6 }
0x15c3   : > { %7732 = vmatprep.mubr.msk.f32.mxu1 %vm8255_vm1, %v8256_v27 }
0x1695   : > { %v6491_v23 = vpop.f32.mrb[14].mxu1 }
0x1696   : > { %v6498_v60 = vrot.slane %v6491_v23, %v13338_v63  ;;  %v7727_v44 = vpop.f32.mrb[15].mxu1  ;;  %v8005_v23 = vpack.c.bf16 %v6783_v14, %v6782_v29 }
0x1698   : > { %v6499_v48 = vsub.f32 %v6417_v18, %v6498_v60  ;;  %v6500_v4 = vsub.f32 %v6422_v1, %v6498_v60 }
0x169a   : > { %v6501_v19 = vmul.f32 %v6499_v48, %v6499_v48  ;;  %v6502_v43 = vmul.f32 %v6500_v4, %v6500_v4 }
0x169c   : > { %v7996_v55 = vpack.c.bf16 %v6502_v43, %v6501_v19  ;;  %v6785_v19 = vld [vmem:[%s13357_s5 + $0x38] sm:$0xff] }
0x169e   : > { %7997 = vmatpush3.bf16.msra.mxu1 %v7996_v55 }
0x169f   : > { %7998 = vmatprep.subr.bf16.mxu1 %v8254_v17 }
0x16a1   : > { %7733 = vmatmul.mubr.msk.f32.vlgmr.msra.gmra.mrb[16].mxu1 %vm4090_vm2, %v8263_v6 }
0x16a2   : > { %8000 = vmatpush1.bf16.msra.mxu1 %v7999_v11 }
0x16a3   : > { %8001 = vmatprep.subr.bf16.mxu1 %v8254_v17 }
0x16a6   : > { %8003 = vmatpush1.bf16.msra.mxu1 %v8002_v15 }
0x16a7   : > { %8004 = vmatprep.subr.bf16.mxu1 %v8254_v17 }
0x16aa   : > { %8006 = vmatpush1.bf16.msra.mxu1 %v8005_v23 }
0x16ab   : > { %8007 = vmatprep.subr.bf16.mxu1 %v8254_v17 }
0x1774   : > { %v6569_v52 = vpop.f32.mrb[16].mxu1 }
0x1775   : > { %v6570_v50 = vadd.f32 1e-05, %v6569_v52  ;;  %v7734_v40 = vpop.f32.mrb[17].mxu1 }
0x1776   : > { %v6787_v40 = vld [vmem:[%s13357_s5 + $0x48] sm:$0xff] }
0x1777   : > { %8140 = vrsqrt.f32 %v6570_v50  ;;  %v6786_v50 = vld [vmem:[%s13357_s5 + $0x40] sm:$0xff] }
0x1781   : > { %v8141_v13 = vpop.eup %8140 }
0x1782   : > { %v6577_v53 = vrot.slane %v8141_v13, %v13338_v63  ;;  %v8011_v13 = vpack.c.bf16 %v6787_v40, %v6786_v50 }
0x1784   : > { %v6578_v37 = vmul.f32 %v6577_v53, %v6499_v48  ;;  %v6579_v9 = vmul.f32 %v6577_v53, %v6500_v4  ;;  %v6784_v4 = vld [vmem:[%s13357_s5 + $0x30] sm:$0xff] }
0x1785   : > { %v8008_v43 = vpack.c.bf16 %v6785_v19, %v6784_v4  ;;  %v6788_v53 = vld [vmem:[%s13357_s5 + $0x50] sm:$0xff] }
0x1786   : > { %v6587_v41 = vmul.f32 %v7317_v57, %v6578_v37  ;;  %v6588_v20 = vmul.f32 %v7317_v57, %v6579_v9  ;;  %v6789_v57 = vld [vmem:[%s13357_s5 + $0x58] sm:$0xff]  ;;  %v6790_v9 = vld [vmem:[%s13357_s5 + $0x60] sm:$0xff] }
0x1787   : > { %8009 = vmatpush1.bf16.msra.mxu1 %v8008_v43  ;;  %v8014_v37 = vpack.c.bf16 %v6789_v57, %v6788_v53 }
0x1788   : > { %v6597_v47 = vadd.f32 %v7318_v54, %v6588_v20  ;;  %v6596_v31 = vadd.f32 %v7318_v54, %v6587_v41  ;;  %8010 = vmatprep.subr.bf16.mxu1 %v8254_v17  ;;  %v6791_v54 = vld [vmem:[%s13357_s5 + $0x68] sm:$0xff]  ;;  %v6792_v20 = vld [vmem:[%s13357_s5 + $0x70] sm:$0xff] }
0x1789   : > { %v8017_v41 = vpack.c.bf16 %v6791_v54, %v6790_v9 }
0x178a   : > { %v6599_v26 = vmax.f32 %v6597_v47, 0.0  ;;  %v6598_v36 = vmax.f32 %v6596_v31, 0.0  ;;  %v6793_v47 = vld [vmem:[%s13357_s5 + $0x78] sm:$0xff] }
0x178b   : > { %8012 = vmatpush1.bf16.msra.mxu1 %v8011_v13  ;;  %v8020_v31 = vpack.c.bf16 %v6793_v47, %v6792_v20 }
0x178c   : > { %v6615_v10 = vrot.slane %v6599_v26, %v12309_v16  ;;  %v6626_v12 = vrot.slane %v6599_v26, 7  ;;  %v6643_v5 = vrot.slane %v6599_v26, %v12312_v46  ;;  %v6611_v0 = vrot.slane %v6598_v36, %v12309_v16  ;;  %8013 = vmatprep.subr.bf16.mxu1 %v8254_v17 }
0x178d   : > { %v6625_v35 = vrot.slane %v6598_v36, 7  ;;  %v6639_v2 = vrot.slane %v6598_v36, %v12312_v46  ;;  %v6602_v25 = vcombine.high %v6598_v36, %v6598_v36  ;;  %v6603_v24 = vcombine.high %v6599_v26, %v6599_v26  ;;  %v6794_v36 = vld [vmem:[%s13357_s5 + $0x80] sm:$0xff] }
0x178e   : > { %v6654_v8 = vsel %vm1033_vm0, %v6615_v10, %v6626_v12  ;;  %v8023_v59 = vpack.c.bf16 %v6795_v62, %v6794_v36 }
0x178f   : > { %v12794_v34 = vsel %vm3455_vm6, %v6654_v8, %v6643_v5  ;;  %v6653_v49 = vsel %vm1033_vm0, %v6611_v0, %v6625_v35  ;;  %v6607_v58 = vrot.slane %v6602_v25, %v12309_v16  ;;  %v6624_v22 = vrot.slane %v6602_v25, 7  ;;  %8015 = vmatpush1.bf16.msra.mxu1 %v8014_v37 }
0x1790   : > { %6728 = vrot.lane.b32.xlu0 %v12794_v34, %s13353_s3  ;;  %v12801_v56 = vsel %vm3455_vm6, %v6653_v49, %v6639_v2  ;;  %v6635_v30 = vrot.slane %v6602_v25, %v12312_v46  ;;  %v6619_v28 = vrot.slane %v6603_v24, %v12309_v16  ;;  %v6627_v42 = vrot.slane %v6603_v24, 7  ;;  %8016 = vmatprep.subr.bf16.mxu1 %v8254_v17 }
0x1791   : > { %6688 = vrot.lane.b32.xlu1 %v12801_v56, %s13358_s26  ;;  %v6664_v3 = vrot.slane %v12801_v56, 1  ;;  %v6652_v61 = vsel %vm1033_vm0, %v6607_v58, %v6624_v22  ;;  %v6647_v38 = vrot.slane %v6603_v24, %v12312_v46  ;;  %v6677_v18 = vrot.slane %v12794_v34, 2 }
0x1792   : > { %v12813_v33 = vsel %vm3455_vm6, %v6652_v61, %v6635_v30  ;;  %v6655_v16 = vsel %vm1033_vm0, %v6619_v28, %v6627_v42  ;;  %v6676_v44 = vrot.slane %v12801_v56, 2  ;;  %v6665_v52 = vrot.slane %v12794_v34, 1 }
0x1793   : > { %v12818_v1 = vrot.slane %v12813_v33, 2  ;;  %v6659_v60 = vsel %vm3455_vm6, %v6655_v16, %v6647_v38  ;;  %8018 = vmatpush1.bf16.msra.mxu1 %v8017_v41  ;;  %v6663_v26 = vrot.slane %v12813_v33, 1 }
0x1794   : > { %6668 = vrot.lane.b32.xlu0 %v6664_v3, %s13359_s16  ;;  %v6713_v48 = vrot.slane %v6659_v60, 2  ;;  %8019 = vmatprep.subr.bf16.mxu1 %v8254_v17  ;;  %v6700_v10 = vrot.slane %v6659_v60, 1 }
0x1795   : > { %6692 = vrot.lane.b32.xlu1 %v12794_v34, %s13358_s26  ;;  %v7321_v46 = vcombine.low %v12818_v1, %v6677_v18 }
0x1796   : > { %v12834_v55 = vcombine.low %v6713_v48, %v6677_v18 }
0x1797   : > { %7324 = vmatprep.mubr.msk.f32.mxu1 %vm4090_vm2, %v7321_v46  ;;  %8021 = vmatpush1.bf16.msra.mxu1 %v8020_v31 }
0x1798   : > { %6680 = vrot.lane.b32.xlu0 %v6676_v44, %s13351_s11  ;;  %8022 = vmatprep.subr.bf16.mxu1 %v8254_v17 }
0x1799   : > { %6701 = vrot.lane.b32.xlu1 %v6664_v3, %s13352_s9 }
0x179b   : > { %8024 = vmatpush1.bf16.msra.mxu1 %v8023_v59 }
0x179c   : > { %6690 = vrot.lane.b32.xlu0 %v12813_v33, %s13358_s26 }
0x179d   : > { %6670 = vrot.lane.b32.xlu1 %v6665_v52, %s13359_s16 }
0x17a0   : > { %6714 = vrot.lane.b32.xlu0 %v6676_v44, %s13345_s22 }
0x17a1   : > { %6726 = vrot.lane.b32.xlu1 %v12813_v33, %s13353_s3 }
0x17a4   : > { %6682 = vrot.lane.b32.xlu0 %v6677_v18, %s13351_s11 }
0x17a5   : > { %6705 = vrot.lane.b32.xlu1 %v6665_v52, %s13352_s9 }
0x17a8   : > { %6694 = vrot.lane.b32.xlu0 %v6659_v60, %s13358_s26 }
0x17a9   : > { %6718 = vrot.lane.b32.xlu1 %v6677_v18, %s13345_s22 }
0x17ac   : > { %6737 = vrot.lane.b32.xlu0 %v6665_v52, %s13346_s2 }
0x17ad   : > { %6666 = vrot.lane.b32.xlu1 %v6663_v26, %s13359_s16 }
0x17b0   : > { %6703 = vrot.lane.b32.xlu0 %v6663_v26, %s13352_s9 }
0x17b1   : > { %6678 = vrot.lane.b32.xlu1 %v12818_v1, %s13351_s11  ;;  %s7336_s11 = sshll.u32 %s8444_s0, 8  ;;  %s8266_s0 = smov [#allocation2]  }
0x17b2   : > { %s12930_s26 = scalar_lea.hbm %s8421_s4, %s7336_s11 }
0x17b4   : > { %6707 = vrot.lane.b32.xlu0 %v6700_v10, %s13352_s9 }
0x17b5   : > { %6716 = vrot.lane.b32.xlu1 %v12818_v1, %s13345_s22 }
0x17b8   : > { %6720 = vrot.lane.b32.xlu0 %v6713_v48, %s13345_s22 }
0x17b9   : > { %6735 = vrot.lane.b32.xlu1 %v6663_v26, %s13346_s2 }
0x17bc   : > { %6739 = vrot.lane.b32.xlu0 %v6700_v10, %s13346_s2  ;;  %v7319_v10 = vld [vmem:[%s8406_s12] ss:$0 sm:$0xff] }
0x17bd   : > { %6730 = vrot.lane.b32.xlu1 %v6659_v60, %s13353_s3  ;;  %s893_s3 = sand.u32 1, %s8198_s10  }
0x17be   : > { %s7226_s9 = sshll.u32 %s893_s3, 4  ;;  %s12933_s16 = scalar_lea.sflag [#allocation3], %s893_s3 }
0x17bf   : > { %s895_s22 = scalar_lea.vmem [#allocation2], %s7226_s9  ;;  %s8148_s9 = sshll.u32 %s8266_s0, 4  ;;  %s8149_s9 = int_to_ptr.vmem [resolvable:$false] %s8148_s9 }
0x17c0   : > { %s7131_s2 = sshll.u32 %s895_s22, 4  ;;  %s8150_s6 = scalar_lea.vmem %s8149_s9, 512  ;;  %s12927_s2 = int_to_ptr.vmem [resolvable:$true] %s7131_s2 }
0x17c1   : > { %s8144_s5 = scalar_lea.vmem %s12927_s2, 256  ;;  %p8151_p0 = scmp.lt.s32.totalorder %s12927_s2, %s8149_s9 }
0x17c2   : > { %p8145_p11 = scmp.ne.s32.totalorder %s12927_s2, %s8144_s5  ;;  %p8152_p1 = scmp.lt.s32.totalorder %s8150_s6, %s8144_s5 }
0x17c4   : > { %p8146_p12 = pnand %p8145_p11, %p8461_p5  ;;  %p8153_p2 = por %p8152_p1, %p8151_p0 }
0x17c6   : > { %p8147_p13 = pneg %p8146_p12 }
0x17c8   : > { %p8154_p3 = pnand %p8153_p2, %p8147_p13 }
0x1802   : > { %v6729_v12 = vpop.permute.xlu0 %6728 }
0x1803   : > { %v6689_v5 = vpop.permute.xlu1 %6688 }
0x1806   : > { %v6669_v0 = vpop.permute.xlu0 %6668 }
0x1807   : > { %v6693_v35 = vpop.permute.xlu1 %6692  ;;  %v6745_v38 = vsel %vm4090_vm2, %v12801_v56, %v6669_v0 }
0x180a   : > { %v6681_v2 = vpop.permute.xlu0 %6680 }
0x180b   : > { %v6702_v25 = vpop.permute.xlu1 %6701  ;;  %v6748_v18 = vsel %vm4106_vm7, %v6745_v38, %v6681_v2 }
0x180e   : > { %v6691_v24 = vpop.permute.xlu0 %6690 }
0x180f   : > { %v6671_v8 = vpop.permute.xlu1 %6670  ;;  %v6751_v29 = vsel %vm4124_vm10, %v6748_v18, %v6691_v24 }
0x1810   : > { %v6746_v23 = vsel %vm4090_vm2, %v12794_v34, %v6671_v8 }
0x1812   : > { %v6715_v11 = vpop.permute.xlu0 %6714 }
0x1813   : > { %v6727_v49 = vpop.permute.xlu1 %6726 }
0x1816   : > { %v6683_v58 = vpop.permute.xlu0 %6682 }
0x1817   : > { %v6706_v22 = vpop.permute.xlu1 %6705  ;;  %v6749_v60 = vsel %vm4106_vm7, %v6746_v23, %v6683_v58 }
0x181a   : > { %v6695_v30 = vpop.permute.xlu0 %6694 }
0x181b   : > { %v6719_v45 = vpop.permute.xlu1 %6718  ;;  %v6753_v48 = vsel %vm4124_vm10, %v6749_v60, %v6695_v30 }
0x181e   : > { %v6738_v21 = vpop.permute.xlu0 %6737 }
0x181f   : > { %v6667_v3 = vpop.permute.xlu1 %6666 }
0x1820   : > { %v6744_v28 = vsel %vm4090_vm2, %v12813_v33, %v6667_v3  ;;  %v7328_v3 = vld [vmem:[%s8411_s20] ss:$0 sm:$0xff] }
0x1822   : > { %v6704_v61 = vpop.permute.xlu0 %6703 }
0x1823   : > { %v6679_v42 = vpop.permute.xlu1 %6678  ;;  %v6755_v33 = vsel %vm4142_vm12, %v6751_v29, %v6704_v61 }
0x1824   : > { %v6747_v15 = vsel %vm4106_vm7, %v6744_v28, %v6679_v42  ;;  %v7329_v42 = vld [vmem:[%s8416_s27] ss:$0 sm:$0xff] }
0x1825   : > { %v6750_v1 = vsel %vm4124_vm10, %v6747_v15, %v6689_v5  ;;  %v6752_v4 = vsel %vm4124_vm10, %v6747_v15, %v6693_v35 }
0x1826   : > { %v6754_v14 = vsel %vm4142_vm12, %v6750_v1, %v6702_v25  ;;  %v6708_v16 = vpop.permute.xlu0 %6707  ;;  %v6756_v57 = vsel %vm4142_vm12, %v6752_v4, %v6706_v22 }
0x1827   : > { %v6717_v46 = vpop.permute.xlu1 %6716  ;;  %v6758_v44 = vsel %vm5355_vm8, %v6754_v14, %v6715_v11  ;;  %v6757_v43 = vsel %vm4142_vm12, %v6753_v48, %v6708_v16  ;;  %v6760_v41 = vsel %vm5355_vm8, %v6756_v57, %v6719_v45 }
0x1828   : > { %v6759_v56 = vsel %vm5355_vm8, %v6755_v33, %v6717_v46  ;;  %v6762_v50 = vsel %vm4902_vm13, %v6758_v44, %v6727_v49 }
0x1829   : > { %v6763_v19 = vsel %vm4902_vm13, %v6759_v56, %v6729_v12 }
0x182a   : > { %v6721_v52 = vpop.permute.xlu0 %6720  ;;  %v6767_v13 = vsel %vm5364_vm11, %v6763_v19, %v6738_v21 }
0x182b   : > { %v6761_v34 = vsel %vm5355_vm8, %v6757_v43, %v6721_v52  ;;  %v6736_v40 = vpop.permute.xlu1 %6735 }
0x182c   : > { %v6766_v53 = vsel %vm5364_vm11, %v6762_v50, %v6736_v40  ;;  %v6765_v9 = vsel %vm4902_vm13, %v6761_v34, %v6729_v12 }
0x182d   : > { %v7320_v37 = vcombine.low %v6766_v53, %v6767_v13  ;;  %v6769_v26 = vsel %vm5364_vm11, %v6765_v9, %v6738_v21 }
0x182e   : > { %v6740_v54 = vpop.permute.xlu0 %6739 }
0x182f   : > { %6878 = vmatmul.mubr.f32.vlgmr.msra.gmra.mrb[18].mxu1 %v7320_v37  ;;  %v6731_v20 = vpop.permute.xlu1 %6730 }
0x1830   : > { %v6764_v47 = vsel %vm4902_vm13, %v6760_v41, %v6731_v20  ;;  %7325 = vmatprep.mubr.msk.f32.mxu1 %vm4090_vm2, %v12834_v55 }
0x1831   : > { %v6768_v31 = vsel %vm5364_vm11, %v6764_v47, %v6740_v54 }
0x1832   : > { %v7322_v36 = vcombine.low %v6768_v31, %v6769_v26 }
0x1834   : > { %6883 = vmatmul.mubr.f32.gmra.mrb[20].mxu1 %v7322_v36 }
0x1902   : > { %v6879_v62 = vpop.f32.mrb[18].mxu1 }
0x1903   : > { %v6881_v59 = vpop.f32.mrb[19].mxu1  ;;  %v6880_v5 = vadd.f32 %v7319_v10, %v6879_v62 }
0x1907   : > { %v6884_v12 = vpop.f32.mrb[20].mxu1 }
0x1908   : > { %v6885_v0 = vadd.f32 %v7319_v10, %v6884_v12  ;;  %v6886_v35 = vpop.f32.mrb[21].mxu1 }
0x190a   : > { %v8026_v2 = vpack.c.bf16 %v6885_v0, %v6880_v5 }
0x190c   : > { %8027 = vmatpush3.bf16.msra.mxu0 %v8026_v2 }
0x190d   : > { %8028 = vmatprep.subr.bf16.mxu0 %v8254_v17 }
0x190f   : > { %7740 = vmatmul.mubr.msk.f32.vlgmr.msra.gmra.mrb[60].mxu0 %vm4090_vm2, %v8263_v6 }
0x1910   : > { %7746 = vmatprep.mubr.msk.f32.mxu0 %vm8255_vm1, %v8256_v27 }
0x19e2   : > { %v6954_v55 = vpop.f32.mrb[60].mxu0 }
0x19e3   : > { %v6961_v25 = vrot.slane %v6954_v55, %v13338_v63  ;;  %v7741_v24 = vpop.f32.mrb[61].mxu0 }
0x19e5   : > { %v6962_v8 = vsub.f32 %v6880_v5, %v6961_v25  ;;  %v6963_v11 = vsub.f32 %v6885_v0, %v6961_v25 }
0x19e7   : > { %v6964_v49 = vmul.f32 %v6962_v8, %v6962_v8  ;;  %v6965_v58 = vmul.f32 %v6963_v11, %v6963_v11 }
0x19e9   : > { %v8029_v22 = vpack.c.bf16 %v6965_v58, %v6964_v49 }
0x19eb   : > { %8030 = vmatpush3.bf16.msra.mxu0 %v8029_v22 }
0x19ee   : > { %7747 = vmatmul.mubr.msk.f32.vlgmr.msra.gmra.mrb[62].mxu0 %vm4090_vm2, %v8263_v6 }
0x1ac1   : > { %v7032_v17 = vpop.f32.mrb[62].mxu0 }
0x1ac2   : > { %v7033_v30 = vadd.f32 1e-05, %v7032_v17  ;;  %v7748_v45 = vpop.f32.mrb[63].mxu0 }
0x1ac4   : > { %8142 = vrsqrt.f32 %v7033_v30 }
0x1ace   : > { %v8143_v27 = vpop.eup %8142 }
0x1acf   : > { %v7040_v21 = vrot.slane %v8143_v27, %v13338_v63 }
0x1ad1   : > { %v7041_v61 = vmul.f32 %v7040_v21, %v6962_v8  ;;  %v7042_v28 = vmul.f32 %v7040_v21, %v6963_v11 }
0x1ad3   : > { %v7050_v38 = vmul.f32 %v7328_v3, %v7041_v61  ;;  %v7051_v15 = vmul.f32 %v7328_v3, %v7042_v28 }
0x1ad5   : > { %v7059_v18 = vadd.f32 %v7329_v42, %v7050_v38  ;;  %v7060_v1 = vadd.f32 %v7329_v42, %v7051_v15 }
0x1ad7   : > { %v7063_v29 = vcombine.high %v7059_v18, %v7059_v18  ;;  %v7067_v14 = vadd.f32 %v7059_v18, %v12619_v51  ;;  %v7064_v6 = vcombine.high %v7060_v1, %v7060_v1  ;;  %v7069_v46 = vadd.f32 %v7060_v1, %v12617_v32 }
0x1ad9   : > { %v7068_v16 = vadd.f32 %v7063_v29, %v12622_v39  ;;  %v7070_v23 = vadd.f32 %v7064_v6, %v12634_v7  ;;  %v7071_v33 = vmax.f32 %v7067_v14, 0.0  ;;  %v7073_v44 = vmax.f32 %v7069_v46, 0.0 }
0x1adb   : > { %v7072_v63 = vmax.f32 %v7068_v16, 0.0  ;;  %v7074_v56 = vmax.f32 %v7070_v23, 0.0 }
0x1add   : > { %v7079_v60 = vcombine.low %v7071_v33, %v7072_v63  ;;  %v7080_v48 = vcombine.low %v7073_v44, %v7074_v56 }
0x1adf   : > { %7083 = vxpose.xlu1.b32.start [1/2] (short) (narrow) %v7079_v60, 16 }
0x1ae3   : > { %7084 = vxpose.xlu1.b32.end [2/2] (short) (narrow) %v7080_v48, 16 }
0x1b5f   : > { %v7099_v51 = vpop.trf.xlu1 }
0x1b60   : > { %7115 = vst.msk [vmem:[%s895_s22] sm:$0xff] %vm4090_vm2, %v7099_v51 }
0x1b63   : > { %v7100_v32 = vpop.trf.xlu1 }
0x1b64   : > { %7116 = vst.msk [vmem:[%s895_s22 + $0x8] sm:$0xff] %vm4090_vm2, %v7100_v32 }
0x1b65   : > { %8157 = shalt.err (!%p8154_p3)
}
0x1b66   : > { %s8158_s3 = scalar_lea.hbm %s12930_s26, 256  ;;  %s8162_s22 = scalar_lea.hbm %s8421_s4, 512 }
0x1b67   : > { %p8159_p4 = scmp.ne.s32.totalorder %s12930_s26, %s8158_s3  ;;  %p8163_p9 = scmp.lt.u32.totalorder %s12930_s26, %s8421_s4 }
0x1b68   : > { %p8164_p10 = scmp.lt.u32.totalorder %s8162_s22, %s8158_s3  ;;  %p8166_p12 = scmp.lt.u32.totalorder %s8158_s3, %s12930_s26 }
0x1b69   : > { %p8160_p7 = pnand %p8159_p4, %p8461_p5 }
0x1b6a   : > { %p8165_p11 = por %p8164_p10, %p8163_p9 }
0x1b6b   : > { %p8161_p8 = pneg %p8160_p7 }
0x1b6c   : > { %p8167_p0 = por %p8166_p12, %p8165_p11 }
0x1b6e   : > { %p8168_p13 = pnand %p8167_p0, %p8161_p8 }
0x1b70   : > { %8171 = shalt.err (!%p8168_p13)
}
0x1b71   : > { %s8267_s6 = smov 128   ;;  %s13360_s5 = smov 8  }
0x1b72   : > { %8031 = dma.vmem_to_hbm [thread:$0]  (%p8461_p5), %s12927_s2, 256, %s12930_s26, %s12933_s16, %s8267_s6, %s8267_s6, %s13360_s5  }
0x1b73 PF: > { %p8037_p1 = scmp.ge.s32.totalorder %s8206_s15, 2  ;;  %s7146_s11 = sand.u32 1, %s8194_s7  }
0x1b74   : > { %s7147_s0 = scalar_lea.sflag [#allocation3], %s7146_s11 }
0x1b75   : > { %p8034_p2 = pnand %p8037_p1, %p8465_p6 }
0x1b77   : > { %8189 = dma.done.wait (!%p8034_p2), %s7147_s0, 256  }
0x1b78   : > { %8191 = vsyncadd (!%p8034_p2), %s7147_s0, 4294967040  ;;  %s13361_s9 = sld [smem:[#allocation21_spill]]  ;;  %s13362_s11 = sld [smem:[#allocation22_spill]] }
0x1b79   : > { %p69_p3 = scmp.ge.s32.totalorder %s8448_s18, 4   ;;  %s13363_s7 = smov %s8198_s10 }
0x1b7a   : > { %s13365_s15 = smov %s8448_s18 }
0x1b7b   :  { %71 = sbr.rel (!%p69_p3) target bundleno = 55 (0x37), region = 200 }
0x1b7e   : > { %s13364_s10 = smov %s13361_s9 }
0x1b82   :  { %7152 = vsyncpa [#allocation3], 1 }
0x1b83   :  { %7154 = vsyncpa [#allocation3 + $0x1], 1 }

</bundles_post_ra>
